<compile_context>
chip_gen: v7x
topology: tpu7x:2x2x1
jax: 0.10.0
libtpu: 0.0.40
codegen_flags: <defaults>
</compile_context>

<pallas_src>
import functools
import math

import jax
import jax.numpy as jnp
from jax import lax
from jax.experimental import pallas as pl
from jax.experimental.pallas import tpu as pltpu


# ---------------------------------------------------------------------------
# Pallas kernel: one full GraphTransformerLayer
# ---------------------------------------------------------------------------

def _layernorm(x, gamma, beta):
    mean = jnp.mean(x, axis=-1, keepdims=True)
    var = jnp.mean(jnp.square(x - mean), axis=-1, keepdims=True)
    return (x - mean) * lax.rsqrt(var + 1e-5) * gamma + beta


def _gt_layer_kernel(hd_ref, hs_ref, m_ref, wq_ref, wkv_ref, wo_ref, bo_ref,
                     ln1g_ref, ln1b_ref, w1_ref, b1_ref, w2_ref, b2_ref,
                     ln2g_ref, ln2b_ref, o_ref,
                     q_s, wv_s, z_s, *, n_heads, d_head):
    """grid = (dst tiles, src chunks).

    hd_ref : (TILE_M, D_in)  f32   destination-row features (also the residual)
    hs_ref : (TILE_S, D_in)  f32   source-chunk features
    m_ref  : (TILE_M, TILE_S) bf16 adjacency mask tile
    wq_ref : (D_in, H*d)     bf16  Q weights with 1/sqrt(d) pre-folded
    wkv_ref: (D_in, 2*H*d)   bf16  K|V weights
    Scratch: q_s (TILE_M, H*d) bf16, wv_s (TILE_M, H*d) f32, z_s (TILE_M, H) f32
    """
    j = pl.program_id(1)
    hd_total = n_heads * d_head

    # ---- per-dst-tile init: Q projection + zeroed accumulators ------------
    @pl.when(j == 0)
    def _init():
        q = jnp.dot(hd_ref[...].astype(jnp.bfloat16), wq_ref[...],
                    preferred_element_type=jnp.float32)
        q_s[...] = q.astype(jnp.bfloat16)
        wv_s[...] = jnp.zeros_like(wv_s)
        z_s[...] = jnp.zeros_like(z_s)

    # ---- project this source chunk to K|V (bf16 MXU, f32 accumulate) ------
    kv = jnp.dot(hs_ref[...].astype(jnp.bfloat16), wkv_ref[...],
                 preferred_element_type=jnp.float32)
    k_bf = kv[:, :hd_total].astype(jnp.bfloat16)
    v_bf = kv[:, hd_total:].astype(jnp.bfloat16)
    mask_f = m_ref[...].astype(jnp.float32)            # once per block, f32 VPU (v5e-safe)

    # ---- masked attention accumulation, head by head -----------------------
    # NOTE: d_head is small so each score matmul underfills one MXU pass; heads
    # are kept separate because cross-head contraction would change semantics.
    for hidx in range(n_heads):
        sl = slice(hidx * d_head, (hidx + 1) * d_head)
        # (TILE_M, d) x (TILE_S, d) contracted on dim 1 -> (TILE_M, TILE_S); no K.T
        s = lax.dot_general(q_s[:, sl], k_bf[:, sl],
                            (((1,), (1,)), ((), ())),
                            preferred_element_type=jnp.float32)
        p = jnp.exp(jnp.clip(s, -5.0, 5.0)) * mask_f
        wv_s[:, sl] += jnp.dot(p.astype(jnp.bfloat16), v_bf[:, sl],
                               preferred_element_type=jnp.float32)
        z_s[:, hidx:hidx + 1] += jnp.sum(p, axis=-1, keepdims=True)

    # ---- finalize on the last source chunk --------------------------------
    @pl.when(j == pl.num_programs(1) - 1)
    def _finalize():
        # Per-head normalization written in place (lane-dense, no concatenate).
        # Exact reciprocal: z is only (TILE_M, H), negligible cost.
        for hidx in range(n_heads):
            sl = slice(hidx * d_head, (hidx + 1) * d_head)
            wv_s[:, sl] = wv_s[:, sl] / (z_s[:, hidx:hidx + 1] + 1e-6)
        attn_bf = wv_s[...].astype(jnp.bfloat16)
        h_in = hd_ref[...]                               # residual (f32)

        # TODO(synk): F.dropout omitted — this config uses dropout=0.0.
        x = jnp.dot(attn_bf, wo_ref[...], preferred_element_type=jnp.float32)
        x = x + bo_ref[...] + h_in
        h1 = _layernorm(x, ln1g_ref[...], ln1b_ref[...])

        ff = jnp.dot(h1.astype(jnp.bfloat16), w1_ref[...],
                     preferred_element_type=jnp.float32)
        ff = jnp.maximum(ff + b1_ref[...], 0.0)
        y = jnp.dot(ff.astype(jnp.bfloat16), w2_ref[...],
                    preferred_element_type=jnp.float32)
        y = y + b2_ref[...] + h1
        o_ref[...] = _layernorm(y, ln2g_ref[...], ln2b_ref[...])


def graph_transformer_layer(h, mask_bf16, p, n_heads, tile_m=128, tile_s=128):
    n, d_in = h.shape
    d_head = p["d_head"]
    d_out = p["k_Wo"].shape[1]
    assert d_out == n_heads * d_head
    tm = tile_m if n % tile_m == 0 else n
    ts = tile_s if n % tile_s == 0 else n
    grid = (n // tm, n // ts)
    hd_total = n_heads * d_head

    def const(shape):
        return pl.BlockSpec(shape, lambda i, j: (0, 0))

    kernel = functools.partial(_gt_layer_kernel, n_heads=n_heads, d_head=d_head)
    return pl.pallas_call(
        kernel,
        out_shape=jax.ShapeDtypeStruct((n, d_out), jnp.float32),
        grid_spec=pltpu.PrefetchScalarGridSpec(
            num_scalar_prefetch=0,
            grid=grid,
            in_specs=[
                pl.BlockSpec((tm, d_in), lambda i, j: (i, 0)),      # h, dst rows
                pl.BlockSpec((ts, d_in), lambda i, j: (j, 0)),      # h, src chunk
                pl.BlockSpec((tm, ts), lambda i, j: (i, j)),        # adjacency tile
                const((d_in, hd_total)),                            # Wq (scaled, bf16)
                const((d_in, 2 * hd_total)),                        # Wk|Wv (bf16)
                const((d_out, d_out)),                              # Wo (bf16)
                const((1, d_out)),                                  # bo
                const((1, d_out)), const((1, d_out)),               # LN1 gamma/beta
                const((d_out, 2 * d_out)), const((1, 2 * d_out)),   # FFN W1/b1
                const((2 * d_out, d_out)), const((1, d_out)),       # FFN W2/b2
                const((1, d_out)), const((1, d_out)),               # LN2 gamma/beta
            ],
            out_specs=pl.BlockSpec((tm, d_out), lambda i, j: (i, 0)),
            scratch_shapes=[
                pltpu.VMEM((tm, hd_total), jnp.bfloat16),           # Q (per dst tile)
                pltpu.VMEM((tm, hd_total), jnp.float32),            # wV accumulator
                pltpu.VMEM((tm, n_heads), jnp.float32),             # z accumulator
            ],
        ),
        compiler_params=pltpu.CompilerParams(
            # dst-row axis shards across v7x's 2 TensorCores; src axis carries
            # the wV/z accumulators so it must stay "arbitrary".
            dimension_semantics=("parallel", "arbitrary"),
            # Explicit budget: fits v7x's 64 MiB physical VMEM with headroom.
            vmem_limit_bytes=48 * 1024 * 1024,
        ),
    )(h, h, mask_bf16, p["k_Wq"], p["k_Wkv"], p["k_Wo"], p["bo"],
      p["ln1_g"], p["ln1_b"], p["k_W1"], p["b1"], p["k_W2"], p["b2"],
      p["ln2_g"], p["ln2_b"])


# ---------------------------------------------------------------------------
# Model glue
# ---------------------------------------------------------------------------

def graph_transformer_forward(x, mask_bf16, params, n_heads):
    # linear_h: tiny (N, node_dim) @ (node_dim, hidden) — plain XLA, a dedicated
    # pallas_call here is pure launch + HBM round-trip overhead.
    h = x @ params["Wh"] + params["bh"]
    for lp in params["layers"]:
        h = graph_transformer_layer(h, mask_bf16, lp, n_heads)
    return h


def init_params(key, node_dim, hidden_dim, out_dim, n_heads, n_layers):
    def nrm(k, shape, scale=0.1):
        w = scale * jax.random.normal(k, shape, jnp.float32)
        # keep weights bf16-representable so the bf16 kernel operands and the
        # f32 reference share identical weight values
        return w.astype(jnp.bfloat16).astype(jnp.float32)

    keys = iter(jax.random.split(key, 8 + 16 * n_layers))
    params = {
        "Wh": nrm(next(keys), (node_dim, hidden_dim)),
        "bh": nrm(next(keys), (1, hidden_dim)),
        "layers": [],
    }
    dims = [hidden_dim] * (n_layers - 1) + [out_dim]
    in_dim = hidden_dim
    for odim in dims:
        d_head = odim // n_heads
        wq = nrm(next(keys), (in_dim, n_heads * d_head))
        wk = nrm(next(keys), (in_dim, n_heads * d_head))
        wv = nrm(next(keys), (in_dim, n_heads * d_head))
        wo = nrm(next(keys), (odim, odim))
        w1 = nrm(next(keys), (odim, 2 * odim))
        w2 = nrm(next(keys), (2 * odim, odim))
        inv_scale = 1.0 / math.sqrt(float(d_head))
        lp = {
            "d_head": d_head,
            # f32 reference weights (mirror the PyTorch module)
            "Wq": wq, "Wk": wk, "Wv": wv, "Wo": wo,
            "W1": w1, "W2": w2,
            "bo": nrm(next(keys), (1, odim)),
            "b1": nrm(next(keys), (1, 2 * odim)),
            "b2": nrm(next(keys), (1, odim)),
            "ln1_g": jnp.ones((1, odim), jnp.float32),
            "ln1_b": jnp.zeros((1, odim), jnp.float32),
            "ln2_g": jnp.ones((1, odim), jnp.float32),
            "ln2_b": jnp.zeros((1, odim), jnp.float32),
            # bf16 kernel operands; 1/sqrt(d_head) folded into Wq (the clamp
            # acts after the division, so this is numerically equivalent).
            "k_Wq": (wq * inv_scale).astype(jnp.bfloat16),
            "k_Wkv": jnp.concatenate([wk, wv], axis=1).astype(jnp.bfloat16),
            "k_Wo": wo.astype(jnp.bfloat16),
            "k_W1": w1.astype(jnp.bfloat16),
            "k_W2": w2.astype(jnp.bfloat16),
        }
        params["layers"].append(lp)
        in_dim = odim
    return params


# Pure-JAX f32 reference (mirrors the PyTorch module) used as a correctness check.
def reference_forward(x, adj_f32, params, n_heads):
    def ln(v, g, b):
        m = jnp.mean(v, axis=-1, keepdims=True)
        s = jnp.mean(jnp.square(v - m), axis=-1, keepdims=True)
        return (v - m) * lax.rsqrt(s + 1e-5) * g + b

    h = x @ params["Wh"] + params["bh"]
    for p in params["layers"]:
        d = p["d_head"]
        q, k, v = h @ p["Wq"], h @ p["Wk"], h @ p["Wv"]
        heads = []
        for i in range(n_heads):
            qi, ki, vi = (t[:, i * d:(i + 1) * d] for t in (q, k, v))
            s = jnp.exp(jnp.clip((qi @ ki.T) / jnp.sqrt(float(d)), -5.0, 5.0))
            s = s * adj_f32
            heads.append((s @ vi) / (s.sum(-1, keepdims=True) + 1e-6))
        attn = jnp.concatenate(heads, axis=-1)
        h1 = ln(attn @ p["Wo"] + p["bo"] + h, p["ln1_g"], p["ln1_b"])
        ff = jnp.maximum(h1 @ p["W1"] + p["b1"], 0.0)
        h = ln(ff @ p["W2"] + p["b2"] + h1, p["ln2_g"], p["ln2_b"])
    return h


if __name__ == "__main__":
    # Small synthetic graph with TPU-friendly (128-aligned) feature dims:
    # 256 nodes, node features dim 16, hidden = out = 128, 4 heads, 2 layers.
    N, NODE_DIM, HIDDEN_DIM, OUT_DIM, N_HEADS, N_LAYERS = 256, 16, 128, 128, 4, 2
    key = jax.random.PRNGKey(0)
    kx, kadj, kp = jax.random.split(key, 3)

    # g.ndata['drs'] node features
    x = jax.random.normal(kx, (N, NODE_DIM), jnp.float32)
    # dense adjacency mask[v, u] = 1 iff edge u -> v; self-loops ensure every
    # node receives at least one message (typical DGL setup).
    adj = (jax.random.uniform(kadj, (N, N)) < 0.15).astype(jnp.float32)
    adj = jnp.maximum(adj, jnp.eye(N, dtype=jnp.float32))
    adj_bf16 = adj.astype(jnp.bfloat16)          # 0/1 exact in bf16, half traffic

    params = init_params(kp, NODE_DIM, HIDDEN_DIM, OUT_DIM, N_HEADS, N_LAYERS)

    h = graph_transformer_forward(x, adj_bf16, params, N_HEADS)
    jax.block_until_ready(h)

    h_ref = reference_forward(x, adj, params, N_HEADS)
    assert h.shape == (N, OUT_DIM)
    assert bool(jnp.all(jnp.isfinite(h)))
    # Tolerance covers the bf16 matmul operands (weights/activations/scores);
    # the z reciprocal is exact and LayerNorm re-normalizes each layer.
    assert bool(jnp.allclose(h, h_ref, rtol=5e-2, atol=5e-2))
    print("KERNEL_OK")
</pallas_src>

<mosaic_0001>
module attributes {stable_mosaic.version = 11 : i64} {
  func.func @_gt_layer_kernel(%arg0: i32, %arg1: i32, %arg2: memref<128x128xf32, #tpu.memory_space<vmem>>, %arg3: memref<128x128xf32, #tpu.memory_space<vmem>>, %arg4: memref<128x128xbf16, #tpu.memory_space<vmem>>, %arg5: memref<128x128xbf16, #tpu.memory_space<vmem>>, %arg6: memref<128x256xbf16, #tpu.memory_space<vmem>>, %arg7: memref<128x128xbf16, #tpu.memory_space<vmem>>, %arg8: memref<1x128xf32, #tpu.memory_space<vmem>>, %arg9: memref<1x128xf32, #tpu.memory_space<vmem>>, %arg10: memref<1x128xf32, #tpu.memory_space<vmem>>, %arg11: memref<128x256xbf16, #tpu.memory_space<vmem>>, %arg12: memref<1x256xf32, #tpu.memory_space<vmem>>, %arg13: memref<256x128xbf16, #tpu.memory_space<vmem>>, %arg14: memref<1x128xf32, #tpu.memory_space<vmem>>, %arg15: memref<1x128xf32, #tpu.memory_space<vmem>>, %arg16: memref<1x128xf32, #tpu.memory_space<vmem>>, %arg17: memref<128x128xf32, #tpu.memory_space<vmem>>, %arg18: memref<128x128xbf16, #tpu.memory_space<vmem>>, %arg19: memref<128x128xf32, #tpu.memory_space<vmem>>, %arg20: memref<128x4xf32, #tpu.memory_space<vmem>>) attributes {dimension_semantics = [#tpu.dimension_semantics<parallel>, #tpu.dimension_semantics<arbitrary>], iteration_bounds = array<i64: 2, 2>, scalar_prefetch = 0 : i64, scratch_operands = 3 : i64, tpu.core_type = #tpu.core_type<tc>, window_params = [{transform_indices = @transform_0, window_bounds = array<i64: 128, 128>}, {transform_indices = @transform_1, window_bounds = array<i64: 128, 128>}, {transform_indices = @transform_2, window_bounds = array<i64: 128, 128>}, {pipeline_mode = #tpu.pipeline_mode<synchronous>, transform_indices = @transform_3, window_bounds = array<i64: 128, 128>}, {pipeline_mode = #tpu.pipeline_mode<synchronous>, transform_indices = @transform_4, window_bounds = array<i64: 128, 256>}, {pipeline_mode = #tpu.pipeline_mode<synchronous>, transform_indices = @transform_5, window_bounds = array<i64: 128, 128>}, {pipeline_mode = #tpu.pipeline_mode<synchronous>, transform_indices = @transform_6, window_bounds = array<i64: 1, 128>}, {pipeline_mode = #tpu.pipeline_mode<synchronous>, transform_indices = @transform_7, window_bounds = array<i64: 1, 128>}, {pipeline_mode = #tpu.pipeline_mode<synchronous>, transform_indices = @transform_8, window_bounds = array<i64: 1, 128>}, {pipeline_mode = #tpu.pipeline_mode<synchronous>, transform_indices = @transform_9, window_bounds = array<i64: 128, 256>}, {pipeline_mode = #tpu.pipeline_mode<synchronous>, transform_indices = @transform_10, window_bounds = array<i64: 1, 256>}, {pipeline_mode = #tpu.pipeline_mode<synchronous>, transform_indices = @transform_11, window_bounds = array<i64: 256, 128>}, {pipeline_mode = #tpu.pipeline_mode<synchronous>, transform_indices = @transform_12, window_bounds = array<i64: 1, 128>}, {pipeline_mode = #tpu.pipeline_mode<synchronous>, transform_indices = @transform_13, window_bounds = array<i64: 1, 128>}, {pipeline_mode = #tpu.pipeline_mode<synchronous>, transform_indices = @transform_14, window_bounds = array<i64: 1, 128>}, {transform_indices = @transform_15, window_bounds = array<i64: 128, 128>}]} {
    %c0_i32 = arith.constant 0 : i32
    %0 = arith.cmpi eq, %arg1, %c0_i32 : i32
    %1 = arith.extui %0 : i1 to i32
    %c0_i32_0 = arith.constant 0 : i32
    %2 = arith.cmpi ne, %1, %c0_i32_0 : i32
    scf.if %2 {
      %c0_61 = arith.constant 0 : index
      %c0_62 = arith.constant 0 : index
      %96 = vector.load %arg2[%c0_61, %c0_62] : memref<128x128xf32, #tpu.memory_space<vmem>>, vector<128x128xf32>
      %97 = arith.truncf %96 : vector<128x128xf32> to vector<128x128xbf16>
      %c0_63 = arith.constant 0 : index
      %c0_64 = arith.constant 0 : index
      %98 = vector.load %arg5[%c0_63, %c0_64] : memref<128x128xbf16, #tpu.memory_space<vmem>>, vector<128x128xbf16>
      %cst_65 = arith.constant dense<0.000000e+00> : vector<128x128xf32>
      %99 = tpu.matmul %97, %98, %cst_65 {dimension_numbers = #tpu.dot_dimension_numbers<[1], [0], [0], [1], [0, 0, 1, 1], [], []>} : vector<128x128xbf16>, vector<128x128xbf16>, vector<128x128xf32> -> vector<128x128xf32>
      %100 = arith.truncf %99 : vector<128x128xf32> to vector<128x128xbf16>
      %c0_66 = arith.constant 0 : index
      %c0_67 = arith.constant 0 : index
      %101 = vector.load %arg18[%c0_66, %c0_67] : memref<128x128xbf16, #tpu.memory_space<vmem>>, vector<128x128xbf16>
      tpu.vector_store %arg18[%c0_66, %c0_67], %100 {strides = array<i32>} : memref<128x128xbf16, #tpu.memory_space<vmem>>, vector<128x128xbf16>,
      %cst_68 = arith.constant 0.000000e+00 : f32
      %102 = vector.broadcast %cst_68 : f32 to vector<128x128xf32>
      %c0_69 = arith.constant 0 : index
      %c0_70 = arith.constant 0 : index
      %103 = vector.load %arg19[%c0_69, %c0_70] : memref<128x128xf32, #tpu.memory_space<vmem>>, vector<128x128xf32>
      tpu.vector_store %arg19[%c0_69, %c0_70], %102 {strides = array<i32>} : memref<128x128xf32, #tpu.memory_space<vmem>>, vector<128x128xf32>,
      %cst_71 = arith.constant 0.000000e+00 : f32
      %104 = vector.broadcast %cst_71 : f32 to vector<128x4xf32>
      %c0_72 = arith.constant 0 : index
      %c0_73 = arith.constant 0 : index
      %105 = vector.load %arg20[%c0_72, %c0_73] : memref<128x4xf32, #tpu.memory_space<vmem>>, vector<128x4xf32>
      tpu.vector_store %arg20[%c0_72, %c0_73], %104 {strides = array<i32>} : memref<128x4xf32, #tpu.memory_space<vmem>>, vector<128x4xf32>,
    } else {
    }
    %c0 = arith.constant 0 : index
    %c0_1 = arith.constant 0 : index
    %3 = vector.load %arg3[%c0, %c0_1] : memref<128x128xf32, #tpu.memory_space<vmem>>, vector<128x128xf32>
    %4 = arith.truncf %3 : vector<128x128xf32> to vector<128x128xbf16>
    %c0_2 = arith.constant 0 : index
    %c0_3 = arith.constant 0 : index
    %5 = vector.load %arg6[%c0_2, %c0_3] : memref<128x256xbf16, #tpu.memory_space<vmem>>, vector<128x256xbf16>
    %cst = arith.constant dense<0.000000e+00> : vector<128x256xf32>
    %6 = tpu.matmul %4, %5, %cst {dimension_numbers = #tpu.dot_dimension_numbers<[1], [0], [0], [1], [0, 0, 1, 1], [], []>} : vector<128x128xbf16>, vector<128x256xbf16>, vector<128x256xf32> -> vector<128x256xf32>
    %7 = vector.extract_strided_slice %6 {offsets = [0, 0], sizes = [128, 128], strides = [1, 1]} : vector<128x256xf32> to vector<128x128xf32>
    %8 = arith.truncf %7 : vector<128x128xf32> to vector<128x128xbf16>
    %9 = vector.extract_strided_slice %6 {offsets = [0, 128], sizes = [128, 128], strides = [1, 1]} : vector<128x256xf32> to vector<128x128xf32>
    %10 = arith.truncf %9 : vector<128x128xf32> to vector<128x128xbf16>
    %c0_4 = arith.constant 0 : index
    %c0_5 = arith.constant 0 : index
    %11 = vector.load %arg4[%c0_4, %c0_5] : memref<128x128xbf16, #tpu.memory_space<vmem>>, vector<128x128xbf16>
    %12 = arith.extf %11 : vector<128x128xbf16> to vector<128x128xf32>
    %c0_6 = arith.constant 0 : index
    %c0_7 = arith.constant 0 : index
    %13 = vector.load %arg18[%c0_6, %c0_7] : memref<128x128xbf16, #tpu.memory_space<vmem>>, vector<128x32xbf16>
    %14 = vector.extract_strided_slice %8 {offsets = [0, 0], sizes = [128, 32], strides = [1, 1]} : vector<128x128xbf16> to vector<128x32xbf16>
    %cst_8 = arith.constant dense<0.000000e+00> : vector<128x128xf32>
    %15 = tpu.matmul %13, %14, %cst_8 {dimension_numbers = #tpu.dot_dimension_numbers<[1], [1], [0], [0], [0, 0, 1, 0], [], []>} : vector<128x32xbf16>, vector<128x32xbf16>, vector<128x128xf32> -> vector<128x128xf32>
    %cst_9 = arith.constant -5.000000e+00 : f32
    %cst_10 = arith.constant 5.000000e+00 : f32
    %16 = vector.broadcast %cst_9 : f32 to vector<128x128xf32>
    %17 = arith.maximumf %16, %15 : vector<128x128xf32>
    %18 = vector.broadcast %cst_10 : f32 to vector<128x128xf32>
    %19 = arith.minimumf %18, %17 : vector<128x128xf32>
    %20 = math.exp %19 : vector<128x128xf32>
    %21 = arith.mulf %20, %12 : vector<128x128xf32>
    %c0_11 = arith.constant 0 : index
    %c0_12 = arith.constant 0 : index
    %22 = vector.load %arg19[%c0_11, %c0_12] : memref<128x128xf32, #tpu.memory_space<vmem>>, vector<128x32xf32>
    %23 = arith.truncf %21 : vector<128x128xf32> to vector<128x128xbf16>
    %24 = vector.extract_strided_slice %10 {offsets = [0, 0], sizes = [128, 32], strides = [1, 1]} : vector<128x128xbf16> to vector<128x32xbf16>
    %cst_13 = arith.constant dense<0.000000e+00> : vector<128x32xf32>
    %25 = tpu.matmul %23, %24, %cst_13 {dimension_numbers = #tpu.dot_dimension_numbers<[1], [0], [0], [1], [0, 0, 1, 1], [], []>} : vector<128x128xbf16>, vector<128x32xbf16>, vector<128x32xf32> -> vector<128x32xf32>
    %26 = arith.addf %22, %25 : vector<128x32xf32>
    %c0_14 = arith.constant 0 : index
    %c0_15 = arith.constant 0 : index
    %27 = vector.load %arg19[%c0_14, %c0_15] : memref<128x128xf32, #tpu.memory_space<vmem>>, vector<128x32xf32>
    tpu.vector_store %arg19[%c0_14, %c0_15], %26 {strides = array<i32>} : memref<128x128xf32, #tpu.memory_space<vmem>>, vector<128x32xf32>,
    %c0_16 = arith.constant 0 : index
    %c0_17 = arith.constant 0 : index
    %28 = vector.load %arg20[%c0_16, %c0_17] : memref<128x4xf32, #tpu.memory_space<vmem>>, vector<128x1xf32>
    %cst_18 = arith.constant dense<0.000000e+00> : vector<128xf32>
    %29 = vector.multi_reduction <add>, %21, %cst_18 [1] : vector<128x128xf32> to vector<128xf32>
    %30 = vector.shape_cast %29 : vector<128xf32> to vector<128x1xf32>
    %31 = arith.addf %28, %30 : vector<128x1xf32>
    %c0_19 = arith.constant 0 : index
    %c0_20 = arith.constant 0 : index
    %32 = vector.load %arg20[%c0_19, %c0_20] : memref<128x4xf32, #tpu.memory_space<vmem>>, vector<128x1xf32>
    tpu.vector_store %arg20[%c0_19, %c0_20], %31 {strides = array<i32>} : memref<128x4xf32, #tpu.memory_space<vmem>>, vector<128x1xf32>,
    %c0_21 = arith.constant 0 : index
    %c32 = arith.constant 32 : index
    %33 = vector.load %arg18[%c0_21, %c32] : memref<128x128xbf16, #tpu.memory_space<vmem>>, vector<128x32xbf16>
    %34 = vector.extract_strided_slice %8 {offsets = [0, 32], sizes = [128, 32], strides = [1, 1]} : vector<128x128xbf16> to vector<128x32xbf16>
    %cst_22 = arith.constant dense<0.000000e+00> : vector<128x128xf32>
    %35 = tpu.matmul %33, %34, %cst_22 {dimension_numbers = #tpu.dot_dimension_numbers<[1], [1], [0], [0], [0, 0, 1, 0], [], []>} : vector<128x32xbf16>, vector<128x32xbf16>, vector<128x128xf32> -> vector<128x128xf32>
    %cst_23 = arith.constant -5.000000e+00 : f32
    %cst_24 = arith.constant 5.000000e+00 : f32
    %36 = vector.broadcast %cst_23 : f32 to vector<128x128xf32>
    %37 = arith.maximumf %36, %35 : vector<128x128xf32>
    %38 = vector.broadcast %cst_24 : f32 to vector<128x128xf32>
    %39 = arith.minimumf %38, %37 : vector<128x128xf32>
    %40 = math.exp %39 : vector<128x128xf32>
    %41 = arith.mulf %40, %12 : vector<128x128xf32>
    %c0_25 = arith.constant 0 : index
    %c32_26 = arith.constant 32 : index
    %42 = vector.load %arg19[%c0_25, %c32_26] : memref<128x128xf32, #tpu.memory_space<vmem>>, vector<128x32xf32>
    %43 = arith.truncf %41 : vector<128x128xf32> to vector<128x128xbf16>
    %44 = vector.extract_strided_slice %10 {offsets = [0, 32], sizes = [128, 32], strides = [1, 1]} : vector<128x128xbf16> to vector<128x32xbf16>
    %cst_27 = arith.constant dense<0.000000e+00> : vector<128x32xf32>
    %45 = tpu.matmul %43, %44, %cst_27 {dimension_numbers = #tpu.dot_dimension_numbers<[1], [0], [0], [1], [0, 0, 1, 1], [], []>} : vector<128x128xbf16>, vector<128x32xbf16>, vector<128x32xf32> -> vector<128x32xf32>
    %46 = arith.addf %42, %45 : vector<128x32xf32>
    %c0_28 = arith.constant 0 : index
    %c32_29 = arith.constant 32 : index
    %47 = vector.load %arg19[%c0_28, %c32_29] : memref<128x128xf32, #tpu.memory_space<vmem>>, vector<128x32xf32>
    tpu.vector_store %arg19[%c0_28, %c32_29], %46 {strides = array<i32>} : memref<128x128xf32, #tpu.memory_space<vmem>>, vector<128x32xf32>,
    %c0_30 = arith.constant 0 : index
    %c1 = arith.constant 1 : index
    %48 = vector.load %arg20[%c0_30, %c1] : memref<128x4xf32, #tpu.memory_space<vmem>>, vector<128x1xf32>
    %cst_31 = arith.constant dense<0.000000e+00> : vector<128xf32>
    %49 = vector.multi_reduction <add>, %41, %cst_31 [1] : vector<128x128xf32> to vector<128xf32>
    %50 = vector.shape_cast %49 : vector<128xf32> to vector<128x1xf32>
    %51 = arith.addf %48, %50 : vector<128x1xf32>
    %c0_32 = arith.constant 0 : index
    %c1_33 = arith.constant 1 : index
    %52 = vector.load %arg20[%c0_32, %c1_33] : memref<128x4xf32, #tpu.memory_space<vmem>>, vector<128x1xf32>
    tpu.vector_store %arg20[%c0_32, %c1_33], %51 {strides = array<i32>} : memref<128x4xf32, #tpu.memory_space<vmem>>, vector<128x1xf32>,
    %c0_34 = arith.constant 0 : index
    %c64 = arith.constant 64 : index
    %53 = vector.load %arg18[%c0_34, %c64] : memref<128x128xbf16, #tpu.memory_space<vmem>>, vector<128x32xbf16>
    %54 = vector.extract_strided_slice %8 {offsets = [0, 64], sizes = [128, 32], strides = [1, 1]} : vector<128x128xbf16> to vector<128x32xbf16>
    %cst_35 = arith.constant dense<0.000000e+00> : vector<128x128xf32>
    %55 = tpu.matmul %53, %54, %cst_35 {dimension_numbers = #tpu.dot_dimension_numbers<[1], [1], [0], [0], [0, 0, 1, 0], [], []>} : vector<128x32xbf16>, vector<128x32xbf16>, vector<128x128xf32> -> vector<128x128xf32>
    %cst_36 = arith.constant -5.000000e+00 : f32
    %cst_37 = arith.constant 5.000000e+00 : f32
    %56 = vector.broadcast %cst_36 : f32 to vector<128x128xf32>
    %57 = arith.maximumf %56, %55 : vector<128x128xf32>
    %58 = vector.broadcast %cst_37 : f32 to vector<128x128xf32>
    %59 = arith.minimumf %58, %57 : vector<128x128xf32>
    %60 = math.exp %59 : vector<128x128xf32>
    %61 = arith.mulf %60, %12 : vector<128x128xf32>
    %c0_38 = arith.constant 0 : index
    %c64_39 = arith.constant 64 : index
    %62 = vector.load %arg19[%c0_38, %c64_39] : memref<128x128xf32, #tpu.memory_space<vmem>>, vector<128x32xf32>
    %63 = arith.truncf %61 : vector<128x128xf32> to vector<128x128xbf16>
    %64 = vector.extract_strided_slice %10 {offsets = [0, 64], sizes = [128, 32], strides = [1, 1]} : vector<128x128xbf16> to vector<128x32xbf16>
    %cst_40 = arith.constant dense<0.000000e+00> : vector<128x32xf32>
    %65 = tpu.matmul %63, %64, %cst_40 {dimension_numbers = #tpu.dot_dimension_numbers<[1], [0], [0], [1], [0, 0, 1, 1], [], []>} : vector<128x128xbf16>, vector<128x32xbf16>, vector<128x32xf32> -> vector<128x32xf32>
    %66 = arith.addf %62, %65 : vector<128x32xf32>
    %c0_41 = arith.constant 0 : index
    %c64_42 = arith.constant 64 : index
    %67 = vector.load %arg19[%c0_41, %c64_42] : memref<128x128xf32, #tpu.memory_space<vmem>>, vector<128x32xf32>
    tpu.vector_store %arg19[%c0_41, %c64_42], %66 {strides = array<i32>} : memref<128x128xf32, #tpu.memory_space<vmem>>, vector<128x32xf32>,
    %c0_43 = arith.constant 0 : index
    %c2 = arith.constant 2 : index
    %68 = vector.load %arg20[%c0_43, %c2] : memref<128x4xf32, #tpu.memory_space<vmem>>, vector<128x1xf32>
    %cst_44 = arith.constant dense<0.000000e+00> : vector<128xf32>
    %69 = vector.multi_reduction <add>, %61, %cst_44 [1] : vector<128x128xf32> to vector<128xf32>
    %70 = vector.shape_cast %69 : vector<128xf32> to vector<128x1xf32>
    %71 = arith.addf %68, %70 : vector<128x1xf32>
    %c0_45 = arith.constant 0 : index
    %c2_46 = arith.constant 2 : index
    %72 = vector.load %arg20[%c0_45, %c2_46] : memref<128x4xf32, #tpu.memory_space<vmem>>, vector<128x1xf32>
    tpu.vector_store %arg20[%c0_45, %c2_46], %71 {strides = array<i32>} : memref<128x4xf32, #tpu.memory_space<vmem>>, vector<128x1xf32>,
    %c0_47 = arith.constant 0 : index
    %c96 = arith.constant 96 : index
    %73 = vector.load %arg18[%c0_47, %c96] : memref<128x128xbf16, #tpu.memory_space<vmem>>, vector<128x32xbf16>
    %74 = vector.extract_strided_slice %8 {offsets = [0, 96], sizes = [128, 32], strides = [1, 1]} : vector<128x128xbf16> to vector<128x32xbf16>
    %cst_48 = arith.constant dense<0.000000e+00> : vector<128x128xf32>
    %75 = tpu.matmul %73, %74, %cst_48 {dimension_numbers = #tpu.dot_dimension_numbers<[1], [1], [0], [0], [0, 0, 1, 0], [], []>} : vector<128x32xbf16>, vector<128x32xbf16>, vector<128x128xf32> -> vector<128x128xf32>
    %cst_49 = arith.constant -5.000000e+00 : f32
    %cst_50 = arith.constant 5.000000e+00 : f32
    %76 = vector.broadcast %cst_49 : f32 to vector<128x128xf32>
    %77 = arith.maximumf %76, %75 : vector<128x128xf32>
    %78 = vector.broadcast %cst_50 : f32 to vector<128x128xf32>
    %79 = arith.minimumf %78, %77 : vector<128x128xf32>
    %80 = math.exp %79 : vector<128x128xf32>
    %81 = arith.mulf %80, %12 : vector<128x128xf32>
    %c0_51 = arith.constant 0 : index
    %c96_52 = arith.constant 96 : index
    %82 = vector.load %arg19[%c0_51, %c96_52] : memref<128x128xf32, #tpu.memory_space<vmem>>, vector<128x32xf32>
    %83 = arith.truncf %81 : vector<128x128xf32> to vector<128x128xbf16>
    %84 = vector.extract_strided_slice %10 {offsets = [0, 96], sizes = [128, 32], strides = [1, 1]} : vector<128x128xbf16> to vector<128x32xbf16>
    %cst_53 = arith.constant dense<0.000000e+00> : vector<128x32xf32>
    %85 = tpu.matmul %83, %84, %cst_53 {dimension_numbers = #tpu.dot_dimension_numbers<[1], [0], [0], [1], [0, 0, 1, 1], [], []>} : vector<128x128xbf16>, vector<128x32xbf16>, vector<128x32xf32> -> vector<128x32xf32>
    %86 = arith.addf %82, %85 : vector<128x32xf32>
    %c0_54 = arith.constant 0 : index
    %c96_55 = arith.constant 96 : index
    %87 = vector.load %arg19[%c0_54, %c96_55] : memref<128x128xf32, #tpu.memory_space<vmem>>, vector<128x32xf32>
    tpu.vector_store %arg19[%c0_54, %c96_55], %86 {strides = array<i32>} : memref<128x128xf32, #tpu.memory_space<vmem>>, vector<128x32xf32>,
    %c0_56 = arith.constant 0 : index
    %c3 = arith.constant 3 : index
    %88 = vector.load %arg20[%c0_56, %c3] : memref<128x4xf32, #tpu.memory_space<vmem>>, vector<128x1xf32>
    %cst_57 = arith.constant dense<0.000000e+00> : vector<128xf32>
    %89 = vector.multi_reduction <add>, %81, %cst_57 [1] : vector<128x128xf32> to vector<128xf32>
    %90 = vector.shape_cast %89 : vector<128xf32> to vector<128x1xf32>
    %91 = arith.addf %88, %90 : vector<128x1xf32>
    %c0_58 = arith.constant 0 : index
    %c3_59 = arith.constant 3 : index
    %92 = vector.load %arg20[%c0_58, %c3_59] : memref<128x4xf32, #tpu.memory_space<vmem>>, vector<128x1xf32>
    tpu.vector_store %arg20[%c0_58, %c3_59], %91 {strides = array<i32>} : memref<128x4xf32, #tpu.memory_space<vmem>>, vector<128x1xf32>,
    %c1_i32 = arith.constant 1 : i32
    %93 = arith.cmpi eq, %arg1, %c1_i32 : i32
    %94 = arith.extui %93 : i1 to i32
    %c0_i32_60 = arith.constant 0 : i32
    %95 = arith.cmpi ne, %94, %c0_i32_60 : i32
    scf.if %95 {
      %c0_61 = arith.constant 0 : index
      %c0_62 = arith.constant 0 : index
      %96 = vector.load %arg19[%c0_61, %c0_62] : memref<128x128xf32, #tpu.memory_space<vmem>>, vector<128x32xf32>
      %c0_63 = arith.constant 0 : index
      %c0_64 = arith.constant 0 : index
      %97 = vector.load %arg20[%c0_63, %c0_64] : memref<128x4xf32, #tpu.memory_space<vmem>>, vector<128x1xf32>
      %cst_65 = arith.constant 9.99999997E-7 : f32
      %98 = vector.broadcast %cst_65 : f32 to vector<128x1xf32>
      %99 = arith.addf %97, %98 : vector<128x1xf32>
      %100 = vector.broadcast %99 : vector<128x1xf32> to vector<128x32xf32>
      %101 = arith.divf %96, %100 : vector<128x32xf32>
      %c0_66 = arith.constant 0 : index
      %c0_67 = arith.constant 0 : index
      %102 = vector.load %arg19[%c0_66, %c0_67] : memref<128x128xf32, #tpu.memory_space<vmem>>, vector<128x32xf32>
      tpu.vector_store %arg19[%c0_66, %c0_67], %101 {strides = array<i32>} : memref<128x128xf32, #tpu.memory_space<vmem>>, vector<128x32xf32>,
      %c0_68 = arith.constant 0 : index
      %c32_69 = arith.constant 32 : index
      %103 = vector.load %arg19[%c0_68, %c32_69] : memref<128x128xf32, #tpu.memory_space<vmem>>, vector<128x32xf32>
      %c0_70 = arith.constant 0 : index
      %c1_71 = arith.constant 1 : index
      %104 = vector.load %arg20[%c0_70, %c1_71] : memref<128x4xf32, #tpu.memory_space<vmem>>, vector<128x1xf32>
      %cst_72 = arith.constant 9.99999997E-7 : f32
      %105 = vector.broadcast %cst_72 : f32 to vector<128x1xf32>
      %106 = arith.addf %104, %105 : vector<128x1xf32>
      %107 = vector.broadcast %106 : vector<128x1xf32> to vector<128x32xf32>
      %108 = arith.divf %103, %107 : vector<128x32xf32>
      %c0_73 = arith.constant 0 : index
      %c32_74 = arith.constant 32 : index
      %109 = vector.load %arg19[%c0_73, %c32_74] : memref<128x128xf32, #tpu.memory_space<vmem>>, vector<128x32xf32>
      tpu.vector_store %arg19[%c0_73, %c32_74], %108 {strides = array<i32>} : memref<128x128xf32, #tpu.memory_space<vmem>>, vector<128x32xf32>,
      %c0_75 = arith.constant 0 : index
      %c64_76 = arith.constant 64 : index
      %110 = vector.load %arg19[%c0_75, %c64_76] : memref<128x128xf32, #tpu.memory_space<vmem>>, vector<128x32xf32>
      %c0_77 = arith.constant 0 : index
      %c2_78 = arith.constant 2 : index
      %111 = vector.load %arg20[%c0_77, %c2_78] : memref<128x4xf32, #tpu.memory_space<vmem>>, vector<128x1xf32>
      %cst_79 = arith.constant 9.99999997E-7 : f32
      %112 = vector.broadcast %cst_79 : f32 to vector<128x1xf32>
      %113 = arith.addf %111, %112 : vector<128x1xf32>
      %114 = vector.broadcast %113 : vector<128x1xf32> to vector<128x32xf32>
      %115 = arith.divf %110, %114 : vector<128x32xf32>
      %c0_80 = arith.constant 0 : index
      %c64_81 = arith.constant 64 : index
      %116 = vector.load %arg19[%c0_80, %c64_81] : memref<128x128xf32, #tpu.memory_space<vmem>>, vector<128x32xf32>
      tpu.vector_store %arg19[%c0_80, %c64_81], %115 {strides = array<i32>} : memref<128x128xf32, #tpu.memory_space<vmem>>, vector<128x32xf32>,
      %c0_82 = arith.constant 0 : index
      %c96_83 = arith.constant 96 : index
      %117 = vector.load %arg19[%c0_82, %c96_83] : memref<128x128xf32, #tpu.memory_space<vmem>>, vector<128x32xf32>
      %c0_84 = arith.constant 0 : index
      %c3_85 = arith.constant 3 : index
      %118 = vector.load %arg20[%c0_84, %c3_85] : memref<128x4xf32, #tpu.memory_space<vmem>>, vector<128x1xf32>
      %cst_86 = arith.constant 9.99999997E-7 : f32
      %119 = vector.broadcast %cst_86 : f32 to vector<128x1xf32>
      %120 = arith.addf %118, %119 : vector<128x1xf32>
      %121 = vector.broadcast %120 : vector<128x1xf32> to vector<128x32xf32>
      %122 = arith.divf %117, %121 : vector<128x32xf32>
      %c0_87 = arith.constant 0 : index
      %c96_88 = arith.constant 96 : index
      %123 = vector.load %arg19[%c0_87, %c96_88] : memref<128x128xf32, #tpu.memory_space<vmem>>, vector<128x32xf32>
      tpu.vector_store %arg19[%c0_87, %c96_88], %122 {strides = array<i32>} : memref<128x128xf32, #tpu.memory_space<vmem>>, vector<128x32xf32>,
      %c0_89 = arith.constant 0 : index
      %c0_90 = arith.constant 0 : index
      %124 = vector.load %arg19[%c0_89, %c0_90] : memref<128x128xf32, #tpu.memory_space<vmem>>, vector<128x128xf32>
      %125 = arith.truncf %124 : vector<128x128xf32> to vector<128x128xbf16>
      %c0_91 = arith.constant 0 : index
      %c0_92 = arith.constant 0 : index
      %126 = vector.load %arg2[%c0_91, %c0_92] : memref<128x128xf32, #tpu.memory_space<vmem>>, vector<128x128xf32>
      %c0_93 = arith.constant 0 : index
      %c0_94 = arith.constant 0 : index
      %127 = vector.load %arg7[%c0_93, %c0_94] : memref<128x128xbf16, #tpu.memory_space<vmem>>, vector<128x128xbf16>
      %cst_95 = arith.constant dense<0.000000e+00> : vector<128x128xf32>
      %128 = tpu.matmul %125, %127, %cst_95 {dimension_numbers = #tpu.dot_dimension_numbers<[1], [0], [0], [1], [0, 0, 1, 1], [], []>} : vector<128x128xbf16>, vector<128x128xbf16>, vector<128x128xf32> -> vector<128x128xf32>
      %c0_96 = arith.constant 0 : index
      %c0_97 = arith.constant 0 : index
      %129 = vector.load %arg8[%c0_96, %c0_97] : memref<1x128xf32, #tpu.memory_space<vmem>>, vector<1x128xf32>
      %130 = vector.broadcast %129 : vector<1x128xf32> to vector<128x128xf32>
      %131 = arith.addf %128, %130 : vector<128x128xf32>
      %132 = arith.addf %131, %126 : vector<128x128xf32>
      %c0_98 = arith.constant 0 : index
      %c0_99 = arith.constant 0 : index
      %133 = vector.load %arg9[%c0_98, %c0_99] : memref<1x128xf32, #tpu.memory_space<vmem>>, vector<1x128xf32>
      %c0_100 = arith.constant 0 : index
      %c0_101 = arith.constant 0 : index
      %134 = vector.load %arg10[%c0_100, %c0_101] : memref<1x128xf32, #tpu.memory_space<vmem>>, vector<1x128xf32>
      %cst_102 = arith.constant dense<0.000000e+00> : vector<128xf32>
      %135 = vector.multi_reduction <add>, %132, %cst_102 [1] : vector<128x128xf32> to vector<128xf32>
      %136 = vector.shape_cast %135 : vector<128xf32> to vector<128x1xf32>
      %cst_103 = arith.constant 1.280000e+02 : f32
      %137 = vector.broadcast %cst_103 : f32 to vector<128x1xf32>
      %138 = arith.divf %136, %137 : vector<128x1xf32>
      %139 = vector.broadcast %138 : vector<128x1xf32> to vector<128x128xf32>
      %140 = arith.subf %132, %139 : vector<128x128xf32>
      %141 = arith.mulf %140, %140 : vector<128x128xf32>
      %cst_104 = arith.constant dense<0.000000e+00> : vector<128xf32>
      %142 = vector.multi_reduction <add>, %141, %cst_104 [1] : vector<128x128xf32> to vector<128xf32>
      %143 = vector.shape_cast %142 : vector<128xf32> to vector<128x1xf32>
      %cst_105 = arith.constant 1.280000e+02 : f32
      %144 = vector.broadcast %cst_105 : f32 to vector<128x1xf32>
      %145 = arith.divf %143, %144 : vector<128x1xf32>
      %146 = vector.broadcast %138 : vector<128x1xf32> to vector<128x128xf32>
      %147 = arith.subf %132, %146 : vector<128x128xf32>
      %cst_106 = arith.constant 9.99999974E-6 : f32
      %148 = vector.broadcast %cst_106 : f32 to vector<128x1xf32>
      %149 = arith.addf %145, %148 : vector<128x1xf32>
      %150 = math.rsqrt %149 : vector<128x1xf32>
      %151 = vector.broadcast %150 : vector<128x1xf32> to vector<128x128xf32>
      %152 = arith.mulf %147, %151 : vector<128x128xf32>
      %153 = vector.broadcast %133 : vector<1x128xf32> to vector<128x128xf32>
      %154 = arith.mulf %152, %153 : vector<128x128xf32>
      %155 = vector.broadcast %134 : vector<1x128xf32> to vector<128x128xf32>
      %156 = arith.addf %154, %155 : vector<128x128xf32>
      %157 = arith.truncf %156 : vector<128x128xf32> to vector<128x128xbf16>
      %c0_107 = arith.constant 0 : index
      %c0_108 = arith.constant 0 : index
      %158 = vector.load %arg11[%c0_107, %c0_108] : memref<128x256xbf16, #tpu.memory_space<vmem>>, vector<128x256xbf16>
      %cst_109 = arith.constant dense<0.000000e+00> : vector<128x256xf32>
      %159 = tpu.matmul %157, %158, %cst_109 {dimension_numbers = #tpu.dot_dimension_numbers<[1], [0], [0], [1], [0, 0, 1, 1], [], []>} : vector<128x128xbf16>, vector<128x256xbf16>, vector<128x256xf32> -> vector<128x256xf32>
      %c0_110 = arith.constant 0 : index
      %c0_111 = arith.constant 0 : index
      %160 = vector.load %arg12[%c0_110, %c0_111] : memref<1x256xf32, #tpu.memory_space<vmem>>, vector<1x256xf32>
      %161 = vector.broadcast %160 : vector<1x256xf32> to vector<128x256xf32>
      %162 = arith.addf %159, %161 : vector<128x256xf32>
      %cst_112 = arith.constant 0.000000e+00 : f32
      %163 = vector.broadcast %cst_112 : f32 to vector<128x256xf32>
      %164 = arith.maximumf %162, %163 : vector<128x256xf32>
      %165 = arith.truncf %164 : vector<128x256xf32> to vector<128x256xbf16>
      %c0_113 = arith.constant 0 : index
      %c0_114 = arith.constant 0 : index
      %166 = vector.load %arg13[%c0_113, %c0_114] : memref<256x128xbf16, #tpu.memory_space<vmem>>, vector<256x128xbf16>
      %cst_115 = arith.constant dense<0.000000e+00> : vector<128x128xf32>
      %167 = tpu.matmul %165, %166, %cst_115 {dimension_numbers = #tpu.dot_dimension_numbers<[1], [0], [0], [1], [0, 0, 1, 1], [], []>} : vector<128x256xbf16>, vector<256x128xbf16>, vector<128x128xf32> -> vector<128x128xf32>
      %c0_116 = arith.constant 0 : index
      %c0_117 = arith.constant 0 : index
      %168 = vector.load %arg14[%c0_116, %c0_117] : memref<1x128xf32, #tpu.memory_space<vmem>>, vector<1x128xf32>
      %169 = vector.broadcast %168 : vector<1x128xf32> to vector<128x128xf32>
      %170 = arith.addf %167, %169 : vector<128x128xf32>
      %171 = arith.addf %170, %156 : vector<128x128xf32>
      %c0_118 = arith.constant 0 : index
      %c0_119 = arith.constant 0 : index
      %172 = vector.load %arg15[%c0_118, %c0_119] : memref<1x128xf32, #tpu.memory_space<vmem>>, vector<1x128xf32>
      %c0_120 = arith.constant 0 : index
      %c0_121 = arith.constant 0 : index
      %173 = vector.load %arg16[%c0_120, %c0_121] : memref<1x128xf32, #tpu.memory_space<vmem>>, vector<1x128xf32>
      %cst_122 = arith.constant dense<0.000000e+00> : vector<128xf32>
      %174 = vector.multi_reduction <add>, %171, %cst_122 [1] : vector<128x128xf32> to vector<128xf32>
      %175 = vector.shape_cast %174 : vector<128xf32> to vector<128x1xf32>
      %cst_123 = arith.constant 1.280000e+02 : f32
      %176 = vector.broadcast %cst_123 : f32 to vector<128x1xf32>
      %177 = arith.divf %175, %176 : vector<128x1xf32>
      %178 = vector.broadcast %177 : vector<128x1xf32> to vector<128x128xf32>
      %179 = arith.subf %171, %178 : vector<128x128xf32>
      %180 = arith.mulf %179, %179 : vector<128x128xf32>
      %cst_124 = arith.constant dense<0.000000e+00> : vector<128xf32>
      %181 = vector.multi_reduction <add>, %180, %cst_124 [1] : vector<128x128xf32> to vector<128xf32>
      %182 = vector.shape_cast %181 : vector<128xf32> to vector<128x1xf32>
      %cst_125 = arith.constant 1.280000e+02 : f32
      %183 = vector.broadcast %cst_125 : f32 to vector<128x1xf32>
      %184 = arith.divf %182, %183 : vector<128x1xf32>
      %185 = vector.broadcast %177 : vector<128x1xf32> to vector<128x128xf32>
      %186 = arith.subf %171, %185 : vector<128x128xf32>
      %cst_126 = arith.constant 9.99999974E-6 : f32
      %187 = vector.broadcast %cst_126 : f32 to vector<128x1xf32>
      %188 = arith.addf %184, %187 : vector<128x1xf32>
      %189 = math.rsqrt %188 : vector<128x1xf32>
      %190 = vector.broadcast %189 : vector<128x1xf32> to vector<128x128xf32>
      %191 = arith.mulf %186, %190 : vector<128x128xf32>
      %192 = vector.broadcast %172 : vector<1x128xf32> to vector<128x128xf32>
      %193 = arith.mulf %191, %192 : vector<128x128xf32>
      %194 = vector.broadcast %173 : vector<1x128xf32> to vector<128x128xf32>
      %195 = arith.addf %193, %194 : vector<128x128xf32>
      %c0_127 = arith.constant 0 : index
      %c0_128 = arith.constant 0 : index
      %196 = vector.load %arg17[%c0_127, %c0_128] : memref<128x128xf32, #tpu.memory_space<vmem>>, vector<128x128xf32>
      tpu.vector_store %arg17[%c0_127, %c0_128], %195 {strides = array<i32>} : memref<128x128xf32, #tpu.memory_space<vmem>>, vector<128x128xf32>,
    } else {
    }
    return
  }
  func.func @transform_0(%arg0: i32, %arg1: i32) -> (i32, i32) {
    %c0_i32 = arith.constant 0 : i32
    %c0_i32_0 = arith.constant 0 : i32
    return %arg0, %c0_i32 : i32, i32
  }
  func.func @transform_1(%arg0: i32, %arg1: i32) -> (i32, i32) {
    %c0_i32 = arith.constant 0 : i32
    %c0_i32_0 = arith.constant 0 : i32
    return %arg1, %c0_i32 : i32, i32
  }
  func.func @transform_2(%arg0: i32, %arg1: i32) -> (i32, i32) {
    %c0_i32 = arith.constant 0 : i32
    return %arg0, %arg1 : i32, i32
  }
  func.func @transform_3(%arg0: i32, %arg1: i32) -> (i32, i32) {
    %c0_i32 = arith.constant 0 : i32
    %c0_i32_0 = arith.constant 0 : i32
    %c0_i32_1 = arith.constant 0 : i32
    return %c0_i32, %c0_i32_0 : i32, i32
  }
  func.func @transform_4(%arg0: i32, %arg1: i32) -> (i32, i32) {
    %c0_i32 = arith.constant 0 : i32
    %c0_i32_0 = arith.constant 0 : i32
    %c0_i32_1 = arith.constant 0 : i32
    return %c0_i32, %c0_i32_0 : i32, i32
  }
  func.func @transform_5(%arg0: i32, %arg1: i32) -> (i32, i32) {
    %c0_i32 = arith.constant 0 : i32
    %c0_i32_0 = arith.constant 0 : i32
    %c0_i32_1 = arith.constant 0 : i32
    return %c0_i32, %c0_i32_0 : i32, i32
  }
  func.func @transform_6(%arg0: i32, %arg1: i32) -> (i32, i32) {
    %c0_i32 = arith.constant 0 : i32
    %c0_i32_0 = arith.constant 0 : i32
    %c0_i32_1 = arith.constant 0 : i32
    return %c0_i32, %c0_i32_0 : i32, i32
  }
  func.func @transform_7(%arg0: i32, %arg1: i32) -> (i32, i32) {
    %c0_i32 = arith.constant 0 : i32
    %c0_i32_0 = arith.constant 0 : i32
    %c0_i32_1 = arith.constant 0 : i32
    return %c0_i32, %c0_i32_0 : i32, i32
  }
  func.func @transform_8(%arg0: i32, %arg1: i32) -> (i32, i32) {
    %c0_i32 = arith.constant 0 : i32
    %c0_i32_0 = arith.constant 0 : i32
    %c0_i32_1 = arith.constant 0 : i32
    return %c0_i32, %c0_i32_0 : i32, i32
  }
  func.func @transform_9(%arg0: i32, %arg1: i32) -> (i32, i32) {
    %c0_i32 = arith.constant 0 : i32
    %c0_i32_0 = arith.constant 0 : i32
    %c0_i32_1 = arith.constant 0 : i32
    return %c0_i32, %c0_i32_0 : i32, i32
  }
  func.func @transform_10(%arg0: i32, %arg1: i32) -> (i32, i32) {
    %c0_i32 = arith.constant 0 : i32
    %c0_i32_0 = arith.constant 0 : i32
    %c0_i32_1 = arith.constant 0 : i32
    return %c0_i32, %c0_i32_0 : i32, i32
  }
  func.func @transform_11(%arg0: i32, %arg1: i32) -> (i32, i32) {
    %c0_i32 = arith.constant 0 : i32
    %c0_i32_0 = arith.constant 0 : i32
    %c0_i32_1 = arith.constant 0 : i32
    return %c0_i32, %c0_i32_0 : i32, i32
  }
  func.func @transform_12(%arg0: i32, %arg1: i32) -> (i32, i32) {
    %c0_i32 = arith.constant 0 : i32
    %c0_i32_0 = arith.constant 0 : i32
    %c0_i32_1 = arith.constant 0 : i32
    return %c0_i32, %c0_i32_0 : i32, i32
  }
  func.func @transform_13(%arg0: i32, %arg1: i32) -> (i32, i32) {
    %c0_i32 = arith.constant 0 : i32
    %c0_i32_0 = arith.constant 0 : i32
    %c0_i32_1 = arith.constant 0 : i32
    return %c0_i32, %c0_i32_0 : i32, i32
  }
  func.func @transform_14(%arg0: i32, %arg1: i32) -> (i32, i32) {
    %c0_i32 = arith.constant 0 : i32
    %c0_i32_0 = arith.constant 0 : i32
    %c0_i32_1 = arith.constant 0 : i32
    return %c0_i32, %c0_i32_0 : i32, i32
  }
  func.func @transform_15(%arg0: i32, %arg1: i32) -> (i32, i32) {
    %c0_i32 = arith.constant 0 : i32
    %c0_i32_0 = arith.constant 0 : i32
    return %arg0, %c0_i32 : i32, i32
  }
}

</mosaic_0001>

<bundles_post_ra>
// kernel: tpu_custom_call.1
= control target key start
LH: loop header
LB: loop body
LE: loop exit
PB: predicated region body
PF: predicated region fallthrough
CT: control target
= control target key end

     0   :  { %s9700_s0 = inlined_call_operand.hbm [shape: f32[256,128], index: 0, kind: input, shape index: {}]   ;;  %s9701_s1 = inlined_call_operand.hbm [shape: f32[256,128], index: 1, kind: input, shape index: {}]   ;;  %s9702_s2 = inlined_call_operand.hbm [shape: bf16[256,256], index: 2, kind: input, shape index: {}]   ;;  %s9703_s3 = inlined_call_operand.hbm [shape: bf16[128,128], index: 3, kind: input, shape index: {}]   ;;  %s9704_s4 = inlined_call_operand.hbm [shape: bf16[128,256], index: 4, kind: input, shape index: {}]   ;;  %s9705_s5 = inlined_call_operand.hbm [shape: bf16[128,128], index: 5, kind: input, shape index: {}]   ;;  %s9706_s6 = inlined_call_operand.vmem [shape: f32[1,128], index: 6, kind: input, shape index: {}]   ;;  %s9707_s7 = inlined_call_operand.vmem [shape: f32[1,128], index: 7, kind: input, shape index: {}]   ;;  %s9708_s8 = inlined_call_operand.vmem [shape: f32[1,128], index: 8, kind: input, shape index: {}]   ;;  %s9709_s9 = inlined_call_operand.hbm [shape: bf16[128,256], index: 9, kind: input, shape index: {}]   ;;  %s9710_s10 = inlined_call_operand.vmem [shape: f32[1,256], index: 10, kind: input, shape index: {}]   ;;  %s9711_s11 = inlined_call_operand.hbm [shape: bf16[256,128], index: 11, kind: input, shape index: {}]   ;;  %s9712_s12 = inlined_call_operand.vmem [shape: f32[1,128], index: 12, kind: input, shape index: {}]   ;;  %s9713_s13 = inlined_call_operand.vmem [shape: f32[1,128], index: 13, kind: input, shape index: {}]   ;;  %s9714_s14 = inlined_call_operand.vmem [shape: f32[1,128], index: 14, kind: input, shape index: {}]   ;;  %s9715_s15 = inlined_call_operand.hbm [shape: f32[256,128], index: 15, kind: output, shape index: {}]  }
   0x1   :  { %9745 = sst [smem:[#allocation44_spill]] %s9700_s0 }
   0x2   :  { %9746 = sst [smem:[#allocation45_spill]] %s9701_s1 }
   0x3   :  { %9747 = sst [smem:[#allocation46_spill]] %s9702_s2 }
   0x4   :  { %9748 = sst [smem:[#allocation47_spill]] %s9703_s3 }
   0x5   :  { %9749 = sst [smem:[#allocation48_spill]] %s9704_s4 }
   0x6   :  { %9750 = sst [smem:[#allocation49_spill]] %s9705_s5 }
   0x7   :  { %9751 = sst [smem:[#allocation50_spill]] %s9706_s6 }
   0x8   :  { %9752 = sst [smem:[#allocation51_spill]] %s9707_s7 }
   0x9   :  { %9753 = sst [smem:[#allocation52_spill]] %s9708_s8 }
   0xa   :  { %9754 = sst [smem:[#allocation53_spill]] %s9709_s9 }
   0xb   :  { %9755 = sst [smem:[#allocation54_spill]] %s9710_s10 }
   0xc   :  { %9756 = sst [smem:[#allocation55_spill]] %s9711_s11 }
   0xd   :  { %9757 = sst [smem:[#allocation56_spill]] %s9712_s12 }
   0xe   :  { %9758 = sst [smem:[#allocation57_spill]] %s9713_s13 }
   0xf   :  { %9759 = sst [smem:[#allocation58_spill]] %s9714_s14 }
  0x10   :  { %9760 = sst [smem:[#allocation59_spill]] %s9715_s15 }
  0x11   :  { %20 = vsyncpa [#allocation6], 0 }
  0x12   :  { %22 = vsyncpa [#allocation6 + $0x1], 0 }
  0x13   :  { %23 = vsyncpa [#allocation9], 0 }
  0x14   :  { %25 = vsyncpa [#allocation9 + $0x1], 0 }
  0x15   :  { %26 = vsyncpa [#allocation12], 0 }
  0x16   :  { %27 = vsyncpa [#allocation15], 0 }
  0x17   :  { %28 = vsyncpa [#allocation18], 0 }
  0x18   :  { %29 = vsyncpa [#allocation7], 0 }
  0x19   :  { %31 = vsyncpa [#allocation7 + $0x1], 0  ;;  %s7567_s18 = smov 0   ;;  %s7569_s19 = smov 0  }
  0x1a   :  { %s7571_s20 = smov 0   ;;  %s7573_s21 = smov 0  }
  0x1b   :  { %s7575_s22 = smov 0   ;;  %s7577_s23 = smov 0  }
  0x1c   :  { %s7579_s24 = smov 0   ;;  %s7581_s25 = smov 0  }
  0x1d   :  { %s7583_s26 = smov 0   ;;  %s7585_s27 = smov 0  }
  0x1e   :  { %s7587_s28 = smov 0   ;;  %s7589_s29 = smov 0  }
  0x1f   :  { %s7591_s30 = smov 0   ;;  %s7593_s16 = smov 0  }
  0x20 LB: > { %9761 = sst [smem:[#allocation27_spill]] %s7409_s18  ;;  %s7638_s17 = sadd.s32 4294967295, %s7461_s16   ;;  %s7461_s16 = sphi %s7593_s16, %s37_s16   ;;  %s7457_s30 = sphi %s7591_s30, %s9864_s30   ;;  %s7453_s29 = sphi %s7589_s29, %s9863_s29   ;;  %s7449_s28 = sphi %s7587_s28, %s9862_s28   ;;  %s7445_s27 = sphi %s7585_s27, %s9861_s27   ;;  %s7441_s26 = sphi %s7583_s26, %s9860_s26   ;;  %s7437_s25 = sphi %s7581_s25, %s9859_s25   ;;  %s7433_s24 = sphi %s7579_s24, %s9858_s24   ;;  %s7429_s23 = sphi %s7577_s23, %s9851_s23   ;;  %s7425_s22 = sphi %s7575_s22, %s9857_s22   ;;  %s7421_s21 = sphi %s7573_s21, %s9856_s21   ;;  %s7417_s20 = sphi %s7571_s20, %s9855_s20   ;;  %s7413_s19 = sphi %s7569_s19, %s9849_s19   ;;  %s7409_s18 = sphi %s7567_s18, %s9848_s18  }
  0x21   : > { %9762 = sst [smem:[#allocation28_spill]] %s7413_s19  ;;  %p5586_p0 = scmp.ge.s32.totalorder %s7461_s16, 1 }
  0x22   : > { %9763 = sst [smem:[#allocation29_spill]] %s7417_s20  ;;  %p9719_p1 = scmp.eq.s32.totalorder %s7638_s17, 0 }
  0x23   : > { %9764 = sst [smem:[#allocation30_spill]] %s7429_s23  ;;  %p412_p2 = scmp.lt.s32.totalorder %s7461_s16, 5 }
  0x24   : > { %9765 = sst [smem:[#allocation31_spill]] %s7445_s27  ;;  %s7464_s12 = smov [#allocation14]  }
  0x25   : > { %9766 = sst [smem:[#allocation32_spill]] %s7449_s28  ;;  %p7643_p3 = pnand %p5586_p0, %p412_p2 }
  0x26   : > { %s7463_s28 = smov [#allocation11]   ;;  %s450_s10 = sshll.u32 %s7464_s12, 4  ;;  %s7655_s10 = int_to_ptr.vmem [resolvable:$true] %s450_s10 }
  0x27   : > { %s9767_s15 = scalar_select %p7643_p3, 1, 0 }
  0x28   : > { %s424_s14 = sshll.u32 %s7463_s28, 4  ;;  %p6465_p4 = pneg %p7643_p3  ;;  %s425_s14 = int_to_ptr.vmem [resolvable:$true] %s424_s14 }
  0x29   : > { %9768 = sst [smem:[#allocation33_spill]] %s9767_s15  ;;  %s9770_s3 = sld [smem:[#allocation47_spill]] }
  0x2a   : > { %p7651_p5 = pnand %p6465_p4, %p9719_p1 }
  0x2c   : > { %s9769_s13 = scalar_select %p7651_p5, 1, 0 }
  0x2d   : > { %p7665_p7 = pneg %p7651_p5 }
  0x2f   : > { %s7065_s6 = scalar_lea.hbm %s9770_s3, 1024 }
  0x30   : > { %p7066_p6 = scmp.ne.s32.totalorder %s9770_s3, %s7065_s6  ;;  %p7072_p10 = scmp.lt.u32.totalorder %s7065_s6, %s9770_s3 }
  0x32   : > { %p7068_p8 = pnand %p7665_p7, %p7066_p6 }
  0x34   : > { %p7069_p9 = pneg %p7068_p8 }
  0x36   : > { %p7074_p11 = pnand %p7072_p10, %p7069_p9 }
  0x38   : > { %7077 = shalt.err (!%p7074_p11)
}
  0x39   : > { %s7078_s7 = scalar_lea.vmem %s425_s14, 1024  ;;  %p7086_p2 = scmp.lt.s32.totalorder %s425_s14, %s425_s14 }
  0x3a   : > { %p7079_p12 = scmp.ne.s32.totalorder %s425_s14, %s7078_s7  ;;  %p7087_p4 = scmp.lt.s32.totalorder %s7078_s7, %s7078_s7 }
  0x3c   : > { %p7081_p13 = pnand %p7079_p12, %p7665_p7  ;;  %p7088_p1 = por %p7087_p4, %p7086_p2 }
  0x3e   : > { %p7082_p0 = pneg %p7081_p13 }
  0x40   : > { %p7089_p3 = pnand %p7088_p1, %p7082_p0 }
  0x42   : > { %7092 = shalt.err (!%p7089_p3)
}
  0x43   : > { %s9724_s2 = smov 64   ;;  %s9726_s8 = smov 4  }
  0x44   : > { %6468 = dma.hbm_to_vmem [thread:$0]  (!%p7651_p5), %s9770_s3, 1024, %s425_s14, [#allocation12], %s9724_s2, %s9724_s2, %s9726_s8  }
  0x45   : > { %s9772_s5 = sld [smem:[#allocation49_spill]] }
  0x4b   : > { %s7093_s18 = scalar_lea.hbm %s9772_s5, 1024 }
  0x4c   : > { %p7094_p1 = scmp.ne.s32.totalorder %s9772_s5, %s7093_s18  ;;  %p7100_p8 = scmp.lt.u32.totalorder %s7093_s18, %s9772_s5 }
  0x4e   : > { %p7096_p3 = pnand %p7094_p1, %p7665_p7 }
  0x50   : > { %p7097_p6 = pneg %p7096_p3 }
  0x52   : > { %p7102_p9 = pnand %p7100_p8, %p7097_p6 }
  0x54   : > { %7105 = shalt.err (!%p7102_p9)
}
  0x55   : > { %s7106_s14 = scalar_lea.vmem %s7655_s10, 1024  ;;  %p7114_p13 = scmp.lt.s32.totalorder %s7655_s10, %s7655_s10 }
  0x56   : > { %p7107_p10 = scmp.ne.s32.totalorder %s7655_s10, %s7106_s14  ;;  %p7115_p0 = scmp.lt.s32.totalorder %s7106_s14, %s7106_s14 }
  0x58   : > { %p7109_p11 = pnand %p7107_p10, %p7665_p7  ;;  %p7116_p2 = por %p7115_p0, %p7114_p13 }
  0x5a   : > { %p7110_p12 = pneg %p7109_p11 }
  0x5c   : > { %p7117_p4 = pnand %p7116_p2, %p7110_p12 }
  0x5e   : > { %7120 = shalt.err (!%p7117_p4)
}
  0x5f   : > { %6474 = dma.hbm_to_vmem [thread:$0]  (!%p7651_p5), %s9772_s5, 1024, %s7655_s10, [#allocation15], %s9724_s2, %s9724_s2, %s9726_s8  }
  0x60   : > { %s46_s19 = sadd.s32 1, %s7453_s29  ;;  %p9730_p1 = scmp.eq.s32.totalorder %s7461_s16, 0 }
  0x61   : > { %p7712_p3 = scmp.ge.s32.totalorder %s46_s19, 2  ;;  %s82_s6 = sadd.s32 1, %s7429_s23 }
  0x62   : > { %p89_p6 = scmp.ne.s32.totalorder %s7429_s23, %s7425_s22  ;;  %p95_p8 = scmp.ne.s32.totalorder %s7425_s22, %s7421_s21 }
  0x63   : > { %s9773_s20 = scalar_select %p7712_p3, 1, 0 }
  0x64   : > { %s9866_s19 = smov (%p7712_p3, %s46_s19), 0  ;;  %p7727_p9 = por %p89_p6, %p9730_p1 }
  0x65   : > { %9774 = sst [smem:[#allocation34_spill]] %s9866_s19  ;;  %p9776_p10 = scmp.eq.s32.totalorder %s7638_s17, 0 }
  0x66   : > { %s7739_s27 = ssub.s32 %s7453_s29, %s9866_s19  ;;  %p9729_p13 = scmp.lt.s32.totalorder %s7461_s16, 4 }
  0x67   : > { %p7733_p11 = por %p95_p8, %p9776_p10  ;;  %p80_p12 = scmp.eq.s32.totalorder %s7739_s27, 0 }
  0x68   : > { %s532_s21 = sand.u32 1, %s7461_s16   ;;  %s534_s7 = sand.u32 1, %s7429_s23  }
  0x69   : > { %s9777_s10 = scalar_select %p7733_p11, 1, 0 }
  0x6a   : > { %s7745_s12 = scalar_select %p80_p12, %s7429_s23, %s82_s6  }
  0x6b   : > { %9778 = sst [smem:[#allocation35_spill]] %s9777_s10  ;;  %s5596_s14 = sshll.u32 %s534_s7, 7 }
  0x6c   : > { %9779 = sst [smem:[#allocation36_spill]] %s7745_s12  ;;  %s5787_s0 = sshll.u32 %s7453_s29, 11 }
  0x6d   : > { %s9780_s1 = sld [smem:[#allocation45_spill]]  ;;  %s536_s3 = scalar_lea.vmem [#allocation8], %s5596_s14 }
  0x6e   : > { %s543_s5 = sshll.u32 %s536_s3, 4  ;;  %p7758_p0 = pnand %p9729_p13, %p7727_p9  ;;  %s7762_s5 = int_to_ptr.vmem [resolvable:$true] %s543_s5 }
  0x6f   : > { %s7467_s6 = smov [#allocation13]   ;;  %s7766_s7 = scalar_lea.sflag [#allocation9], %s532_s21 }
  0x70   : > { %s7764_s2 = sshll.u32 %s7467_s6, 4  ;;  %p7123_p4 = pneg %p7758_p0  ;;  %s438_s2 = int_to_ptr.vmem [resolvable:$true] %s7764_s2 }
  0x73   : > { %s7752_s8 = scalar_lea.hbm %s9780_s1, %s5787_s0  ;;  %s7126_s14 = scalar_lea.hbm %s9780_s1, 4096 }
  0x74   : > { %s7121_s0 = scalar_lea.hbm %s7752_s8, 2048  ;;  %p7127_p9 = scmp.lt.u32.totalorder %s7752_s8, %s9780_s1 }
  0x75   : > { %p7122_p2 = scmp.ne.s32.totalorder %s7752_s8, %s7121_s0  ;;  %p7128_p10 = scmp.lt.u32.totalorder %s7126_s14, %s7121_s0 }
  0x76   : > { %p7130_p13 = scmp.lt.u32.totalorder %s7121_s0, %s7752_s8 }
  0x77   : > { %p7124_p6 = pnand %p7123_p4, %p7122_p2  ;;  %p7129_p12 = por %p7128_p10, %p7127_p9 }
  0x79   : > { %p7125_p8 = pneg %p7124_p6  ;;  %p7131_p1 = por %p7130_p13, %p7129_p12 }
  0x7b   : > { %p7132_p11 = pnand %p7131_p1, %p7125_p8 }
  0x7d   : > { %7135 = shalt.err (!%p7132_p11)
}
  0x7e   : > { %s7136_s21 = scalar_lea.vmem %s7762_s5, 2048  ;;  %s7468_s6 = smov [#allocation8]  }
  0x7f   : > { %p7137_p2 = scmp.ne.s32.totalorder %s7762_s5, %s7136_s21  ;;  %s7141_s3 = sshll.u32 %s7468_s6, 4  ;;  %s7142_s3 = int_to_ptr.vmem [resolvable:$false] %s7141_s3 }
  0x80   : > { %s7143_s12 = scalar_lea.vmem %s7142_s3, 4096  ;;  %p7144_p5 = scmp.lt.s32.totalorder %s7762_s5, %s7142_s3 }
  0x81   : > { %p7139_p6 = pnand %p7137_p2, %p7123_p4  ;;  %p7145_p9 = scmp.lt.s32.totalorder %s7143_s12, %s7136_s21 }
  0x83   : > { %p7140_p3 = pneg %p7139_p6  ;;  %p7146_p10 = por %p7145_p9, %p7144_p5 }
  0x85   : > { %p7147_p13 = pnand %p7146_p10, %p7140_p3 }
  0x87   : > { %7150 = shalt.err (!%p7147_p13)
}
  0x88   : > { %s9738_s0 = smov 128   ;;  %s9740_s15 = smov 8  }
  0x89   : > { %6487 = dma.hbm_to_vmem [thread:$0]  (!%p7758_p0), %s7752_s8, 2048, %s7762_s5, %s7766_s7, %s9738_s0, %s9738_s0, %s9740_s15  }
  0x8a   : > { %s9782_s4 = sld [smem:[#allocation48_spill]] }
  0x90   : > { %s7151_s21 = scalar_lea.hbm %s9782_s4, 2048 }
  0x91   : > { %p7152_p5 = scmp.ne.s32.totalorder %s9782_s4, %s7151_s21  ;;  %p7158_p11 = scmp.lt.u32.totalorder %s7151_s21, %s9782_s4 }
  0x93   : > { %p7154_p1 = pnand %p7152_p5, %p7665_p7 }
  0x95   : > { %p7155_p3 = pneg %p7154_p1 }
  0x97   : > { %p7160_p4 = pnand %p7158_p11, %p7155_p3 }
  0x99   : > { %7163 = shalt.err (!%p7160_p4)
}
  0x9a   : > { %s7164_s19 = scalar_lea.vmem %s438_s2, 2048  ;;  %p7172_p2 = scmp.lt.s32.totalorder %s438_s2, %s438_s2 }
  0x9b   : > { %p7165_p0 = scmp.ne.s32.totalorder %s438_s2, %s7164_s19  ;;  %p7173_p6 = scmp.lt.s32.totalorder %s7164_s19, %s7164_s19 }
  0x9d   : > { %p7167_p8 = pnand %p7165_p0, %p7665_p7  ;;  %p7174_p9 = por %p7173_p6, %p7172_p2 }
  0x9f   : > { %p7168_p12 = pneg %p7167_p8 }
  0xa1   : > { %p7175_p10 = pnand %p7174_p9, %p7168_p12 }
  0xa3   : > { %7178 = shalt.err (!%p7175_p10)
}
  0xa4   : > { %p9783_p13 = scmp.ne.s32.totalorder %s9769_s13, 0  ;;  %s7471_s8 = smov [#allocation16]  }
  0xa5   : > { %s472_s14 = sshll.u32 %s7471_s8, 4  ;;  %s7472_s18 = smov [#allocation17]   ;;  %s473_s14 = int_to_ptr.vmem [resolvable:$true] %s472_s14 }
  0xa6   : > { %6471 = dma.hbm_to_vmem [thread:$0]  (!%p9783_p13), %s9782_s4, 2048, %s438_s2, [#allocation12], %s9738_s0, %s9738_s0, %s9740_s15  }
  0xa7   : > { %s488_s21 = sshll.u32 %s7472_s18, 4  ;;  %s9784_s9 = sld [smem:[#allocation53_spill]]  ;;  %s489_s21 = int_to_ptr.vmem [resolvable:$true] %s488_s21 }
  0xad   : > { %s7179_s12 = scalar_lea.hbm %s9784_s9, 2048 }
  0xae   : > { %p7180_p5 = scmp.ne.s32.totalorder %s9784_s9, %s7179_s12  ;;  %p7186_p11 = scmp.lt.u32.totalorder %s7179_s12, %s9784_s9 }
  0xb0   : > { %p7182_p1 = pnand %p7180_p5, %p7665_p7 }
  0xb2   : > { %p7183_p3 = pneg %p7182_p1 }
  0xb4   : > { %p7188_p4 = pnand %p7186_p11, %p7183_p3 }
  0xb6   : > { %7191 = shalt.err (!%p7188_p4)
}
  0xb7   : > { %s7192_s2 = scalar_lea.vmem %s473_s14, 2048  ;;  %p7200_p2 = scmp.lt.s32.totalorder %s473_s14, %s473_s14 }
  0xb8   : > { %p7193_p0 = scmp.ne.s32.totalorder %s473_s14, %s7192_s2  ;;  %p7201_p6 = scmp.lt.s32.totalorder %s7192_s2, %s7192_s2 }
  0xba   : > { %p7195_p8 = pnand %p7193_p0, %p7665_p7  ;;  %p7202_p9 = por %p7201_p6, %p7200_p2 }
  0xbc   : > { %p7196_p12 = pneg %p7195_p8 }
  0xbe   : > { %p7203_p10 = pnand %p7202_p9, %p7196_p12 }
  0xc0   : > { %7206 = shalt.err (!%p7203_p10)
}
  0xc1   : > { %6477 = dma.hbm_to_vmem [thread:$0]  (!%p9783_p13), %s9784_s9, 2048, %s473_s14, [#allocation15], %s9738_s0, %s9738_s0, %s9740_s15  }
  0xc2   : > { %s9785_s11 = sld [smem:[#allocation55_spill]] }
  0xc8   : > { %s7207_s18 = scalar_lea.hbm %s9785_s11, 2048 }
  0xc9   : > { %p7208_p5 = scmp.ne.s32.totalorder %s9785_s11, %s7207_s18  ;;  %p7214_p11 = scmp.lt.u32.totalorder %s7207_s18, %s9785_s11 }
  0xcb   : > { %p7210_p1 = pnand %p7208_p5, %p7665_p7 }
  0xcd   : > { %p7211_p3 = pneg %p7210_p1 }
  0xcf   : > { %p7216_p4 = pnand %p7214_p11, %p7211_p3 }
  0xd1   : > { %7219 = shalt.err (!%p7216_p4)
}
  0xd2   : > { %s7220_s1 = scalar_lea.vmem %s489_s21, 2048  ;;  %p7228_p2 = scmp.lt.s32.totalorder %s489_s21, %s489_s21 }
  0xd3   : > { %p7221_p0 = scmp.ne.s32.totalorder %s489_s21, %s7220_s1  ;;  %p7229_p6 = scmp.lt.s32.totalorder %s7220_s1, %s7220_s1 }
  0xd5   : > { %p7223_p8 = pnand %p7221_p0, %p7665_p7  ;;  %p7230_p9 = por %p7229_p6, %p7228_p2 }
  0xd7   : > { %p7224_p12 = pneg %p7223_p8 }
  0xd9   : > { %p7231_p10 = pnand %p7230_p9, %p7224_p12 }
  0xdb   : > { %7234 = shalt.err (!%p7231_p10)
}
  0xdc   : > { %s9786_s14 = smov 4   ;;  %s9787_s2 = smov 64  }
  0xdd   : > { %6480 = dma.hbm_to_vmem [thread:$0]  (!%p9783_p13), %s9785_s11, 2048, %s489_s21, [#allocation18], %s9787_s2, %s9787_s2, %s9786_s14  }
  0xde   : > { %s5585_s13 = sadd.s32 4294967294, %s7461_s16   ;;  %s49_s28 = sadd.s32 1, %s7457_s30 }
  0xdf   : > { %s56_s5 = sadd.s32 1, %s7441_s26  ;;  %p9788_p7 = scmp.ne.s32.totalorder %s9773_s20, 0 }
  0xe0   : > { %p63_p5 = scmp.ne.s32.totalorder %s7441_s26, %s7437_s25  ;;  %p69_p1 = scmp.ne.s32.totalorder %s7437_s25, %s7433_s24 }
  0xe1   : > { %s9868_s28 = smov (!%p9788_p7, %s49_s28), %s7457_s30  ;;  %p399_p11 = scmp.eq.s32.totalorder %s7638_s17, 3 }
  0xe2   : > { %p51_p3 = scmp.ge.s32.totalorder %s9868_s28, 2  ;;  %p9789_p4 = scmp.eq.s32.totalorder %s7461_s16, 0 }
  0xe3   : > { %p9791_p13 = scmp.eq.s32.totalorder %s7638_s17, 0  ;;  %p7889_p12 = por %p399_p11, %p63_p5 }
  0xe4   : > { %p7874_p0 = por %p9789_p4, %p63_p5  ;;  %s9870_s28 = smov (%p51_p3, %s9868_s28), 0 }
  0xe5   : > { %p7883_p8 = por %p9791_p13, %p69_p1  ;;  %9793 = sst [smem:[#allocation37_spill]] %s9870_s28 }
  0xe6   : > { %s9794_s20 = scalar_select %p7889_p12, 1, 0 }
  0xe7   : > { %s9792_s21 = scalar_select %p7883_p8, 1, 0 }
  0xe8   : > { %p405_p2 = scmp.eq.s32.totalorder %s5585_s13, 3  ;;  %s53_s18 = ssub.s32 %s7457_s30, %s9870_s28 }
  0xe9   : > { %s511_s6 = sand.u32 1, %s7441_s26   ;;  %p54_p6 = scmp.eq.s32.totalorder %s53_s18, 0 }
  0xea   : > { %s107_s3 = sor.u32 %s7739_s27, %s53_s18  ;;  %p7904_p10 = por %p405_p2, %p69_p1 }
  0xeb   : > { %p7897_p9 = scmp.eq.s32.totalorder %s107_s3, 0  ;;  %s5593_s23 = sshll.u32 %s511_s6, 7 }
  0xec   : > { %s9796_s19 = scalar_select %p7904_p10, 1, 0 }
  0xed   : > { %s7909_s1 = scalar_select %p54_p6, %s7441_s26, %s56_s5  }
  0xee   : > { %s5786_s10 = sshll.u32 %s7457_s30, 11  ;;  %s9798_s13 = sld [smem:[#allocation44_spill]] }
  0xef   : > { %9797 = sst [smem:[#allocation38_spill]] %s7909_s1  ;;  %s515_s27 = scalar_lea.vmem [#allocation5], %s5593_s23 }
  0xf0   : > { %s522_s18 = sshll.u32 %s515_s27, 4  ;;  %p9799_p7 = scmp.lt.s32.totalorder %s7461_s16, 4  ;;  %s7917_s18 = int_to_ptr.vmem [resolvable:$true] %s522_s18 }
  0xf1   : > { %s7927_s3 = scalar_lea.sflag [#allocation6], %s511_s6 }
  0xf2   : > { %p7923_p5 = pnand %p9799_p7, %p7874_p0 }
  0xf4   : > { %s7915_s4 = scalar_lea.hbm %s9798_s13, %s5786_s10  ;;  %p7237_p3 = pneg %p7923_p5 }
  0xf5   : > { %s7235_s0 = scalar_lea.hbm %s7915_s4, 2048  ;;  %s7240_s8 = scalar_lea.hbm %s9798_s13, 4096 }
  0xf6   : > { %p7236_p1 = scmp.ne.s32.totalorder %s7915_s4, %s7235_s0  ;;  %p7241_p0 = scmp.lt.u32.totalorder %s7915_s4, %s9798_s13 }
  0xf7   : > { %p7242_p13 = scmp.lt.u32.totalorder %s7240_s8, %s7235_s0  ;;  %p7244_p6 = scmp.lt.u32.totalorder %s7235_s0, %s7915_s4 }
  0xf8   : > { %p7238_p11 = pnand %p7237_p3, %p7236_p1 }
  0xf9   : > { %p7243_p2 = por %p7242_p13, %p7241_p0 }
  0xfa   : > { %p7239_p4 = pneg %p7238_p11 }
  0xfb   : > { %p7245_p7 = por %p7244_p6, %p7243_p2 }
  0xfd   : > { %p7246_p10 = pnand %p7245_p7, %p7239_p4 }
  0xff   : > { %7249 = shalt.err (!%p7246_p10)
}
 0x100   : > { %s7250_s6 = scalar_lea.vmem %s7917_s18, 2048  ;;  %s7473_s15 = smov [#allocation5]  }
 0x101   : > { %p7251_p1 = scmp.ne.s32.totalorder %s7917_s18, %s7250_s6  ;;  %s7255_s23 = sshll.u32 %s7473_s15, 4  ;;  %s7256_s23 = int_to_ptr.vmem [resolvable:$false] %s7255_s23 }
 0x102   : > { %s7257_s10 = scalar_lea.vmem %s7256_s23, 4096  ;;  %p7258_p8 = scmp.lt.s32.totalorder %s7917_s18, %s7256_s23 }
 0x103   : > { %p7253_p11 = pnand %p7251_p1, %p7237_p3  ;;  %p7259_p0 = scmp.lt.s32.totalorder %s7257_s10, %s7250_s6 }
 0x105   : > { %p7254_p12 = pneg %p7253_p11  ;;  %p7260_p13 = por %p7259_p0, %p7258_p8 }
 0x107   : > { %p7261_p2 = pnand %p7260_p13, %p7254_p12 }
 0x109   : > { %7264 = shalt.err (!%p7261_p2)
}
 0x10a   : > { %s9801_s0 = smov 8   ;;  %s9802_s8 = smov 128  }
 0x10b   : > { %s9803_s27 = sld [smem:[#allocation29_spill]]  ;;  %s9804_s9 = sld [smem:[#allocation28_spill]] }
 0x10c   : > { %s9805_s15 = sld [smem:[#allocation27_spill]]  ;;  %s5788_s10 = sshll.u32 %s7457_s30, 5 }
 0x10d   : > { %6484 = dma.hbm_to_vmem [thread:$0]  (!%p7923_p5), %s7915_s4, 2048, %s7917_s18, %s7927_s3, %s9802_s8, %s9802_s8, %s9801_s0  }
 0x10e   : > { %p9806_p10 = scmp.eq.s32.totalorder %s7461_s16, 0  ;;  %p9807_p4 = scmp.eq.s32.totalorder %s7638_s17, 0 }
 0x10f   : > { %s563_s28 = sadd.s32 %s7453_s29, %s5788_s10  ;;  %s9809_s3 = sld [smem:[#allocation46_spill]] }
 0x110   : > { %s5602_s1 = sshll.u32 %s563_s28, 6 }
 0x111   : > { %s110_s5 = sadd.s32 1, %s9803_s27  ;;  %p117_p8 = scmp.ne.s32.totalorder %s9803_s27, %s9804_s9 }
 0x112   : > { %s7962_s6 = scalar_select %p7897_p9, %s9803_s27, %s110_s5  }
 0x113   : > { %p123_p12 = scmp.ne.s32.totalorder %s9804_s9, %s9805_s15  ;;  %s555_s23 = sand.u32 1, %s9803_s27  }
 0x114   : > { %p119_p3 = por %p117_p8, %p9806_p10  ;;  %s5599_s13 = sshll.u32 %s555_s23, 6 }
 0x115   : > { %p7974_p6 = por %p123_p12, %p9807_p4  ;;  %s7982_s12 = scalar_lea.hbm %s9809_s3, %s5602_s1 }
 0x116   : > { %s557_s9 = scalar_lea.vmem [#allocation10], %s5599_s13  ;;  %p9810_p9 = scmp.lt.s32.totalorder %s7461_s16, 4 }
 0x117   : > { %s566_s0 = sshll.u32 %s557_s9, 4  ;;  %s7265_s28 = scalar_lea.hbm %s7982_s12, 1024  ;;  %s7984_s0 = int_to_ptr.vmem [resolvable:$true] %s566_s0 }
 0x118   : > { %p7988_p5 = pnand %p9810_p9, %p119_p3  ;;  %p7266_p7 = scmp.ne.s32.totalorder %s7982_s12, %s7265_s28 }
 0x119   : > { %s7270_s15 = scalar_lea.hbm %s9809_s3, 4096  ;;  %p7271_p13 = scmp.lt.u32.totalorder %s7982_s12, %s9809_s3 }
 0x11a   : > { %p7267_p1 = pneg %p7988_p5  ;;  %p7272_p2 = scmp.lt.u32.totalorder %s7270_s15, %s7265_s28 }
 0x11b   : > { %p7274_p12 = scmp.lt.u32.totalorder %s7265_s28, %s7982_s12 }
 0x11c   : > { %p7268_p11 = pnand %p7267_p1, %p7266_p7  ;;  %p7273_p8 = por %p7272_p2, %p7271_p13 }
 0x11e   : > { %p7269_p0 = pneg %p7268_p11  ;;  %p7275_p10 = por %p7274_p12, %p7273_p8 }
 0x120   : > { %p7276_p3 = pnand %p7275_p10, %p7269_p0 }
 0x122   : > { %7279 = shalt.err (!%p7276_p3)
}
 0x123   : > { %s7280_s10 = scalar_lea.vmem %s7984_s0, 1024  ;;  %s7474_s4 = smov [#allocation10]  }
 0x124   : > { %p7281_p4 = scmp.ne.s32.totalorder %s7984_s0, %s7280_s10  ;;  %s7285_s18 = sshll.u32 %s7474_s4, 4  ;;  %s7286_s18 = int_to_ptr.vmem [resolvable:$false] %s7285_s18 }
 0x125   : > { %s7287_s9 = scalar_lea.vmem %s7286_s18, 2048  ;;  %p7288_p11 = scmp.lt.s32.totalorder %s7984_s0, %s7286_s18 }
 0x126   : > { %p7283_p9 = pnand %p7281_p4, %p7267_p1  ;;  %p7289_p13 = scmp.lt.s32.totalorder %s7287_s9, %s7280_s10 }
 0x128   : > { %p7284_p7 = pneg %p7283_p9  ;;  %p7290_p2 = por %p7289_p13, %p7288_p11 }
 0x12a   : > { %p7291_p8 = pnand %p7290_p2, %p7284_p7 }
 0x12c   : > { %7294 = shalt.err (!%p7291_p8)
}
 0x12d   : > { %6490 = dma.hbm_to_vmem [thread:$0]  (!%p7988_p5), %s7982_s12, 1024, %s7984_s0, %s7766_s7, %s9802_s8, %s9787_s2, %s9786_s14  }
 0x12e   : > { %s9812_s28 = sld [smem:[#allocation33_spill]] }
 0x134   : > { %p9813_p1 = scmp.ne.s32.totalorder %s9812_s28, 0 }
 0x136   : > { %578 = sbr.rel (%p9813_p1) target bundleno = 3826 (0xef2), region = 80 }
 0x13d   : > { %s8024_s1 = sand.u32 1, %s7437_s25   ;;  %p9814_p0 = scmp.ne.s32.totalorder %s9792_s21, 0 }
 0x13e   : > { %s5604_s13 = sshll.u32 %s8024_s1, 7  ;;  %s581_s15 = scalar_lea.sflag [#allocation6], %s8024_s1 }
 0x13f   : > { %s8028_s5 = scalar_lea.vmem [#allocation5], %s5604_s13 }
 0x140   : > { %7380 = dma.done.wait (%p9814_p0), %s581_s15, 2048  }
 0x141   : > { %7382 = vsyncadd (%p9814_p0), %s581_s15, 4294965248  ;;  %s9815_s7 = sld [smem:[#allocation35_spill]]  ;;  %s589_s14 = sand.u32 1, %s7638_s17  }
 0x142   : > { %s591_s2 = sand.u32 1, %s7425_s22   ;;  %s590_s12 = scalar_lea.sflag [#allocation9], %s589_s14 }
 0x143   : > { %s5605_s8 = sshll.u32 %s591_s2, 7 }
 0x144   : > { %s8036_s0 = scalar_lea.vmem [#allocation8], %s5605_s8 }
 0x147   : > { %p9816_p5 = scmp.ne.s32.totalorder %s9815_s7, 0 }
 0x149   : > { %7384 = dma.done.wait (%p9816_p5), %s590_s12, 2048  }
 0x14a   : > { %7386 = vsyncadd (%p9816_p5), %s590_s12, 4294965248  ;;  %s9817_s27 = sld [smem:[#allocation28_spill]] }
 0x150   : > { %s600_s23 = sand.u32 1, %s9817_s27  }
 0x151   : > { %s5606_s10 = sshll.u32 %s600_s23, 6 }
 0x152   : > { %s8043_s21 = scalar_lea.vmem [#allocation10], %s5606_s10 }
 0x153   : > { %7388 = dma.done.wait (%p7974_p6), %s590_s12, 1024  }
 0x154   : > { %7390 = vsyncadd (%p7974_p6), %s590_s12, 4294966272  ;;  %p9818_p12 = scmp.eq.s32.totalorder %s7638_s17, 0 }
 0x156   : > { %7392 = dma.done.wait (%p9818_p12), [#allocation12], 3072   ;;  %p9819_p10 = pmov %p9818_p12 }
 0x158   : > { %7394 = vsyncadd (%p9819_p10), [#allocation12], 4294964224  ;;  %p9820_p3 = pmov %p9819_p10 }
 0x15a   : > { %7396 = dma.done.wait (%p9820_p3), [#allocation15], 3072   ;;  %p9821_p4 = pmov %p9820_p3 }
 0x15b   : > { %p9822_p9 = pmov %p9820_p3 }
 0x15c   : > { %7398 = vsyncadd (%p9821_p4), [#allocation15], 4294964224 }
 0x15d   : > { %7400 = dma.done.wait (%p9822_p9), [#allocation18], 2048   ;;  %p9823_p7 = pmov %p9820_p3 }
 0x15e   : > { %s8061_s11 = scalar_lea.vmem [#allocation19], %s5604_s13  ;;  %s9824_s4 = sld [smem:[#allocation31_spill]] }
 0x15f   : > { %7402 = vsyncadd (%p9823_p7), [#allocation18], 4294965248 }
 0x164   : > { %p5613_p6 = scmp.ne.s32.totalorder %s9824_s4, 0 }
 0x165   : > { %v6639_v0 = vld [vmem:[#allocation11] sm:$0xff] (!%p5613_p6)   ;;  %v6640_v1 = vld [vmem:[#allocation11 + $0x8] sm:$0xff] (!%p5613_p6)   ;;  %v6641_v2 = vld [vmem:[#allocation11 + $0x10] sm:$0xff] (!%p5613_p6)   ;;  %vm905_vm0 = vcmask (!%p5613_p6), 31744   ;;  %v7475_v32 = vmov (!%p5613_p6), 0.0  }
 0x166   : > { %687 = sbr.rel (%p5613_p6) target bundleno = 616 (0x268), region = 116  ;;  %6053 = vmatprep.subr.bf16.mxu0 (!%p5613_p6), %v6639_v0  ;;  %6373 = vmatprep.subr.bf16.mxu1 (!%p5613_p6), %v6639_v0  ;;  %v6642_v3 = vld [vmem:[#allocation11 + $0x18] sm:$0xff] (!%p5613_p6)   ;;  %v688_v4 = vld [vmem:[%s8028_s5] sm:$0xff] (!%p5613_p6)  ;;  %v689_v5 = vld [vmem:[%s8028_s5 + $0x8] sm:$0xff] (!%p5613_p6)  ;;  %889 = vst [vmem:[#allocation3] sm:$0xff] (!%p5613_p6), %v7475_v32 }
 0x167   : > { %6054 = vmatpush3.bf16.msra.mxu0 (!%p5613_p6), %v6639_v0  ;;  %6381 = vmatpush3.bf16.msra.mxu1 (!%p5613_p6), %v6639_v0  ;;  %v696_v6 = vld [vmem:[%s8028_s5 + $0x40] sm:$0xff] (!%p5613_p6)  ;;  %v704_v7 = vpack.c.bf16 (!%p5613_p6), %v689_v5, %v688_v4  ;;  %v697_v8 = vld [vmem:[%s8028_s5 + $0x48] sm:$0xff] (!%p5613_p6)  ;;  %v6645_v12 = vld [vmem:[#allocation11 + $0x30] sm:$0xff] (!%p5613_p6)   ;;  %890 = vst [vmem:[#allocation3 + $0x8] sm:$0xff] (!%p5613_p6), %v7475_v32 }
 0x168   : > { %6055 = vmatprep.subr.bf16.mxu0 (!%p5613_p6), %v6640_v1  ;;  %6374 = vmatprep.subr.bf16.mxu1 (!%p5613_p6), %v6640_v1  ;;  %v708_v9 = vpack.c.bf16 (!%p5613_p6), %v697_v8, %v696_v6  ;;  %v6643_v10 = vld [vmem:[#allocation11 + $0x20] sm:$0xff] (!%p5613_p6)   ;;  %v6644_v11 = vld [vmem:[#allocation11 + $0x28] sm:$0xff] (!%p5613_p6)   ;;  %v6646_v13 = vld [vmem:[#allocation11 + $0x38] sm:$0xff] (!%p5613_p6)   ;;  %891 = vst [vmem:[#allocation3 + $0x10] sm:$0xff] (!%p5613_p6), %v7475_v32 }
 0x169   : > { %6069 = vmatprep.mubr.bf16.mxu0 (!%p5613_p6), %v704_v7  ;;  %v690_v14 = vld [vmem:[%s8028_s5 + $0x10] sm:$0xff] (!%p5613_p6)  ;;  %v691_v15 = vld [vmem:[%s8028_s5 + $0x18] sm:$0xff] (!%p5613_p6)  ;;  %v692_v18 = vld [vmem:[%s8028_s5 + $0x20] sm:$0xff] (!%p5613_p6)  ;;  %892 = vst [vmem:[#allocation3 + $0x18] sm:$0xff] (!%p5613_p6), %v7475_v32 }
 0x16a   : > { %6077 = vmatprep.mubr.bf16.mxu1 (!%p5613_p6), %v708_v9  ;;  %v698_v16 = vld [vmem:[%s8028_s5 + $0x50] sm:$0xff] (!%p5613_p6)  ;;  %v699_v17 = vld [vmem:[%s8028_s5 + $0x58] sm:$0xff] (!%p5613_p6)  ;;  %v693_v19 = vld [vmem:[%s8028_s5 + $0x28] sm:$0xff] (!%p5613_p6)  ;;  %v705_v22 = vpack.c.bf16 (!%p5613_p6), %v691_v15, %v690_v14  ;;  %893 = vst [vmem:[#allocation3 + $0x20] sm:$0xff] (!%p5613_p6), %v7475_v32 }
 0x16b   : > { %6056 = vmatpush3.bf16.msra.mxu0 (!%p5613_p6), %v6640_v1  ;;  %6382 = vmatpush3.bf16.msra.mxu1 (!%p5613_p6), %v6640_v1  ;;  %v700_v20 = vld [vmem:[%s8028_s5 + $0x60] sm:$0xff] (!%p5613_p6)  ;;  %v701_v21 = vld [vmem:[%s8028_s5 + $0x68] sm:$0xff] (!%p5613_p6)  ;;  %v709_v23 = vpack.c.bf16 (!%p5613_p6), %v699_v17, %v698_v16  ;;  %v706_v24 = vpack.c.bf16 (!%p5613_p6), %v693_v19, %v692_v18  ;;  %v694_v26 = vld [vmem:[%s8028_s5 + $0x30] sm:$0xff] (!%p5613_p6)  ;;  %894 = vst [vmem:[#allocation3 + $0x28] sm:$0xff] (!%p5613_p6), %v7475_v32 }
 0x16c   : > { %6057 = vmatprep.subr.bf16.mxu0 (!%p5613_p6), %v6641_v2  ;;  %6375 = vmatprep.subr.bf16.mxu1 (!%p5613_p6), %v6641_v2  ;;  %v710_v25 = vpack.c.bf16 (!%p5613_p6), %v701_v21, %v700_v20  ;;  %v695_v27 = vld [vmem:[%s8028_s5 + $0x38] sm:$0xff] (!%p5613_p6)  ;;  %v702_v28 = vld [vmem:[%s8028_s5 + $0x70] sm:$0xff] (!%p5613_p6)  ;;  %895 = vst [vmem:[#allocation3 + $0x30] sm:$0xff] (!%p5613_p6), %v7475_v32  ;;  %896 = vst [vmem:[#allocation3 + $0x38] sm:$0xff] (!%p5613_p6), %v7475_v32 }
 0x16d   : > { %v703_v29 = vld [vmem:[%s8028_s5 + $0x78] sm:$0xff]  ;;  %v707_v30 = vpack.c.bf16 %v695_v27, %v694_v26  ;;  %897 = vst [vmem:[#allocation3 + $0x40] sm:$0xff] %v7475_v32  ;;  %898 = vst [vmem:[#allocation3 + $0x48] sm:$0xff] %v7475_v32 }
 0x16e   : > { %v711_v31 = vpack.c.bf16 %v703_v29, %v702_v28  ;;  %899 = vst [vmem:[#allocation3 + $0x50] sm:$0xff] %v7475_v32  ;;  %900 = vst [vmem:[#allocation3 + $0x58] sm:$0xff] %v7475_v32 }
 0x16f   : > { %6058 = vmatpush3.bf16.msra.mxu0 %v6641_v2  ;;  %6383 = vmatpush3.bf16.msra.mxu1 %v6641_v2  ;;  %901 = vst [vmem:[#allocation3 + $0x60] sm:$0xff] %v7475_v32  ;;  %902 = vst [vmem:[#allocation3 + $0x68] sm:$0xff] %v7475_v32 }
 0x170   : > { %6059 = vmatprep.subr.bf16.mxu0 %v6642_v3  ;;  %6376 = vmatprep.subr.bf16.mxu1 %v6642_v3  ;;  %903 = vst [vmem:[#allocation3 + $0x70] sm:$0xff] %v7475_v32  ;;  %904 = vst [vmem:[#allocation3 + $0x78] sm:$0xff] %v7475_v32 }
 0x171   : > { %906 = vst.msk [vmem:[#allocation4] sm:$0xff] %vm905_vm0, %v7475_v32  ;;  %907 = vst.msk [vmem:[#allocation4 + $0x8] sm:$0xff] %vm905_vm0, %v7475_v32 }
 0x172   : > { %908 = vst.msk [vmem:[#allocation4 + $0x10] sm:$0xff] %vm905_vm0, %v7475_v32  ;;  %909 = vst.msk [vmem:[#allocation4 + $0x18] sm:$0xff] %vm905_vm0, %v7475_v32 }
 0x173   : > { %6060 = vmatpush3.bf16.msra.mxu0 %v6642_v3  ;;  %6384 = vmatpush3.bf16.msra.mxu1 %v6642_v3  ;;  %910 = vst.msk [vmem:[#allocation4 + $0x20] sm:$0xff] %vm905_vm0, %v7475_v32  ;;  %911 = vst.msk [vmem:[#allocation4 + $0x28] sm:$0xff] %vm905_vm0, %v7475_v32 }
 0x174   : > { %6061 = vmatprep.subr.bf16.mxu0 %v6643_v10  ;;  %6377 = vmatprep.subr.bf16.mxu1 %v6643_v10  ;;  %912 = vst.msk [vmem:[#allocation4 + $0x30] sm:$0xff] %vm905_vm0, %v7475_v32  ;;  %913 = vst.msk [vmem:[#allocation4 + $0x38] sm:$0xff] %vm905_vm0, %v7475_v32 }
 0x175   : > { %914 = vst.msk [vmem:[#allocation4 + $0x40] sm:$0xff] %vm905_vm0, %v7475_v32  ;;  %915 = vst.msk [vmem:[#allocation4 + $0x48] sm:$0xff] %vm905_vm0, %v7475_v32 }
 0x176   : > { %916 = vst.msk [vmem:[#allocation4 + $0x50] sm:$0xff] %vm905_vm0, %v7475_v32  ;;  %917 = vst.msk [vmem:[#allocation4 + $0x58] sm:$0xff] %vm905_vm0, %v7475_v32 }
 0x177   : > { %6062 = vmatpush3.bf16.msra.mxu0 %v6643_v10  ;;  %6385 = vmatpush3.bf16.msra.mxu1 %v6643_v10  ;;  %918 = vst.msk [vmem:[#allocation4 + $0x60] sm:$0xff] %vm905_vm0, %v7475_v32  ;;  %919 = vst.msk [vmem:[#allocation4 + $0x68] sm:$0xff] %vm905_vm0, %v7475_v32 }
 0x178   : > { %6063 = vmatprep.subr.bf16.mxu0 %v6644_v11  ;;  %6378 = vmatprep.subr.bf16.mxu1 %v6644_v11  ;;  %920 = vst.msk [vmem:[#allocation4 + $0x70] sm:$0xff] %vm905_vm0, %v7475_v32  ;;  %921 = vst.msk [vmem:[#allocation4 + $0x78] sm:$0xff] %vm905_vm0, %v7475_v32 }
 0x17b   : > { %6064 = vmatpush3.bf16.msra.mxu0 %v6644_v11  ;;  %6386 = vmatpush3.bf16.msra.mxu1 %v6644_v11 }
 0x17c   : > { %6065 = vmatprep.subr.bf16.mxu0 %v6645_v12  ;;  %6379 = vmatprep.subr.bf16.mxu1 %v6645_v12 }
 0x17f   : > { %6066 = vmatpush3.bf16.msra.mxu0 %v6645_v12  ;;  %6387 = vmatpush3.bf16.msra.mxu1 %v6645_v12 }
 0x180   : > { %6067 = vmatprep.subr.bf16.mxu0 %v6646_v13  ;;  %6380 = vmatprep.subr.bf16.mxu1 %v6646_v13 }
 0x183   : > { %6068 = vmatpush3.bf16.msra.mxu0 %v6646_v13  ;;  %6388 = vmatpush3.bf16.msra.mxu1 %v6646_v13 }
 0x186   : > { %6070 = vmatmul.mubr.bf16.vlgmr.msra.gmra.mrb[0].mxu0 %v705_v22  ;;  %6078 = vmatmul.mubr.bf16.vlgmr.msra.gmra.mrb[0].mxu1 %v709_v23 }
 0x187   : > { %6073 = vmatprep.mubr.bf16.mxu0 %v706_v24  ;;  %6081 = vmatprep.mubr.bf16.mxu1 %v710_v25 }
 0x18e   : > { %6074 = vmatmul.mubr.bf16.gmra.mrb[4].mxu0 %v707_v30  ;;  %6082 = vmatmul.mubr.bf16.gmra.mrb[4].mxu1 %v711_v31 }
 0x259   : > { %v6071_v33 = vpop.f32.mrb[0].mxu0  ;;  %v6079_v34 = vpop.f32.mrb[0].mxu1 }
 0x25a   : > { %v810_v35 = vpop.f32.mrb[1].mxu0  ;;  %v842_v36 = vpop.f32.mrb[1].mxu1 }
 0x25b   : > { %v6072_v37 = vpop.f32.mrb[2].mxu0  ;;  %v6080_v38 = vpop.f32.mrb[2].mxu1 }
 0x25c   : > { %v874_v39 = vpack.c.bf16 %v6072_v37, %v6071_v33  ;;  %v878_v40 = vpack.c.bf16 %v6080_v38, %v6079_v34  ;;  %v813_v41 = vpop.f32.mrb[3].mxu0  ;;  %v845_v42 = vpop.f32.mrb[3].mxu1 }
 0x25d   : > { %v873_v43 = vpack.c.bf16 %v813_v41, %v810_v35  ;;  %v877_v44 = vpack.c.bf16 %v845_v42, %v842_v36 }
 0x25e   : > { %882 = vst [vmem:[#allocation2 + $0x8] sm:$0xff] %v874_v39  ;;  %886 = vst [vmem:[#allocation2 + $0x28] sm:$0xff] %v878_v40 }
 0x25f   : > { %881 = vst [vmem:[#allocation2] sm:$0xff] %v873_v43  ;;  %885 = vst [vmem:[#allocation2 + $0x20] sm:$0xff] %v877_v44 }
 0x261   : > { %v6075_v45 = vpop.f32.mrb[4].mxu0  ;;  %v6083_v46 = vpop.f32.mrb[4].mxu1 }
 0x262   : > { %v826_v47 = vpop.f32.mrb[5].mxu0  ;;  %v858_v48 = vpop.f32.mrb[5].mxu1 }
 0x263   : > { %v6076_v49 = vpop.f32.mrb[6].mxu0  ;;  %v6084_v50 = vpop.f32.mrb[6].mxu1 }
 0x264   : > { %v876_v51 = vpack.c.bf16 %v6076_v49, %v6075_v45  ;;  %v880_v52 = vpack.c.bf16 %v6084_v50, %v6083_v46  ;;  %v829_v53 = vpop.f32.mrb[7].mxu0  ;;  %v861_v54 = vpop.f32.mrb[7].mxu1 }
 0x265   : > { %v875_v55 = vpack.c.bf16 %v829_v53, %v826_v47  ;;  %v879_v56 = vpack.c.bf16 %v861_v54, %v858_v48 }
 0x266   : > { %884 = vst [vmem:[#allocation2 + $0x18] sm:$0xff] %v876_v51  ;;  %888 = vst [vmem:[#allocation2 + $0x38] sm:$0xff] %v880_v52 }
 0x267   : > { %883 = vst [vmem:[#allocation2 + $0x10] sm:$0xff] %v875_v55  ;;  %887 = vst [vmem:[#allocation2 + $0x30] sm:$0xff] %v879_v56 }
 0x268 PF: > { %v6647_v57 = vld [vmem:[#allocation13 + $0x4] ss:$8 sps:$4 sm:$0xff]   ;;  %v6649_v58 = vld [vmem:[#allocation13] ss:$8 sps:$4 sm:$0xff]   ;;  %v7476_v59 = vmov 0   ;;  %v924_v13 = vld [vmem:[%s8036_s0 + $0x10] sm:$0xff] }
 0x269   : > { %1074 = vmatprep.mubr.bf16.mxu0 %v7476_v59  ;;  %1042 = vmatprep.subr.bf16.mxu0 %v6647_v57  ;;  %v6650_v60 = vld [vmem:[#allocation13 + $0x14] ss:$8 sps:$4 sm:$0xff]   ;;  %v6652_v61 = vld [vmem:[#allocation13 + $0x10] ss:$8 sps:$4 sm:$0xff]   ;;  %v6653_v62 = vld [vmem:[#allocation13 + $0x24] ss:$8 sps:$4 sm:$0xff]  }
 0x26a   : > { %1043 = vmatpush1.bf16.msra.mxu0 %v6649_v58  ;;  %v6655_v63 = vld [vmem:[#allocation13 + $0x20] ss:$8 sps:$4 sm:$0xff]   ;;  %v6656_v0 = vld [vmem:[#allocation13 + $0x34] ss:$8 sps:$4 sm:$0xff]   ;;  %v6658_v1 = vld [vmem:[#allocation13 + $0x30] ss:$8 sps:$4 sm:$0xff]  }
 0x26b   : > { %1044 = vmatprep.subr.bf16.mxu0 %v6650_v60  ;;  %v6659_v2 = vld [vmem:[#allocation13 + $0x44] ss:$8 sps:$4 sm:$0xff]   ;;  %v6661_v3 = vld [vmem:[#allocation13 + $0x40] ss:$8 sps:$4 sm:$0xff]   ;;  %v6662_v4 = vld [vmem:[#allocation13 + $0x54] ss:$8 sps:$4 sm:$0xff]  }
 0x26c   : > { %v6664_v5 = vld [vmem:[#allocation13 + $0x50] ss:$8 sps:$4 sm:$0xff]   ;;  %v6665_v6 = vld [vmem:[#allocation13 + $0x64] ss:$8 sps:$4 sm:$0xff]   ;;  %v6667_v7 = vld [vmem:[#allocation13 + $0x60] ss:$8 sps:$4 sm:$0xff]  }
 0x26d   : > { %v6668_v8 = vld [vmem:[#allocation13 + $0x74] ss:$8 sps:$4 sm:$0xff]   ;;  %v6670_v9 = vld [vmem:[#allocation13 + $0x70] ss:$8 sps:$4 sm:$0xff]   ;;  %v922_v10 = vld [vmem:[%s8036_s0] sm:$0xff]  ;;  %vm1211_vm1 = vcmask 261120  }
 0x26e   : > { %1045 = vmatpush1.bf16.msra.mxu0 %v6652_v61  ;;  %v923_v11 = vld [vmem:[%s8036_s0 + $0x8] sm:$0xff]  ;;  %v925_v14 = vld [vmem:[%s8036_s0 + $0x18] sm:$0xff]  ;;  %v926_v16 = vld [vmem:[%s8036_s0 + $0x20] sm:$0xff]  ;;  %s7477_s17 = smov 96   ;;  %s7478_s18 = smov 64   ;;  %vm1654_vm2 = vcmask 7168  }
 0x26f   : > { %1046 = vmatprep.subr.bf16.mxu0 %v6653_v62  ;;  %v938_v12 = vpack.c.bf16 %v923_v11, %v922_v10  ;;  %v939_v15 = vpack.c.bf16 %v925_v14, %v924_v13  ;;  %v927_v17 = vld [vmem:[%s8036_s0 + $0x28] sm:$0xff]  ;;  %v928_v19 = vld [vmem:[%s8036_s0 + $0x30] sm:$0xff]  ;;  %v929_v20 = vld [vmem:[%s8036_s0 + $0x38] sm:$0xff]  ;;  %s7479_s9 = smov 32   ;;  %vm2266_vm3 = vcmask 15368   ;;  %vm2185_vm4 = vcmask 523520  }
 0x270   : > { %v940_v18 = vpack.c.bf16 %v927_v17, %v926_v16  ;;  %v941_v21 = vpack.c.bf16 %v929_v20, %v928_v19  ;;  %v930_v22 = vld [vmem:[%s8036_s0 + $0x40] sm:$0xff]  ;;  %v931_v23 = vld [vmem:[%s8036_s0 + $0x48] sm:$0xff]  ;;  %v932_v25 = vld [vmem:[%s8036_s0 + $0x50] sm:$0xff]  ;;  %vm2862_vm5 = vcmask 23568   ;;  %vm2781_vm6 = vcmask 785920   ;;  %s9835_s28 = sld [smem:[#allocation31_spill]] }
 0x271   : > { %v942_v24 = vpack.c.bf16 %v931_v23, %v930_v22  ;;  %v933_v26 = vld [vmem:[%s8036_s0 + $0x58] sm:$0xff]  ;;  %v934_v28 = vld [vmem:[%s8036_s0 + $0x60] sm:$0xff]  ;;  %v935_v29 = vld [vmem:[%s8036_s0 + $0x68] sm:$0xff]  ;;  %vm3458_vm7 = vcmask 31768   ;;  %vm3377_vm8 = vcmask 1048320  }
 0x272   : > { %1047 = vmatpush1.bf16.msra.mxu0 %v6655_v63  ;;  %v943_v27 = vpack.c.bf16 %v933_v26, %v932_v25  ;;  %v944_v30 = vpack.c.bf16 %v935_v29, %v934_v28  ;;  %v936_v31 = vld [vmem:[%s8036_s0 + $0x70] sm:$0xff]  ;;  %v937_v32 = vld [vmem:[%s8036_s0 + $0x78] sm:$0xff]  ;;  %v8120_v34 = vld [vmem:[#allocation2] sm:$0xff] }
 0x273   : > { %1048 = vmatprep.subr.bf16.mxu0 %v6656_v0  ;;  %v945_v33 = vpack.c.bf16 %v937_v32, %v936_v31  ;;  %6101 = vmatprep.mubr.msk.bf16.mxu1 %vm1211_vm1, %v8120_v34  ;;  %v8210_v23 = vld [vmem:[#allocation2 + $0x10] sm:$0xff]  ;;  %v8225_v28 = vld [vmem:[#allocation2 + $0x20] sm:$0xff]  ;;  %v8227_v29 = vld [vmem:[#allocation2 + $0x8] sm:$0xff] }
 0x274   : > { %v8236_v31 = vld [vmem:[#allocation2 + $0x18] sm:$0xff]  ;;  %v8244_v32 = vld [vmem:[#allocation2 + $0x28] sm:$0xff] }
 0x276   : > { %1049 = vmatpush1.bf16.msra.mxu0 %v6658_v1  ;;  %p5734_p11 = scmp.ne.s32.totalorder %s9835_s28, 1 }
 0x277   : > { %1050 = vmatprep.subr.bf16.mxu0 %v6659_v2  ;;  %s9836_s7 = sld [smem:[#allocation50_spill]] (!%p5734_p11)  ;;  %s9837_s2 = sld [smem:[#allocation51_spill]] (!%p5734_p11) }
 0x278   : > { %s9838_s0 = sld [smem:[#allocation52_spill]] (!%p5734_p11)  ;;  %s9839_s10 = sld [smem:[#allocation54_spill]] (!%p5734_p11) }
 0x279   : > { %s9841_s28 = sld [smem:[#allocation57_spill]] (!%p5734_p11) }
 0x27a   : > { %1051 = vmatpush1.bf16.msra.mxu0 %v6661_v3 }
 0x27b   : > { %1052 = vmatprep.subr.bf16.mxu0 %v6662_v4 }
 0x27e   : > { %1053 = vmatpush1.bf16.msra.mxu0 %v6664_v5 }
 0x27f   : > { %1054 = vmatprep.subr.bf16.mxu0 %v6665_v6 }
 0x282   : > { %1055 = vmatpush1.bf16.msra.mxu0 %v6667_v7 }
 0x283   : > { %1056 = vmatprep.subr.bf16.mxu0 %v6668_v8 }
 0x286   : > { %1057 = vmatpush1.bf16.msra.mxu0 %v6670_v9 }
 0x289   : > { %1075 = vmatmul.mubr.bf16.vlgmr.msra.gmra.mrb[0].mxu0 %v938_v12 }
 0x28a   : > { %1084 = vmatprep.mubr.bf16.mxu0 %v7476_v59 }
 0x291   : > { %1085 = vmatmul.mubr.bf16.gmra.mrb[4].mxu0 %v939_v15 }
 0x292   : > { %1094 = vmatprep.mubr.bf16.mxu0 %v7476_v59 }
 0x299   : > { %1095 = vmatmul.mubr.bf16.gmra.mrb[8].mxu0 %v940_v18 }
 0x29a   : > { %1104 = vmatprep.mubr.bf16.mxu0 %v7476_v59 }
 0x2a1   : > { %1105 = vmatmul.mubr.bf16.gmra.mrb[12].mxu0 %v941_v21 }
 0x2a2   : > { %1114 = vmatprep.mubr.bf16.mxu0 %v7476_v59 }
 0x2a9   : > { %1115 = vmatmul.mubr.bf16.gmra.mrb[16].mxu0 %v942_v24 }
 0x2aa   : > { %1124 = vmatprep.mubr.bf16.mxu0 %v7476_v59 }
 0x2b1   : > { %1125 = vmatmul.mubr.bf16.gmra.mrb[20].mxu0 %v943_v27 }
 0x2b2   : > { %1134 = vmatprep.mubr.bf16.mxu0 %v7476_v59 }
 0x2b9   : > { %1135 = vmatmul.mubr.bf16.gmra.mrb[24].mxu0 %v944_v30  ;;  %v8234_v30 = vld [vmem:[#allocation2 + $0x30] sm:$0xff] }
 0x2ba   : > { %1144 = vmatprep.mubr.bf16.mxu0 %v7476_v59 }
 0x2c1   : > { %1145 = vmatmul.mubr.bf16.gmra.mrb[28].mxu0 %v945_v33  ;;  %v8252_v33 = vld [vmem:[#allocation2 + $0x38] sm:$0xff] }
 0x35c   : > { %v1076_v35 = vpop.f32.mrb[0].mxu0 }
 0x35d   : > { %v1078_v36 = vpop.f32.mrb[1].mxu0 }
 0x35e   : > { %v1080_v37 = vpop.f32.mrb[2].mxu0 }
 0x35f   : > { %v8124_v38 = vpack.c.bf16 %v1080_v37, %v1076_v35  ;;  %v1082_v39 = vpop.f32.mrb[3].mxu0 }
 0x360   : > { %v8126_v40 = vpack.c.bf16 %v1082_v39, %v1078_v36 }
 0x361   : > { %1711 = vrot.lane.b32.xlu0 %v8124_v38, %s7477_s17  ;;  %6405 = vmatprep.subr.msk.bf16.mxu1 %vm1211_vm1, %v8124_v38  ;;  %v1237_v41 = vsel %vm1211_vm1, %v8124_v38, 0 }
 0x362   : > { %6086 = vmatpush3.bf16.xpose.msra.mxu1 %v1237_v41  ;;  %6117 = vmatprep.subr.bf16.mxu0 %v8126_v40 }
 0x363   : > { %6118 = vmatpush3.bf16.msra.mxu0 %v8126_v40 }
 0x364   : > { %v1086_v42 = vpop.f32.mrb[4].mxu0 }
 0x365   : > { %v1088_v43 = vpop.f32.mrb[5].mxu0 }
 0x366   : > { %v1090_v44 = vpop.f32.mrb[6].mxu0 }
 0x367   : > { %v8136_v45 = vpack.c.bf16 %v1090_v44, %v1086_v42  ;;  %v1092_v46 = vpop.f32.mrb[7].mxu0 }
 0x368   : > { %v8138_v47 = vpack.c.bf16 %v1092_v46, %v1088_v43 }
 0x369   : > { %1713 = vrot.lane.b32.xlu0 %v8136_v45, %s7477_s17  ;;  %6406 = vmatprep.subr.msk.bf16.mxu1 %vm1211_vm1, %v8136_v45  ;;  %v1240_v48 = vsel %vm1211_vm1, %v8136_v45, 0 }
 0x36a   : > { %6088 = vmatpush3.bf16.xpose.msra.mxu1 %v1240_v48  ;;  %6119 = vmatprep.subr.bf16.mxu0 %v8138_v47 }
 0x36b   : > { %6120 = vmatpush3.bf16.msra.mxu0 %v8138_v47 }
 0x36c   : > { %v1096_v49 = vpop.f32.mrb[8].mxu0 }
 0x36d   : > { %v1098_v50 = vpop.f32.mrb[9].mxu0 }
 0x36e   : > { %v1100_v51 = vpop.f32.mrb[10].mxu0 }
 0x36f   : > { %v8148_v52 = vpack.c.bf16 %v1100_v51, %v1096_v49  ;;  %v1102_v53 = vpop.f32.mrb[11].mxu0 }
 0x370   : > { %v8150_v54 = vpack.c.bf16 %v1102_v53, %v1098_v50 }
 0x371   : > { %1715 = vrot.lane.b32.xlu1 %v8148_v52, %s7477_s17  ;;  %6407 = vmatprep.subr.msk.bf16.mxu1 %vm1211_vm1, %v8148_v52  ;;  %v1243_v55 = vsel %vm1211_vm1, %v8148_v52, 0 }
 0x372   : > { %6090 = vmatpush3.bf16.xpose.msra.mxu1 %v1243_v55  ;;  %6121 = vmatprep.subr.bf16.mxu0 %v8150_v54 }
 0x373   : > { %6122 = vmatpush3.bf16.msra.mxu0 %v8150_v54 }
 0x374   : > { %v1106_v56 = vpop.f32.mrb[12].mxu0 }
 0x375   : > { %v1108_v57 = vpop.f32.mrb[13].mxu0 }
 0x376   : > { %v1110_v58 = vpop.f32.mrb[14].mxu0 }
 0x377   : > { %v8160_v59 = vpack.c.bf16 %v1110_v58, %v1106_v56  ;;  %v1112_v60 = vpop.f32.mrb[15].mxu0 }
 0x378   : > { %v8162_v61 = vpack.c.bf16 %v1112_v60, %v1108_v57 }
 0x379   : > { %1717 = vrot.lane.b32.xlu1 %v8160_v59, %s7477_s17  ;;  %6408 = vmatprep.subr.msk.bf16.mxu1 %vm1211_vm1, %v8160_v59  ;;  %v1246_v62 = vsel %vm1211_vm1, %v8160_v59, 0 }
 0x37a   : > { %6092 = vmatpush3.bf16.xpose.msra.mxu1 %v1246_v62  ;;  %6123 = vmatprep.subr.bf16.mxu0 %v8162_v61 }
 0x37b   : > { %6124 = vmatpush3.bf16.msra.mxu0 %v8162_v61 }
 0x37c   : > { %v1116_v63 = vpop.f32.mrb[16].mxu0 }
 0x37d   : > { %v1118_v0 = vpop.f32.mrb[17].mxu0 }
 0x37e   : > { %v1120_v1 = vpop.f32.mrb[18].mxu0 }
 0x37f   : > { %v8172_v2 = vpack.c.bf16 %v1120_v1, %v1116_v63  ;;  %v1122_v3 = vpop.f32.mrb[19].mxu0 }
 0x380   : > { %v8174_v4 = vpack.c.bf16 %v1122_v3, %v1118_v0 }
 0x381   : > { %1719 = vrot.lane.b32.xlu0 %v8172_v2, %s7477_s17  ;;  %6409 = vmatprep.subr.msk.bf16.mxu1 %vm1211_vm1, %v8172_v2  ;;  %v1249_v5 = vsel %vm1211_vm1, %v8172_v2, 0 }
 0x382   : > { %6094 = vmatpush3.bf16.xpose.msra.mxu1 %v1249_v5  ;;  %6125 = vmatprep.subr.bf16.mxu0 %v8174_v4 }
 0x383   : > { %6126 = vmatpush3.bf16.msra.mxu0 %v8174_v4 }
 0x384   : > { %v1126_v6 = vpop.f32.mrb[20].mxu0 }
 0x385   : > { %v1128_v7 = vpop.f32.mrb[21].mxu0 }
 0x386   : > { %v1130_v8 = vpop.f32.mrb[22].mxu0 }
 0x387   : > { %v8184_v9 = vpack.c.bf16 %v1130_v8, %v1126_v6  ;;  %v1132_v10 = vpop.f32.mrb[23].mxu0 }
 0x388   : > { %v8186_v11 = vpack.c.bf16 %v1132_v10, %v1128_v7 }
 0x389   : > { %1721 = vrot.lane.b32.xlu1 %v8184_v9, %s7477_s17  ;;  %6410 = vmatprep.subr.msk.bf16.mxu1 %vm1211_vm1, %v8184_v9  ;;  %v1252_v12 = vsel %vm1211_vm1, %v8184_v9, 0 }
 0x38a   : > { %6096 = vmatpush3.bf16.xpose.msra.mxu1 %v1252_v12  ;;  %6127 = vmatprep.subr.bf16.mxu0 %v8186_v11 }
 0x38b   : > { %6128 = vmatpush3.bf16.msra.mxu0 %v8186_v11 }
 0x38c   : > { %v1136_v13 = vpop.f32.mrb[24].mxu0 }
 0x38d   : > { %v1138_v14 = vpop.f32.mrb[25].mxu0 }
 0x38e   : > { %v1140_v15 = vpop.f32.mrb[26].mxu0 }
 0x38f   : > { %v8196_v16 = vpack.c.bf16 %v1140_v15, %v1136_v13  ;;  %v1142_v17 = vpop.f32.mrb[27].mxu0 }
 0x390   : > { %v8198_v18 = vpack.c.bf16 %v1142_v17, %v1138_v14 }
 0x391   : > { %1723 = vrot.lane.b32.xlu0 %v8196_v16, %s7477_s17  ;;  %6411 = vmatprep.subr.msk.bf16.mxu1 %vm1211_vm1, %v8196_v16  ;;  %v1255_v19 = vsel %vm1211_vm1, %v8196_v16, 0 }
 0x392   : > { %6098 = vmatpush3.bf16.xpose.msra.mxu1 %v1255_v19  ;;  %6129 = vmatprep.subr.bf16.mxu0 %v8198_v18 }
 0x393   : > { %6130 = vmatpush3.bf16.msra.mxu0 %v8198_v18 }
 0x394   : > { %v1146_v20 = vpop.f32.mrb[28].mxu0 }
 0x395   : > { %1687 = vrot.lane.b32.xlu0 %v8120_v34, %s7477_s17  ;;  %v1148_v21 = vpop.f32.mrb[29].mxu0 }
 0x396   : > { %v1150_v22 = vpop.f32.mrb[30].mxu0 }
 0x397   : > { %v8212_v24 = vpack.c.bf16 %v1150_v22, %v1146_v20  ;;  %v1152_v25 = vpop.f32.mrb[31].mxu0 }
 0x398   : > { %v8214_v26 = vpack.c.bf16 %v1152_v25, %v1148_v21 }
 0x399   : > { %1691 = vrot.lane.b32.xlu0 %v8210_v23, %s7477_s17  ;;  %1725 = vrot.lane.b32.xlu1 %v8212_v24, %s7477_s17  ;;  %v1258_v27 = vsel %vm1211_vm1, %v8212_v24, 0 }
 0x39a   : > { %6412 = vmatprep.subr.msk.bf16.mxu1 %vm1211_vm1, %v8212_v24  ;;  %6131 = vmatprep.subr.bf16.mxu0 %v8214_v26 }
 0x39b   : > { %6100 = vmatpush3.bf16.xpose.msra.mxu1 %v1258_v27  ;;  %6132 = vmatpush3.bf16.msra.mxu0 %v8214_v26 }
 0x39d   : > { %1695 = vrot.lane.b32.xlu0 %v8225_v28, %s7477_s17  ;;  %1689 = vrot.lane.b32.xlu1 %v8227_v29, %s7477_s17 }
 0x3a1   : > { %1699 = vrot.lane.b32.xlu0 %v8234_v30, %s7477_s17  ;;  %1693 = vrot.lane.b32.xlu1 %v8236_v31, %s7477_s17 }
 0x3a2   : > { %6102 = vmatmul.mubr.msk.bf16.vlgmr.msra.gmra.mrb[0].mxu1 %vm1211_vm1, %v8227_v29 }
 0x3a3   : > { %6105 = vmatprep.mubr.msk.bf16.mxu1 %vm1211_vm1, %v8210_v23 }
 0x3a5   : > { %1984 = vrot.lane.b32.xlu0 %v8126_v40, %s7477_s17  ;;  %1697 = vrot.lane.b32.xlu1 %v8244_v32, %s7477_s17 }
 0x3a9   : > { %1988 = vrot.lane.b32.xlu0 %v8150_v54, %s7477_s17  ;;  %1701 = vrot.lane.b32.xlu1 %v8252_v33, %s7477_s17 }
 0x3aa   : > { %6106 = vmatmul.mubr.msk.bf16.gmra.mrb[4].mxu1 %vm1211_vm1, %v8236_v31 }
 0x3ab   : > { %6109 = vmatprep.mubr.msk.bf16.mxu1 %vm1211_vm1, %v8225_v28 }
 0x3ad   : > { %1992 = vrot.lane.b32.xlu0 %v8174_v4, %s7477_s17  ;;  %1986 = vrot.lane.b32.xlu1 %v8138_v47, %s7477_s17 }
 0x3b1   : > { %1996 = vrot.lane.b32.xlu0 %v8198_v18, %s7477_s17  ;;  %1990 = vrot.lane.b32.xlu1 %v8162_v61, %s7477_s17 }
 0x3b2   : > { %6110 = vmatmul.mubr.msk.bf16.gmra.mrb[8].mxu1 %vm1211_vm1, %v8244_v32 }
 0x3b3   : > { %6113 = vmatprep.mubr.msk.bf16.mxu1 %vm1211_vm1, %v8234_v30 }
 0x3b5   : > { %2315 = vrot.lane.b32.xlu0 %v8124_v38, %s7478_s18  ;;  %1994 = vrot.lane.b32.xlu1 %v8186_v11, %s7477_s17 }
 0x3b9   : > { %2319 = vrot.lane.b32.xlu0 %v8148_v52, %s7478_s18  ;;  %1998 = vrot.lane.b32.xlu1 %v8214_v26, %s7477_s17 }
 0x3ba   : > { %6114 = vmatmul.mubr.msk.bf16.gmra.mrb[12].mxu1 %vm1211_vm1, %v8252_v33 }
 0x3bd   : > { %2323 = vrot.lane.b32.xlu0 %v8172_v2, %s7478_s18  ;;  %2317 = vrot.lane.b32.xlu1 %v8136_v45, %s7478_s18 }
 0x3c1   : > { %2327 = vrot.lane.b32.xlu0 %v8196_v16, %s7478_s18  ;;  %2321 = vrot.lane.b32.xlu1 %v8160_v59, %s7478_s18 }
 0x3c5   : > { %2299 = vrot.lane.b32.xlu0 %v8120_v34, %s7478_s18  ;;  %2325 = vrot.lane.b32.xlu1 %v8184_v9, %s7478_s18 }
 0x3c9   : > { %2303 = vrot.lane.b32.xlu0 %v8210_v23, %s7478_s18  ;;  %2329 = vrot.lane.b32.xlu1 %v8212_v24, %s7478_s18 }
 0x3cd   : > { %2307 = vrot.lane.b32.xlu0 %v8225_v28, %s7478_s18  ;;  %2301 = vrot.lane.b32.xlu1 %v8227_v29, %s7478_s18 }
 0x3d1   : > { %2311 = vrot.lane.b32.xlu0 %v8234_v30, %s7478_s18  ;;  %2305 = vrot.lane.b32.xlu1 %v8236_v31, %s7478_s18 }
 0x3d3   : > { %v1712_v35 = vpop.permute.xlu0 %1711 }
 0x3d4   : > { %6413 = vmatprep.subr.msk.bf16.mxu1 %vm1211_vm1, %v1712_v35  ;;  %v1752_v36 = vsel %vm1211_vm1, %v1712_v35, 0 }
 0x3d5   : > { %2580 = vrot.lane.b32.xlu0 %v8126_v40, %s7478_s18  ;;  %6150 = vmatpush3.bf16.xpose.msra.mxu1 %v1752_v36 }
 0x3d6   : > { %2309 = vrot.lane.b32.xlu1 %v8244_v32, %s7478_s18 }
 0x3d9   : > { %2584 = vrot.lane.b32.xlu0 %v8150_v54, %s7478_s18 }
 0x3da   : > { %2313 = vrot.lane.b32.xlu1 %v8252_v33, %s7478_s18 }
 0x3db   : > { %v1714_v37 = vpop.permute.xlu0 %1713 }
 0x3dc   : > { %6414 = vmatprep.subr.msk.bf16.mxu1 %vm1211_vm1, %v1714_v37  ;;  %v1755_v39 = vsel %vm1211_vm1, %v1714_v37, 0 }
 0x3dd   : > { %2588 = vrot.lane.b32.xlu0 %v8174_v4, %s7478_s18  ;;  %6152 = vmatpush3.bf16.xpose.msra.mxu1 %v1755_v39 }
 0x3de   : > { %2582 = vrot.lane.b32.xlu1 %v8138_v47, %s7478_s18 }
 0x3e1   : > { %2592 = vrot.lane.b32.xlu0 %v8198_v18, %s7478_s18 }
 0x3e2   : > { %2586 = vrot.lane.b32.xlu1 %v8162_v61, %s7478_s18 }
 0x3e3   : > { %v1716_v41 = vpop.permute.xlu1 %1715 }
 0x3e4   : > { %6415 = vmatprep.subr.msk.bf16.mxu1 %vm1211_vm1, %v1716_v41  ;;  %v1758_v42 = vsel %vm1211_vm1, %v1716_v41, 0 }
 0x3e5   : > { %2911 = vrot.lane.b32.xlu0 %v8124_v38, %s7479_s9  ;;  %6154 = vmatpush3.bf16.xpose.msra.mxu1 %v1758_v42 }
 0x3e6   : > { %2590 = vrot.lane.b32.xlu1 %v8186_v11, %s7478_s18 }
 0x3e9   : > { %2915 = vrot.lane.b32.xlu0 %v8148_v52, %s7479_s9 }
 0x3ea   : > { %2594 = vrot.lane.b32.xlu1 %v8214_v26, %s7478_s18 }
 0x3eb   : > { %v1718_v43 = vpop.permute.xlu1 %1717 }
 0x3ec   : > { %6416 = vmatprep.subr.msk.bf16.mxu1 %vm1211_vm1, %v1718_v43  ;;  %v1761_v44 = vsel %vm1211_vm1, %v1718_v43, 0  ;;  %v5822_v43 = vld [vmem:[%s8043_s21 + $0x8] sm:$0xff]  }
 0x3ed   : > { %2919 = vrot.lane.b32.xlu0 %v8172_v2, %s7479_s9  ;;  %6156 = vmatpush3.bf16.xpose.msra.mxu1 %v1761_v44 }
 0x3ee   : > { %2913 = vrot.lane.b32.xlu1 %v8136_v45, %s7479_s9 }
 0x3f1   : > { %2923 = vrot.lane.b32.xlu0 %v8196_v16, %s7479_s9 }
 0x3f2   : > { %2917 = vrot.lane.b32.xlu1 %v8160_v59, %s7479_s9 }
 0x3f3   : > { %v1720_v38 = vpop.permute.xlu0 %1719 }
 0x3f4   : > { %6417 = vmatprep.subr.msk.bf16.mxu1 %vm1211_vm1, %v1720_v38  ;;  %v1764_v46 = vsel %vm1211_vm1, %v1720_v38, 0 }
 0x3f5   : > { %2895 = vrot.lane.b32.xlu0 %v8120_v34, %s7479_s9  ;;  %6158 = vmatpush3.bf16.xpose.msra.mxu1 %v1764_v46  ;;  %v5791_v46 = vld [vmem:[%s8043_s21] sm:$0xff]  }
 0x3f6   : > { %2921 = vrot.lane.b32.xlu1 %v8184_v9, %s7479_s9 }
 0x3f9   : > { %2899 = vrot.lane.b32.xlu0 %v8210_v23, %s7479_s9 }
 0x3fa   : > { %2925 = vrot.lane.b32.xlu1 %v8212_v24, %s7479_s9 }
 0x3fb   : > { %v1722_v45 = vpop.permute.xlu1 %1721 }
 0x3fc   : > { %6418 = vmatprep.subr.msk.bf16.mxu1 %vm1211_vm1, %v1722_v45  ;;  %v1767_v48 = vsel %vm1211_vm1, %v1722_v45, 0 }
 0x3fd   : > { %2903 = vrot.lane.b32.xlu0 %v8225_v28, %s7479_s9  ;;  %6160 = vmatpush3.bf16.xpose.msra.mxu1 %v1767_v48 }
 0x3fe   : > { %2897 = vrot.lane.b32.xlu1 %v8227_v29, %s7479_s9 }
 0x401   : > { %2907 = vrot.lane.b32.xlu0 %v8234_v30, %s7479_s9 }
 0x402   : > { %2901 = vrot.lane.b32.xlu1 %v8236_v31, %s7479_s9 }
 0x403   : > { %v1724_v34 = vpop.permute.xlu0 %1723 }
 0x404   : > { %6419 = vmatprep.subr.msk.bf16.mxu1 %vm1211_vm1, %v1724_v34  ;;  %v1770_v49 = vsel %vm1211_vm1, %v1724_v34, 0 }
 0x405   : > { %3176 = vrot.lane.b32.xlu0 %v8126_v40, %s7479_s9  ;;  %6162 = vmatpush3.bf16.xpose.msra.mxu1 %v1770_v49 }
 0x406   : > { %2905 = vrot.lane.b32.xlu1 %v8244_v32, %s7479_s9 }
 0x407   : > { %v1688_v50 = vpop.permute.xlu0 %1687 }
 0x408   : > { %6165 = vmatprep.mubr.msk.bf16.mxu1 %vm1211_vm1, %v1688_v50 }
 0x409   : > { %3180 = vrot.lane.b32.xlu0 %v8150_v54, %s7479_s9 }
 0x40a   : > { %2909 = vrot.lane.b32.xlu1 %v8252_v33, %s7479_s9 }
 0x40b   : > { %v1692_v51 = vpop.permute.xlu0 %1691  ;;  %v1726_v52 = vpop.permute.xlu1 %1725 }
 0x40c   : > { %6420 = vmatprep.subr.msk.bf16.mxu1 %vm1211_vm1, %v1726_v52  ;;  %v1773_v53 = vsel %vm1211_vm1, %v1726_v52, 0 }
 0x40d   : > { %3184 = vrot.lane.b32.xlu0 %v8174_v4, %s7479_s9  ;;  %6164 = vmatpush3.bf16.xpose.msra.mxu1 %v1773_v53 }
 0x40e   : > { %3178 = vrot.lane.b32.xlu1 %v8138_v47, %s7479_s9 }
 0x40f   : > { %v1696_v40 = vpop.permute.xlu0 %1695  ;;  %v1690_v55 = vpop.permute.xlu1 %1689 }
 0x411   : > { %3188 = vrot.lane.b32.xlu0 %v8198_v18, %s7479_s9 }
 0x412   : > { %3182 = vrot.lane.b32.xlu1 %v8162_v61, %s7479_s9 }
 0x413   : > { %v1700_v54 = vpop.permute.xlu0 %1699  ;;  %v1694_v56 = vpop.permute.xlu1 %1693 }
 0x414   : > { %6166 = vmatmul.mubr.msk.bf16.vlgmr.msra.gmra.mrb[16].mxu1 %vm1211_vm1, %v1690_v55 }
 0x415   : > { %6169 = vmatprep.mubr.msk.bf16.mxu1 %vm1211_vm1, %v1692_v51  ;;  %v8455_v51 = vunpack.c.l.bf16 %v5822_v43 }
 0x416   : > { %3186 = vrot.lane.b32.xlu1 %v8186_v11, %s7479_s9 }
 0x417   : > { %v8393_v57 = vpop.permute.xlu0 %1984  ;;  %v1698_v47 = vpop.permute.xlu1 %1697 }
 0x418   : > { %6181 = vmatprep.subr.bf16.mxu0 %v8393_v57 }
 0x41a   : > { %3190 = vrot.lane.b32.xlu1 %v8214_v26, %s7479_s9 }
 0x41b   : > { %v8398_v58 = vpop.permute.xlu0 %1988  ;;  %v1702_v59 = vpop.permute.xlu1 %1701 }
 0x41c   : > { %6170 = vmatmul.mubr.msk.bf16.gmra.mrb[20].mxu1 %vm1211_vm1, %v1694_v56 }
 0x41d   : > { %6173 = vmatprep.mubr.msk.bf16.mxu1 %vm1211_vm1, %v1696_v40  ;;  %v8457_v40 = vunpack.c.l.bf16 %v5791_v46 }
 0x41f   : > { %v8402_v60 = vpop.permute.xlu0 %1992  ;;  %v8404_v61 = vpop.permute.xlu1 %1986 }
 0x423   : > { %v8406_v62 = vpop.permute.xlu0 %1996  ;;  %v8408_v63 = vpop.permute.xlu1 %1990 }
 0x424   : > { %6174 = vmatmul.mubr.msk.bf16.gmra.mrb[24].mxu1 %vm1211_vm1, %v1698_v47 }
 0x425   : > { %6177 = vmatprep.mubr.msk.bf16.mxu1 %vm1211_vm1, %v1700_v54  ;;  %v8459_v54 = vunpack.c.h.bf16 %v5822_v43 }
 0x427   : > { %v8412_v0 = vpop.permute.xlu0 %2315  ;;  %v8414_v1 = vpop.permute.xlu1 %1994 }
 0x42b   : > { %v8416_v2 = vpop.permute.xlu0 %2319  ;;  %v8418_v3 = vpop.permute.xlu1 %1998 }
 0x42c   : > { %6178 = vmatmul.mubr.msk.bf16.gmra.mrb[28].mxu1 %vm1211_vm1, %v1702_v59  ;;  %v8461_v59 = vunpack.c.h.bf16 %v5791_v46 }
 0x42f   : > { %v8421_v4 = vpop.permute.xlu0 %2323  ;;  %v8423_v5 = vpop.permute.xlu1 %2317 }
 0x433   : > { %v8425_v6 = vpop.permute.xlu0 %2327  ;;  %v8427_v7 = vpop.permute.xlu1 %2321 }
 0x437   : > { %v8429_v8 = vpop.permute.xlu0 %2299  ;;  %v8431_v9 = vpop.permute.xlu1 %2325 }
 0x43b   : > { %v8433_v10 = vpop.permute.xlu0 %2303  ;;  %v8435_v11 = vpop.permute.xlu1 %2329 }
 0x43f   : > { %v8437_v12 = vpop.permute.xlu0 %2307  ;;  %v8439_v13 = vpop.permute.xlu1 %2301 }
 0x443   : > { %v8441_v14 = vpop.permute.xlu0 %2311  ;;  %v8443_v15 = vpop.permute.xlu1 %2305 }
 0x447   : > { %v2581_v16 = vpop.permute.xlu0 %2580 }
 0x448   : > { %v8445_v17 = vpop.permute.xlu1 %2309  ;;  %6245 = vmatprep.subr.bf16.mxu1 %v2581_v16 }
 0x449   : > { %6246 = vmatpush3.bf16.msra.mxu1 %v2581_v16 }
 0x44b   : > { %v2585_v20 = vpop.permute.xlu0 %2584 }
 0x44c   : > { %v8447_v18 = vpop.permute.xlu1 %2313 }
 0x44f   : > { %v2589_v22 = vpop.permute.xlu0 %2588 }
 0x450   : > { %v2583_v19 = vpop.permute.xlu1 %2582 }
 0x451   : > { %6247 = vmatprep.subr.bf16.mxu1 %v2583_v19 }
 0x452   : > { %6248 = vmatpush3.bf16.msra.mxu1 %v2583_v19 }
 0x453   : > { %6249 = vmatprep.subr.bf16.mxu1 %v2585_v20  ;;  %v2593_v24 = vpop.permute.xlu0 %2592 }
 0x454   : > { %v2587_v21 = vpop.permute.xlu1 %2586 }
 0x456   : > { %6250 = vmatpush3.bf16.msra.mxu1 %v2585_v20 }
 0x457   : > { %6251 = vmatprep.subr.bf16.mxu1 %v2587_v21  ;;  %v8449_v26 = vpop.permute.xlu0 %2911 }
 0x458   : > { %v2591_v23 = vpop.permute.xlu1 %2590 }
 0x45a   : > { %6252 = vmatpush3.bf16.msra.mxu1 %v2587_v21 }
 0x45b   : > { %6253 = vmatprep.subr.bf16.mxu1 %v2589_v22 }
 0x45c   : > { %v2595_v25 = vpop.permute.xlu1 %2594 }
 0x45e   : > { %6254 = vmatpush3.bf16.msra.mxu1 %v2589_v22 }
 0x45f   : > { %6255 = vmatprep.subr.bf16.mxu1 %v2591_v23 }
 0x462   : > { %6256 = vmatpush3.bf16.msra.mxu1 %v2591_v23 }
 0x463   : > { %6257 = vmatprep.subr.bf16.mxu1 %v2593_v24 }
 0x466   : > { %6258 = vmatpush3.bf16.msra.mxu1 %v2593_v24 }
 0x467   : > { %6259 = vmatprep.subr.bf16.mxu1 %v2595_v25 }
 0x46a   : > { %6260 = vmatpush3.bf16.msra.mxu1 %v2595_v25  ;;  %v5824_v25 = vld [vmem:[%s8043_s21 + $0x18] sm:$0xff]  }
 0x46b   : > { %6429 = vmatprep.subr.msk.bf16.mxu1 %vm1211_vm1, %v8449_v26 }
 0x475   : > { %v6103_v27 = vpop.f32.mrb[0].mxu1 }
 0x476   : > { %v5648_v28 = vclamps-f32 %v6103_v27, 5.0  ;;  %v1294_v29 = vpop.f32.mrb[1].mxu1 }
 0x477   : > { %v5646_v30 = vclamps-f32 %v1294_v29, 5.0  ;;  %v6104_v31 = vpop.f32.mrb[2].mxu1 }
 0x478   : > { %v1393_v32 = vmul.f32 1.442695, %v5648_v28  ;;  %v5649_v33 = vclamps-f32 %v6104_v31, 5.0  ;;  %v1297_v35 = vpop.f32.mrb[3].mxu1  ;;  %v5823_v31 = vld [vmem:[%s8043_s21 + $0x10] sm:$0xff]  }
 0x479   : > { %v1389_v36 = vmul.f32 1.442695, %v5646_v30  ;;  %v5647_v37 = vclamps-f32 %v1297_v35, 5.0 }
 0x47a   : > { %6671 = vpow2.f32 %v1393_v32  ;;  %v1395_v39 = vmul.f32 1.442695, %v5649_v33 }
 0x47b   : > { %6673 = vpow2.f32 %v1389_v36  ;;  %v1391_v41 = vmul.f32 1.442695, %v5647_v37 }
 0x47c   : > { %6675 = vpow2.f32 %v1395_v39 }
 0x47d   : > { %6677 = vpow2.f32 %v1391_v41  ;;  %v6107_v42 = vpop.f32.mrb[4].mxu1 }
 0x47e   : > { %v5652_v44 = vclamps-f32 %v6107_v42, 5.0  ;;  %v1310_v38 = vpop.f32.mrb[5].mxu1  ;;  %v8469_v42 = vunpack.c.l.bf16 %v5824_v25 }
 0x47f   : > { %v5650_v45 = vclamps-f32 %v1310_v38, 5.0  ;;  %v6108_v48 = vpop.f32.mrb[6].mxu1  ;;  %v8471_v38 = vunpack.c.l.bf16 %v5823_v31 }
 0x480   : > { %v1401_v34 = vmul.f32 1.442695, %v5652_v44  ;;  %v5653_v49 = vclamps-f32 %v6108_v48, 5.0  ;;  %v1313_v50 = vpop.f32.mrb[7].mxu1 }
 0x481   : > { %v1397_v52 = vmul.f32 1.442695, %v5650_v45  ;;  %v5651_v53 = vclamps-f32 %v1313_v50, 5.0  ;;  %v8473_v45 = vunpack.c.h.bf16 %v5824_v25 }
 0x482   : > { %6679 = vpow2.f32 %v1401_v34  ;;  %v1403_v55 = vmul.f32 1.442695, %v5653_v49  ;;  %v8475_v34 = vunpack.c.h.bf16 %v5823_v31 }
 0x483   : > { %6681 = vpow2.f32 %v1397_v52  ;;  %v1399_v56 = vmul.f32 1.442695, %v5651_v53 }
 0x484   : > { %v6672_v47 = vpop.eup %6671  ;;  %6683 = vpow2.f32 %v1403_v55 }
 0x485   : > { %v6674_v16 = vpop.eup %6673  ;;  %v1423_v19 = vmul.f32 %v6672_v47, %v8455_v51  ;;  %6685 = vpow2.f32 %v1399_v56  ;;  %v6111_v20 = vpop.f32.mrb[8].mxu1 }
 0x486   : > { %v6676_v21 = vpop.eup %6675  ;;  %v1421_v22 = vmul.f32 %v6674_v16, %v8457_v40  ;;  %v5656_v23 = vclamps-f32 %v6111_v20, 5.0  ;;  %v1326_v24 = vpop.f32.mrb[9].mxu1  ;;  %v5826_v16 = vld [vmem:[%s8043_s21 + $0x28] sm:$0xff]  }
 0x487   : > { %v6678_v27 = vpop.eup %6677  ;;  %v1424_v28 = vmul.f32 %v6676_v21, %v8459_v54  ;;  %1610 = vadd.xlane.f32.xlu0 %v1423_v19  ;;  %v5654_v29 = vclamps-f32 %v1326_v24, 5.0  ;;  %v6112_v30 = vpop.f32.mrb[10].mxu1 }
 0x488   : > { %v1422_v32 = vmul.f32 %v6678_v27, %v8461_v59  ;;  %v1409_v33 = vmul.f32 1.442695, %v5656_v23  ;;  %v5657_v35 = vclamps-f32 %v6112_v30, 5.0  ;;  %v1329_v36 = vpop.f32.mrb[11].mxu1  ;;  %v5825_v23 = vld [vmem:[%s8043_s21 + $0x20] sm:$0xff]  }
 0x489   : > { %v1454_v37 = vpack.c.bf16 %v1424_v28, %v1423_v19  ;;  %v1405_v39 = vmul.f32 1.442695, %v5654_v29  ;;  %v5655_v41 = vclamps-f32 %v1329_v36, 5.0 }
 0x48a   : > { %v1453_v43 = vpack.c.bf16 %v1422_v32, %v1421_v22  ;;  %1608 = vadd.xlane.f32.xlu1 %v1422_v32  ;;  %6687 = vpow2.f32 %v1409_v33  ;;  %v1411_v44 = vmul.f32 1.442695, %v5657_v35  ;;  %v8485_v32 = vunpack.c.l.bf16 %v5826_v16 }
 0x48b   : > { %1606 = vadd.xlane.f32.xlu0 %v1421_v22  ;;  %6689 = vpow2.f32 %v1405_v39  ;;  %v1407_v46 = vmul.f32 1.442695, %v5655_v41  ;;  %v8488_v35 = vunpack.c.l.bf16 %v5825_v23  ;;  %v8493_v41 = vunpack.c.h.bf16 %v5825_v23 }
 0x48c   : > { %v6680_v48 = vpop.eup %6679  ;;  %6133 = vmatprep.mubr.bf16.mxu0 %v1453_v43  ;;  %6691 = vpow2.f32 %v1411_v44 }
 0x48d   : > { %v6682_v49 = vpop.eup %6681  ;;  %6134 = vmatmul.mubr.bf16.vlgmr.msra.gmra.mrb[32].mxu0 %v1454_v37  ;;  %6693 = vpow2.f32 %v1407_v46  ;;  %v6115_v50 = vpop.f32.mrb[12].mxu1  ;;  %v1427_v52 = vmul.f32 %v6680_v48, %v8469_v42  ;;  %v8491_v37 = vunpack.c.h.bf16 %v5826_v16  ;;  %v5828_v48 = vld [vmem:[%s8043_s21 + $0x38] sm:$0xff]  }
 0x48e   : > { %v6684_v53 = vpop.eup %6683  ;;  %6182 = vmatpush3.bf16.msra.mxu0 %v8393_v57  ;;  %v5660_v55 = vclamps-f32 %v6115_v50, 5.0  ;;  %v1342_v56 = vpop.f32.mrb[13].mxu1  ;;  %v1425_v47 = vmul.f32 %v6682_v49, %v8471_v38  ;;  %v8509_v16 = vunpack.c.h.bf16 %v5828_v48 }
 0x48f   : > { %v6686_v19 = vpop.eup %6685  ;;  %6183 = vmatprep.subr.bf16.mxu0 %v8404_v61  ;;  %1612 = vadd.xlane.f32.xlu0 %v1424_v28  ;;  %v5658_v20 = vclamps-f32 %v1342_v56, 5.0  ;;  %v6116_v21 = vpop.f32.mrb[14].mxu1  ;;  %v1428_v22 = vmul.f32 %v6684_v53, %v8473_v45  ;;  %v8503_v56 = vunpack.c.l.bf16 %v5828_v48 }
 0x490   : > { %v1417_v24 = vmul.f32 1.442695, %v5660_v55  ;;  %v5661_v25 = vclamps-f32 %v6116_v21, 5.0  ;;  %v1345_v27 = vpop.f32.mrb[15].mxu1  ;;  %1618 = vadd.xlane.f32.xlu1 %v1427_v52  ;;  %v1426_v57 = vmul.f32 %v6686_v19, %v8475_v34 }
 0x491   : > { %v1413_v29 = vmul.f32 1.442695, %v5658_v20  ;;  %v5659_v30 = vclamps-f32 %v1345_v27, 5.0  ;;  %v1456_v31 = vpack.c.bf16 %v1428_v22, %v1427_v52  ;;  %v5827_v52 = vld [vmem:[%s8043_s21 + $0x30] sm:$0xff]  }
 0x492   : > { %6184 = vmatpush3.bf16.msra.mxu0 %v8404_v61  ;;  %6695 = vpow2.f32 %v1417_v24  ;;  %v1419_v28 = vmul.f32 1.442695, %v5661_v25  ;;  %v1455_v33 = vpack.c.bf16 %v1426_v57, %v1425_v47  ;;  %v8511_v20 = vunpack.c.h.bf16 %v5827_v52 }
 0x493   : > { %6185 = vmatprep.subr.bf16.mxu0 %v8398_v58  ;;  %6697 = vpow2.f32 %v1413_v29  ;;  %v1415_v36 = vmul.f32 1.442695, %v5659_v30  ;;  %1620 = vadd.xlane.f32.xlu0 %v1428_v22 }
 0x494   : > { %v6688_v39 = vpop.eup %6687  ;;  %6699 = vpow2.f32 %v1419_v28  ;;  %6137 = vmatprep.mubr.bf16.mxu0 %v1455_v33  ;;  %1614 = vadd.xlane.f32.xlu1 %v1425_v47 }
 0x495   : > { %v6690_v61 = vpop.eup %6689  ;;  %6701 = vpow2.f32 %v1415_v36  ;;  %6138 = vmatmul.mubr.bf16.gmra.mrb[36].mxu0 %v1456_v31  ;;  %v1431_v43 = vmul.f32 %v6688_v39, %v8485_v32 }
 0x496   : > { %v6692_v44 = vpop.eup %6691  ;;  %6186 = vmatpush3.bf16.msra.mxu0 %v8398_v58  ;;  %v1429_v46 = vmul.f32 %v6690_v61, %v8488_v35  ;;  %v8506_v58 = vunpack.c.l.bf16 %v5827_v52 }
 0x497   : > { %v6694_v49 = vpop.eup %6693  ;;  %6187 = vmatprep.subr.bf16.mxu0 %v8408_v63  ;;  %1616 = vadd.xlane.f32.xlu0 %v1426_v57  ;;  %v1432_v50 = vmul.f32 %v6692_v44, %v8491_v37 }
 0x498   : > { %1626 = vadd.xlane.f32.xlu1 %v1431_v43  ;;  %v1430_v53 = vmul.f32 %v6694_v49, %v8493_v41 }
 0x499   : > { %v1458_v55 = vpack.c.bf16 %v1432_v50, %v1431_v43 }
 0x49a   : > { %6188 = vmatpush3.bf16.msra.mxu0 %v8408_v63  ;;  %v1457_v47 = vpack.c.bf16 %v1430_v53, %v1429_v46 }
 0x49b   : > { %6189 = vmatprep.subr.bf16.mxu0 %v8402_v60  ;;  %1628 = vadd.xlane.f32.xlu0 %v1432_v50 }
 0x49c   : > { %v6696_v19 = vpop.eup %6695  ;;  %6141 = vmatprep.mubr.bf16.mxu0 %v1457_v47  ;;  %1622 = vadd.xlane.f32.xlu1 %v1429_v46 }
 0x49d   : > { %v6698_v21 = vpop.eup %6697  ;;  %6142 = vmatmul.mubr.bf16.gmra.mrb[40].mxu0 %v1458_v55  ;;  %v1435_v22 = vmul.f32 %v6696_v19, %v8503_v56 }
 0x49e   : > { %v6700_v23 = vpop.eup %6699  ;;  %6190 = vmatpush3.bf16.msra.mxu0 %v8402_v60  ;;  %v1433_v63 = vmul.f32 %v6698_v21, %v8506_v58  ;;  %v8526_v60 = vpop.permute.xlu1 %2913 }
 0x49f   : > { %v6702_v24 = vpop.eup %6701  ;;  %6191 = vmatprep.subr.bf16.mxu0 %v8414_v1  ;;  %1624 = vadd.xlane.f32.xlu0 %v1430_v53  ;;  %v1436_v25 = vmul.f32 %v6700_v23, %v8509_v16 }
 0x4a0   : > { %1634 = vadd.xlane.f32.xlu1 %v1435_v22  ;;  %v1434_v27 = vmul.f32 %v6702_v24, %v8511_v20 }
 0x4a1   : > { %v1460_v57 = vpack.c.bf16 %v1436_v25, %v1435_v22 }
 0x4a2   : > { %6192 = vmatpush3.bf16.msra.mxu0 %v8414_v1  ;;  %v1459_v29 = vpack.c.bf16 %v1434_v27, %v1433_v63  ;;  %v8528_v1 = vpop.permute.xlu0 %2915  ;;  %v8530_v30 = vpop.permute.xlu1 %2917 }
 0x4a3   : > { %6193 = vmatprep.subr.bf16.mxu0 %v8406_v62  ;;  %1636 = vadd.xlane.f32.xlu0 %v1436_v25 }
 0x4a4   : > { %6145 = vmatprep.mubr.bf16.mxu0 %v1459_v29  ;;  %1630 = vadd.xlane.f32.xlu1 %v1433_v63 }
 0x4a5   : > { %6146 = vmatmul.mubr.bf16.gmra.mrb[44].mxu0 %v1460_v57 }
 0x4a6   : > { %6194 = vmatpush3.bf16.msra.mxu0 %v8406_v62  ;;  %v8532_v31 = vpop.permute.xlu0 %2919  ;;  %v8534_v28 = vpop.permute.xlu1 %2921 }
 0x4a7   : > { %6195 = vmatprep.subr.bf16.mxu0 %v8418_v3  ;;  %1632 = vadd.xlane.f32.xlu0 %v1434_v27 }
 0x4aa   : > { %6196 = vmatpush3.bf16.msra.mxu0 %v8418_v3  ;;  %v8536_v33 = vpop.permute.xlu0 %2923  ;;  %v8538_v62 = vpop.permute.xlu1 %2925 }
 0x4ab   : > { %6421 = vmatprep.subr.msk.bf16.mxu0 %vm1211_vm1, %v8412_v0 }
 0x4ae   : > { %v8540_v36 = vpop.permute.xlu0 %2895  ;;  %v8542_v43 = vpop.permute.xlu1 %2897 }
 0x4b2   : > { %v8544_v55 = vpop.permute.xlu0 %2899  ;;  %v8546_v21 = vpop.permute.xlu1 %2901 }
 0x4b3   : > { %9825 = vst [vmem:[#allocation39_spill] sm:$0xff] %v8546_v21 }
 0x4b6   : > { %v8548_v27 = vpop.permute.xlu0 %2903 }
 0x4b7   : > { %9826 = vst [vmem:[#allocation40_spill] sm:$0xff] %v8548_v27 }
 0x4e7   : > { %v6167_v3 = vpop.f32.mrb[16].mxu1 }
 0x4e8   : > { %v5672_v39 = vclamps-f32 %v6167_v3, 5.0  ;;  %v1809_v61 = vpop.f32.mrb[17].mxu1 }
 0x4e9   : > { %v5670_v44 = vclamps-f32 %v1809_v61, 5.0  ;;  %v6168_v46 = vpop.f32.mrb[18].mxu1 }
 0x4ea   : > { %v1908_v48 = vmul.f32 1.442695, %v5672_v39  ;;  %v5673_v49 = vclamps-f32 %v6168_v46, 5.0  ;;  %v1812_v50 = vpop.f32.mrb[19].mxu1  ;;  %v8550_v46 = vpop.permute.xlu1 %2905 }
 0x4eb   : > { %v1904_v52 = vmul.f32 1.442695, %v5670_v44  ;;  %v5671_v53 = vclamps-f32 %v1812_v50, 5.0  ;;  %9827 = vst [vmem:[#allocation41_spill] sm:$0xff] %v8550_v46 }
 0x4ec   : > { %6703 = vpow2.f32 %v1908_v48  ;;  %v1910_v47 = vmul.f32 1.442695, %v5673_v49 }
 0x4ed   : > { %6705 = vpow2.f32 %v1904_v52  ;;  %v1906_v19 = vmul.f32 1.442695, %v5671_v53 }
 0x4ee   : > { %6707 = vpow2.f32 %v1910_v47 }
 0x4ef   : > { %6709 = vpow2.f32 %v1906_v19  ;;  %v6171_v22 = vpop.f32.mrb[20].mxu1  ;;  %v8553_v19 = vpop.permute.xlu0 %2907 }
 0x4f0   : > { %v5676_v23 = vclamps-f32 %v6171_v22, 5.0  ;;  %v1825_v63 = vpop.f32.mrb[21].mxu1  ;;  %9828 = vst [vmem:[#allocation42_spill] sm:$0xff] %v8553_v19 }
 0x4f1   : > { %v5674_v24 = vclamps-f32 %v1825_v63, 5.0  ;;  %v6172_v25 = vpop.f32.mrb[22].mxu1 }
 0x4f2   : > { %v1916_v57 = vmul.f32 1.442695, %v5676_v23  ;;  %v5677_v29 = vclamps-f32 %v6172_v25, 5.0  ;;  %v1828_v3 = vpop.f32.mrb[23].mxu1 }
 0x4f3   : > { %v1912_v39 = vmul.f32 1.442695, %v5674_v24  ;;  %v5675_v61 = vclamps-f32 %v1828_v3, 5.0 }
 0x4f4   : > { %6711 = vpow2.f32 %v1916_v57  ;;  %v1918_v44 = vmul.f32 1.442695, %v5677_v29 }
 0x4f5   : > { %6713 = vpow2.f32 %v1912_v39  ;;  %v1914_v48 = vmul.f32 1.442695, %v5675_v61 }
 0x4f6   : > { %v6704_v49 = vpop.eup %6703  ;;  %6715 = vpow2.f32 %v1918_v44 }
 0x4f7   : > { %v6706_v50 = vpop.eup %6705  ;;  %6717 = vpow2.f32 %v1914_v48  ;;  %v6175_v52 = vpop.f32.mrb[24].mxu1  ;;  %v1938_v53 = vmul.f32 %v6704_v49, %v8455_v51 }
 0x4f8   : > { %v6708_v47 = vpop.eup %6707  ;;  %v5680_v22 = vclamps-f32 %v6175_v52, 5.0  ;;  %v1841_v23 = vpop.f32.mrb[25].mxu1  ;;  %v1936_v44 = vmul.f32 %v6706_v50, %v8457_v40 }
 0x4f9   : > { %v6710_v63 = vpop.eup %6709  ;;  %v5678_v24 = vclamps-f32 %v1841_v23, 5.0  ;;  %v6176_v25 = vpop.f32.mrb[26].mxu1  ;;  %v1939_v57 = vmul.f32 %v6708_v47, %v8459_v54  ;;  %2222 = vadd.xlane.f32.xlu0 %v1938_v53 }
 0x4fa   : > { %v1924_v29 = vmul.f32 1.442695, %v5680_v22  ;;  %v5681_v3 = vclamps-f32 %v6176_v25, 5.0  ;;  %v1844_v39 = vpop.f32.mrb[27].mxu1  ;;  %v1937_v61 = vmul.f32 %v6710_v63, %v8461_v59  ;;  %v8558_v48 = vpop.permute.xlu1 %2909 }
 0x4fb   : > { %9829 = vst [vmem:[#allocation43_spill] sm:$0xff] %v8558_v48  ;;  %v1920_v49 = vmul.f32 1.442695, %v5678_v24  ;;  %v1969_v46 = vpack.c.bf16 %v1939_v57, %v1938_v53  ;;  %v5679_v19 = vclamps-f32 %v1844_v39, 5.0  ;;  %v8560_v22 = vpop.permute.xlu0 %3176  ;;  %v2356_v53 = vsel %vm1211_vm1, %v8412_v0, 0 }
 0x4fc   : > { %6719 = vpow2.f32 %v1924_v29  ;;  %v1926_v52 = vmul.f32 1.442695, %v5681_v3  ;;  %2220 = vadd.xlane.f32.xlu1 %v1937_v61  ;;  %v1968_v23 = vpack.c.bf16 %v1937_v61, %v1936_v44 }
 0x4fd   : > { %6721 = vpow2.f32 %v1920_v49  ;;  %v1922_v27 = vmul.f32 1.442695, %v5679_v19  ;;  %2218 = vadd.xlane.f32.xlu0 %v1936_v44 }
 0x4fe   : > { %v6712_v47 = vpop.eup %6711  ;;  %6723 = vpow2.f32 %v1926_v52  ;;  %6197 = vmatprep.mubr.bf16.mxu0 %v1968_v23  ;;  %v8566_v61 = vpop.permute.xlu1 %3178 }
 0x4ff   : > { %v6714_v63 = vpop.eup %6713  ;;  %6725 = vpow2.f32 %v1922_v27  ;;  %v6179_v50 = vpop.f32.mrb[28].mxu1  ;;  %6198 = vmatmul.mubr.bf16.vlgmr.msra.gmra.mrb[48].mxu0 %v1969_v46  ;;  %v1942_v24 = vmul.f32 %v6712_v47, %v8469_v42 }
 0x500   : > { %v6716_v25 = vpop.eup %6715  ;;  %v5684_v29 = vclamps-f32 %v6179_v50, 5.0  ;;  %6214 = vmatpush3.bf16.xpose.msra.mxu0 %v2356_v53  ;;  %v1857_v3 = vpop.f32.mrb[29].mxu1  ;;  %v1940_v19 = vmul.f32 %v6714_v63, %v8471_v38 }
 0x501   : > { %v6718_v39 = vpop.eup %6717  ;;  %v5682_v44 = vclamps-f32 %v1857_v3, 5.0  ;;  %6422 = vmatprep.subr.msk.bf16.mxu0 %vm1211_vm1, %v8423_v5  ;;  %v6180_v27 = vpop.f32.mrb[30].mxu1  ;;  %2224 = vadd.xlane.f32.xlu0 %v1939_v57  ;;  %v1943_v46 = vmul.f32 %v6716_v25, %v8473_v45 }
 0x502   : > { %v1932_v0 = vmul.f32 1.442695, %v5684_v29  ;;  %v5685_v49 = vclamps-f32 %v6180_v27, 5.0  ;;  %2230 = vadd.xlane.f32.xlu1 %v1942_v24  ;;  %v1860_v52 = vpop.f32.mrb[31].mxu1  ;;  %v1941_v23 = vmul.f32 %v6718_v39, %v8475_v34  ;;  %v8572_v53 = vpop.permute.xlu0 %3180 }
 0x503   : > { %v1928_v47 = vmul.f32 1.442695, %v5682_v44  ;;  %v5683_v50 = vclamps-f32 %v1860_v52, 5.0  ;;  %v1971_v63 = vpack.c.bf16 %v1943_v46, %v1942_v24  ;;  %v8574_v29 = vpop.permute.xlu1 %3182  ;;  %v2359_v24 = vsel %vm1211_vm1, %v8423_v5, 0 }
 0x504   : > { %6727 = vpow2.f32 %v1932_v0  ;;  %v1934_v3 = vmul.f32 1.442695, %v5685_v49  ;;  %v1970_v48 = vpack.c.bf16 %v1941_v23, %v1940_v19 }
 0x505   : > { %6729 = vpow2.f32 %v1928_v47  ;;  %v1930_v21 = vmul.f32 1.442695, %v5683_v50  ;;  %2232 = vadd.xlane.f32.xlu0 %v1943_v46 }
 0x506   : > { %v6720_v57 = vpop.eup %6719  ;;  %6731 = vpow2.f32 %v1934_v3  ;;  %2226 = vadd.xlane.f32.xlu1 %v1940_v19  ;;  %6201 = vmatprep.mubr.bf16.mxu0 %v1970_v48  ;;  %v8583_v19 = vpop.permute.xlu0 %3184 }
 0x507   : > { %v6722_v25 = vpop.eup %6721  ;;  %6733 = vpow2.f32 %v1930_v21  ;;  %6202 = vmatmul.mubr.bf16.gmra.mrb[52].mxu0 %v1971_v63  ;;  %v1946_v39 = vmul.f32 %v6720_v57, %v8485_v32  ;;  %v8586_v49 = vpop.permute.xlu1 %3186 }
 0x508   : > { %v6724_v44 = vpop.eup %6723  ;;  %6216 = vmatpush3.bf16.xpose.msra.mxu0 %v2359_v24  ;;  %v1944_v27 = vmul.f32 %v6722_v25, %v8488_v35 }
 0x509   : > { %v6726_v0 = vpop.eup %6725  ;;  %6423 = vmatprep.subr.msk.bf16.mxu0 %vm1211_vm1, %v8416_v2  ;;  %2228 = vadd.xlane.f32.xlu0 %v1941_v23  ;;  %v1947_v48 = vmul.f32 %v6724_v44, %v8491_v37  ;;  %v2362_v23 = vsel %vm1211_vm1, %v8416_v2, 0  ;;  %v1592_v44 = vld [vmem:[#allocation4 + $0x10] sm:$0xff] }
 0x50a   : > { %2238 = vadd.xlane.f32.xlu1 %v1946_v39  ;;  %v1945_v21 = vmul.f32 %v6726_v0, %v8493_v41  ;;  %v8591_v3 = vpop.permute.xlu0 %3188 }
 0x50b   : > { %v1973_v46 = vpack.c.bf16 %v1947_v48, %v1946_v39  ;;  %v8598_v2 = vpop.permute.xlu1 %3190 }
 0x50c   : > { %v1972_v5 = vpack.c.bf16 %v1945_v21, %v1944_v27 }
 0x50d   : > { %2240 = vadd.xlane.f32.xlu0 %v1947_v48 }
 0x50e   : > { %v6728_v52 = vpop.eup %6727  ;;  %2234 = vadd.xlane.f32.xlu1 %v1944_v27  ;;  %6205 = vmatprep.mubr.bf16.mxu0 %v1972_v5  ;;  %v1591_v5 = vld [vmem:[#allocation4 + $0x8] sm:$0xff] }
 0x50f   : > { %v6730_v47 = vpop.eup %6729  ;;  %6206 = vmatmul.mubr.bf16.gmra.mrb[56].mxu0 %v1973_v46  ;;  %v1950_v50 = vmul.f32 %v6728_v52, %v8503_v56  ;;  %v1590_v52 = vld [vmem:[#allocation4] sm:$0xff] }
 0x510   : > { %v6732_v63 = vpop.eup %6731  ;;  %6218 = vmatpush3.bf16.xpose.msra.mxu0 %v2362_v23  ;;  %v1948_v57 = vmul.f32 %v6730_v47, %v8506_v58 }
 0x511   : > { %v6734_v25 = vpop.eup %6733  ;;  %6424 = vmatprep.subr.msk.bf16.mxu0 %vm1211_vm1, %v8427_v7  ;;  %2236 = vadd.xlane.f32.xlu0 %v1945_v21  ;;  %v1951_v24 = vmul.f32 %v6732_v63, %v8509_v16  ;;  %v2365_v21 = vsel %vm1211_vm1, %v8427_v7, 0  ;;  %v1596_v7 = vld [vmem:[#allocation4 + $0x30] sm:$0xff] }
 0x512   : > { %2246 = vadd.xlane.f32.xlu1 %v1950_v50  ;;  %v1949_v39 = vmul.f32 %v6734_v25, %v8511_v20 }
 0x513   : > { %v1975_v27 = vpack.c.bf16 %v1951_v24, %v1950_v50 }
 0x514   : > { %v1974_v0 = vpack.c.bf16 %v1949_v39, %v1948_v57  ;;  %v1611_v48 = vpop.xlane.xlu0 %1610 }
 0x515   : > { %2248 = vadd.xlane.f32.xlu0 %v1951_v24  ;;  %v1640_v46 = vadd.f32 %v1611_v48, %v1592_v44  ;;  %v1594_v48 = vld [vmem:[#allocation4 + $0x20] sm:$0xff] }
 0x516   : > { %2242 = vadd.xlane.f32.xlu1 %v1948_v57  ;;  %6209 = vmatprep.mubr.bf16.mxu0 %v1974_v0  ;;  %v1593_v57 = vld [vmem:[#allocation4 + $0x18] sm:$0xff] }
 0x517   : > { %6210 = vmatmul.mubr.bf16.gmra.mrb[60].mxu0 %v1975_v27  ;;  %1657 = vst.msk [vmem:[#allocation4 + $0x10] sm:$0xff] %vm1654_vm2, %v1640_v46  ;;  %v1609_v47 = vpop.xlane.xlu1 %1608  ;;  %v1597_v27 = vld [vmem:[#allocation4 + $0x38] sm:$0xff] }
 0x518   : > { %6220 = vmatpush3.bf16.xpose.msra.mxu0 %v2365_v21  ;;  %6229 = vmatprep.mubr.msk.bf16.mxu0 %vm1211_vm1, %v8429_v8  ;;  %v1607_v23 = vpop.xlane.xlu0 %1606  ;;  %v1639_v50 = vadd.f32 %v1609_v47, %v1591_v5  ;;  %v2368_v8 = vsel %vm1211_vm1, %v8421_v4, 0  ;;  %v1600_v47 = vld [vmem:[#allocation4 + $0x50] sm:$0xff] }
 0x519   : > { %6425 = vmatprep.subr.msk.bf16.mxu0 %vm1211_vm1, %v8421_v4  ;;  %2244 = vadd.xlane.f32.xlu0 %v1949_v39  ;;  %v1638_v63 = vadd.f32 %v1607_v23, %v1590_v52  ;;  %v1595_v52 = vld [vmem:[#allocation4 + $0x28] sm:$0xff] }
 0x51a   : > { %1656 = vst.msk [vmem:[#allocation4 + $0x8] sm:$0xff] %vm1654_vm2, %v1639_v50 }
 0x51b   : > { %1655 = vst.msk [vmem:[#allocation4] sm:$0xff] %vm1654_vm2, %v1638_v63  ;;  %v1601_v63 = vld [vmem:[#allocation4 + $0x58] sm:$0xff] }
 0x51c   : > { %v1613_v25 = vpop.xlane.xlu0 %1612 }
 0x51d   : > { %v1641_v24 = vadd.f32 %v1613_v25, %v1593_v57  ;;  %v1619_v44 = vpop.xlane.xlu1 %1618  ;;  %v1598_v25 = vld [vmem:[#allocation4 + $0x40] sm:$0xff] }
 0x51e   : > { %v1644_v0 = vadd.f32 %v1619_v44, %v1596_v7  ;;  %v2371_v7 = vsel %vm1211_vm1, %v8431_v9, 0 }
 0x51f   : > { %1658 = vst.msk [vmem:[#allocation4 + $0x18] sm:$0xff] %vm1654_vm2, %v1641_v24 }
 0x520   : > { %6222 = vmatpush3.bf16.xpose.msra.mxu0 %v2368_v8  ;;  %v1621_v39 = vpop.xlane.xlu0 %1620  ;;  %1661 = vst.msk [vmem:[#allocation4 + $0x30] sm:$0xff] %vm1654_vm2, %v1644_v0  ;;  %v1599_v0 = vld [vmem:[#allocation4 + $0x48] sm:$0xff] }
 0x521   : > { %6426 = vmatprep.subr.msk.bf16.mxu0 %vm1211_vm1, %v8431_v9  ;;  %v1645_v46 = vadd.f32 %v1621_v39, %v1597_v27  ;;  %v1615_v5 = vpop.xlane.xlu1 %1614 }
 0x522   : > { %v1642_v21 = vadd.f32 %v1615_v5, %v1594_v48  ;;  %v1604_v48 = vld [vmem:[#allocation4 + $0x70] sm:$0xff]  ;;  %v1605_v5 = vld [vmem:[#allocation4 + $0x78] sm:$0xff] }
 0x523   : > { %1662 = vst.msk [vmem:[#allocation4 + $0x38] sm:$0xff] %vm1654_vm2, %v1645_v46 }
 0x524   : > { %v1617_v23 = vpop.xlane.xlu0 %1616  ;;  %1659 = vst.msk [vmem:[#allocation4 + $0x20] sm:$0xff] %vm1654_vm2, %v1642_v21  ;;  %v2374_v21 = vsel %vm1211_vm1, %v8425_v6, 0 }
 0x525   : > { %v1643_v4 = vadd.f32 %v1617_v23, %v1595_v52  ;;  %v1627_v50 = vpop.xlane.xlu1 %1626 }
 0x526   : > { %v1648_v57 = vadd.f32 %v1627_v50, %v1600_v47  ;;  %v1602_v47 = vld [vmem:[#allocation4 + $0x60] sm:$0xff] }
 0x527   : > { %1660 = vst.msk [vmem:[#allocation4 + $0x28] sm:$0xff] %vm1654_vm2, %v1643_v4 }
 0x528   : > { %6224 = vmatpush3.bf16.xpose.msra.mxu0 %v2371_v7  ;;  %v1629_v24 = vpop.xlane.xlu0 %1628  ;;  %1665 = vst.msk [vmem:[#allocation4 + $0x50] sm:$0xff] %vm1654_vm2, %v1648_v57 }
 0x529   : > { %6427 = vmatprep.subr.msk.bf16.mxu0 %vm1211_vm1, %v8425_v6  ;;  %v1649_v44 = vadd.f32 %v1629_v24, %v1601_v63  ;;  %v1623_v27 = vpop.xlane.xlu1 %1622  ;;  %v1603_v63 = vld [vmem:[#allocation4 + $0x68] sm:$0xff] }
 0x52a   : > { %v1646_v8 = vadd.f32 %v1623_v27, %v1598_v25  ;;  %v2377_v25 = vsel %vm1211_vm1, %v8435_v11, 0  ;;  %v1442_v27 = vld [vmem:[#allocation3 + $0x28] sm:$0xff] }
 0x52b   : > { %1666 = vst.msk [vmem:[#allocation4 + $0x58] sm:$0xff] %vm1654_vm2, %v1649_v44 }
 0x52c   : > { %v1625_v39 = vpop.xlane.xlu0 %1624  ;;  %1663 = vst.msk [vmem:[#allocation4 + $0x40] sm:$0xff] %vm1654_vm2, %v1646_v8 }
 0x52d   : > { %v1647_v9 = vadd.f32 %v1625_v39, %v1599_v0  ;;  %v1635_v46 = vpop.xlane.xlu1 %1634 }
 0x52e   : > { %v1652_v52 = vadd.f32 %v1635_v46, %v1604_v48  ;;  %v1447_v46 = vld [vmem:[#allocation3 + $0x50] sm:$0xff] }
 0x52f   : > { %1664 = vst.msk [vmem:[#allocation4 + $0x48] sm:$0xff] %vm1654_vm2, %v1647_v9 }
 0x530   : > { %6226 = vmatpush3.bf16.xpose.msra.mxu0 %v2374_v21  ;;  %v1637_v23 = vpop.xlane.xlu0 %1636  ;;  %1669 = vst.msk [vmem:[#allocation4 + $0x70] sm:$0xff] %vm1654_vm2, %v1652_v52  ;;  %v1448_v21 = vld [vmem:[#allocation3 + $0x58] sm:$0xff] }
 0x531   : > { %6428 = vmatprep.subr.msk.bf16.mxu0 %vm1211_vm1, %v8435_v11  ;;  %v1653_v4 = vadd.f32 %v1637_v23, %v1605_v5  ;;  %v1631_v50 = vpop.xlane.xlu1 %1630  ;;  %v1437_v11 = vld [vmem:[#allocation3] sm:$0xff] }
 0x532   : > { %v1650_v57 = vadd.f32 %v1631_v50, %v1602_v47  ;;  %v1445_v5 = vld [vmem:[#allocation3 + $0x40] sm:$0xff] }
 0x533   : > { %1670 = vst.msk [vmem:[#allocation4 + $0x78] sm:$0xff] %vm1654_vm2, %v1653_v4  ;;  %v1446_v4 = vld [vmem:[#allocation3 + $0x48] sm:$0xff] }
 0x534   : > { %v1633_v7 = vpop.xlane.xlu0 %1632  ;;  %1667 = vst.msk [vmem:[#allocation4 + $0x60] sm:$0xff] %vm1654_vm2, %v1650_v57 }
 0x535   : > { %v1651_v6 = vadd.f32 %v1633_v7, %v1603_v63 }
 0x537   : > { %1668 = vst.msk [vmem:[#allocation4 + $0x68] sm:$0xff] %vm1654_vm2, %v1651_v6 }
 0x538   : > { %6228 = vmatpush3.bf16.xpose.msra.mxu0 %v2377_v25  ;;  %v1451_v25 = vld [vmem:[#allocation3 + $0x70] sm:$0xff] }
 0x539   : > { %6309 = vmatprep.subr.bf16.mxu0 %v8560_v22 }
 0x53f   : > { %6230 = vmatmul.mubr.msk.bf16.vlgmr.msra.gmra.mrb[64].mxu0 %vm1211_vm1, %v8439_v13  ;;  %v1440_v13 = vld [vmem:[#allocation3 + $0x18] sm:$0xff] }
 0x540   : > { %6310 = vmatpush3.bf16.msra.mxu0 %v8560_v22  ;;  %6233 = vmatprep.mubr.msk.bf16.mxu0 %vm1211_vm1, %v8433_v10  ;;  %v1439_v10 = vld [vmem:[#allocation3 + $0x10] sm:$0xff] }
 0x541   : > { %6311 = vmatprep.subr.bf16.mxu0 %v8566_v61 }
 0x544   : > { %6312 = vmatpush3.bf16.msra.mxu0 %v8566_v61 }
 0x545   : > { %6313 = vmatprep.subr.bf16.mxu0 %v8572_v53 }
 0x547   : > { %6234 = vmatmul.mubr.msk.bf16.gmra.mrb[68].mxu0 %vm1211_vm1, %v8443_v15 }
 0x548   : > { %6314 = vmatpush3.bf16.msra.mxu0 %v8572_v53  ;;  %6237 = vmatprep.mubr.msk.bf16.mxu0 %vm1211_vm1, %v8437_v12 }
 0x549   : > { %6315 = vmatprep.subr.bf16.mxu0 %v8574_v29 }
 0x54c   : > { %6316 = vmatpush3.bf16.msra.mxu0 %v8574_v29 }
 0x54d   : > { %6317 = vmatprep.subr.bf16.mxu0 %v8583_v19 }
 0x54f   : > { %6238 = vmatmul.mubr.msk.bf16.gmra.mrb[72].mxu0 %vm1211_vm1, %v8445_v17  ;;  %v1438_v17 = vld [vmem:[#allocation3 + $0x8] sm:$0xff] }
 0x550   : > { %6318 = vmatpush3.bf16.msra.mxu0 %v8583_v19  ;;  %6241 = vmatprep.mubr.msk.bf16.mxu0 %vm1211_vm1, %v8441_v14  ;;  %v1443_v19 = vld [vmem:[#allocation3 + $0x30] sm:$0xff] }
 0x551   : > { %6319 = vmatprep.subr.bf16.mxu0 %v8586_v49 }
 0x554   : > { %6320 = vmatpush3.bf16.msra.mxu0 %v8586_v49  ;;  %v1441_v49 = vld [vmem:[#allocation3 + $0x20] sm:$0xff] }
 0x555   : > { %6321 = vmatprep.subr.bf16.mxu0 %v8591_v3 }
 0x557   : > { %6242 = vmatmul.mubr.msk.bf16.gmra.mrb[76].mxu0 %vm1211_vm1, %v8447_v18 }
 0x558   : > { %6322 = vmatpush3.bf16.msra.mxu0 %v8591_v3 }
 0x559   : > { %6323 = vmatprep.subr.bf16.mxu0 %v8598_v2 }
 0x55c   : > { %6324 = vmatpush3.bf16.msra.mxu0 %v8598_v2  ;;  %v1444_v2 = vld [vmem:[#allocation3 + $0x38] sm:$0xff] }
 0x560   : > { %v6135_v12 = vpop.f32.mrb[32].mxu0 }
 0x561   : > { %v1560_v14 = vadd.f32 %v6135_v12, %v1439_v10  ;;  %v1495_v15 = vpop.f32.mrb[33].mxu0  ;;  %v1449_v10 = vld [vmem:[#allocation3 + $0x60] sm:$0xff]  ;;  %v1452_v12 = vld [vmem:[#allocation3 + $0x78] sm:$0xff] }
 0x562   : > { %v1558_v22 = vadd.f32 %v1495_v15, %v1437_v11  ;;  %v6136_v61 = vpop.f32.mrb[34].mxu0  ;;  %v1450_v15 = vld [vmem:[#allocation3 + $0x68] sm:$0xff] }
 0x563   : > { %1576 = vst.msk [vmem:[#allocation3 + $0x10] sm:$0xff] %vm1211_vm1, %v1560_v14  ;;  %v1561_v53 = vadd.f32 %v6136_v61, %v1440_v13  ;;  %v1498_v29 = vpop.f32.mrb[35].mxu0 }
 0x564   : > { %1574 = vst.msk [vmem:[#allocation3] sm:$0xff] %vm1211_vm1, %v1558_v22  ;;  %v1559_v18 = vadd.f32 %v1498_v29, %v1438_v17 }
 0x565   : > { %1577 = vst.msk [vmem:[#allocation3 + $0x18] sm:$0xff] %vm1211_vm1, %v1561_v53 }
 0x566   : > { %1575 = vst.msk [vmem:[#allocation3 + $0x8] sm:$0xff] %vm1211_vm1, %v1559_v18  ;;  %v2204_v18 = vld [vmem:[#allocation4 + $0x10] sm:$0xff] }
 0x568   : > { %v6139_v3 = vpop.f32.mrb[36].mxu0 }
 0x569   : > { %v1564_v24 = vadd.f32 %v6139_v3, %v1443_v19  ;;  %v1511_v44 = vpop.f32.mrb[37].mxu0  ;;  %v2203_v3 = vld [vmem:[#allocation4 + $0x8] sm:$0xff] }
 0x56a   : > { %v1562_v0 = vadd.f32 %v1511_v44, %v1441_v49  ;;  %v6140_v8 = vpop.f32.mrb[38].mxu0  ;;  %v2202_v44 = vld [vmem:[#allocation4] sm:$0xff] }
 0x56b   : > { %1580 = vst.msk [vmem:[#allocation3 + $0x30] sm:$0xff] %vm1211_vm1, %v1564_v24  ;;  %v1565_v48 = vadd.f32 %v6140_v8, %v1444_v2  ;;  %v1514_v39 = vpop.f32.mrb[39].mxu0  ;;  %v2205_v8 = vld [vmem:[#allocation4 + $0x18] sm:$0xff] }
 0x56c   : > { %1578 = vst.msk [vmem:[#allocation3 + $0x20] sm:$0xff] %vm1211_vm1, %v1562_v0  ;;  %v1563_v9 = vadd.f32 %v1514_v39, %v1442_v27 }
 0x56d   : > { %1581 = vst.msk [vmem:[#allocation3 + $0x38] sm:$0xff] %vm1211_vm1, %v1565_v48 }
 0x56e   : > { %1579 = vst.msk [vmem:[#allocation3 + $0x28] sm:$0xff] %vm1211_vm1, %v1563_v9  ;;  %v2208_v9 = vld [vmem:[#allocation4 + $0x30] sm:$0xff] }
 0x570   : > { %v6143_v52 = vpop.f32.mrb[40].mxu0 }
 0x571   : > { %v1568_v47 = vadd.f32 %v6143_v52, %v1447_v46  ;;  %v1527_v23 = vpop.f32.mrb[41].mxu0  ;;  %v2209_v52 = vld [vmem:[#allocation4 + $0x38] sm:$0xff] }
 0x572   : > { %v1566_v50 = vadd.f32 %v1527_v23, %v1445_v5  ;;  %v6144_v63 = vpop.f32.mrb[42].mxu0  ;;  %v2206_v23 = vld [vmem:[#allocation4 + $0x20] sm:$0xff] }
 0x573   : > { %1584 = vst.msk [vmem:[#allocation3 + $0x50] sm:$0xff] %vm1211_vm1, %v1568_v47  ;;  %v1569_v57 = vadd.f32 %v6144_v63, %v1448_v21  ;;  %v1530_v7 = vpop.f32.mrb[43].mxu0  ;;  %v2207_v63 = vld [vmem:[#allocation4 + $0x28] sm:$0xff] }
 0x574   : > { %1582 = vst.msk [vmem:[#allocation3 + $0x40] sm:$0xff] %vm1211_vm1, %v1566_v50  ;;  %v1567_v6 = vadd.f32 %v1530_v7, %v1446_v4 }
 0x575   : > { %1585 = vst.msk [vmem:[#allocation3 + $0x58] sm:$0xff] %vm1211_vm1, %v1569_v57 }
 0x576   : > { %1583 = vst.msk [vmem:[#allocation3 + $0x48] sm:$0xff] %vm1211_vm1, %v1567_v6  ;;  %v2212_v6 = vld [vmem:[#allocation4 + $0x50] sm:$0xff] }
 0x578   : > { %v6147_v11 = vpop.f32.mrb[44].mxu0 }
 0x579   : > { %v1572_v13 = vadd.f32 %v6147_v11, %v1451_v25  ;;  %v1543_v14 = vpop.f32.mrb[45].mxu0  ;;  %v2213_v11 = vld [vmem:[#allocation4 + $0x58] sm:$0xff] }
 0x57a   : > { %v1570_v17 = vadd.f32 %v1543_v14, %v1449_v10  ;;  %v6148_v22 = vpop.f32.mrb[46].mxu0  ;;  %v2210_v14 = vld [vmem:[#allocation4 + $0x40] sm:$0xff] }
 0x57b   : > { %1588 = vst.msk [vmem:[#allocation3 + $0x70] sm:$0xff] %vm1211_vm1, %v1572_v13  ;;  %v1573_v61 = vadd.f32 %v6148_v22, %v1452_v12  ;;  %v1546_v53 = vpop.f32.mrb[47].mxu0  ;;  %v2211_v22 = vld [vmem:[#allocation4 + $0x48] sm:$0xff] }
 0x57c   : > { %1586 = vst.msk [vmem:[#allocation3 + $0x60] sm:$0xff] %vm1211_vm1, %v1570_v17  ;;  %v1571_v29 = vadd.f32 %v1546_v53, %v1450_v15 }
 0x57d   : > { %1589 = vst.msk [vmem:[#allocation3 + $0x78] sm:$0xff] %vm1211_vm1, %v1573_v61 }
 0x57e   : > { %1587 = vst.msk [vmem:[#allocation3 + $0x68] sm:$0xff] %vm1211_vm1, %v1571_v29  ;;  %v2216_v29 = vld [vmem:[#allocation4 + $0x70] sm:$0xff] }
 0x586   : > { %v2223_v19 = vpop.xlane.xlu0 %2222 }
 0x587   : > { %v2252_v49 = vadd.f32 %v2223_v19, %v2204_v18 }
 0x589   : > { %2269 = vst.msk [vmem:[#allocation4 + $0x10] sm:$0xff] %vm2266_vm3, %v2252_v49  ;;  %v2221_v2 = vpop.xlane.xlu1 %2220  ;;  %v2217_v49 = vld [vmem:[#allocation4 + $0x78] sm:$0xff] }
 0x58a   : > { %v2251_v24 = vadd.f32 %v2221_v2, %v2203_v3  ;;  %v2219_v27 = vpop.xlane.xlu0 %2218 }
 0x58b   : > { %v2250_v0 = vadd.f32 %v2219_v27, %v2202_v44 }
 0x58c   : > { %2268 = vst.msk [vmem:[#allocation4 + $0x8] sm:$0xff] %vm2266_vm3, %v2251_v24  ;;  %v2214_v24 = vld [vmem:[#allocation4 + $0x60] sm:$0xff] }
 0x58d   : > { %2267 = vst.msk [vmem:[#allocation4] sm:$0xff] %vm2266_vm3, %v2250_v0  ;;  %v2215_v0 = vld [vmem:[#allocation4 + $0x68] sm:$0xff] }
 0x58e   : > { %v2225_v48 = vpop.xlane.xlu0 %2224 }
 0x58f   : > { %v2253_v39 = vadd.f32 %v2225_v48, %v2205_v8  ;;  %v2231_v46 = vpop.xlane.xlu1 %2230 }
 0x590   : > { %v2256_v5 = vadd.f32 %v2231_v46, %v2208_v9 }
 0x591   : > { %2270 = vst.msk [vmem:[#allocation4 + $0x18] sm:$0xff] %vm2266_vm3, %v2253_v39 }
 0x592   : > { %2273 = vst.msk [vmem:[#allocation4 + $0x30] sm:$0xff] %vm2266_vm3, %v2256_v5  ;;  %v2233_v21 = vpop.xlane.xlu0 %2232 }
 0x593   : > { %v2257_v47 = vadd.f32 %v2233_v21, %v2209_v52  ;;  %v2227_v4 = vpop.xlane.xlu1 %2226 }
 0x594   : > { %v2254_v50 = vadd.f32 %v2227_v4, %v2206_v23 }
 0x595   : > { %2274 = vst.msk [vmem:[#allocation4 + $0x38] sm:$0xff] %vm2266_vm3, %v2257_v47 }
 0x596   : > { %2271 = vst.msk [vmem:[#allocation4 + $0x20] sm:$0xff] %vm2266_vm3, %v2254_v50  ;;  %v2229_v57 = vpop.xlane.xlu0 %2228 }
 0x597   : > { %v2255_v7 = vadd.f32 %v2229_v57, %v2207_v63  ;;  %v2239_v25 = vpop.xlane.xlu1 %2238 }
 0x598   : > { %v2260_v10 = vadd.f32 %v2239_v25, %v2212_v6 }
 0x599   : > { %2272 = vst.msk [vmem:[#allocation4 + $0x28] sm:$0xff] %vm2266_vm3, %v2255_v7 }
 0x59a   : > { %2277 = vst.msk [vmem:[#allocation4 + $0x50] sm:$0xff] %vm2266_vm3, %v2260_v10  ;;  %v2241_v12 = vpop.xlane.xlu0 %2240 }
 0x59b   : > { %v2261_v13 = vadd.f32 %v2241_v12, %v2213_v11  ;;  %v2235_v15 = vpop.xlane.xlu1 %2234 }
 0x59c   : > { %v2258_v17 = vadd.f32 %v2235_v15, %v2210_v14 }
 0x59d   : > { %2278 = vst.msk [vmem:[#allocation4 + $0x58] sm:$0xff] %vm2266_vm3, %v2261_v13 }
 0x59e   : > { %2275 = vst.msk [vmem:[#allocation4 + $0x40] sm:$0xff] %vm2266_vm3, %v2258_v17  ;;  %v2237_v61 = vpop.xlane.xlu0 %2236 }
 0x59f   : > { %v2259_v53 = vadd.f32 %v2237_v61, %v2211_v22  ;;  %v2247_v18 = vpop.xlane.xlu1 %2246 }
 0x5a0   : > { %v2264_v19 = vadd.f32 %v2247_v18, %v2216_v29 }
 0x5a1   : > { %2276 = vst.msk [vmem:[#allocation4 + $0x48] sm:$0xff] %vm2266_vm3, %v2259_v53 }
 0x5a2   : > { %2281 = vst.msk [vmem:[#allocation4 + $0x70] sm:$0xff] %vm2266_vm3, %v2264_v19  ;;  %v2249_v3 = vpop.xlane.xlu0 %2248 }
 0x5a3   : > { %v2265_v2 = vadd.f32 %v2249_v3, %v2217_v49  ;;  %v2243_v44 = vpop.xlane.xlu1 %2242 }
 0x5a4   : > { %v2262_v27 = vadd.f32 %v2243_v44, %v2214_v24 }
 0x5a5   : > { %2282 = vst.msk [vmem:[#allocation4 + $0x78] sm:$0xff] %vm2266_vm3, %v2265_v2 }
 0x5a6   : > { %2279 = vst.msk [vmem:[#allocation4 + $0x60] sm:$0xff] %vm2266_vm3, %v2262_v27  ;;  %v2245_v8 = vpop.xlane.xlu0 %2244 }
 0x5a7   : > { %v2263_v48 = vadd.f32 %v2245_v8, %v2215_v0 }
 0x5a9   : > { %2280 = vst.msk [vmem:[#allocation4 + $0x68] sm:$0xff] %vm2266_vm3, %v2263_v48 }
 0x5d2   : > { %v6199_v39 = vpop.f32.mrb[48].mxu0 }
 0x5d3   : > { %2125 = vrot.lane.b32.xlu1 %v6199_v39, %s7479_s9  ;;  %v2042_v9 = vpop.f32.mrb[49].mxu0 }
 0x5d4   : > { %v6200_v46 = vpop.f32.mrb[50].mxu0 }
 0x5d5   : > { %v2045_v5 = vpop.f32.mrb[51].mxu0 }
 0x5d6   : > { %2123 = vrot.lane.b32.xlu0 %v2045_v5, %s7479_s9 }
 0x5d7   : > { %2121 = vrot.lane.b32.xlu1 %v2042_v9, %s7479_s9 }
 0x5da   : > { %v6203_v52 = vpop.f32.mrb[52].mxu0 }
 0x5db   : > { %2127 = vrot.lane.b32.xlu1 %v6200_v46, %s7479_s9  ;;  %2133 = vrot.lane.b32.xlu0 %v6203_v52, %s7479_s9  ;;  %v2058_v21 = vpop.f32.mrb[53].mxu0 }
 0x5dc   : > { %v6204_v47 = vpop.f32.mrb[54].mxu0 }
 0x5dd   : > { %v2061_v23 = vpop.f32.mrb[55].mxu0 }
 0x5df   : > { %2129 = vrot.lane.b32.xlu0 %v2058_v21, %s7479_s9  ;;  %2135 = vrot.lane.b32.xlu1 %v6204_v47, %s7479_s9 }
 0x5e2   : > { %v6207_v4 = vpop.f32.mrb[56].mxu0 }
 0x5e3   : > { %2131 = vrot.lane.b32.xlu1 %v2061_v23, %s7479_s9  ;;  %2141 = vrot.lane.b32.xlu0 %v6207_v4, %s7479_s9  ;;  %v2074_v50 = vpop.f32.mrb[57].mxu0 }
 0x5e4   : > { %v6208_v63 = vpop.f32.mrb[58].mxu0 }
 0x5e5   : > { %v2077_v57 = vpop.f32.mrb[59].mxu0 }
 0x5e7   : > { %2137 = vrot.lane.b32.xlu0 %v2074_v50, %s7479_s9  ;;  %2143 = vrot.lane.b32.xlu1 %v6208_v63, %s7479_s9 }
 0x5ea   : > { %v6211_v7 = vpop.f32.mrb[60].mxu0 }
 0x5eb   : > { %2139 = vrot.lane.b32.xlu1 %v2077_v57, %s7479_s9  ;;  %2149 = vrot.lane.b32.xlu0 %v6211_v7, %s7479_s9  ;;  %v2090_v6 = vpop.f32.mrb[61].mxu0 }
 0x5ec   : > { %v6212_v25 = vpop.f32.mrb[62].mxu0 }
 0x5ed   : > { %v2093_v10 = vpop.f32.mrb[63].mxu0 }
 0x5ef   : > { %2145 = vrot.lane.b32.xlu0 %v2090_v6, %s7479_s9  ;;  %2151 = vrot.lane.b32.xlu1 %v6212_v25, %s7479_s9 }
 0x5f3   : > { %2147 = vrot.lane.b32.xlu1 %v2093_v10, %s7479_s9 }
 0x612   : > { %v6231_v11 = vpop.f32.mrb[64].mxu0 }
 0x613   : > { %v5696_v12 = vclamps-f32 %v6231_v11, 5.0  ;;  %v2413_v13 = vpop.f32.mrb[65].mxu0 }
 0x614   : > { %v5694_v14 = vclamps-f32 %v2413_v13, 5.0  ;;  %v6232_v15 = vpop.f32.mrb[66].mxu0 }
 0x615   : > { %v2512_v17 = vmul.f32 1.442695, %v5696_v12  ;;  %v5697_v22 = vclamps-f32 %v6232_v15, 5.0  ;;  %v2416_v61 = vpop.f32.mrb[67].mxu0 }
 0x616   : > { %v2508_v53 = vmul.f32 1.442695, %v5694_v14  ;;  %v5695_v29 = vclamps-f32 %v2416_v61, 5.0 }
 0x617   : > { %6735 = vpow2.f32 %v2512_v17  ;;  %v2514_v18 = vmul.f32 1.442695, %v5697_v22 }
 0x618   : > { %6737 = vpow2.f32 %v2508_v53  ;;  %v2510_v19 = vmul.f32 1.442695, %v5695_v29 }
 0x619   : > { %6739 = vpow2.f32 %v2514_v18 }
 0x61a   : > { %6741 = vpow2.f32 %v2510_v19  ;;  %v6235_v49 = vpop.f32.mrb[68].mxu0 }
 0x61b   : > { %v5700_v3 = vclamps-f32 %v6235_v49, 5.0  ;;  %v2429_v2 = vpop.f32.mrb[69].mxu0  ;;  %v2952_v49 = vsel %vm1211_vm1, %v8449_v26, 0 }
 0x61c   : > { %v5698_v24 = vclamps-f32 %v2429_v2, 5.0  ;;  %v6236_v44 = vpop.f32.mrb[70].mxu0 }
 0x61d   : > { %v2520_v27 = vmul.f32 1.442695, %v5700_v3  ;;  %v5701_v0 = vclamps-f32 %v6236_v44, 5.0  ;;  %v2432_v8 = vpop.f32.mrb[71].mxu0 }
 0x61e   : > { %v2516_v48 = vmul.f32 1.442695, %v5698_v24  ;;  %v5699_v39 = vclamps-f32 %v2432_v8, 5.0 }
 0x61f   : > { %6743 = vpow2.f32 %v2520_v27  ;;  %v2522_v9 = vmul.f32 1.442695, %v5701_v0 }
 0x620   : > { %6745 = vpow2.f32 %v2516_v48  ;;  %v2518_v46 = vmul.f32 1.442695, %v5699_v39 }
 0x621   : > { %v6736_v5 = vpop.eup %6735  ;;  %6747 = vpow2.f32 %v2522_v9 }
 0x622   : > { %v6738_v52 = vpop.eup %6737  ;;  %6749 = vpow2.f32 %v2518_v46  ;;  %v6239_v21 = vpop.f32.mrb[72].mxu0  ;;  %v2542_v47 = vmul.f32 %v6736_v5, %v8455_v51 }
 0x623   : > { %v6740_v23 = vpop.eup %6739  ;;  %v5704_v4 = vclamps-f32 %v6239_v21, 5.0  ;;  %v2445_v50 = vpop.f32.mrb[73].mxu0  ;;  %v2540_v13 = vmul.f32 %v6738_v52, %v8457_v40 }
 0x624   : > { %v6742_v63 = vpop.eup %6741  ;;  %v5702_v57 = vclamps-f32 %v2445_v50, 5.0  ;;  %2818 = vadd.xlane.f32.xlu0 %v2542_v47  ;;  %v2543_v7 = vmul.f32 %v6740_v23, %v8459_v54  ;;  %v6240_v6 = vpop.f32.mrb[74].mxu0 }
 0x625   : > { %v2528_v25 = vmul.f32 1.442695, %v5704_v4  ;;  %v5705_v10 = vclamps-f32 %v6240_v6, 5.0  ;;  %v2448_v11 = vpop.f32.mrb[75].mxu0  ;;  %v2541_v12 = vmul.f32 %v6742_v63, %v8461_v59 }
 0x626   : > { %v2524_v14 = vmul.f32 1.442695, %v5702_v57  ;;  %v2573_v15 = vpack.c.bf16 %v2543_v7, %v2542_v47  ;;  %v5703_v17 = vclamps-f32 %v2448_v11, 5.0 }
 0x627   : > { %6751 = vpow2.f32 %v2528_v25  ;;  %v2530_v22 = vmul.f32 1.442695, %v5705_v10  ;;  %2816 = vadd.xlane.f32.xlu1 %v2541_v12  ;;  %v2572_v61 = vpack.c.bf16 %v2541_v12, %v2540_v13 }
 0x628   : > { %6753 = vpow2.f32 %v2524_v14  ;;  %v2526_v53 = vmul.f32 1.442695, %v5703_v17  ;;  %2814 = vadd.xlane.f32.xlu0 %v2540_v13 }
 0x629   : > { %v6744_v29 = vpop.eup %6743  ;;  %6755 = vpow2.f32 %v2530_v22  ;;  %6261 = vmatprep.mubr.bf16.mxu1 %v2572_v61  ;;  %v2958_v22 = vsel %vm1211_vm1, %v8528_v1, 0 }
 0x62a   : > { %v6746_v18 = vpop.eup %6745  ;;  %6757 = vpow2.f32 %v2526_v53  ;;  %v6243_v19 = vpop.f32.mrb[76].mxu0  ;;  %6262 = vmatmul.mubr.bf16.vlgmr.msra.gmra.mrb[32].mxu1 %v2573_v15  ;;  %v2546_v3 = vmul.f32 %v6744_v29, %v8469_v42 }
 0x62b   : > { %v6748_v2 = vpop.eup %6747  ;;  %v5708_v24 = vclamps-f32 %v6243_v19, 5.0  ;;  %6278 = vmatpush3.bf16.xpose.msra.mxu1 %v2952_v49  ;;  %v2461_v44 = vpop.f32.mrb[77].mxu0  ;;  %v2544_v27 = vmul.f32 %v6746_v18, %v8471_v38 }
 0x62c   : > { %v6750_v0 = vpop.eup %6749  ;;  %v5706_v8 = vclamps-f32 %v2461_v44, 5.0  ;;  %6430 = vmatprep.subr.msk.bf16.mxu1 %vm1211_vm1, %v8526_v60  ;;  %2820 = vadd.xlane.f32.xlu0 %v2543_v7  ;;  %v6244_v48 = vpop.f32.mrb[78].mxu0  ;;  %v2547_v39 = vmul.f32 %v6748_v2, %v8473_v45  ;;  %v2955_v7 = vsel %vm1211_vm1, %v8526_v60, 0 }
 0x62d   : > { %v2536_v9 = vmul.f32 1.442695, %v5708_v24  ;;  %2826 = vadd.xlane.f32.xlu1 %v2546_v3  ;;  %v5709_v26 = vclamps-f32 %v6244_v48, 5.0  ;;  %v2464_v46 = vpop.f32.mrb[79].mxu0  ;;  %v2545_v5 = vmul.f32 %v6750_v0, %v8475_v34  ;;  %v1954_v24 = vld [vmem:[#allocation3 + $0x10] sm:$0xff]  ;;  %v1953_v0 = vld [vmem:[#allocation3 + $0x8] sm:$0xff] }
 0x62e   : > { %v2532_v52 = vmul.f32 1.442695, %v5706_v8  ;;  %v5707_v21 = vclamps-f32 %v2464_v46, 5.0  ;;  %v2575_v47 = vpack.c.bf16 %v2547_v39, %v2546_v3 }
 0x62f   : > { %6759 = vpow2.f32 %v2536_v9  ;;  %v2538_v23 = vmul.f32 1.442695, %v5709_v26  ;;  %v2574_v4 = vpack.c.bf16 %v2545_v5, %v2544_v27  ;;  %v2964_v26 = vsel %vm1211_vm1, %v8532_v31, 0 }
 0x630   : > { %6761 = vpow2.f32 %v2532_v52  ;;  %v2534_v50 = vmul.f32 1.442695, %v5707_v21  ;;  %2828 = vadd.xlane.f32.xlu0 %v2547_v39  ;;  %v1952_v39 = vld [vmem:[#allocation3] sm:$0xff] }
 0x631   : > { %v6752_v63 = vpop.eup %6751  ;;  %6763 = vpow2.f32 %v2538_v23  ;;  %2822 = vadd.xlane.f32.xlu1 %v2544_v27  ;;  %6265 = vmatprep.mubr.bf16.mxu1 %v2574_v4  ;;  %v1956_v23 = vld [vmem:[#allocation3 + $0x20] sm:$0xff]  ;;  %v1959_v4 = vld [vmem:[#allocation3 + $0x38] sm:$0xff] }
 0x632   : > { %v6754_v57 = vpop.eup %6753  ;;  %6765 = vpow2.f32 %v2534_v50  ;;  %6266 = vmatmul.mubr.bf16.gmra.mrb[36].mxu1 %v2575_v47  ;;  %v2550_v6 = vmul.f32 %v6752_v63, %v8485_v32 }
 0x633   : > { %v6756_v25 = vpop.eup %6755  ;;  %6280 = vmatpush3.bf16.xpose.msra.mxu1 %v2955_v7  ;;  %v2548_v10 = vmul.f32 %v6754_v57, %v8488_v35  ;;  %v2967_v7 = vsel %vm1211_vm1, %v8534_v28, 0 }
 0x634   : > { %v6758_v11 = vpop.eup %6757  ;;  %6431 = vmatprep.subr.msk.bf16.mxu1 %vm1211_vm1, %v8528_v1  ;;  %2824 = vadd.xlane.f32.xlu0 %v2545_v5  ;;  %v2551_v12 = vmul.f32 %v6756_v25, %v8491_v37  ;;  %v2961_v1 = vsel %vm1211_vm1, %v8530_v30, 0  ;;  %v1958_v5 = vld [vmem:[#allocation3 + $0x30] sm:$0xff] }
 0x635   : > { %2834 = vadd.xlane.f32.xlu1 %v2550_v6  ;;  %v2549_v13 = vmul.f32 %v6758_v11, %v8493_v41 }
 0x636   : > { %v2577_v14 = vpack.c.bf16 %v2551_v12, %v2550_v6  ;;  %v1957_v6 = vld [vmem:[#allocation3 + $0x28] sm:$0xff] }
 0x637   : > { %v2576_v15 = vpack.c.bf16 %v2549_v13, %v2548_v10 }
 0x638   : > { %2836 = vadd.xlane.f32.xlu0 %v2551_v12 }
 0x639   : > { %v6760_v60 = vpop.eup %6759  ;;  %2830 = vadd.xlane.f32.xlu1 %v2548_v10  ;;  %6269 = vmatprep.mubr.bf16.mxu1 %v2576_v15  ;;  %v1962_v10 = vld [vmem:[#allocation3 + $0x50] sm:$0xff]  ;;  %v1963_v15 = vld [vmem:[#allocation3 + $0x58] sm:$0xff] }
 0x63a   : > { %v6762_v17 = vpop.eup %6761  ;;  %6270 = vmatmul.mubr.bf16.gmra.mrb[40].mxu1 %v2577_v14  ;;  %v2554_v61 = vmul.f32 %v6760_v60, %v8503_v56  ;;  %v1960_v14 = vld [vmem:[#allocation3 + $0x40] sm:$0xff] }
 0x63b   : > { %v6764_v53 = vpop.eup %6763  ;;  %6282 = vmatpush3.bf16.xpose.msra.mxu1 %v2958_v22  ;;  %v2552_v29 = vmul.f32 %v6762_v17, %v8506_v58 }
 0x63c   : > { %v6766_v18 = vpop.eup %6765  ;;  %6432 = vmatprep.subr.msk.bf16.mxu1 %vm1211_vm1, %v8530_v30  ;;  %2832 = vadd.xlane.f32.xlu0 %v2549_v13  ;;  %v2555_v19 = vmul.f32 %v6764_v53, %v8509_v16  ;;  %v1961_v53 = vld [vmem:[#allocation3 + $0x48] sm:$0xff] }
 0x63d   : > { %2842 = vadd.xlane.f32.xlu1 %v2554_v61  ;;  %v2553_v49 = vmul.f32 %v6766_v18, %v8511_v20  ;;  %v1966_v18 = vld [vmem:[#allocation3 + $0x70] sm:$0xff] }
 0x63e   : > { %v2579_v3 = vpack.c.bf16 %v2555_v19, %v2554_v61  ;;  %v2970_v61 = vsel %vm1211_vm1, %v8536_v33, 0 }
 0x63f   : > { %v2578_v2 = vpack.c.bf16 %v2553_v49, %v2552_v29 }
 0x640   : > { %2844 = vadd.xlane.f32.xlu0 %v2555_v19 }
 0x641   : > { %2838 = vadd.xlane.f32.xlu1 %v2552_v29  ;;  %6273 = vmatprep.mubr.bf16.mxu1 %v2578_v2  ;;  %v1964_v2 = vld [vmem:[#allocation3 + $0x60] sm:$0xff] }
 0x642   : > { %6274 = vmatmul.mubr.bf16.gmra.mrb[44].mxu1 %v2579_v3 }
 0x643   : > { %6284 = vmatpush3.bf16.xpose.msra.mxu1 %v2961_v1  ;;  %6293 = vmatprep.mubr.msk.bf16.mxu1 %vm1211_vm1, %v8540_v36  ;;  %v1955_v36 = vld [vmem:[#allocation3 + $0x18] sm:$0xff] }
 0x644   : > { %6433 = vmatprep.subr.msk.bf16.mxu1 %vm1211_vm1, %v8532_v31  ;;  %2840 = vadd.xlane.f32.xlu0 %v2553_v49  ;;  %v1967_v1 = vld [vmem:[#allocation3 + $0x78] sm:$0xff] }
 0x645   : > { %v2126_v44 = vpop.permute.xlu1 %2125 }
 0x646   : > { %v2171_v27 = vadd.f32 %v2126_v44, %v1954_v24 }
 0x648   : > { %2188 = vst.msk [vmem:[#allocation3 + $0x10] sm:$0xff] %vm2185_vm4, %v2171_v27  ;;  %v2124_v8 = vpop.permute.xlu0 %2123 }
 0x649   : > { %v2170_v48 = vadd.f32 %v2124_v8, %v1953_v0  ;;  %v2122_v9 = vpop.permute.xlu1 %2121  ;;  %v2973_v0 = vsel %vm1211_vm1, %v8538_v62, 0 }
 0x64a   : > { %v2169_v30 = vadd.f32 %v2122_v9, %v1952_v39  ;;  %v9830_v9 = vld [vmem:[#allocation39_spill] sm:$0xff] }
 0x64b   : > { %2187 = vst.msk [vmem:[#allocation3 + $0x8] sm:$0xff] %vm2185_vm4, %v2170_v48  ;;  %6286 = vmatpush3.bf16.xpose.msra.mxu1 %v2964_v26  ;;  %v1965_v48 = vld [vmem:[#allocation3 + $0x68] sm:$0xff]  ;;  %v9833_v26 = vld [vmem:[#allocation42_spill] sm:$0xff] }
 0x64c   : > { %2186 = vst.msk [vmem:[#allocation3] sm:$0xff] %vm2185_vm4, %v2169_v30  ;;  %6434 = vmatprep.subr.msk.bf16.mxu1 %vm1211_vm1, %v8534_v28  ;;  %v9832_v30 = vld [vmem:[#allocation41_spill] sm:$0xff] }
 0x64d   : > { %v2128_v46 = vpop.permute.xlu1 %2127  ;;  %v2134_v52 = vpop.permute.xlu0 %2133 }
 0x64e   : > { %v2172_v21 = vadd.f32 %v2128_v46, %v1955_v36  ;;  %v2175_v47 = vadd.f32 %v2134_v52, %v1958_v5  ;;  %v9834_v36 = vld [vmem:[#allocation43_spill] sm:$0xff]  ;;  %v2800_v46 = vld [vmem:[#allocation4 + $0x10] sm:$0xff] }
 0x650   : > { %2189 = vst.msk [vmem:[#allocation3 + $0x18] sm:$0xff] %vm2185_vm4, %v2172_v21  ;;  %2192 = vst.msk [vmem:[#allocation3 + $0x30] sm:$0xff] %vm2185_vm4, %v2175_v47  ;;  %v2798_v47 = vld [vmem:[#allocation4] sm:$0xff] }
 0x651   : > { %v2130_v31 = vpop.permute.xlu0 %2129  ;;  %v2136_v50 = vpop.permute.xlu1 %2135 }
 0x652   : > { %v2173_v63 = vadd.f32 %v2130_v31, %v1956_v23  ;;  %v2176_v57 = vadd.f32 %v2136_v50, %v1959_v4  ;;  %v2801_v4 = vld [vmem:[#allocation4 + $0x18] sm:$0xff] }
 0x653   : > { %6288 = vmatpush3.bf16.xpose.msra.mxu1 %v2967_v7 }
 0x654   : > { %2190 = vst.msk [vmem:[#allocation3 + $0x20] sm:$0xff] %vm2185_vm4, %v2173_v63  ;;  %2193 = vst.msk [vmem:[#allocation3 + $0x38] sm:$0xff] %vm2185_vm4, %v2176_v57  ;;  %6435 = vmatprep.subr.msk.bf16.mxu1 %vm1211_vm1, %v8536_v33  ;;  %v2804_v57 = vld [vmem:[#allocation4 + $0x30] sm:$0xff] }
 0x655   : > { %v2132_v25 = vpop.permute.xlu1 %2131  ;;  %v2142_v11 = vpop.permute.xlu0 %2141 }
 0x656   : > { %v2174_v12 = vadd.f32 %v2132_v25, %v1957_v6  ;;  %v2179_v13 = vadd.f32 %v2142_v11, %v1962_v10  ;;  %v2805_v25 = vld [vmem:[#allocation4 + $0x38] sm:$0xff]  ;;  %v2802_v11 = vld [vmem:[#allocation4 + $0x20] sm:$0xff] }
 0x658   : > { %2191 = vst.msk [vmem:[#allocation3 + $0x28] sm:$0xff] %vm2185_vm4, %v2174_v12  ;;  %2196 = vst.msk [vmem:[#allocation3 + $0x50] sm:$0xff] %vm2185_vm4, %v2179_v13 }
 0x659   : > { %v2138_v28 = vpop.permute.xlu0 %2137  ;;  %v2144_v60 = vpop.permute.xlu1 %2143 }
 0x65a   : > { %v2177_v17 = vadd.f32 %v2138_v28, %v1960_v14  ;;  %v2180_v22 = vadd.f32 %v2144_v60, %v1963_v15  ;;  %v2803_v28 = vld [vmem:[#allocation4 + $0x28] sm:$0xff] }
 0x65b   : > { %6290 = vmatpush3.bf16.xpose.msra.mxu1 %v2970_v61 }
 0x65c   : > { %2194 = vst.msk [vmem:[#allocation3 + $0x40] sm:$0xff] %vm2185_vm4, %v2177_v17  ;;  %2197 = vst.msk [vmem:[#allocation3 + $0x58] sm:$0xff] %vm2185_vm4, %v2180_v22  ;;  %6436 = vmatprep.subr.msk.bf16.mxu1 %vm1211_vm1, %v8538_v62  ;;  %v9831_v62 = vld [vmem:[#allocation40_spill] sm:$0xff]  ;;  %v2808_v17 = vld [vmem:[#allocation4 + $0x50] sm:$0xff] }
 0x65d   : > { %v2140_v29 = vpop.permute.xlu1 %2139  ;;  %v2150_v19 = vpop.permute.xlu0 %2149 }
 0x65e   : > { %v2178_v49 = vadd.f32 %v2140_v29, %v1961_v53  ;;  %v2183_v3 = vadd.f32 %v2150_v19, %v1966_v18  ;;  %v2809_v53 = vld [vmem:[#allocation4 + $0x58] sm:$0xff]  ;;  %v2806_v18 = vld [vmem:[#allocation4 + $0x40] sm:$0xff] }
 0x660   : > { %2195 = vst.msk [vmem:[#allocation3 + $0x48] sm:$0xff] %vm2185_vm4, %v2178_v49  ;;  %2200 = vst.msk [vmem:[#allocation3 + $0x70] sm:$0xff] %vm2185_vm4, %v2183_v3 }
 0x661   : > { %v2146_v33 = vpop.permute.xlu0 %2145  ;;  %v2152_v24 = vpop.permute.xlu1 %2151 }
 0x662   : > { %v2181_v44 = vadd.f32 %v2146_v33, %v1964_v2  ;;  %v2184_v27 = vadd.f32 %v2152_v24, %v1967_v1  ;;  %v2807_v2 = vld [vmem:[#allocation4 + $0x48] sm:$0xff]  ;;  %v2812_v24 = vld [vmem:[#allocation4 + $0x70] sm:$0xff] }
 0x663   : > { %6292 = vmatpush3.bf16.xpose.msra.mxu1 %v2973_v0  ;;  %v2813_v0 = vld [vmem:[#allocation4 + $0x78] sm:$0xff] }
 0x664   : > { %2198 = vst.msk [vmem:[#allocation3 + $0x60] sm:$0xff] %vm2185_vm4, %v2181_v44  ;;  %2201 = vst.msk [vmem:[#allocation3 + $0x78] sm:$0xff] %vm2185_vm4, %v2184_v27 }
 0x665   : > { %v2148_v8 = vpop.permute.xlu1 %2147 }
 0x666   : > { %v2182_v39 = vadd.f32 %v2148_v8, %v1965_v48  ;;  %v2810_v48 = vld [vmem:[#allocation4 + $0x60] sm:$0xff] }
 0x668   : > { %2199 = vst.msk [vmem:[#allocation3 + $0x68] sm:$0xff] %vm2185_vm4, %v2182_v39 }
 0x66a   : > { %6294 = vmatmul.mubr.msk.bf16.vlgmr.msra.gmra.mrb[48].mxu1 %vm1211_vm1, %v8542_v43 }
 0x66b   : > { %6297 = vmatprep.mubr.msk.bf16.mxu1 %vm1211_vm1, %v8544_v55  ;;  %v2799_v55 = vld [vmem:[#allocation4 + $0x8] sm:$0xff] }
 0x672   : > { %6298 = vmatmul.mubr.msk.bf16.gmra.mrb[52].mxu1 %vm1211_vm1, %v9830_v9 }
 0x673   : > { %6301 = vmatprep.mubr.msk.bf16.mxu1 %vm1211_vm1, %v9831_v62 }
 0x67a   : > { %6302 = vmatmul.mubr.msk.bf16.gmra.mrb[56].mxu1 %vm1211_vm1, %v9832_v30  ;;  %v2811_v30 = vld [vmem:[#allocation4 + $0x68] sm:$0xff] }
 0x67b   : > { %6305 = vmatprep.mubr.msk.bf16.mxu1 %vm1211_vm1, %v9833_v26 }
 0x682   : > { %6306 = vmatmul.mubr.msk.bf16.gmra.mrb[60].mxu1 %vm1211_vm1, %v9834_v36 }
 0x6b1   : > { %v2819_v43 = vpop.xlane.xlu0 %2818 }
 0x6b2   : > { %v2848_v5 = vadd.f32 %v2819_v43, %v2800_v46 }
 0x6b4   : > { %2865 = vst.msk [vmem:[#allocation4 + $0x10] sm:$0xff] %vm2862_vm5, %v2848_v5  ;;  %v2817_v52 = vpop.xlane.xlu1 %2816 }
 0x6b5   : > { %v2847_v21 = vadd.f32 %v2817_v52, %v2799_v55  ;;  %v2815_v23 = vpop.xlane.xlu0 %2814 }
 0x6b6   : > { %v2846_v31 = vadd.f32 %v2815_v23, %v2798_v47 }
 0x6b7   : > { %2864 = vst.msk [vmem:[#allocation4 + $0x8] sm:$0xff] %vm2862_vm5, %v2847_v21 }
 0x6b8   : > { %2863 = vst.msk [vmem:[#allocation4] sm:$0xff] %vm2862_vm5, %v2846_v31 }
 0x6b9   : > { %v2821_v50 = vpop.xlane.xlu0 %2820 }
 0x6ba   : > { %v2849_v63 = vadd.f32 %v2821_v50, %v2801_v4  ;;  %v2827_v7 = vpop.xlane.xlu1 %2826 }
 0x6bb   : > { %v2852_v6 = vadd.f32 %v2827_v7, %v2804_v57 }
 0x6bc   : > { %2866 = vst.msk [vmem:[#allocation4 + $0x18] sm:$0xff] %vm2862_vm5, %v2849_v63 }
 0x6bd   : > { %2869 = vst.msk [vmem:[#allocation4 + $0x30] sm:$0xff] %vm2862_vm5, %v2852_v6  ;;  %v2829_v10 = vpop.xlane.xlu0 %2828 }
 0x6be   : > { %v2823_v12 = vpop.xlane.xlu1 %2822  ;;  %v2853_v13 = vadd.f32 %v2829_v10, %v2805_v25 }
 0x6bf   : > { %v2850_v14 = vadd.f32 %v2823_v12, %v2802_v11 }
 0x6c0   : > { %2870 = vst.msk [vmem:[#allocation4 + $0x38] sm:$0xff] %vm2862_vm5, %v2853_v13 }
 0x6c1   : > { %2867 = vst.msk [vmem:[#allocation4 + $0x20] sm:$0xff] %vm2862_vm5, %v2850_v14  ;;  %v2825_v15 = vpop.xlane.xlu0 %2824 }
 0x6c2   : > { %v2851_v60 = vadd.f32 %v2825_v15, %v2803_v28  ;;  %v2835_v22 = vpop.xlane.xlu1 %2834 }
 0x6c3   : > { %v2856_v61 = vadd.f32 %v2835_v22, %v2808_v17 }
 0x6c4   : > { %2868 = vst.msk [vmem:[#allocation4 + $0x28] sm:$0xff] %vm2862_vm5, %v2851_v60 }
 0x6c5   : > { %2873 = vst.msk [vmem:[#allocation4 + $0x50] sm:$0xff] %vm2862_vm5, %v2856_v61  ;;  %v2837_v29 = vpop.xlane.xlu0 %2836 }
 0x6c6   : > { %v2831_v19 = vpop.xlane.xlu1 %2830  ;;  %v2857_v49 = vadd.f32 %v2837_v29, %v2809_v53 }
 0x6c7   : > { %v2854_v3 = vadd.f32 %v2831_v19, %v2806_v18 }
 0x6c8   : > { %2874 = vst.msk [vmem:[#allocation4 + $0x58] sm:$0xff] %vm2862_vm5, %v2857_v49 }
 0x6c9   : > { %2871 = vst.msk [vmem:[#allocation4 + $0x40] sm:$0xff] %vm2862_vm5, %v2854_v3  ;;  %v2833_v33 = vpop.xlane.xlu0 %2832 }
 0x6ca   : > { %v2855_v1 = vadd.f32 %v2833_v33, %v2807_v2  ;;  %v2843_v44 = vpop.xlane.xlu1 %2842 }
 0x6cb   : > { %v2860_v27 = vadd.f32 %v2843_v44, %v2812_v24 }
 0x6cc   : > { %2872 = vst.msk [vmem:[#allocation4 + $0x48] sm:$0xff] %vm2862_vm5, %v2855_v1 }
 0x6cd   : > { %2877 = vst.msk [vmem:[#allocation4 + $0x70] sm:$0xff] %vm2862_vm5, %v2860_v27  ;;  %v2845_v8 = vpop.xlane.xlu0 %2844 }
 0x6ce   : > { %v2839_v39 = vpop.xlane.xlu1 %2838  ;;  %v2861_v9 = vadd.f32 %v2845_v8, %v2813_v0 }
 0x6cf   : > { %v2858_v62 = vadd.f32 %v2839_v39, %v2810_v48 }
 0x6d0   : > { %2878 = vst.msk [vmem:[#allocation4 + $0x78] sm:$0xff] %vm2862_vm5, %v2861_v9 }
 0x6d1   : > { %2875 = vst.msk [vmem:[#allocation4 + $0x60] sm:$0xff] %vm2862_vm5, %v2858_v62  ;;  %v2841_v26 = vpop.xlane.xlu0 %2840 }
 0x6d2   : > { %v2859_v36 = vadd.f32 %v2841_v26, %v2811_v30 }
 0x6d4   : > { %2876 = vst.msk [vmem:[#allocation4 + $0x68] sm:$0xff] %vm2862_vm5, %v2859_v36 }
 0x6fd   : > { %v6263_v46 = vpop.f32.mrb[32].mxu1 }
 0x6fe   : > { %v2638_v43 = vpop.f32.mrb[33].mxu1  ;;  %2721 = vrot.lane.b32.xlu1 %v6263_v46, %s7478_s18 }
 0x6ff   : > { %v6264_v5 = vpop.f32.mrb[34].mxu1 }
 0x700   : > { %v2641_v55 = vpop.f32.mrb[35].mxu1 }
 0x701   : > { %2719 = vrot.lane.b32.xlu0 %v2641_v55, %s7478_s18 }
 0x702   : > { %2717 = vrot.lane.b32.xlu1 %v2638_v43, %s7478_s18 }
 0x705   : > { %v6267_v52 = vpop.f32.mrb[36].mxu1 }
 0x706   : > { %2723 = vrot.lane.b32.xlu1 %v6264_v5, %s7478_s18  ;;  %2729 = vrot.lane.b32.xlu0 %v6267_v52, %s7478_s18  ;;  %v2654_v21 = vpop.f32.mrb[37].mxu1 }
 0x707   : > { %v6268_v47 = vpop.f32.mrb[38].mxu1 }
 0x708   : > { %v2657_v23 = vpop.f32.mrb[39].mxu1 }
 0x70a   : > { %2731 = vrot.lane.b32.xlu1 %v6268_v47, %s7478_s18  ;;  %2725 = vrot.lane.b32.xlu0 %v2654_v21, %s7478_s18 }
 0x70d   : > { %v6271_v31 = vpop.f32.mrb[40].mxu1 }
 0x70e   : > { %2727 = vrot.lane.b32.xlu1 %v2657_v23, %s7478_s18  ;;  %2737 = vrot.lane.b32.xlu0 %v6271_v31, %s7478_s18  ;;  %v2670_v4 = vpop.f32.mrb[41].mxu1 }
 0x70f   : > { %v6272_v50 = vpop.f32.mrb[42].mxu1 }
 0x710   : > { %v2673_v63 = vpop.f32.mrb[43].mxu1 }
 0x712   : > { %2739 = vrot.lane.b32.xlu1 %v6272_v50, %s7478_s18  ;;  %2733 = vrot.lane.b32.xlu0 %v2670_v4, %s7478_s18 }
 0x715   : > { %v6275_v57 = vpop.f32.mrb[44].mxu1 }
 0x716   : > { %2735 = vrot.lane.b32.xlu1 %v2673_v63, %s7478_s18  ;;  %2745 = vrot.lane.b32.xlu0 %v6275_v57, %s7478_s18  ;;  %v2686_v7 = vpop.f32.mrb[45].mxu1 }
 0x717   : > { %v6276_v6 = vpop.f32.mrb[46].mxu1 }
 0x718   : > { %v2689_v25 = vpop.f32.mrb[47].mxu1 }
 0x71a   : > { %2741 = vrot.lane.b32.xlu0 %v2686_v7, %s7478_s18  ;;  %2747 = vrot.lane.b32.xlu1 %v6276_v6, %s7478_s18 }
 0x71e   : > { %2743 = vrot.lane.b32.xlu1 %v2689_v25, %s7478_s18 }
 0x73d   : > { %v6295_v10 = vpop.f32.mrb[48].mxu1 }
 0x73e   : > { %v5720_v11 = vclamps-f32 %v6295_v10, 5.0  ;;  %v3009_v12 = vpop.f32.mrb[49].mxu1 }
 0x73f   : > { %v5718_v13 = vclamps-f32 %v3009_v12, 5.0  ;;  %v6296_v14 = vpop.f32.mrb[50].mxu1 }
 0x740   : > { %v3108_v28 = vmul.f32 1.442695, %v5720_v11  ;;  %v5721_v15 = vclamps-f32 %v6296_v14, 5.0  ;;  %v3012_v60 = vpop.f32.mrb[51].mxu1 }
 0x741   : > { %v3104_v17 = vmul.f32 1.442695, %v5718_v13  ;;  %v5719_v22 = vclamps-f32 %v3012_v60, 5.0 }
 0x742   : > { %6767 = vpow2.f32 %v3108_v28  ;;  %v3110_v61 = vmul.f32 1.442695, %v5721_v15 }
 0x743   : > { %6769 = vpow2.f32 %v3104_v17  ;;  %v3106_v53 = vmul.f32 1.442695, %v5719_v22 }
 0x744   : > { %6771 = vpow2.f32 %v3110_v61 }
 0x745   : > { %6773 = vpow2.f32 %v3106_v53  ;;  %v6299_v29 = vpop.f32.mrb[52].mxu1 }
 0x746   : > { %v5724_v18 = vclamps-f32 %v6299_v29, 5.0  ;;  %v3025_v19 = vpop.f32.mrb[53].mxu1 }
 0x747   : > { %v5722_v49 = vclamps-f32 %v3025_v19, 5.0  ;;  %v6300_v3 = vpop.f32.mrb[54].mxu1 }
 0x748   : > { %v3116_v2 = vmul.f32 1.442695, %v5724_v18  ;;  %v5725_v33 = vclamps-f32 %v6300_v3, 5.0  ;;  %v3028_v1 = vpop.f32.mrb[55].mxu1 }
 0x749   : > { %v3112_v24 = vmul.f32 1.442695, %v5722_v49  ;;  %v5723_v44 = vclamps-f32 %v3028_v1, 5.0 }
 0x74a   : > { %6775 = vpow2.f32 %v3116_v2  ;;  %v3118_v27 = vmul.f32 1.442695, %v5725_v33 }
 0x74b   : > { %6777 = vpow2.f32 %v3112_v24  ;;  %v3114_v0 = vmul.f32 1.442695, %v5723_v44 }
 0x74c   : > { %v6768_v8 = vpop.eup %6767  ;;  %6779 = vpow2.f32 %v3118_v27 }
 0x74d   : > { %v6770_v48 = vpop.eup %6769  ;;  %6781 = vpow2.f32 %v3114_v0  ;;  %v6303_v39 = vpop.f32.mrb[56].mxu1  ;;  %v3138_v9 = vmul.f32 %v6768_v8, %v8455_v51 }
 0x74e   : > { %v6772_v62 = vpop.eup %6771  ;;  %v5728_v30 = vclamps-f32 %v6303_v39, 5.0  ;;  %v3041_v26 = vpop.f32.mrb[57].mxu1  ;;  %v3136_v47 = vmul.f32 %v6770_v48, %v8457_v40 }
 0x74f   : > { %v6774_v36 = vpop.eup %6773  ;;  %v5726_v46 = vclamps-f32 %v3041_v26, 5.0  ;;  %3414 = vadd.xlane.f32.xlu1 %v3138_v9  ;;  %v6304_v43 = vpop.f32.mrb[58].mxu1  ;;  %v3139_v5 = vmul.f32 %v6772_v62, %v8459_v54  ;;  %v2558_v62 = vld [vmem:[#allocation3 + $0x10] sm:$0xff]  ;;  %v2557_v26 = vld [vmem:[#allocation3 + $0x8] sm:$0xff] }
 0x750   : > { %v3124_v55 = vmul.f32 1.442695, %v5728_v30  ;;  %v5729_v52 = vclamps-f32 %v6304_v43, 5.0  ;;  %v3044_v21 = vpop.f32.mrb[59].mxu1  ;;  %v3137_v23 = vmul.f32 %v6774_v36, %v8461_v59 }
 0x751   : > { %v3120_v31 = vmul.f32 1.442695, %v5726_v46  ;;  %v5727_v4 = vclamps-f32 %v3044_v21, 5.0  ;;  %3416 = vadd.xlane.f32.xlu0 %v3139_v5  ;;  %v3169_v51 = vpack.c.bf16 %v3139_v5, %v3138_v9  ;;  %v2556_v46 = vld [vmem:[#allocation3] sm:$0xff] }
 0x752   : > { %6783 = vpow2.f32 %v3124_v55  ;;  %v3126_v50 = vmul.f32 1.442695, %v5729_v52  ;;  %v3168_v63 = vpack.c.bf16 %v3137_v23, %v3136_v47  ;;  %v2562_v55 = vld [vmem:[#allocation3 + $0x30] sm:$0xff] }
 0x753   : > { %6785 = vpow2.f32 %v3120_v31  ;;  %v3122_v57 = vmul.f32 1.442695, %v5727_v4  ;;  %3410 = vadd.xlane.f32.xlu1 %v3136_v47  ;;  %v2560_v4 = vld [vmem:[#allocation3 + $0x20] sm:$0xff] }
 0x754   : > { %v6776_v7 = vpop.eup %6775  ;;  %6787 = vpow2.f32 %v3126_v50  ;;  %6325 = vmatprep.mubr.bf16.mxu0 %v3168_v63 }
 0x755   : > { %v6778_v54 = vpop.eup %6777  ;;  %6789 = vpow2.f32 %v3122_v57  ;;  %3412 = vadd.xlane.f32.xlu0 %v3137_v23  ;;  %v6307_v6 = vpop.f32.mrb[60].mxu1  ;;  %6326 = vmatmul.mubr.bf16.vlgmr.msra.gmra.mrb[80].mxu0 %v3169_v51  ;;  %v3142_v40 = vmul.f32 %v6776_v7, %v8469_v42  ;;  %v2563_v23 = vld [vmem:[#allocation3 + $0x38] sm:$0xff]  ;;  %v2561_v57 = vld [vmem:[#allocation3 + $0x28] sm:$0xff] }
 0x756   : > { %v6780_v59 = vpop.eup %6779  ;;  %v5732_v25 = vclamps-f32 %v6307_v6, 5.0  ;;  %v3057_v10 = vpop.f32.mrb[61].mxu1  ;;  %v3140_v17 = vmul.f32 %v6778_v54, %v8471_v38  ;;  %v2566_v54 = vld [vmem:[#allocation3 + $0x50] sm:$0xff] }
 0x757   : > { %v6782_v11 = vpop.eup %6781  ;;  %v5730_v12 = vclamps-f32 %v3057_v10, 5.0  ;;  %3422 = vadd.xlane.f32.xlu1 %v3142_v40  ;;  %v6308_v13 = vpop.f32.mrb[62].mxu1  ;;  %v3143_v14 = vmul.f32 %v6780_v59, %v8473_v45 }
 0x758   : > { %v3132_v28 = vmul.f32 1.442695, %v5732_v25  ;;  %v5733_v15 = vclamps-f32 %v6308_v13, 5.0  ;;  %v3060_v60 = vpop.f32.mrb[63].mxu1  ;;  %v3141_v22 = vmul.f32 %v6782_v11, %v8475_v34  ;;  %v2567_v25 = vld [vmem:[#allocation3 + $0x58] sm:$0xff]  ;;  %v2564_v11 = vld [vmem:[#allocation3 + $0x40] sm:$0xff] }
 0x759   : > { %v3128_v61 = vmul.f32 1.442695, %v5730_v12  ;;  %v5731_v53 = vclamps-f32 %v3060_v60, 5.0  ;;  %3424 = vadd.xlane.f32.xlu0 %v3143_v14  ;;  %v3171_v42 = vpack.c.bf16 %v3143_v14, %v3142_v40  ;;  %v2570_v60 = vld [vmem:[#allocation3 + $0x70] sm:$0xff] }
 0x75a   : > { %6791 = vpow2.f32 %v3132_v28  ;;  %v3134_v29 = vmul.f32 1.442695, %v5733_v15  ;;  %v3170_v18 = vpack.c.bf16 %v3141_v22, %v3140_v17  ;;  %v2565_v28 = vld [vmem:[#allocation3 + $0x48] sm:$0xff] }
 0x75b   : > { %6793 = vpow2.f32 %v3128_v61  ;;  %v3130_v19 = vmul.f32 1.442695, %v5731_v53  ;;  %3418 = vadd.xlane.f32.xlu1 %v3140_v17  ;;  %v2568_v53 = vld [vmem:[#allocation3 + $0x60] sm:$0xff] }
 0x75c   : > { %v6784_v49 = vpop.eup %6783  ;;  %6795 = vpow2.f32 %v3134_v29  ;;  %6329 = vmatprep.mubr.bf16.mxu0 %v3170_v18  ;;  %v2571_v29 = vld [vmem:[#allocation3 + $0x78] sm:$0xff] }
 0x75d   : > { %v6786_v45 = vpop.eup %6785  ;;  %6797 = vpow2.f32 %v3130_v19  ;;  %3420 = vadd.xlane.f32.xlu0 %v3141_v22  ;;  %6330 = vmatmul.mubr.bf16.gmra.mrb[84].mxu0 %v3171_v42  ;;  %v3146_v38 = vmul.f32 %v6784_v49, %v8485_v32 }
 0x75e   : > { %v6788_v34 = vpop.eup %6787  ;;  %v3144_v33 = vmul.f32 %v6786_v45, %v8488_v35 }
 0x75f   : > { %v6790_v3 = vpop.eup %6789  ;;  %3430 = vadd.xlane.f32.xlu1 %v3146_v38  ;;  %v3147_v2 = vmul.f32 %v6788_v34, %v8491_v37 }
 0x760   : > { %v3145_v1 = vmul.f32 %v6790_v3, %v8493_v41  ;;  %v3396_v3 = vld [vmem:[#allocation4 + $0x10] sm:$0xff] }
 0x761   : > { %3432 = vadd.xlane.f32.xlu0 %v3147_v2  ;;  %v3173_v24 = vpack.c.bf16 %v3147_v2, %v3146_v38  ;;  %v2569_v38 = vld [vmem:[#allocation3 + $0x68] sm:$0xff] }
 0x762   : > { %v3172_v44 = vpack.c.bf16 %v3145_v1, %v3144_v33 }
 0x763   : > { %3426 = vadd.xlane.f32.xlu1 %v3144_v33 }
 0x764   : > { %v6792_v27 = vpop.eup %6791  ;;  %6333 = vmatprep.mubr.bf16.mxu0 %v3172_v44 }
 0x765   : > { %v6794_v0 = vpop.eup %6793  ;;  %3428 = vadd.xlane.f32.xlu0 %v3145_v1  ;;  %6334 = vmatmul.mubr.bf16.gmra.mrb[88].mxu0 %v3173_v24  ;;  %v3150_v32 = vmul.f32 %v6792_v27, %v8503_v56  ;;  %v3397_v1 = vld [vmem:[#allocation4 + $0x18] sm:$0xff]  ;;  %v3394_v27 = vld [vmem:[#allocation4] sm:$0xff] }
 0x766   : > { %v6796_v8 = vpop.eup %6795  ;;  %v3148_v35 = vmul.f32 %v6794_v0, %v8506_v58 }
 0x767   : > { %v6798_v48 = vpop.eup %6797  ;;  %3438 = vadd.xlane.f32.xlu1 %v3150_v32  ;;  %v3151_v37 = vmul.f32 %v6796_v8, %v8509_v16  ;;  %v3395_v8 = vld [vmem:[#allocation4 + $0x8] sm:$0xff] }
 0x768   : > { %v3149_v41 = vmul.f32 %v6798_v48, %v8511_v20  ;;  %v2559_v20 = vld [vmem:[#allocation3 + $0x18] sm:$0xff] }
 0x769   : > { %3440 = vadd.xlane.f32.xlu0 %v3151_v37  ;;  %v3175_v39 = vpack.c.bf16 %v3151_v37, %v3150_v32 }
 0x76a   : > { %v3174_v9 = vpack.c.bf16 %v3149_v41, %v3148_v35 }
 0x76b   : > { %3434 = vadd.xlane.f32.xlu1 %v3148_v35  ;;  %v3400_v35 = vld [vmem:[#allocation4 + $0x30] sm:$0xff] }
 0x76c   : > { %6337 = vmatprep.mubr.bf16.mxu0 %v3174_v9  ;;  %v3401_v9 = vld [vmem:[#allocation4 + $0x38] sm:$0xff] }
 0x76d   : > { %3436 = vadd.xlane.f32.xlu0 %v3149_v41  ;;  %6338 = vmatmul.mubr.bf16.gmra.mrb[92].mxu0 %v3175_v39 }
 0x770   : > { %v2722_v30 = vpop.permute.xlu1 %2721 }
 0x771   : > { %v2767_v56 = vadd.f32 %v2722_v30, %v2558_v62 }
 0x773   : > { %2784 = vst.msk [vmem:[#allocation3 + $0x10] sm:$0xff] %vm2781_vm6, %v2767_v56  ;;  %v2720_v36 = vpop.permute.xlu0 %2719  ;;  %v3398_v56 = vld [vmem:[#allocation4 + $0x20] sm:$0xff] }
 0x774   : > { %v2766_v16 = vadd.f32 %v2720_v36, %v2557_v26  ;;  %v2718_v58 = vpop.permute.xlu1 %2717 }
 0x775   : > { %v2765_v43 = vadd.f32 %v2718_v58, %v2556_v46 }
 0x776   : > { %2783 = vst.msk [vmem:[#allocation3 + $0x8] sm:$0xff] %vm2781_vm6, %v2766_v16  ;;  %v3399_v16 = vld [vmem:[#allocation4 + $0x28] sm:$0xff] }
 0x777   : > { %2782 = vst.msk [vmem:[#allocation3] sm:$0xff] %vm2781_vm6, %v2765_v43  ;;  %v3404_v43 = vld [vmem:[#allocation4 + $0x50] sm:$0xff] }
 0x778   : > { %v2724_v5 = vpop.permute.xlu1 %2723  ;;  %v2730_v52 = vpop.permute.xlu0 %2729 }
 0x779   : > { %v2768_v21 = vadd.f32 %v2724_v5, %v2559_v20  ;;  %v2771_v47 = vadd.f32 %v2730_v52, %v2562_v55  ;;  %v3405_v55 = vld [vmem:[#allocation4 + $0x58] sm:$0xff] }
 0x77b   : > { %2785 = vst.msk [vmem:[#allocation3 + $0x18] sm:$0xff] %vm2781_vm6, %v2768_v21  ;;  %2788 = vst.msk [vmem:[#allocation3 + $0x30] sm:$0xff] %vm2781_vm6, %v2771_v47  ;;  %v3402_v47 = vld [vmem:[#allocation4 + $0x40] sm:$0xff] }
 0x77c   : > { %v2732_v31 = vpop.permute.xlu1 %2731  ;;  %v2726_v51 = vpop.permute.xlu0 %2725 }
 0x77d   : > { %v2772_v50 = vadd.f32 %v2732_v31, %v2563_v23  ;;  %v2769_v63 = vadd.f32 %v2726_v51, %v2560_v4  ;;  %v3403_v4 = vld [vmem:[#allocation4 + $0x48] sm:$0xff] }
 0x77f   : > { %2789 = vst.msk [vmem:[#allocation3 + $0x38] sm:$0xff] %vm2781_vm6, %v2772_v50  ;;  %2786 = vst.msk [vmem:[#allocation3 + $0x20] sm:$0xff] %vm2781_vm6, %v2769_v63  ;;  %v3408_v63 = vld [vmem:[#allocation4 + $0x70] sm:$0xff] }
 0x780   : > { %v2728_v7 = vpop.permute.xlu1 %2727  ;;  %v2738_v6 = vpop.permute.xlu0 %2737 }
 0x781   : > { %v2770_v40 = vadd.f32 %v2728_v7, %v2561_v57  ;;  %v2775_v59 = vadd.f32 %v2738_v6, %v2566_v54  ;;  %v3409_v54 = vld [vmem:[#allocation4 + $0x78] sm:$0xff] }
 0x783   : > { %2787 = vst.msk [vmem:[#allocation3 + $0x28] sm:$0xff] %vm2781_vm6, %v2770_v40  ;;  %2792 = vst.msk [vmem:[#allocation3 + $0x50] sm:$0xff] %vm2781_vm6, %v2775_v59  ;;  %v3406_v59 = vld [vmem:[#allocation4 + $0x60] sm:$0xff] }
 0x784   : > { %v2740_v10 = vpop.permute.xlu1 %2739  ;;  %v2734_v12 = vpop.permute.xlu0 %2733 }
 0x785   : > { %v2776_v13 = vadd.f32 %v2740_v10, %v2567_v25  ;;  %v2773_v14 = vadd.f32 %v2734_v12, %v2564_v11  ;;  %v3407_v11 = vld [vmem:[#allocation4 + $0x68] sm:$0xff] }
 0x787   : > { %2793 = vst.msk [vmem:[#allocation3 + $0x58] sm:$0xff] %vm2781_vm6, %v2776_v13  ;;  %2790 = vst.msk [vmem:[#allocation3 + $0x40] sm:$0xff] %vm2781_vm6, %v2773_v14 }
 0x788   : > { %v2736_v15 = vpop.permute.xlu1 %2735  ;;  %v2746_v17 = vpop.permute.xlu0 %2745 }
 0x789   : > { %v2774_v22 = vadd.f32 %v2736_v15, %v2565_v28  ;;  %v2779_v61 = vadd.f32 %v2746_v17, %v2570_v60 }
 0x78b   : > { %2791 = vst.msk [vmem:[#allocation3 + $0x48] sm:$0xff] %vm2781_vm6, %v2774_v22  ;;  %2796 = vst.msk [vmem:[#allocation3 + $0x70] sm:$0xff] %vm2781_vm6, %v2779_v61 }
 0x78c   : > { %v2742_v42 = vpop.permute.xlu0 %2741  ;;  %v2748_v18 = vpop.permute.xlu1 %2747 }
 0x78d   : > { %v2777_v19 = vadd.f32 %v2742_v42, %v2568_v53  ;;  %v2780_v49 = vadd.f32 %v2748_v18, %v2571_v29 }
 0x78f   : > { %2794 = vst.msk [vmem:[#allocation3 + $0x60] sm:$0xff] %vm2781_vm6, %v2777_v19  ;;  %2797 = vst.msk [vmem:[#allocation3 + $0x78] sm:$0xff] %vm2781_vm6, %v2780_v49 }
 0x790   : > { %v2744_v45 = vpop.permute.xlu1 %2743 }
 0x791   : > { %v2778_v34 = vadd.f32 %v2744_v45, %v2569_v38 }
 0x793   : > { %2795 = vst.msk [vmem:[#allocation3 + $0x68] sm:$0xff] %vm2781_vm6, %v2778_v34 }
 0x7dc   : > { %v3415_v2 = vpop.xlane.xlu1 %3414 }
 0x7dd   : > { %v3444_v33 = vadd.f32 %v3415_v2, %v3396_v3  ;;  %v3154_v3 = vld [vmem:[#allocation3 + $0x10] sm:$0xff] }
 0x7de   : > { %v3417_v24 = vpop.xlane.xlu0 %3416 }
 0x7df   : > { %3461 = vst.msk [vmem:[#allocation4 + $0x10] sm:$0xff] %vm3458_vm7, %v3444_v33  ;;  %v3445_v44 = vadd.f32 %v3417_v24, %v3397_v1  ;;  %v3153_v1 = vld [vmem:[#allocation3 + $0x8] sm:$0xff] }
 0x7e0   : > { %v3411_v0 = vpop.xlane.xlu1 %3410 }
 0x7e1   : > { %3462 = vst.msk [vmem:[#allocation4 + $0x18] sm:$0xff] %vm3458_vm7, %v3445_v44  ;;  %v3442_v32 = vadd.f32 %v3411_v0, %v3394_v27  ;;  %v3152_v27 = vld [vmem:[#allocation3] sm:$0xff] }
 0x7e2   : > { %v3413_v48 = vpop.xlane.xlu0 %3412 }
 0x7e3   : > { %3459 = vst.msk [vmem:[#allocation4] sm:$0xff] %vm3458_vm7, %v3442_v32  ;;  %v3443_v37 = vadd.f32 %v3413_v48, %v3395_v8  ;;  %v3155_v8 = vld [vmem:[#allocation3 + $0x18] sm:$0xff] }
 0x7e4   : > { %v3423_v41 = vpop.xlane.xlu1 %3422 }
 0x7e5   : > { %3460 = vst.msk [vmem:[#allocation4 + $0x8] sm:$0xff] %vm3458_vm7, %v3443_v37  ;;  %v3448_v39 = vadd.f32 %v3423_v41, %v3400_v35  ;;  %v3158_v37 = vld [vmem:[#allocation3 + $0x30] sm:$0xff] }
 0x7e6   : > { %v3425_v62 = vpop.xlane.xlu0 %3424 }
 0x7e7   : > { %3465 = vst.msk [vmem:[#allocation4 + $0x30] sm:$0xff] %vm3458_vm7, %v3448_v39  ;;  %v3449_v30 = vadd.f32 %v3425_v62, %v3401_v9  ;;  %v3159_v9 = vld [vmem:[#allocation3 + $0x38] sm:$0xff] }
 0x7e8   : > { %v3419_v26 = vpop.xlane.xlu1 %3418 }
 0x7e9   : > { %3466 = vst.msk [vmem:[#allocation4 + $0x38] sm:$0xff] %vm3458_vm7, %v3449_v30  ;;  %v3446_v36 = vadd.f32 %v3419_v26, %v3398_v56  ;;  %v3156_v30 = vld [vmem:[#allocation3 + $0x20] sm:$0xff] }
 0x7ea   : > { %v3421_v46 = vpop.xlane.xlu0 %3420 }
 0x7eb   : > { %3463 = vst.msk [vmem:[#allocation4 + $0x20] sm:$0xff] %vm3458_vm7, %v3446_v36  ;;  %v3447_v58 = vadd.f32 %v3421_v46, %v3399_v16  ;;  %v3157_v16 = vld [vmem:[#allocation3 + $0x28] sm:$0xff] }
 0x7ec   : > { %v3431_v20 = vpop.xlane.xlu1 %3430 }
 0x7ed   : > { %3464 = vst.msk [vmem:[#allocation4 + $0x28] sm:$0xff] %vm3458_vm7, %v3447_v58  ;;  %v3452_v5 = vadd.f32 %v3431_v20, %v3404_v43  ;;  %v3162_v58 = vld [vmem:[#allocation3 + $0x50] sm:$0xff] }
 0x7ee   : > { %v3433_v52 = vpop.xlane.xlu0 %3432 }
 0x7ef   : > { %3469 = vst.msk [vmem:[#allocation4 + $0x50] sm:$0xff] %vm3458_vm7, %v3452_v5  ;;  %v3453_v21 = vadd.f32 %v3433_v52, %v3405_v55  ;;  %v3163_v55 = vld [vmem:[#allocation3 + $0x58] sm:$0xff] }
 0x7f0   : > { %v3427_v23 = vpop.xlane.xlu1 %3426 }
 0x7f1   : > { %3470 = vst.msk [vmem:[#allocation4 + $0x58] sm:$0xff] %vm3458_vm7, %v3453_v21  ;;  %v3450_v31 = vadd.f32 %v3427_v23, %v3402_v47  ;;  %v3160_v21 = vld [vmem:[#allocation3 + $0x40] sm:$0xff] }
 0x7f2   : > { %v3429_v51 = vpop.xlane.xlu0 %3428 }
 0x7f3   : > { %3467 = vst.msk [vmem:[#allocation4 + $0x40] sm:$0xff] %vm3458_vm7, %v3450_v31  ;;  %v3451_v50 = vadd.f32 %v3429_v51, %v3403_v4  ;;  %v3161_v4 = vld [vmem:[#allocation3 + $0x48] sm:$0xff] }
 0x7f4   : > { %v3439_v57 = vpop.xlane.xlu1 %3438 }
 0x7f5   : > { %3468 = vst.msk [vmem:[#allocation4 + $0x48] sm:$0xff] %vm3458_vm7, %v3451_v50  ;;  %v3456_v7 = vadd.f32 %v3439_v57, %v3408_v63  ;;  %v3164_v63 = vld [vmem:[#allocation3 + $0x60] sm:$0xff] }
 0x7f6   : > { %v3441_v6 = vpop.xlane.xlu0 %3440 }
 0x7f7   : > { %3473 = vst.msk [vmem:[#allocation4 + $0x70] sm:$0xff] %vm3458_vm7, %v3456_v7  ;;  %v3457_v40 = vadd.f32 %v3441_v6, %v3409_v54  ;;  %v3165_v6 = vld [vmem:[#allocation3 + $0x68] sm:$0xff] }
 0x7f8   : > { %v3435_v25 = vpop.xlane.xlu1 %3434 }
 0x7f9   : > { %3474 = vst.msk [vmem:[#allocation4 + $0x78] sm:$0xff] %vm3458_vm7, %v3457_v40  ;;  %v3454_v10 = vadd.f32 %v3435_v25, %v3406_v59  ;;  %v3166_v59 = vld [vmem:[#allocation3 + $0x70] sm:$0xff] }
 0x7fa   : > { %v3437_v12 = vpop.xlane.xlu0 %3436 }
 0x7fb   : > { %3471 = vst.msk [vmem:[#allocation4 + $0x60] sm:$0xff] %vm3458_vm7, %v3454_v10  ;;  %v3455_v13 = vadd.f32 %v3437_v12, %v3407_v11  ;;  %v3167_v11 = vld [vmem:[#allocation3 + $0x78] sm:$0xff] }
 0x7fd   : > { %3472 = vst.msk [vmem:[#allocation4 + $0x68] sm:$0xff] %vm3458_vm7, %v3455_v13 }
 0x828   : > { %v6327_v14 = vpop.f32.mrb[80].mxu0 }
 0x829   : > { %v3234_v28 = vpop.f32.mrb[81].mxu0  ;;  %3317 = vrot.lane.b32.xlu1 %v6327_v14, %s7477_s17  ;;  %v3497_v14 = vld [vmem:[#allocation4 + $0x10] sm:$0xff] (!%p5734_p11) }
 0x82a   : > { %v6328_v15 = vpop.f32.mrb[82].mxu0 }
 0x82b   : > { %v3237_v60 = vpop.f32.mrb[83].mxu0 }
 0x82c   : > { %3315 = vrot.lane.b32.xlu0 %v3237_v60, %s7477_s17  ;;  %v7480_v60 = vmov (!%p5734_p11), 0  }
 0x82d   : > { %3313 = vrot.lane.b32.xlu1 %v3234_v28, %s7477_s17  ;;  %v3495_v28 = vld [vmem:[#allocation4] sm:$0xff] (!%p5734_p11)  ;;  %6799 = vset.pattern.permute.xlu0 (!%p5734_p11), %v7480_v60 }
 0x82e   : > { %6800 = vset.pattern.permute.xlu1 (!%p5734_p11), %v7480_v60  ;;  %4778 = vmatprep.mubr.bf16.mxu1 (!%p5734_p11), %v7480_v60 }
 0x830   : > { %v6331_v17 = vpop.f32.mrb[84].mxu0 }
 0x831   : > { %v3250_v22 = vpop.f32.mrb[85].mxu0  ;;  %3319 = vrot.lane.b32.xlu1 %v6328_v15, %s7477_s17  ;;  %3325 = vrot.lane.b32.xlu0 %v6331_v17, %s7477_s17  ;;  %v3498_v15 = vld [vmem:[#allocation4 + $0x18] sm:$0xff] (!%p5734_p11)  ;;  %v8907_v17 = vadd.f32 (!%p5734_p11), 1e-06, %v3497_v14 }
 0x832   : > { %v6332_v61 = vpop.f32.mrb[86].mxu0 }
 0x833   : > { %v3253_v53 = vpop.f32.mrb[87].mxu0 }
 0x835   : > { %3327 = vrot.lane.b32.xlu1 %v6332_v61, %s7477_s17  ;;  %3321 = vrot.lane.b32.xlu0 %v3250_v22, %s7477_s17  ;;  %v3511_v22 = vadd.f32 (!%p5734_p11), 1e-06, %v3495_v28  ;;  %v3496_v61 = vld [vmem:[#allocation4 + $0x8] sm:$0xff] (!%p5734_p11) }
 0x838   : > { %v6335_v42 = vpop.f32.mrb[88].mxu0 }
 0x839   : > { %v3266_v29 = vpop.f32.mrb[89].mxu0  ;;  %3323 = vrot.lane.b32.xlu1 %v3253_v53, %s7477_s17  ;;  %3333 = vrot.lane.b32.xlu0 %v6335_v42, %s7477_s17  ;;  %v3514_v53 = vadd.f32 (!%p5734_p11), 1e-06, %v3498_v15  ;;  %v3512_v42 = vadd.f32 (!%p5734_p11), 1e-06, %v3496_v61 }
 0x83a   : > { %v6336_v18 = vpop.f32.mrb[90].mxu0 }
 0x83b   : > { %v3269_v19 = vpop.f32.mrb[91].mxu0 }
 0x83d   : > { %3335 = vrot.lane.b32.xlu1 %v6336_v18, %s7477_s17  ;;  %3329 = vrot.lane.b32.xlu0 %v3266_v29, %s7477_s17  ;;  %v7481_v29 = vmov (!%p5734_p11), 1   ;;  %v7482_v18 = vmov (!%p5734_p11), 2  }
 0x840   : > { %v6339_v49 = vpop.f32.mrb[92].mxu0 }
 0x841   : > { %3331 = vrot.lane.b32.xlu1 %v3269_v19, %s7477_s17  ;;  %v3282_v45 = vpop.f32.mrb[93].mxu0  ;;  %v3499_v19 = vld [vmem:[#allocation4 + $0x20] sm:$0xff] (!%p5734_p11) }
 0x842   : > { %3337 = vrot.lane.b32.xlu0 %v3282_v45, %s7477_s17  ;;  %v6340_v38 = vpop.f32.mrb[94].mxu0  ;;  %v3502_v45 = vld [vmem:[#allocation4 + $0x38] sm:$0xff] (!%p5734_p11) }
 0x843   : > { %v3285_v34 = vpop.f32.mrb[95].mxu0 }
 0x845   : > { %3339 = vrot.lane.b32.xlu1 %v3285_v34, %s7477_s17  ;;  %v3676_v34 = vld [vmem:[#allocation4 + $0x28] sm:$0xff] (!%p5734_p11) }
 0x846   : > { %3341 = vrot.lane.b32.xlu0 %v6339_v49, %s7477_s17  ;;  %v3501_v49 = vld [vmem:[#allocation4 + $0x30] sm:$0xff] (!%p5734_p11) }
 0x849   : > { %3343 = vrot.lane.b32.xlu1 %v6340_v38, %s7477_s17  ;;  %v3515_v38 = vadd.f32 (!%p5734_p11), 1e-06, %v3499_v19  ;;  %s9840_s17 = sld [smem:[#allocation56_spill]] (!%p5734_p11) }
 0x84a   : > { %3529 = vperm.xlu0 (!%p5734_p11), %6799, %v3511_v22  }
 0x84d   : > { %3539 = vperm.xlu1 (!%p5734_p11), %6800, %v8907_v17  }
 0x84e   : > { %3534 = vperm.xlu0 (!%p5734_p11), %6799, %v3512_v42  }
 0x851   : > { %3544 = vperm.xlu1 (!%p5734_p11), %6800, %v3514_v53  }
 0x852   : > { %6803 = vset.pattern.permute.xlu0 (!%p5734_p11), %v7482_v18 }
 0x853   : > { %3881 = vperm.xlu0 (!%p5734_p11), %6803, %v3511_v22  }
 0x855   : > { %6801 = vset.pattern.permute.xlu1 (!%p5734_p11), %v7481_v29 }
 0x856   : > { %3710 = vperm.xlu1 (!%p5734_p11), %6801, %v3512_v42  }
 0x857   : > { %3896 = vperm.xlu0 (!%p5734_p11), %6803, %v3514_v53  }
 0x85a   : > { %3715 = vperm.xlu1 (!%p5734_p11), %6801, %v8907_v17  }
 0x85b   : > { %6805 = vset.pattern.permute.xlu0 (!%p5734_p11), %v7481_v29 }
 0x85c   : > { %3705 = vperm.xlu0 (!%p5734_p11), %6805, %v3511_v22  }
 0x85e   : > { %6802 = vset.pattern.permute.xlu1 (!%p5734_p11), %v7480_v60 }
 0x85f   : > { %3549 = vperm.xlu1 (!%p5734_p11), %6802, %v3515_v38  }
 0x860   : > { %3720 = vperm.xlu0 (!%p5734_p11), %6805, %v3514_v53  }
 0x89b   : > { %v3318_v2 = vpop.permute.xlu1 %3317 }
 0x89c   : > { %v3363_v33 = vadd.f32 %v3318_v2, %v3154_v3  ;;  %v3680_v3 = vld [vmem:[#allocation4 + $0x48] sm:$0xff] (!%p5734_p11)  ;;  %v8914_v2 = vadd.f32 (!%p5734_p11), 1e-06, %v3501_v49 }
 0x89e   : > { %3380 = vst.msk [vmem:[#allocation3 + $0x10] sm:$0xff] %vm3377_vm8, %v3363_v33  ;;  %v3316_v24 = vpop.permute.xlu0 %3315  ;;  %v3518_v33 = vadd.f32 (!%p5734_p11), 1e-06, %v3502_v45  ;;  %3559 = vperm.xlu1 (!%p5734_p11), %6802, %v8914_v2  }
 0x89f   : > { %v3362_v44 = vadd.f32 %v3316_v24, %v3153_v1  ;;  %v3314_v0 = vpop.permute.xlu1 %3313  ;;  %v8918_v1 = vadd.f32 (!%p5734_p11), 1e-06, %v3676_v34  ;;  %v8920_v24 = vadd.f32 (!%p5734_p11), 1e-06, %v3680_v3 }
 0x8a0   : > { %v3361_v32 = vadd.f32 %v3314_v0, %v3152_v27  ;;  %v6825_v27 = vld [vmem:[#allocation14] sm:$0xff] (!%p5734_p11)   ;;  %v6826_v0 = vld [vmem:[#allocation14 + $0x8] sm:$0xff] (!%p5734_p11)  }
 0x8a1   : > { %3379 = vst.msk [vmem:[#allocation3 + $0x8] sm:$0xff] %vm3377_vm8, %v3362_v44  ;;  %3730 = vperm.xlu0 (!%p5734_p11), %6805, %v8918_v1   ;;  %v7483_v44 = vmov (!%p5734_p11), 3   ;;  %6341 = vmatprep.subr.bf16.mxu0 (!%p5734_p11), %v6825_v27 }
 0x8a2   : > { %3378 = vst.msk [vmem:[#allocation3] sm:$0xff] %vm3377_vm8, %v3361_v32  ;;  %3564 = vperm.xlu1 (!%p5734_p11), %6802, %v3518_v33   ;;  %6342 = vmatpush3.bf16.msra.mxu0 (!%p5734_p11), %v6825_v27  ;;  %v3508_v32 = vld [vmem:[#allocation4 + $0x68] sm:$0xff] (!%p5734_p11) }
 0x8a3   : > { %v3320_v48 = vpop.permute.xlu1 %3319  ;;  %v3326_v35 = vpop.permute.xlu0 %3325  ;;  %6343 = vmatprep.subr.bf16.mxu0 (!%p5734_p11), %v6826_v0 }
 0x8a4   : > { %v3364_v41 = vadd.f32 %v3320_v48, %v3155_v8  ;;  %v3367_v39 = vadd.f32 %v3326_v35, %v3158_v37  ;;  %v3503_v8 = vld [vmem:[#allocation4 + $0x40] sm:$0xff] (!%p5734_p11)  ;;  %v6827_v48 = vld [vmem:[#allocation14 + $0x10] sm:$0xff] (!%p5734_p11)   ;;  %v8934_v37 = vadd.f32 (!%p5734_p11), 1e-06, %v3508_v32 }
 0x8a5   : > { %3750 = vperm.xlu0 (!%p5734_p11), %6805, %v8920_v24   ;;  %v3519_v35 = vadd.f32 (!%p5734_p11), 1e-06, %v3503_v8 }
 0x8a6   : > { %3381 = vst.msk [vmem:[#allocation3 + $0x18] sm:$0xff] %vm3377_vm8, %v3364_v41  ;;  %3384 = vst.msk [vmem:[#allocation3 + $0x30] sm:$0xff] %vm3377_vm8, %v3367_v39  ;;  %6804 = vset.pattern.permute.xlu1 (!%p5734_p11), %v7482_v18  ;;  %6344 = vmatpush3.bf16.msra.mxu0 (!%p5734_p11), %v6826_v0  ;;  %v3505_v41 = vld [vmem:[#allocation4 + $0x50] sm:$0xff] (!%p5734_p11)  ;;  %v6828_v39 = vld [vmem:[#allocation14 + $0x18] sm:$0xff] (!%p5734_p11)  }
 0x8a7   : > { %v3328_v62 = vpop.permute.xlu1 %3327  ;;  %v3322_v56 = vpop.permute.xlu0 %3321  ;;  %3886 = vperm.xlu1 (!%p5734_p11), %6804, %v3512_v42   ;;  %6345 = vmatprep.subr.bf16.mxu0 (!%p5734_p11), %v6827_v48 }
 0x8a8   : > { %v3368_v26 = vadd.f32 %v3328_v62, %v3159_v9  ;;  %v3365_v36 = vadd.f32 %v3322_v56, %v3156_v30  ;;  %v8939_v9 = vadd.f32 (!%p5734_p11), 1e-06, %v3505_v41  ;;  %v3506_v62 = vld [vmem:[#allocation4 + $0x58] sm:$0xff] (!%p5734_p11)  ;;  %v6829_v30 = vld [vmem:[#allocation14 + $0x20] sm:$0xff] (!%p5734_p11)  }
 0x8a9   : > { %6811 = vset.pattern.permute.xlu0 (!%p5734_p11), %v7483_v44  ;;  %v3522_v56 = vadd.f32 (!%p5734_p11), 1e-06, %v3506_v62 }
 0x8aa   : > { %3385 = vst.msk [vmem:[#allocation3 + $0x38] sm:$0xff] %vm3377_vm8, %v3368_v26  ;;  %3382 = vst.msk [vmem:[#allocation3 + $0x20] sm:$0xff] %vm3377_vm8, %v3365_v36  ;;  %4057 = vperm.xlu0 (!%p5734_p11), %6811, %v3511_v22   ;;  %6346 = vmatpush3.bf16.msra.mxu0 (!%p5734_p11), %v6827_v48  ;;  %v6830_v26 = vld [vmem:[#allocation14 + $0x28] sm:$0xff] (!%p5734_p11)   ;;  %v6831_v36 = vld [vmem:[#allocation14 + $0x30] sm:$0xff] (!%p5734_p11)  }
 0x8ab   : > { %v3324_v46 = vpop.permute.xlu1 %3323  ;;  %v3334_v43 = vpop.permute.xlu0 %3333  ;;  %3891 = vperm.xlu1 (!%p5734_p11), %6804, %v8907_v17   ;;  %6347 = vmatprep.subr.bf16.mxu0 (!%p5734_p11), %v6828_v39 }
 0x8ac   : > { %v3366_v20 = vadd.f32 %v3324_v46, %v3157_v16  ;;  %v3371_v5 = vadd.f32 %v3334_v43, %v3162_v58  ;;  %v6832_v16 = vld [vmem:[#allocation14 + $0x38] sm:$0xff] (!%p5734_p11)   ;;  %v3507_v46 = vld [vmem:[#allocation4 + $0x60] sm:$0xff] (!%p5734_p11) }
 0x8ad   : > { %v3523_v58 = vadd.f32 (!%p5734_p11), 1e-06, %v3507_v46  ;;  %v3510_v43 = vld [vmem:[#allocation4 + $0x78] sm:$0xff] (!%p5734_p11) }
 0x8ae   : > { %3383 = vst.msk [vmem:[#allocation3 + $0x28] sm:$0xff] %vm3377_vm8, %v3366_v20  ;;  %3388 = vst.msk [vmem:[#allocation3 + $0x50] sm:$0xff] %vm3377_vm8, %v3371_v5  ;;  %4072 = vperm.xlu0 (!%p5734_p11), %6811, %v3514_v53   ;;  %6348 = vmatpush3.bf16.msra.mxu0 (!%p5734_p11), %v6828_v39  ;;  %v3509_v20 = vld [vmem:[#allocation4 + $0x70] sm:$0xff] (!%p5734_p11)  ;;  %v8957_v5 = vadd.f32 (!%p5734_p11), 1e-06, %v3510_v43 }
 0x8af   : > { %v3336_v52 = vpop.permute.xlu1 %3335  ;;  %v3330_v47 = vpop.permute.xlu0 %3329  ;;  %6806 = vset.pattern.permute.xlu1 (!%p5734_p11), %v7481_v29  ;;  %6349 = vmatprep.subr.bf16.mxu0 (!%p5734_p11), %v6829_v30 }
 0x8b0   : > { %v3372_v23 = vadd.f32 %v3336_v52, %v3163_v55  ;;  %v3369_v31 = vadd.f32 %v3330_v47, %v3160_v21  ;;  %3725 = vperm.xlu1 (!%p5734_p11), %6806, %v3515_v38   ;;  %v8961_v55 = vadd.f32 (!%p5734_p11), 1e-06, %v3509_v20 }
 0x8b1   : > { %v3486_v41 = vld [vmem:[#allocation3 + $0x38] sm:$0xff] (!%p5734_p11) }
 0x8b2   : > { %3389 = vst.msk [vmem:[#allocation3 + $0x58] sm:$0xff] %vm3377_vm8, %v3372_v23  ;;  %3386 = vst.msk [vmem:[#allocation3 + $0x40] sm:$0xff] %vm3377_vm8, %v3369_v31  ;;  %4077 = vperm.xlu0 (!%p5734_p11), %6811, %v3515_v38   ;;  %6350 = vmatpush3.bf16.msra.mxu0 (!%p5734_p11), %v6829_v30  ;;  %v3481_v31 = vld [vmem:[#allocation3 + $0x10] sm:$0xff] (!%p5734_p11) }
 0x8b3   : > { %v3332_v51 = vpop.permute.xlu1 %3331  ;;  %6351 = vmatprep.subr.bf16.mxu0 (!%p5734_p11), %v6830_v26 }
 0x8b4   : > { %v3370_v50 = vadd.f32 %v3332_v51, %v3161_v4  ;;  %v3338_v57 = vpop.permute.xlu0 %3337  ;;  %3735 = vperm.xlu1 (!%p5734_p11), %6806, %v8914_v2  }
 0x8b5   : > { %v3373_v7 = vadd.f32 %v3338_v57, %v3164_v63 }
 0x8b6   : > { %3387 = vst.msk [vmem:[#allocation3 + $0x48] sm:$0xff] %vm3377_vm8, %v3370_v50  ;;  %4092 = vperm.xlu0 (!%p5734_p11), %6811, %v3518_v33   ;;  %6352 = vmatpush3.bf16.msra.mxu0 (!%p5734_p11), %v6830_v26  ;;  %v3479_v50 = vld [vmem:[#allocation3] sm:$0xff] (!%p5734_p11) }
 0x8b7   : > { %3390 = vst.msk [vmem:[#allocation3 + $0x60] sm:$0xff] %vm3377_vm8, %v3373_v7  ;;  %v3340_v54 = vpop.permute.xlu1 %3339  ;;  %6353 = vmatprep.subr.bf16.mxu0 (!%p5734_p11), %v6831_v36 }
 0x8b8   : > { %v3374_v40 = vadd.f32 %v3340_v54, %v3165_v6  ;;  %v3342_v25 = vpop.permute.xlu0 %3341  ;;  %3478 = sbr.rel (%p5734_p11) target bundleno = 3798 (0xed6), region = 120  ;;  %3740 = vperm.xlu1 (!%p5734_p11), %6806, %v3518_v33   ;;  %v3482_v6 = vld [vmem:[#allocation3 + $0x18] sm:$0xff] (!%p5734_p11) }
 0x8b9   : > { %v3375_v10 = vadd.f32 %v3342_v25, %v3166_v59  ;;  %v3480_v25 = vld [vmem:[#allocation3 + $0x8] sm:$0xff] (!%p5734_p11) }
 0x8ba   : > { %3391 = vst.msk [vmem:[#allocation3 + $0x68] sm:$0xff] %vm3377_vm8, %v3374_v40  ;;  %6813 = vset.pattern.permute.xlu0 (!%p5734_p11), %v7480_v60  ;;  %6354 = vmatpush3.bf16.msra.mxu0 (!%p5734_p11), %v6831_v36 }
 0x8bb   : > { %3392 = vst.msk [vmem:[#allocation3 + $0x70] sm:$0xff] %vm3377_vm8, %v3375_v10  ;;  %v3344_v12 = vpop.permute.xlu1 %3343  ;;  %3554 = vperm.xlu0 (!%p5734_p11), %6813, %v8918_v1   ;;  %6355 = vmatprep.subr.bf16.mxu0 (!%p5734_p11), %v6832_v16 }
 0x8bc   : > { %v3376_v13 = vadd.f32 %v3344_v12, %v3167_v11  ;;  %6807 = vset.pattern.permute.xlu1 (!%p5734_p11), %v7483_v44 }
 0x8bd   : > { %4062 = vperm.xlu1 (!%p5734_p11), %6807, %v3512_v42  }
 0x8be   : > { %3393 = vst.msk [vmem:[#allocation3 + $0x78] sm:$0xff] %vm3377_vm8, %v3376_v13  ;;  %6356 = vmatpush3.bf16.msra.mxu0 (!%p5734_p11), %v6832_v16 }
 0x8bf   : > { %3574 = vperm.xlu0 %6813, %v8920_v24  }
 0x8c1   : > { %4067 = vperm.xlu1 %6807, %v8907_v17  }
 0x8c3   : > { %3594 = vperm.xlu0 %6813, %v8934_v37  }
 0x8c5   : > { %6808 = vset.pattern.permute.xlu1 %v7480_v60 }
 0x8c6   : > { %3569 = vperm.xlu1 %6808, %v3519_v35  }
 0x8c7   : > { %6815 = vset.pattern.permute.xlu0 %v7482_v18 }
 0x8c8   : > { %3901 = vperm.xlu0 %6815, %v3515_v38   ;;  %v3483_v38 = vld [vmem:[#allocation3 + $0x20] sm:$0xff] }
 0x8c9   : > { %v3530_v21 = vpop.permute.xlu0 %3529 }
 0x8ca   : > { %3579 = vperm.xlu1 %6808, %v8939_v9  }
 0x8cc   : > { %3916 = vperm.xlu0 %6815, %v3518_v33   ;;  %v3540_v52 = vpop.permute.xlu1 %3539 }
 0x8cd   : > { %6873 = vrcp.f32 %v3540_v52  ;;  %v3535_v23 = vpop.permute.xlu0 %3534 }
 0x8ce   : > { %3584 = vperm.xlu1 %6808, %v3522_v56   ;;  %6875 = vrcp.f32 %v3530_v21 }
 0x8d0   : > { %3921 = vperm.xlu0 %6815, %v3519_v35   ;;  %v3545_v47 = vpop.permute.xlu1 %3544 }
 0x8d1   : > { %6877 = vrcp.f32 %v3545_v47 }
 0x8d2   : > { %6809 = vset.pattern.permute.xlu1 %v7482_v18  ;;  %6879 = vrcp.f32 %v3535_v23  ;;  %v3882_v51 = vpop.permute.xlu0 %3881 }
 0x8d3   : > { %3906 = vperm.xlu1 %6809, %v8918_v1  }
 0x8d4   : > { %3936 = vperm.xlu0 %6815, %v3522_v56  }
 0x8d5   : > { %v3711_v4 = vpop.permute.xlu1 %3710 }
 0x8d6   : > { %v3897_v59 = vpop.permute.xlu0 %3896 }
 0x8d7   : > { %3911 = vperm.xlu1 %6809, %v8914_v2   ;;  %v6874_v63 = vpop.eup %6873 }
 0x8d8   : > { %6818 = vset.pattern.permute.xlu0 %v7481_v29  ;;  %v6876_v57 = vpop.eup %6875  ;;  %v3612_v7 = vmul.f32 %v6874_v63, %v3481_v31 }
 0x8d9   : > { %3770 = vperm.xlu0 %6818, %v8934_v37   ;;  %v3608_v54 = vmul.f32 %v6876_v57, %v3479_v50  ;;  %v3716_v40 = vpop.permute.xlu1 %3715 }
 0x8da   : > { %3641 = vst.msk [vmem:[#allocation3 + $0x10] sm:$0xff] %vm1211_vm1, %v3612_v7  ;;  %6881 = vrcp.f32 %v3716_v40 }
 0x8db   : > { %6810 = vset.pattern.permute.xlu1 %v7481_v29  ;;  %v6878_v10 = vpop.eup %6877  ;;  %3639 = vst.msk [vmem:[#allocation3] sm:$0xff] %vm1211_vm1, %v3608_v54  ;;  %6883 = vrcp.f32 %v3711_v4  ;;  %v3706_v28 = vpop.permute.xlu0 %3705 }
 0x8dc   : > { %3745 = vperm.xlu1 %6810, %v3519_v35   ;;  %v6880_v11 = vpop.eup %6879  ;;  %v3614_v12 = vmul.f32 %v6878_v10, %v3482_v6 }
 0x8dd   : > { %6819 = vset.pattern.permute.xlu0 %v7483_v44  ;;  %v3610_v13 = vmul.f32 %v6880_v11, %v3480_v25 }
 0x8de   : > { %4097 = vperm.xlu0 %6819, %v3519_v35   ;;  %3642 = vst.msk [vmem:[#allocation3 + $0x18] sm:$0xff] %vm1211_vm1, %v3614_v12  ;;  %v3550_v14 = vpop.permute.xlu1 %3549 }
 0x8df   : > { %3640 = vst.msk [vmem:[#allocation3 + $0x8] sm:$0xff] %vm1211_vm1, %v3610_v13  ;;  %6885 = vrcp.f32 %v3550_v14  ;;  %v3721_v17 = vpop.permute.xlu0 %3720 }
 0x8e0   : > { %3755 = vperm.xlu1 %6810, %v8939_v9   ;;  %6887 = vrcp.f32 %v3706_v28 }
 0x8e1   : > { %v3657_v61 = vld [vmem:[#allocation3 + $0x10] sm:$0xff] }
 0x8e2   : > { %4112 = vperm.xlu0 %6819, %v3522_v56  }
 0x8e4   : > { %3760 = vperm.xlu1 %6810, %v3522_v56   ;;  %v6882_v22 = vpop.eup %6881 }
 0x8e5   : > { %v3788_v53 = vmul.f32 %v6882_v22, %v3657_v61  ;;  %v6884_v42 = vpop.eup %6883  ;;  %v3658_v48 = vld [vmem:[#allocation3 + $0x18] sm:$0xff] }
 0x8e6   : > { %6822 = vset.pattern.permute.xlu0 %v7482_v18 }
 0x8e7   : > { %3946 = vperm.xlu0 %6822, %v8934_v37   ;;  %3817 = vst.msk [vmem:[#allocation3 + $0x10] sm:$0xff] %vm2185_vm4, %v3788_v53  ;;  %v3484_v53 = vld [vmem:[#allocation3 + $0x28] sm:$0xff] }
 0x8e8   : > { %6812 = vset.pattern.permute.xlu1 %v7483_v44 }
 0x8e9   : > { %4082 = vperm.xlu1 %6812, %v8918_v1   ;;  %v6886_v34 = vpop.eup %6885 }
 0x8ea   : > { %v6888_v3 = vpop.eup %6887 }
 0x8eb   : > { %6823 = vset.pattern.permute.xlu0 %v7483_v44 }
 0x8ec   : > { %4117 = vperm.xlu0 %6823, %v3523_v58  }
 0x8ed   : > { %4087 = vperm.xlu1 %6812, %v8914_v2   ;;  %v3616_v2 = vmul.f32 %v6886_v34, %v3483_v38  ;;  %v3488_v34 = vld [vmem:[#allocation3 + $0x48] sm:$0xff] }
 0x8ef   : > { %3643 = vst.msk [vmem:[#allocation3 + $0x20] sm:$0xff] %vm1211_vm1, %v3616_v2 }
 0x8f0   : > { %4132 = vperm.xlu0 %6823, %v8957_v5  }
 0x8f1   : > { %6814 = vset.pattern.permute.xlu1 %v7480_v60 }
 0x8f2   : > { %3589 = vperm.xlu1 %6814, %v3523_v58  }
 0x8f6   : > { %3599 = vperm.xlu1 %6814, %v8961_v55   ;;  %v3659_v7 = vld [vmem:[#allocation3 + $0x20] sm:$0xff] }
 0x8fa   : > { %3604 = vperm.xlu1 %6814, %v8957_v5  }
 0x8fe   : > { %6816 = vset.pattern.permute.xlu1 %v7482_v18 }
 0x8ff   : > { %3926 = vperm.xlu1 %6816, %v8920_v24  }
 0x903   : > { %3931 = vperm.xlu1 %6816, %v8939_v9  }
 0x907   : > { %6817 = vset.pattern.permute.xlu1 %v7481_v29  ;;  %v3656_v29 = vld [vmem:[#allocation3 + $0x8] sm:$0xff] }
 0x908   : > { %3765 = vperm.xlu1 %6817, %v3523_v58   ;;  %v3786_v45 = vmul.f32 %v6884_v42, %v3656_v29 }
 0x90a   : > { %3816 = vst.msk [vmem:[#allocation3 + $0x8] sm:$0xff] %vm2185_vm4, %v3786_v45 }
 0x90c   : > { %3775 = vperm.xlu1 %6817, %v8961_v55  }
 0x910   : > { %3780 = vperm.xlu1 %6817, %v8957_v5  }
 0x911   : > { %v3832_v43 = vld [vmem:[#allocation3 + $0x8] sm:$0xff] }
 0x914   : > { %6820 = vset.pattern.permute.xlu1 %v7483_v44 }
 0x915   : > { %4102 = vperm.xlu1 %6820, %v8920_v24   ;;  %v3485_v24 = vld [vmem:[#allocation3 + $0x30] sm:$0xff] }
 0x919   : > { %4107 = vperm.xlu1 %6820, %v8939_v9  }
 0x91d   : > { %6821 = vset.pattern.permute.xlu1 %v7482_v18  ;;  %v3560_v15 = vpop.permute.xlu1 %3559  ;;  %v3655_v18 = vld [vmem:[#allocation3] sm:$0xff] }
 0x91e   : > { %6889 = vrcp.f32 %v3560_v15  ;;  %3941 = vperm.xlu1 %6821, %v3523_v58   ;;  %v3784_v1 = vmul.f32 %v6888_v3, %v3655_v18 }
 0x91f   : > { %6891 = vrcp.f32 %v3721_v17 }
 0x920   : > { %v8979_v49 = vpop.permute.xlu0 %3730  ;;  %3815 = vst.msk [vmem:[#allocation3] sm:$0xff] %vm2185_vm4, %v3784_v1 }
 0x921   : > { %v3565_v19 = vpop.permute.xlu1 %3564 }
 0x922   : > { %6893 = vrcp.f32 %v3565_v19  ;;  %3951 = vperm.xlu1 %6821, %v8961_v55  }
 0x923   : > { %6895 = vrcp.f32 %v3882_v51 }
 0x924   : > { %v8984_v33 = vpop.permute.xlu0 %3750  ;;  %6897 = vrcp.f32 %v3897_v59 }
 0x926   : > { %3956 = vperm.xlu1 %6821, %v8957_v5   ;;  %v3887_v27 = vpop.permute.xlu1 %3886 }
 0x927   : > { %6899 = vrcp.f32 %v3887_v27  ;;  %v3831_v36 = vld [vmem:[#allocation3] sm:$0xff] }
 0x928   : > { %v6890_v0 = vpop.eup %6889 }
 0x929   : > { %v6892_v32 = vpop.eup %6891  ;;  %v3620_v8 = vmul.f32 %v6890_v0, %v3485_v24  ;;  %v4058_v9 = vpop.permute.xlu0 %4057 }
 0x92a   : > { %v3790_v35 = vmul.f32 %v6892_v32, %v3658_v48  ;;  %6824 = vset.pattern.permute.xlu1 %v7483_v44  ;;  %v3892_v39 = vpop.permute.xlu1 %3891  ;;  %v3492_v32 = vld [vmem:[#allocation3 + $0x68] sm:$0xff] }
 0x92b   : > { %3645 = vst.msk [vmem:[#allocation3 + $0x30] sm:$0xff] %vm1211_vm1, %v3620_v8  ;;  %6901 = vrcp.f32 %v3892_v39  ;;  %4122 = vperm.xlu1 %6824, %v8934_v37  }
 0x92c   : > { %v6894_v62 = vpop.eup %6893  ;;  %3818 = vst.msk [vmem:[#allocation3 + $0x18] sm:$0xff] %vm2185_vm4, %v3790_v35  ;;  %6903 = vrcp.f32 %v4058_v9 }
 0x92d   : > { %v6896_v30 = vpop.eup %6895  ;;  %v3622_v56 = vmul.f32 %v6894_v62, %v3486_v41  ;;  %v4073_v26 = vpop.permute.xlu0 %4072  ;;  %v3487_v41 = vld [vmem:[#allocation3 + $0x40] sm:$0xff] }
 0x92e   : > { %v6898_v16 = vpop.eup %6897  ;;  %v3960_v46 = vmul.f32 %v6896_v30, %v3831_v36 }
 0x92f   : > { %3646 = vst.msk [vmem:[#allocation3 + $0x38] sm:$0xff] %vm1211_vm1, %v3622_v56  ;;  %4127 = vperm.xlu1 %6824, %v8961_v55   ;;  %v3726_v44 = vpop.permute.xlu1 %3725  ;;  %v3833_v55 = vld [vmem:[#allocation3 + $0x10] sm:$0xff] }
 0x930   : > { %6905 = vrcp.f32 %v3726_v44  ;;  %3991 = vst.msk [vmem:[#allocation3] sm:$0xff] %vm2781_vm6, %v3960_v46  ;;  %v3489_v46 = vld [vmem:[#allocation3 + $0x50] sm:$0xff] }
 0x931   : > { %v6900_v58 = vpop.eup %6899  ;;  %6907 = vrcp.f32 %v4073_v26  ;;  %v8996_v20 = vpop.permute.xlu0 %4077 }
 0x932   : > { %v3962_v37 = vmul.f32 %v6900_v58, %v3832_v43  ;;  %v3661_v12 = vld [vmem:[#allocation3 + $0x30] sm:$0xff] }
 0x933   : > { %v3834_v5 = vld [vmem:[#allocation3 + $0x18] sm:$0xff]  ;;  %v3736_v52 = vpop.permute.xlu1 %3735 }
 0x934   : > { %3992 = vst.msk [vmem:[#allocation3 + $0x8] sm:$0xff] %vm2781_vm6, %v3962_v37  ;;  %v3966_v21 = vmul.f32 %v6898_v16, %v3834_v5  ;;  %6909 = vrcp.f32 %v3736_v52 }
 0x935   : > { %v6902_v47 = vpop.eup %6901  ;;  %v9000_v31 = vpop.permute.xlu0 %4092 }
 0x936   : > { %v3964_v23 = vmul.f32 %v6902_v47, %v3833_v55  ;;  %3994 = vst.msk [vmem:[#allocation3 + $0x18] sm:$0xff] %vm2781_vm6, %v3966_v21  ;;  %v6904_v4 = vpop.eup %6903  ;;  %v3662_v17 = vld [vmem:[#allocation3 + $0x38] sm:$0xff] }
 0x937   : > { %v3741_v51 = vpop.permute.xlu1 %3740  ;;  %v4007_v50 = vld [vmem:[#allocation3] sm:$0xff] }
 0x938   : > { %3993 = vst.msk [vmem:[#allocation3 + $0x10] sm:$0xff] %vm2781_vm6, %v3964_v23  ;;  %6911 = vrcp.f32 %v3741_v51  ;;  %v4136_v57 = vmul.f32 %v6904_v4, %v4007_v50  ;;  %v3490_v50 = vld [vmem:[#allocation3 + $0x58] sm:$0xff] }
 0x93a   : > { %v6906_v63 = vpop.eup %6905  ;;  %v3555_v40 = vpop.permute.xlu0 %3554  ;;  %4167 = vst.msk [vmem:[#allocation3] sm:$0xff] %vm3377_vm8, %v4136_v57 }
 0x93b   : > { %v6908_v54 = vpop.eup %6907  ;;  %v3792_v6 = vmul.f32 %v6906_v63, %v3659_v7  ;;  %6913 = vrcp.f32 %v3555_v40  ;;  %v4008_v45 = vld [vmem:[#allocation3 + $0x8] sm:$0xff] }
 0x93c   : > { %v4063_v59 = vpop.permute.xlu1 %4062 }
 0x93d   : > { %3819 = vst.msk [vmem:[#allocation3 + $0x20] sm:$0xff] %vm2185_vm4, %v3792_v6  ;;  %v4010_v25 = vld [vmem:[#allocation3 + $0x18] sm:$0xff]  ;;  %6915 = vrcp.f32 %v4063_v59 }
 0x93e   : > { %v6910_v10 = vpop.eup %6909  ;;  %v4142_v11 = vmul.f32 %v6908_v54, %v4010_v25  ;;  %v3575_v14 = vpop.permute.xlu0 %3574 }
 0x93f   : > { %v3796_v13 = vmul.f32 %v6910_v10, %v3661_v12  ;;  %6917 = vrcp.f32 %v3575_v14  ;;  %v4009_v24 = vld [vmem:[#allocation3 + $0x10] sm:$0xff] }
 0x940   : > { %4170 = vst.msk [vmem:[#allocation3 + $0x18] sm:$0xff] %vm3377_vm8, %v4142_v11  ;;  %v4068_v28 = vpop.permute.xlu1 %4067 }
 0x941   : > { %3821 = vst.msk [vmem:[#allocation3 + $0x30] sm:$0xff] %vm2185_vm4, %v3796_v13  ;;  %6919 = vrcp.f32 %v4068_v28  ;;  %v4183_v9 = vld [vmem:[#allocation3] sm:$0xff] }
 0x942   : > { %v6912_v15 = vpop.eup %6911  ;;  %6921 = vrcp.f32 %v8979_v49  ;;  %v3595_v61 = vpop.permute.xlu0 %3594 }
 0x943   : > { %v3798_v22 = vmul.f32 %v6912_v15, %v3662_v17  ;;  %6923 = vrcp.f32 %v3595_v61 }
 0x944   : > { %v3835_v5 = vld [vmem:[#allocation3 + $0x20] sm:$0xff] }
 0x945   : > { %3822 = vst.msk [vmem:[#allocation3 + $0x38] sm:$0xff] %vm2185_vm4, %v3798_v22  ;;  %v3570_v42 = vpop.permute.xlu1 %3569  ;;  %v6914_v29 = vpop.eup %6913 }
 0x946   : > { %6925 = vrcp.f32 %v3570_v42  ;;  %v3618_v38 = vmul.f32 %v6914_v29, %v3484_v53 }
 0x947   : > { %v6916_v19 = vpop.eup %6915  ;;  %6927 = vrcp.f32 %v8984_v33  ;;  %v3902_v3 = vpop.permute.xlu0 %3901  ;;  %v4186_v51 = vld [vmem:[#allocation3 + $0x18] sm:$0xff] }
 0x948   : > { %v4138_v18 = vmul.f32 %v6916_v19, %v4008_v45  ;;  %3644 = vst.msk [vmem:[#allocation3 + $0x28] sm:$0xff] %vm1211_vm1, %v3618_v38  ;;  %6929 = vrcp.f32 %v3902_v3  ;;  %v3837_v42 = vld [vmem:[#allocation3 + $0x30] sm:$0xff] }
 0x949   : > { %v3580_v49 = vpop.permute.xlu1 %3579  ;;  %v6918_v2 = vpop.eup %6917 }
 0x94a   : > { %4168 = vst.msk [vmem:[#allocation3 + $0x8] sm:$0xff] %vm3377_vm8, %v4138_v18  ;;  %6931 = vrcp.f32 %v3580_v49  ;;  %v3626_v27 = vmul.f32 %v6918_v2, %v3488_v34 }
 0x94b   : > { %v6920_v1 = vpop.eup %6919  ;;  %v3917_v8 = vpop.permute.xlu0 %3916 }
 0x94c   : > { %v4140_v0 = vmul.f32 %v6920_v1, %v4009_v24  ;;  %v6922_v48 = vpop.eup %6921  ;;  %3648 = vst.msk [vmem:[#allocation3 + $0x48] sm:$0xff] %vm1211_vm1, %v3626_v27  ;;  %6933 = vrcp.f32 %v3917_v8  ;;  %v3838_v54 = vld [vmem:[#allocation3 + $0x38] sm:$0xff] }
 0x94d   : > { %v3585_v33 = vpop.permute.xlu1 %3584  ;;  %v6924_v35 = vpop.eup %6923 }
 0x94e   : > { %4169 = vst.msk [vmem:[#allocation3 + $0x10] sm:$0xff] %vm3377_vm8, %v4140_v0  ;;  %6935 = vrcp.f32 %v3585_v33  ;;  %v3634_v39 = vmul.f32 %v6924_v35, %v3492_v32 }
 0x94f   : > { %v3660_v30 = vld [vmem:[#allocation3 + $0x28] sm:$0xff]  ;;  %v3922_v56 = vpop.permute.xlu0 %3921  ;;  %6937 = vrcp.f32 %v8996_v20 }
 0x950   : > { %v6926_v62 = vpop.eup %6925  ;;  %v3794_v26 = vmul.f32 %v6922_v48, %v3660_v30  ;;  %3652 = vst.msk [vmem:[#allocation3 + $0x68] sm:$0xff] %vm1211_vm1, %v3634_v39 }
 0x951   : > { %v3624_v36 = vmul.f32 %v6926_v62, %v3487_v41  ;;  %v4184_v44 = vld [vmem:[#allocation3 + $0x8] sm:$0xff]  ;;  %v6928_v16 = vpop.eup %6927 }
 0x952   : > { %v3907_v58 = vpop.permute.xlu1 %3906  ;;  %v4199_v43 = vpack.c.bf16 %v4184_v44, %v4183_v9  ;;  %v6930_v37 = vpop.eup %6929  ;;  %3820 = vst.msk [vmem:[#allocation3 + $0x28] sm:$0xff] %vm2185_vm4, %v3794_v26 }
 0x953   : > { %3647 = vst.msk [vmem:[#allocation3 + $0x40] sm:$0xff] %vm1211_vm1, %v3624_v36  ;;  %6939 = vrcp.f32 %v3907_v58  ;;  %v3664_v21 = vld [vmem:[#allocation3 + $0x48] sm:$0xff]  ;;  %v3968_v47 = vmul.f32 %v6930_v37, %v3835_v5  ;;  %v9018_v20 = vpop.permute.xlu0 %3936 }
 0x954   : > { %v6932_v52 = vpop.eup %6931  ;;  %6357 = vmatprep.mubr.bf16.mxu0 %v4199_v43  ;;  %6941 = vrcp.f32 %v9000_v31  ;;  %v3802_v55 = vmul.f32 %v6928_v16, %v3664_v21 }
 0x955   : > { %v3628_v23 = vmul.f32 %v6932_v52, %v3489_v46  ;;  %v4185_v4 = vld [vmem:[#allocation3 + $0x10] sm:$0xff]  ;;  %3995 = vst.msk [vmem:[#allocation3 + $0x20] sm:$0xff] %vm2781_vm6, %v3968_v47 }
 0x956   : > { %v3912_v63 = vpop.permute.xlu1 %3911  ;;  %v4200_v57 = vpack.c.bf16 %v4186_v51, %v4185_v4  ;;  %v6934_v7 = vpop.eup %6933  ;;  %3824 = vst.msk [vmem:[#allocation3 + $0x48] sm:$0xff] %vm2185_vm4, %v3802_v55  ;;  %v3491_v4 = vld [vmem:[#allocation3 + $0x60] sm:$0xff] }
 0x957   : > { %3649 = vst.msk [vmem:[#allocation3 + $0x50] sm:$0xff] %vm1211_vm1, %v3628_v23  ;;  %6943 = vrcp.f32 %v3912_v63  ;;  %v3974_v40 = vmul.f32 %v6934_v7, %v3838_v54  ;;  %v3668_v45 = vld [vmem:[#allocation3 + $0x68] sm:$0xff]  ;;  %v3493_v54 = vld [vmem:[#allocation3 + $0x70] sm:$0xff] }
 0x958   : > { %v6936_v6 = vpop.eup %6935  ;;  %6358 = vmatmul.mubr.bf16.vlgmr.msra.gmra.mrb[0].mxu0 %v4200_v57  ;;  %v3771_v59 = vpop.permute.xlu0 %3770 }
 0x959   : > { %v3630_v31 = vmul.f32 %v6936_v6, %v3490_v50  ;;  %3998 = vst.msk [vmem:[#allocation3 + $0x38] sm:$0xff] %vm2781_vm6, %v3974_v40  ;;  %6945 = vrcp.f32 %v3771_v59  ;;  %v6938_v25 = vpop.eup %6937  ;;  %v3836_v10 = vld [vmem:[#allocation3 + $0x28] sm:$0xff] }
 0x95a   : > { %v3663_v2 = vld [vmem:[#allocation3 + $0x40] sm:$0xff] }
 0x95b   : > { %3650 = vst.msk [vmem:[#allocation3 + $0x58] sm:$0xff] %vm1211_vm1, %v3630_v31  ;;  %v3746_v11 = vpop.permute.xlu1 %3745 }
 0x95c   : > { %6947 = vrcp.f32 %v3746_v11  ;;  %v4011_v13 = vld [vmem:[#allocation3 + $0x20] sm:$0xff] }
 0x95d   : > { %v6940_v12 = vpop.eup %6939  ;;  %v4144_v14 = vmul.f32 %v6938_v25, %v4011_v13  ;;  %v4098_v22 = vpop.permute.xlu0 %4097  ;;  %v3494_v13 = vld [vmem:[#allocation3 + $0x78] sm:$0xff] }
 0x95e   : > { %v3970_v28 = vmul.f32 %v6940_v12, %v3836_v10  ;;  %v6942_v15 = vpop.eup %6941  ;;  %v3665_v32 = vld [vmem:[#allocation3 + $0x50] sm:$0xff] }
 0x95f   : > { %v3756_v17 = vpop.permute.xlu1 %3755  ;;  %4171 = vst.msk [vmem:[#allocation3 + $0x20] sm:$0xff] %vm3377_vm8, %v4144_v14 }
 0x960   : > { %3996 = vst.msk [vmem:[#allocation3 + $0x28] sm:$0xff] %vm2781_vm6, %v3970_v28  ;;  %6949 = vrcp.f32 %v3756_v17  ;;  %v4014_v53 = vld [vmem:[#allocation3 + $0x38] sm:$0xff] }
 0x961   : > { %v6944_v61 = vpop.eup %6943  ;;  %v4150_v29 = vmul.f32 %v6942_v15, %v4014_v53  ;;  %6951 = vrcp.f32 %v3922_v56  ;;  %v4113_v18 = vpop.permute.xlu0 %4112 }
 0x962   : > { %v3972_v19 = vmul.f32 %v6944_v61, %v3837_v42  ;;  %v3666_v41 = vld [vmem:[#allocation3 + $0x58] sm:$0xff]  ;;  %v3840_v42 = vld [vmem:[#allocation3 + $0x48] sm:$0xff] }
 0x963   : > { %v3761_v38 = vpop.permute.xlu1 %3760  ;;  %v6946_v34 = vpop.eup %6945  ;;  %4174 = vst.msk [vmem:[#allocation3 + $0x38] sm:$0xff] %vm3377_vm8, %v4150_v29 }
 0x964   : > { %3997 = vst.msk [vmem:[#allocation3 + $0x30] sm:$0xff] %vm2781_vm6, %v3972_v19  ;;  %6953 = vrcp.f32 %v3761_v38  ;;  %v3810_v3 = vmul.f32 %v6946_v34, %v3668_v45 }
 0x966   : > { %v6948_v49 = vpop.eup %6947  ;;  %3828 = vst.msk [vmem:[#allocation3 + $0x68] sm:$0xff] %vm2185_vm4, %v3810_v3  ;;  %v3947_v24 = vpop.permute.xlu0 %3946  ;;  %v4187_v57 = vld [vmem:[#allocation3 + $0x20] sm:$0xff] }
 0x967   : > { %v3800_v1 = vmul.f32 %v6948_v49, %v3663_v2  ;;  %6955 = vrcp.f32 %v3947_v24  ;;  %v4012_v44 = vld [vmem:[#allocation3 + $0x28] sm:$0xff] }
 0x968   : > { %v4083_v27 = vpop.permute.xlu1 %4082 }
 0x969   : > { %3823 = vst.msk [vmem:[#allocation3 + $0x40] sm:$0xff] %vm2185_vm4, %v3800_v1  ;;  %6957 = vrcp.f32 %v4083_v27 }
 0x96a   : > { %v6950_v0 = vpop.eup %6949  ;;  %6959 = vrcp.f32 %v9018_v20  ;;  %v4190_v11 = vld [vmem:[#allocation3 + $0x38] sm:$0xff] }
 0x96b   : > { %v3804_v8 = vmul.f32 %v6950_v0, %v3665_v32  ;;  %v6952_v33 = vpop.eup %6951  ;;  %v4013_v5 = vld [vmem:[#allocation3 + $0x30] sm:$0xff] }
 0x96c   : > { %v4088_v48 = vpop.permute.xlu1 %4087 }
 0x96d   : > { %3825 = vst.msk [vmem:[#allocation3 + $0x50] sm:$0xff] %vm2185_vm4, %v3804_v8  ;;  %6961 = vrcp.f32 %v4088_v48  ;;  %v3844_v62 = vld [vmem:[#allocation3 + $0x68] sm:$0xff] }
 0x96e   : > { %v6954_v35 = vpop.eup %6953  ;;  %6963 = vrcp.f32 %v4098_v22 }
 0x96f   : > { %v3806_v39 = vmul.f32 %v6954_v35, %v3666_v41 }
 0x970   : > { %v3839_v9 = vld [vmem:[#allocation3 + $0x40] sm:$0xff] }
 0x971   : > { %3826 = vst.msk [vmem:[#allocation3 + $0x58] sm:$0xff] %vm2185_vm4, %v3806_v39  ;;  %v3976_v30 = vmul.f32 %v6952_v33, %v3839_v9  ;;  %v3590_v56 = vpop.permute.xlu1 %3589  ;;  %v6956_v26 = vpop.eup %6955 }
 0x972   : > { %6965 = vrcp.f32 %v3590_v56  ;;  %v3986_v16 = vmul.f32 %v6956_v26, %v3844_v62 }
 0x973   : > { %v6958_v36 = vpop.eup %6957  ;;  %3999 = vst.msk [vmem:[#allocation3 + $0x40] sm:$0xff] %vm2781_vm6, %v3976_v30  ;;  %6967 = vrcp.f32 %v4113_v18  ;;  %v4118_v30 = vpop.permute.xlu0 %4117 }
 0x974   : > { %v4146_v46 = vmul.f32 %v6958_v36, %v4012_v44  ;;  %4004 = vst.msk [vmem:[#allocation3 + $0x68] sm:$0xff] %vm2781_vm6, %v3986_v16  ;;  %v6960_v43 = vpop.eup %6959  ;;  %v3841_v38 = vld [vmem:[#allocation3 + $0x50] sm:$0xff] }
 0x975   : > { %v3600_v58 = vpop.permute.xlu1 %3599 }
 0x976   : > { %4172 = vst.msk [vmem:[#allocation3 + $0x28] sm:$0xff] %vm3377_vm8, %v4146_v46  ;;  %6969 = vrcp.f32 %v3600_v58 }
 0x977   : > { %v6962_v37 = vpop.eup %6961 }
 0x978   : > { %v6964_v52 = vpop.eup %6963  ;;  %v3842_v21 = vld [vmem:[#allocation3 + $0x58] sm:$0xff]  ;;  %v4148_v47 = vmul.f32 %v6962_v37, %v4013_v5 }
 0x979   : > { %v3982_v20 = vmul.f32 %v6960_v43, %v3842_v21  ;;  %v3605_v55 = vpop.permute.xlu1 %3604 }
 0x97a   : > { %4173 = vst.msk [vmem:[#allocation3 + $0x30] sm:$0xff] %vm3377_vm8, %v4148_v47  ;;  %v4015_v23 = vld [vmem:[#allocation3 + $0x40] sm:$0xff]  ;;  %6971 = vrcp.f32 %v3605_v55  ;;  %v4133_v55 = vpop.permute.xlu0 %4132 }
 0x97b   : > { %4002 = vst.msk [vmem:[#allocation3 + $0x58] sm:$0xff] %vm2781_vm6, %v3982_v20  ;;  %v4152_v51 = vmul.f32 %v6964_v52, %v4015_v23 }
 0x97c   : > { %v6966_v50 = vpop.eup %6965 }
 0x97d   : > { %4175 = vst.msk [vmem:[#allocation3 + $0x40] sm:$0xff] %vm3377_vm8, %v4152_v51  ;;  %v3632_v63 = vmul.f32 %v6966_v50, %v3491_v4  ;;  %v4188_v7 = vld [vmem:[#allocation3 + $0x28] sm:$0xff]  ;;  %v6968_v31 = vpop.eup %6967 }
 0x97e   : > { %v3927_v6 = vpop.permute.xlu1 %3926  ;;  %v4201_v40 = vpack.c.bf16 %v4188_v7, %v4187_v57 }
 0x97f   : > { %3651 = vst.msk [vmem:[#allocation3 + $0x60] sm:$0xff] %vm1211_vm1, %v3632_v63  ;;  %6973 = vrcp.f32 %v3927_v6 }
 0x980   : > { %v6970_v59 = vpop.eup %6969  ;;  %6361 = vmatprep.mubr.bf16.mxu0 %v4201_v40 }
 0x981   : > { %v3636_v25 = vmul.f32 %v6970_v59, %v3493_v54  ;;  %v4189_v10 = vld [vmem:[#allocation3 + $0x30] sm:$0xff]  ;;  %v4020_v59 = vld [vmem:[#allocation3 + $0x68] sm:$0xff] }
 0x982   : > { %v4018_v12 = vld [vmem:[#allocation3 + $0x58] sm:$0xff]  ;;  %v3932_v14 = vpop.permute.xlu1 %3931  ;;  %v4202_v28 = vpack.c.bf16 %v4190_v11, %v4189_v10 }
 0x983   : > { %3653 = vst.msk [vmem:[#allocation3 + $0x70] sm:$0xff] %vm1211_vm1, %v3636_v25  ;;  %v4158_v15 = vmul.f32 %v6968_v31, %v4018_v12  ;;  %6975 = vrcp.f32 %v3932_v14 }
 0x984   : > { %v6972_v17 = vpop.eup %6971  ;;  %6362 = vmatmul.mubr.bf16.gmra.mrb[4].mxu0 %v4202_v28  ;;  %v4191_v43 = vld [vmem:[#allocation3 + $0x40] sm:$0xff] }
 0x985   : > { %4178 = vst.msk [vmem:[#allocation3 + $0x58] sm:$0xff] %vm3377_vm8, %v4158_v15  ;;  %v3638_v22 = vmul.f32 %v6972_v17, %v3494_v13 }
 0x986   : > { %v3667_v49 = vld [vmem:[#allocation3 + $0x60] sm:$0xff] }
 0x987   : > { %3654 = vst.msk [vmem:[#allocation3 + $0x78] sm:$0xff] %vm1211_vm1, %v3638_v22  ;;  %v3766_v61 = vpop.permute.xlu1 %3765 }
 0x988   : > { %6977 = vrcp.f32 %v3766_v61 }
 0x989   : > { %v6974_v53 = vpop.eup %6973 }
 0x98a   : > { %v3978_v29 = vmul.f32 %v6974_v53, %v3840_v42  ;;  %v3669_v27 = vld [vmem:[#allocation3 + $0x70] sm:$0xff] }
 0x98b   : > { %v3776_v19 = vpop.permute.xlu1 %3775 }
 0x98c   : > { %4000 = vst.msk [vmem:[#allocation3 + $0x48] sm:$0xff] %vm2781_vm6, %v3978_v29  ;;  %6979 = vrcp.f32 %v3776_v19  ;;  %v4194_v4 = vld [vmem:[#allocation3 + $0x58] sm:$0xff]  ;;  %v9062_v29 = vld [vmem:[%s9836_s7] ss:$0 sm:$0xff]  ;;  %s9842_s7 = sld [smem:[#allocation58_spill]] }
 0x98d   : > { %v6976_v45 = vpop.eup %6975 }
 0x98e   : > { %v3980_v18 = vmul.f32 %v6976_v45, %v3841_v38  ;;  %v3670_v48 = vld [vmem:[#allocation3 + $0x78] sm:$0xff]  ;;  %v4207_v38 = vld [vmem:[%s8028_s5] sm:$0xff] }
 0x98f   : > { %v3781_v34 = vpop.permute.xlu1 %3780 }
 0x990   : > { %4001 = vst.msk [vmem:[#allocation3 + $0x50] sm:$0xff] %vm2781_vm6, %v3980_v18  ;;  %6981 = vrcp.f32 %v3781_v34 }
 0x992   : > { %v6978_v3 = vpop.eup %6977 }
 0x993   : > { %v3808_v2 = vmul.f32 %v6978_v3, %v3667_v49  ;;  %v4016_v39 = vld [vmem:[#allocation3 + $0x48] sm:$0xff] }
 0x994   : > { %v4103_v1 = vpop.permute.xlu1 %4102  ;;  %v4208_v49 = vld [vmem:[%s8028_s5 + $0x8] sm:$0xff] }
 0x995   : > { %3827 = vst.msk [vmem:[#allocation3 + $0x60] sm:$0xff] %vm2185_vm4, %v3808_v2  ;;  %6983 = vrcp.f32 %v4103_v1 }
 0x996   : > { %v6980_v24 = vpop.eup %6979 }
 0x997   : > { %v3812_v0 = vmul.f32 %v6980_v24, %v3669_v27  ;;  %v4017_v26 = vld [vmem:[#allocation3 + $0x50] sm:$0xff]  ;;  %v4210_v27 = vld [vmem:[%s8028_s5 + $0x18] sm:$0xff] }
 0x998   : > { %v4108_v32 = vpop.permute.xlu1 %4107 }
 0x999   : > { %3829 = vst.msk [vmem:[#allocation3 + $0x70] sm:$0xff] %vm2185_vm4, %v3812_v0  ;;  %6985 = vrcp.f32 %v4108_v32 }
 0x99a   : > { %v6982_v8 = vpop.eup %6981 }
 0x99b   : > { %v3814_v33 = vmul.f32 %v6982_v8, %v3670_v48  ;;  %v4209_v8 = vld [vmem:[%s8028_s5 + $0x10] sm:$0xff] }
 0x99c   : > { %v3843_v46 = vld [vmem:[#allocation3 + $0x60] sm:$0xff] }
 0x99d   : > { %3830 = vst.msk [vmem:[#allocation3 + $0x78] sm:$0xff] %vm2185_vm4, %v3814_v33  ;;  %v3942_v35 = vpop.permute.xlu1 %3941 }
 0x99e   : > { %6987 = vrcp.f32 %v3942_v35 }
 0x99f   : > { %v6984_v41 = vpop.eup %6983 }
 0x9a0   : > { %v4154_v9 = vmul.f32 %v6984_v41, %v4016_v39  ;;  %v3845_v47 = vld [vmem:[#allocation3 + $0x70] sm:$0xff]  ;;  %v4211_v39 = vld [vmem:[%s8028_s5 + $0x20] sm:$0xff] }
 0x9a1   : > { %v3952_v62 = vpop.permute.xlu1 %3951 }
 0x9a2   : > { %4176 = vst.msk [vmem:[#allocation3 + $0x48] sm:$0xff] %vm3377_vm8, %v4154_v9  ;;  %6989 = vrcp.f32 %v3952_v62 }
 0x9a3   : > { %v6986_v56 = vpop.eup %6985  ;;  %6991 = vrcp.f32 %v4118_v30 }
 0x9a4   : > { %v4156_v36 = vmul.f32 %v6986_v56, %v4017_v26  ;;  %v3846_v7 = vld [vmem:[#allocation3 + $0x78] sm:$0xff]  ;;  %v4212_v56 = vld [vmem:[%s8028_s5 + $0x28] sm:$0xff] }
 0x9a5   : > { %v3957_v44 = vpop.permute.xlu1 %3956 }
 0x9a6   : > { %4177 = vst.msk [vmem:[#allocation3 + $0x50] sm:$0xff] %vm3377_vm8, %v4156_v36  ;;  %6993 = vrcp.f32 %v3957_v44 }
 0x9a8   : > { %v6988_v16 = vpop.eup %6987 }
 0x9a9   : > { %v3984_v58 = vmul.f32 %v6988_v16, %v3843_v46  ;;  %v4192_v37 = vld [vmem:[#allocation3 + $0x48] sm:$0xff]  ;;  %v4213_v16 = vld [vmem:[%s8028_s5 + $0x30] sm:$0xff] }
 0x9aa   : > { %v4123_v5 = vpop.permute.xlu1 %4122  ;;  %v4203_v52 = vpack.c.bf16 %v4192_v37, %v4191_v43  ;;  %v4214_v43 = vld [vmem:[%s8028_s5 + $0x38] sm:$0xff] }
 0x9ab   : > { %4003 = vst.msk [vmem:[#allocation3 + $0x60] sm:$0xff] %vm2781_vm6, %v3984_v58  ;;  %6995 = vrcp.f32 %v4123_v5 }
 0x9ac   : > { %v6990_v21 = vpop.eup %6989  ;;  %6365 = vmatprep.mubr.bf16.mxu0 %v4203_v52 }
 0x9ad   : > { %v3988_v20 = vmul.f32 %v6990_v21, %v3845_v47  ;;  %v4193_v23 = vld [vmem:[#allocation3 + $0x50] sm:$0xff]  ;;  %v6992_v63 = vpop.eup %6991  ;;  %v4215_v47 = vld [vmem:[%s8028_s5 + $0x40] sm:$0xff] }
 0x9ae   : > { %v4128_v51 = vpop.permute.xlu1 %4127  ;;  %v4204_v50 = vpack.c.bf16 %v4194_v4, %v4193_v23  ;;  %v4216_v4 = vld [vmem:[%s8028_s5 + $0x48] sm:$0xff] }
 0x9af   : > { %4005 = vst.msk [vmem:[#allocation3 + $0x70] sm:$0xff] %vm2781_vm6, %v3988_v20  ;;  %6997 = vrcp.f32 %v4128_v51 }
 0x9b0   : > { %v6994_v57 = vpop.eup %6993  ;;  %6999 = vrcp.f32 %v4133_v55  ;;  %6366 = vmatmul.mubr.bf16.gmra.mrb[8].mxu0 %v4204_v50 }
 0x9b1   : > { %v3990_v54 = vmul.f32 %v6994_v57, %v3846_v7  ;;  %v4217_v57 = vld [vmem:[%s8028_s5 + $0x50] sm:$0xff] }
 0x9b2   : > { %v4019_v6 = vld [vmem:[#allocation3 + $0x60] sm:$0xff] }
 0x9b3   : > { %4006 = vst.msk [vmem:[#allocation3 + $0x78] sm:$0xff] %vm2781_vm6, %v3990_v54  ;;  %v4160_v40 = vmul.f32 %v6992_v63, %v4019_v6  ;;  %v4218_v6 = vld [vmem:[%s8028_s5 + $0x58] sm:$0xff] }
 0x9b5   : > { %v6996_v31 = vpop.eup %6995  ;;  %4179 = vst.msk [vmem:[#allocation3 + $0x60] sm:$0xff] %vm3377_vm8, %v4160_v40 }
 0x9b6   : > { %v4162_v25 = vmul.f32 %v6996_v31, %v4020_v59  ;;  %v4021_v11 = vld [vmem:[#allocation3 + $0x70] sm:$0xff] }
 0x9b8   : > { %4180 = vst.msk [vmem:[#allocation3 + $0x68] sm:$0xff] %vm3377_vm8, %v4162_v25 }
 0x9b9   : > { %v6998_v10 = vpop.eup %6997 }
 0x9ba   : > { %v7000_v12 = vpop.eup %6999  ;;  %v4022_v13 = vld [vmem:[#allocation3 + $0x78] sm:$0xff]  ;;  %v4164_v14 = vmul.f32 %v6998_v10, %v4021_v11  ;;  %v4219_v10 = vld [vmem:[%s8028_s5 + $0x60] sm:$0xff] }
 0x9bb   : > { %v4166_v28 = vmul.f32 %v7000_v12, %v4022_v13 }
 0x9bc   : > { %4181 = vst.msk [vmem:[#allocation3 + $0x70] sm:$0xff] %vm3377_vm8, %v4164_v14  ;;  %v4195_v15 = vld [vmem:[#allocation3 + $0x60] sm:$0xff]  ;;  %v4220_v14 = vld [vmem:[%s8028_s5 + $0x68] sm:$0xff] }
 0x9bd   : > { %4182 = vst.msk [vmem:[#allocation3 + $0x78] sm:$0xff] %vm3377_vm8, %v4166_v28 }
 0x9bf   : > { %v4196_v17 = vld [vmem:[#allocation3 + $0x68] sm:$0xff] }
 0x9c0   : > { %v4205_v22 = vpack.c.bf16 %v4196_v17, %v4195_v15 }
 0x9c2   : > { %6369 = vmatprep.mubr.bf16.mxu0 %v4205_v22  ;;  %v4221_v22 = vld [vmem:[%s8028_s5 + $0x70] sm:$0xff] }
 0x9c3   : > { %v4197_v61 = vld [vmem:[#allocation3 + $0x70] sm:$0xff] }
 0x9c4   : > { %v4198_v53 = vld [vmem:[#allocation3 + $0x78] sm:$0xff] }
 0x9c5   : > { %v4206_v42 = vpack.c.bf16 %v4198_v53, %v4197_v61 }
 0x9c7   : > { %6370 = vmatmul.mubr.bf16.gmra.mrb[12].mxu0 %v4206_v42  ;;  %v4222_v42 = vld [vmem:[%s8028_s5 + $0x78] sm:$0xff] }
 0xa2b   : > { %v6359_v19 = vpop.f32.mrb[0].mxu0 }
 0xa2c   : > { %v4328_v45 = vpop.f32.mrb[1].mxu0  ;;  %v4337_v0 = vadd.f32 %v6359_v19, %v9062_v29 }
 0xa2d   : > { %v4329_v18 = vadd.f32 %v9062_v29, %v4328_v45  ;;  %v6360_v34 = vpop.f32.mrb[2].mxu0 }
 0xa2e   : > { %v4331_v3 = vpop.f32.mrb[3].mxu0  ;;  %v4340_v2 = vadd.f32 %v6360_v34, %v9062_v29  ;;  %v9081_v33 = vadd.f32 %v4337_v0, %v4209_v8  ;;  %v6836_v34 = vld [vmem:[#allocation16 + $0x14] ss:$8 sps:$4 sm:$0xff]  }
 0xa2f   : > { %v4332_v1 = vadd.f32 %v9062_v29, %v4331_v3  ;;  %v9069_v24 = vadd.f32 %v4329_v18, %v4207_v38  ;;  %v6833_v38 = vld [vmem:[#allocation16 + $0x4] ss:$8 sps:$4 sm:$0xff]   ;;  %v6835_v18 = vld [vmem:[#allocation16] ss:$8 sps:$4 sm:$0xff]  }
 0xa30   : > { %v9078_v48 = vadd.f32 %v4340_v2, %v4210_v27  ;;  %4746 = vmatprep.subr.bf16.mxu1 %v6833_v38 }
 0xa31   : > { %4409 = vadd.xlane.f32.xlu1 %v9069_v24  ;;  %v9074_v32 = vadd.f32 %v4332_v1, %v4208_v49  ;;  %4747 = vmatpush1.bf16.msra.mxu1 %v6835_v18 }
 0xa32   : > { %4748 = vmatprep.subr.bf16.mxu1 %v6836_v34 }
 0xa33   : > { %4411 = vadd.xlane.f32.xlu0 %v9074_v32 }
 0xa35   : > { %4415 = vadd.xlane.f32.xlu1 %v9078_v48 }
 0xa37   : > { %4413 = vadd.xlane.f32.xlu0 %v9081_v33 }
 0xa57   : > { %v6363_v35 = vpop.f32.mrb[4].mxu0 }
 0xa58   : > { %v4344_v41 = vpop.f32.mrb[5].mxu0  ;;  %v4353_v26 = vadd.f32 %v6363_v35, %v9062_v29 }
 0xa59   : > { %v4345_v9 = vadd.f32 %v9062_v29, %v4344_v41  ;;  %v6364_v62 = vpop.f32.mrb[6].mxu0 }
 0xa5a   : > { %v4347_v30 = vpop.f32.mrb[7].mxu0  ;;  %v4356_v46 = vadd.f32 %v6364_v62, %v9062_v29  ;;  %v9098_v37 = vadd.f32 %v4353_v26, %v4213_v16  ;;  %v6839_v26 = vld [vmem:[#allocation16 + $0x24] ss:$8 sps:$4 sm:$0xff]   ;;  %v6844_v16 = vld [vmem:[#allocation16 + $0x30] ss:$8 sps:$4 sm:$0xff]  }
 0xa5b   : > { %v4348_v36 = vadd.f32 %v9062_v29, %v4347_v30  ;;  %v9089_v44 = vadd.f32 %v4345_v9, %v4211_v39 }
 0xa5c   : > { %v9101_v5 = vadd.f32 %v4356_v46, %v4214_v43  ;;  %v6845_v46 = vld [vmem:[#allocation16 + $0x44] ss:$8 sps:$4 sm:$0xff]   ;;  %v6848_v43 = vld [vmem:[#allocation16 + $0x54] ss:$8 sps:$4 sm:$0xff]  }
 0xa5d   : > { %4417 = vadd.xlane.f32.xlu0 %v9089_v44  ;;  %v9094_v58 = vadd.f32 %v4348_v36, %v4212_v56  ;;  %v6842_v36 = vld [vmem:[#allocation16 + $0x34] ss:$8 sps:$4 sm:$0xff]  }
 0xa5f   : > { %4419 = vadd.xlane.f32.xlu1 %v9094_v58 }
 0xa61   : > { %4421 = vadd.xlane.f32.xlu0 %v9098_v37 }
 0xa63   : > { %4423 = vadd.xlane.f32.xlu1 %v9101_v5 }
 0xa83   : > { %v6367_v52 = vpop.f32.mrb[8].mxu0 }
 0xa84   : > { %v4360_v21 = vpop.f32.mrb[9].mxu0  ;;  %v4369_v51 = vadd.f32 %v6367_v52, %v9062_v29  ;;  %v6850_v52 = vld [vmem:[#allocation16 + $0x50] ss:$8 sps:$4 sm:$0xff]  }
 0xa85   : > { %v4361_v20 = vadd.f32 %v9062_v29, %v4360_v21  ;;  %v6368_v55 = vpop.f32.mrb[10].mxu0  ;;  %v6851_v21 = vld [vmem:[#allocation16 + $0x64] ss:$8 sps:$4 sm:$0xff]  }
 0xa86   : > { %v4363_v23 = vpop.f32.mrb[11].mxu0  ;;  %v4372_v7 = vadd.f32 %v6368_v55, %v9062_v29  ;;  %v9118_v40 = vadd.f32 %v4369_v51, %v4217_v57  ;;  %v6856_v55 = vld [vmem:[#allocation16 + $0x70] ss:$8 sps:$4 sm:$0xff]  }
 0xa87   : > { %v4364_v50 = vadd.f32 %v9062_v29, %v4363_v23  ;;  %v9109_v63 = vadd.f32 %v4361_v20, %v4215_v47  ;;  %v6853_v47 = vld [vmem:[#allocation16 + $0x60] ss:$8 sps:$4 sm:$0xff]   ;;  %v6854_v20 = vld [vmem:[#allocation16 + $0x74] ss:$8 sps:$4 sm:$0xff]  }
 0xa88   : > { %v9121_v31 = vadd.f32 %v4372_v7, %v4218_v6 }
 0xa89   : > { %4425 = vadd.xlane.f32.xlu0 %v9109_v63  ;;  %v9114_v54 = vadd.f32 %v4364_v50, %v4216_v4 }
 0xa8b   : > { %4427 = vadd.xlane.f32.xlu1 %v9114_v54 }
 0xa8d   : > { %4429 = vadd.xlane.f32.xlu0 %v9118_v40 }
 0xa8f   : > { %4431 = vadd.xlane.f32.xlu1 %v9121_v31 }
 0xa9a   : > { %v6371_v59 = vpop.f32.mrb[12].mxu0 }
 0xa9b   : > { %v4376_v25 = vpop.f32.mrb[13].mxu0  ;;  %v4385_v28 = vadd.f32 %v6371_v59, %v9062_v29 }
 0xa9c   : > { %v4377_v11 = vadd.f32 %v9062_v29, %v4376_v25  ;;  %v6372_v12 = vpop.f32.mrb[14].mxu0 }
 0xa9d   : > { %v4379_v13 = vpop.f32.mrb[15].mxu0  ;;  %v4388_v61 = vadd.f32 %v6372_v12, %v9062_v29  ;;  %v9138_v19 = vadd.f32 %v4385_v28, %v4221_v22 }
 0xa9e   : > { %v4380_v15 = vadd.f32 %v9062_v29, %v4379_v13  ;;  %v9129_v17 = vadd.f32 %v4377_v11, %v4219_v10  ;;  %v6838_v29 = vld [vmem:[#allocation16 + $0x10] ss:$8 sps:$4 sm:$0xff]  }
 0xa9f   : > { %v9141_v45 = vadd.f32 %v4388_v61, %v4222_v42  ;;  %4749 = vmatpush1.bf16.msra.mxu1 %v6838_v29 }
 0xaa0   : > { %4433 = vadd.xlane.f32.xlu0 %v9129_v17  ;;  %v9134_v53 = vadd.f32 %v4380_v15, %v4220_v14  ;;  %4750 = vmatprep.subr.bf16.mxu1 %v6839_v26 }
 0xaa2   : > { %4435 = vadd.xlane.f32.xlu1 %v9134_v53 }
 0xaa4   : > { %4437 = vadd.xlane.f32.xlu0 %v9138_v19 }
 0xaa6   : > { %4439 = vadd.xlane.f32.xlu1 %v9141_v45 }
 0xabe   : > { %v4410_v3 = vpop.xlane.xlu1 %4409 }
 0xabf   : > { %v4442_v49 = vmul.f32 0.0078125, %v4410_v3 }
 0xac0   : > { %v4412_v2 = vpop.xlane.xlu0 %4411 }
 0xac1   : > { %v9145_v1 = vsub.f32 %v9069_v24, %v4442_v49  ;;  %v4443_v27 = vmul.f32 0.0078125, %v4412_v2 }
 0xac2   : > { %v4416_v0 = vpop.xlane.xlu1 %4415 }
 0xac3   : > { %v9148_v8 = vsub.f32 %v9074_v32, %v4443_v27  ;;  %v4445_v35 = vmul.f32 0.0078125, %v4416_v0  ;;  %v4474_v41 = vmul.f32 %v9145_v1, %v9145_v1 }
 0xac4   : > { %v4414_v39 = vpop.xlane.xlu0 %4413 }
 0xac5   : > { %v9153_v9 = vsub.f32 %v9078_v48, %v4445_v35  ;;  %v4444_v62 = vmul.f32 0.0078125, %v4414_v39  ;;  %4490 = vadd.xlane.f32.xlu0 %v4474_v41  ;;  %v4475_v24 = vmul.f32 %v9148_v8, %v9148_v8  ;;  %v6841_v48 = vld [vmem:[#allocation16 + $0x20] ss:$8 sps:$4 sm:$0xff]  }
 0xac6   : > { %4751 = vmatpush1.bf16.msra.mxu1 %v6841_v48 }
 0xac7   : > { %v9158_v30 = vsub.f32 %v9081_v33, %v4444_v62  ;;  %4492 = vadd.xlane.f32.xlu1 %v4475_v24  ;;  %v4477_v56 = vmul.f32 %v9153_v9, %v9153_v9  ;;  %4752 = vmatprep.subr.bf16.mxu1 %v6842_v36  ;;  %v6847_v33 = vld [vmem:[#allocation16 + $0x40] ss:$8 sps:$4 sm:$0xff]  }
 0xac9   : > { %v4476_v32 = vmul.f32 %v9158_v30, %v9158_v30 }
 0xaca   : > { %4753 = vmatpush1.bf16.msra.mxu1 %v6844_v16 }
 0xacb   : > { %4494 = vadd.xlane.f32.xlu0 %v4476_v32  ;;  %4496 = vadd.xlane.f32.xlu1 %v4477_v56 }
 0xacc   : > { %4754 = vmatprep.subr.bf16.mxu1 %v6845_v46 }
 0xace   : > { %4755 = vmatpush1.bf16.msra.mxu1 %v6847_v33 }
 0xacf   : > { %4756 = vmatprep.subr.bf16.mxu1 %v6848_v43 }
 0xad2   : > { %4757 = vmatpush1.bf16.msra.mxu1 %v6850_v52 }
 0xad3   : > { %4758 = vmatprep.subr.bf16.mxu1 %v6851_v21 }
 0xad6   : > { %4759 = vmatpush1.bf16.msra.mxu1 %v6853_v47 }
 0xad7   : > { %4760 = vmatprep.subr.bf16.mxu1 %v6854_v20 }
 0xada   : > { %4761 = vmatpush1.bf16.msra.mxu1 %v6856_v55 }
 0xaea   : > { %v4418_v23 = vpop.xlane.xlu0 %4417 }
 0xaeb   : > { %v4446_v4 = vmul.f32 0.0078125, %v4418_v23 }
 0xaec   : > { %v4420_v51 = vpop.xlane.xlu1 %4419 }
 0xaed   : > { %v9165_v50 = vsub.f32 %v9089_v44, %v4446_v4  ;;  %v4447_v57 = vmul.f32 0.0078125, %v4420_v51  ;;  %v9227_v51 = vld [vmem:[%s9837_s2] ss:$0 sm:$0xff] }
 0xaee   : > { %v4422_v7 = vpop.xlane.xlu0 %4421 }
 0xaef   : > { %v9168_v6 = vsub.f32 %v9094_v58, %v4447_v57  ;;  %v4448_v59 = vmul.f32 0.0078125, %v4422_v7  ;;  %v4478_v25 = vmul.f32 %v9165_v50, %v9165_v50 }
 0xaf0   : > { %v4424_v10 = vpop.xlane.xlu1 %4423 }
 0xaf1   : > { %v9173_v11 = vsub.f32 %v9098_v37, %v4448_v59  ;;  %v4449_v12 = vmul.f32 0.0078125, %v4424_v10  ;;  %4498 = vadd.xlane.f32.xlu0 %v4478_v25  ;;  %v4479_v13 = vmul.f32 %v9168_v6, %v9168_v6  ;;  %v6857_v59 = vld [vmem:[#allocation17 + $0x40] sm:$0xff]   ;;  %v6859_v10 = vld [vmem:[#allocation17 + $0x48] sm:$0xff]  }
 0xaf2   : > { %v6858_v25 = vld [vmem:[#allocation17] sm:$0xff]   ;;  %5989 = vmatprep.subr.bf16.mxu0 %v6857_v59  ;;  %6389 = vmatprep.subr.bf16.mxu1 %v6857_v59 }
 0xaf3   : > { %v9178_v44 = vsub.f32 %v9101_v5, %v4449_v12  ;;  %4500 = vadd.xlane.f32.xlu1 %v4479_v13  ;;  %v4480_v58 = vmul.f32 %v9173_v11, %v9173_v11  ;;  %5990 = vmatpush3.bf16.msra.mxu0 %v6858_v25 }
 0xaf4   : > { %5991 = vmatprep.subr.bf16.mxu0 %v6859_v10 }
 0xaf5   : > { %4502 = vadd.xlane.f32.xlu0 %v4480_v58  ;;  %v4481_v14 = vmul.f32 %v9178_v44, %v9178_v44  ;;  %v9235_v58 = vld [vmem:[%s9838_s0] ss:$0 sm:$0xff] }
 0xaf7   : > { %4504 = vadd.xlane.f32.xlu1 %v4481_v14 }
 0xb16   : > { %v4426_v28 = vpop.xlane.xlu0 %4425 }
 0xb17   : > { %v4450_v37 = vmul.f32 0.0078125, %v4426_v28  ;;  %v6860_v28 = vld [vmem:[#allocation17 + $0x8] sm:$0xff]  }
 0xb18   : > { %v4428_v15 = vpop.xlane.xlu1 %4427  ;;  %5992 = vmatpush3.bf16.msra.mxu0 %v6860_v28 }
 0xb19   : > { %v9185_v22 = vsub.f32 %v9109_v63, %v4450_v37  ;;  %v4451_v61 = vmul.f32 0.0078125, %v4428_v15  ;;  %v6861_v37 = vld [vmem:[#allocation17 + $0x50] sm:$0xff]  }
 0xb1a   : > { %v4430_v42 = vpop.xlane.xlu0 %4429  ;;  %5993 = vmatprep.subr.bf16.mxu0 %v6861_v37 }
 0xb1b   : > { %v9188_v5 = vsub.f32 %v9114_v54, %v4451_v61  ;;  %v4452_v38 = vmul.f32 0.0078125, %v4430_v42  ;;  %v4482_v18 = vmul.f32 %v9185_v22, %v9185_v22 }
 0xb1c   : > { %v4432_v34 = vpop.xlane.xlu1 %4431 }
 0xb1d   : > { %v9193_v29 = vsub.f32 %v9118_v40, %v4452_v38  ;;  %v4453_v3 = vmul.f32 0.0078125, %v4432_v34  ;;  %4506 = vadd.xlane.f32.xlu0 %v4482_v18  ;;  %v4483_v49 = vmul.f32 %v9188_v5, %v9188_v5 }
 0xb1f   : > { %v9198_v63 = vsub.f32 %v9121_v31, %v4453_v3  ;;  %4508 = vadd.xlane.f32.xlu1 %v4483_v49  ;;  %v4484_v54 = vmul.f32 %v9193_v29, %v9193_v29  ;;  %v6862_v3 = vld [vmem:[#allocation17 + $0x10] sm:$0xff]  }
 0xb20   : > { %5994 = vmatpush3.bf16.msra.mxu0 %v6862_v3 }
 0xb21   : > { %4510 = vadd.xlane.f32.xlu0 %v4484_v54  ;;  %v4485_v2 = vmul.f32 %v9198_v63, %v9198_v63  ;;  %v6863_v54 = vld [vmem:[#allocation17 + $0x58] sm:$0xff]  }
 0xb22   : > { %5995 = vmatprep.subr.bf16.mxu0 %v6863_v54 }
 0xb23   : > { %4512 = vadd.xlane.f32.xlu1 %v4485_v2 }
 0xb2d   : > { %v4434_v27 = vpop.xlane.xlu0 %4433 }
 0xb2e   : > { %v4454_v40 = vmul.f32 0.0078125, %v4434_v27  ;;  %v6865_v27 = vld [vmem:[#allocation17 + $0x60] sm:$0xff]  }
 0xb2f   : > { %v4436_v0 = vpop.xlane.xlu1 %4435 }
 0xb30   : > { %v9205_v35 = vsub.f32 %v9129_v17, %v4454_v40  ;;  %v4455_v41 = vmul.f32 0.0078125, %v4436_v0  ;;  %v6866_v0 = vld [vmem:[#allocation17 + $0x20] sm:$0xff]  }
 0xb31   : > { %v4438_v39 = vpop.xlane.xlu0 %4437 }
 0xb32   : > { %v9208_v31 = vsub.f32 %v9134_v53, %v4455_v41  ;;  %v4456_v62 = vmul.f32 0.0078125, %v4438_v39  ;;  %v4486_v24 = vmul.f32 %v9205_v35, %v9205_v35  ;;  %v6867_v41 = vld [vmem:[#allocation17 + $0x68] sm:$0xff]  }
 0xb33   : > { %v4440_v32 = vpop.xlane.xlu1 %4439 }
 0xb34   : > { %v9213_v56 = vsub.f32 %v9138_v19, %v4456_v62  ;;  %v4457_v26 = vmul.f32 0.0078125, %v4440_v32  ;;  %4514 = vadd.xlane.f32.xlu0 %v4486_v24  ;;  %v4487_v48 = vmul.f32 %v9208_v31, %v9208_v31 }
 0xb36   : > { %v9218_v17 = vsub.f32 %v9141_v45, %v4457_v26  ;;  %4516 = vadd.xlane.f32.xlu1 %v4487_v48  ;;  %v4488_v53 = vmul.f32 %v9213_v56, %v9213_v56 }
 0xb38   : > { %4518 = vadd.xlane.f32.xlu0 %v4488_v53  ;;  %v4489_v36 = vmul.f32 %v9218_v17, %v9218_v17 }
 0xb3a   : > { %4520 = vadd.xlane.f32.xlu1 %v4489_v36 }
 0xb52   : > { %v4491_v16 = vpop.xlane.xlu0 %4490 }
 0xb53   : > { %v4522_v19 = vmul.f32 0.0078125, %v4491_v16 }
 0xb54   : > { %v4493_v46 = vpop.xlane.xlu1 %4492 }
 0xb55   : > { %v4538_v33 = vadd.f32 1e-05, %v4522_v19  ;;  %v4523_v43 = vmul.f32 0.0078125, %v4493_v46 }
 0xb57   : > { %7001 = vrsqrt.f32 %v4538_v33  ;;  %v4539_v52 = vadd.f32 1e-05, %v4523_v43 }
 0xb58   : > { %v4495_v21 = vpop.xlane.xlu0 %4494  ;;  %v4497_v47 = vpop.xlane.xlu1 %4496 }
 0xb59   : > { %7003 = vrsqrt.f32 %v4539_v52  ;;  %v4524_v45 = vmul.f32 0.0078125, %v4495_v21  ;;  %v4525_v20 = vmul.f32 0.0078125, %v4497_v47 }
 0xb5b   : > { %v4540_v55 = vadd.f32 1e-05, %v4524_v45  ;;  %v4541_v23 = vadd.f32 1e-05, %v4525_v20 }
 0xb5d   : > { %7005 = vrsqrt.f32 %v4540_v55 }
 0xb5e   : > { %7007 = vrsqrt.f32 %v4541_v23 }
 0xb61   : > { %v7002_v4 = vpop.eup %7001 }
 0xb62   : > { %v4570_v57 = vmul.f32 %v7002_v4, %v9145_v1 }
 0xb63   : > { %v7004_v7 = vpop.eup %7003 }
 0xb64   : > { %v4571_v12 = vmul.f32 %v7004_v7, %v9148_v8  ;;  %v4592_v13 = vmul.f32 %v9227_v51, %v4570_v57 }
 0xb66   : > { %v4593_v14 = vmul.f32 %v9227_v51, %v4571_v12  ;;  %v9239_v61 = vadd.f32 %v9235_v58, %v4592_v13 }
 0xb67   : > { %v7006_v1 = vpop.eup %7005 }
 0xb68   : > { %v7008_v15 = vpop.eup %7007  ;;  %v9242_v8 = vadd.f32 %v9235_v58, %v4593_v14  ;;  %v4572_v42 = vmul.f32 %v7006_v1, %v9158_v30  ;;  %v6864_v30 = vld [vmem:[#allocation17 + $0x18] sm:$0xff]  }
 0xb69   : > { %v4573_v38 = vmul.f32 %v7008_v15, %v9153_v9  ;;  %5996 = vmatpush3.bf16.msra.mxu0 %v6864_v30 }
 0xb6a   : > { %v4630_v18 = vpack.c.bf16 %v9242_v8, %v9239_v61  ;;  %v4594_v34 = vmul.f32 %v9227_v51, %v4572_v42  ;;  %5997 = vmatprep.subr.bf16.mxu0 %v6865_v27 }
 0xb6b   : > { %v4595_v49 = vmul.f32 %v9227_v51, %v4573_v38 }
 0xb6c   : > { %4779 = vmatmul.mubr.bf16.vlgmr.msra.gmra.mrb[0].mxu1 %v4630_v18  ;;  %v9252_v2 = vadd.f32 %v9235_v58, %v4594_v34 }
 0xb6d   : > { %4788 = vmatprep.mubr.bf16.mxu1 %v7480_v60  ;;  %6397 = vmatpush3.bf16.msra.mxu1 %v6858_v25  ;;  %v9255_v9 = vadd.f32 %v9235_v58, %v4595_v49 }
 0xb6e   : > { %6390 = vmatprep.subr.bf16.mxu1 %v6859_v10  ;;  %5998 = vmatpush3.bf16.msra.mxu0 %v6866_v0 }
 0xb6f   : > { %v4631_v40 = vpack.c.bf16 %v9255_v9, %v9252_v2  ;;  %5999 = vmatprep.subr.bf16.mxu0 %v6867_v41 }
 0xb71   : > { %6398 = vmatpush3.bf16.msra.mxu1 %v6860_v28 }
 0xb72   : > { %6391 = vmatprep.subr.bf16.mxu1 %v6861_v37 }
 0xb74   : > { %4789 = vmatmul.mubr.bf16.gmra.mrb[4].mxu1 %v4631_v40 }
 0xb75   : > { %4798 = vmatprep.mubr.bf16.mxu1 %v7480_v60  ;;  %6399 = vmatpush3.bf16.msra.mxu1 %v6862_v3 }
 0xb76   : > { %6392 = vmatprep.subr.bf16.mxu1 %v6863_v54 }
 0xb79   : > { %6400 = vmatpush3.bf16.msra.mxu1 %v6864_v30 }
 0xb7a   : > { %6393 = vmatprep.subr.bf16.mxu1 %v6865_v27 }
 0xb7d   : > { %6401 = vmatpush3.bf16.msra.mxu1 %v6866_v0 }
 0xb7e   : > { %v4499_v39 = vpop.xlane.xlu0 %4498  ;;  %6394 = vmatprep.subr.bf16.mxu1 %v6867_v41 }
 0xb7f   : > { %v4526_v62 = vmul.f32 0.0078125, %v4499_v39  ;;  %v6868_v39 = vld [vmem:[#allocation17 + $0x28] sm:$0xff]  }
 0xb80   : > { %v4501_v24 = vpop.xlane.xlu1 %4500  ;;  %6000 = vmatpush3.bf16.msra.mxu0 %v6868_v39 }
 0xb81   : > { %v4542_v32 = vadd.f32 1e-05, %v4526_v62  ;;  %v4527_v26 = vmul.f32 0.0078125, %v4501_v24  ;;  %6402 = vmatpush3.bf16.msra.mxu1 %v6868_v39 }
 0xb82   : > { %v4503_v48 = vpop.xlane.xlu0 %4502 }
 0xb83   : > { %7009 = vrsqrt.f32 %v4542_v32  ;;  %v4543_v53 = vadd.f32 1e-05, %v4527_v26  ;;  %v4528_v36 = vmul.f32 0.0078125, %v4503_v48 }
 0xb84   : > { %v4505_v16 = vpop.xlane.xlu1 %4504 }
 0xb85   : > { %7011 = vrsqrt.f32 %v4543_v53  ;;  %v4544_v19 = vadd.f32 1e-05, %v4528_v36  ;;  %v4529_v46 = vmul.f32 0.0078125, %v4505_v16 }
 0xb87   : > { %7013 = vrsqrt.f32 %v4544_v19  ;;  %v4545_v33 = vadd.f32 1e-05, %v4529_v46  ;;  %v6870_v19 = vld [vmem:[#allocation17 + $0x30] sm:$0xff]  }
 0xb89   : > { %7015 = vrsqrt.f32 %v4545_v33 }
 0xb8d   : > { %v7010_v43 = vpop.eup %7009 }
 0xb8e   : > { %v4574_v52 = vmul.f32 %v7010_v43, %v9165_v50 }
 0xb8f   : > { %v7012_v21 = vpop.eup %7011 }
 0xb90   : > { %v4575_v47 = vmul.f32 %v7012_v21, %v9168_v6  ;;  %v4596_v45 = vmul.f32 %v9227_v51, %v4574_v52  ;;  %v6871_v52 = vld [vmem:[#allocation17 + $0x78] sm:$0xff]  }
 0xb91   : > { %v7014_v20 = vpop.eup %7013 }
 0xb92   : > { %v4597_v55 = vmul.f32 %v9227_v51, %v4575_v47  ;;  %v9265_v4 = vadd.f32 %v9235_v58, %v4596_v45  ;;  %v4576_v7 = vmul.f32 %v7014_v20, %v9173_v11  ;;  %v6872_v20 = vld [vmem:[#allocation17 + $0x38] sm:$0xff]  }
 0xb93   : > { %v7016_v23 = vpop.eup %7015 }
 0xb94   : > { %v9268_v57 = vadd.f32 %v9235_v58, %v4597_v55  ;;  %v4577_v59 = vmul.f32 %v7016_v23, %v9178_v44  ;;  %v4598_v25 = vmul.f32 %v9227_v51, %v4576_v7 }
 0xb96   : > { %v4632_v50 = vpack.c.bf16 %v9268_v57, %v9265_v4  ;;  %v4599_v6 = vmul.f32 %v9227_v51, %v4577_v59  ;;  %v9281_v12 = vadd.f32 %v9235_v58, %v4598_v25 }
 0xb98   : > { %4799 = vmatmul.mubr.bf16.gmra.mrb[8].mxu1 %v4632_v50  ;;  %v9278_v10 = vadd.f32 %v9235_v58, %v4599_v6 }
 0xb99   : > { %4808 = vmatprep.mubr.bf16.mxu1 %v7480_v60 }
 0xb9a   : > { %v4633_v11 = vpack.c.bf16 %v9278_v10, %v9281_v12 }
 0xba0   : > { %4809 = vmatmul.mubr.bf16.gmra.mrb[12].mxu1 %v4633_v11 }
 0xba1   : > { %4818 = vmatprep.mubr.bf16.mxu1 %v7480_v60 }
 0xbaa   : > { %v4507_v44 = vpop.xlane.xlu0 %4506 }
 0xbab   : > { %v4530_v13 = vmul.f32 0.0078125, %v4507_v44 }
 0xbac   : > { %v4509_v14 = vpop.xlane.xlu1 %4508 }
 0xbad   : > { %v4546_v28 = vadd.f32 1e-05, %v4530_v13  ;;  %v4531_v1 = vmul.f32 0.0078125, %v4509_v14 }
 0xbae   : > { %v4511_v37 = vpop.xlane.xlu0 %4510 }
 0xbaf   : > { %7017 = vrsqrt.f32 %v4546_v28  ;;  %v4547_v15 = vadd.f32 1e-05, %v4531_v1  ;;  %v4532_v42 = vmul.f32 0.0078125, %v4511_v37 }
 0xbb0   : > { %v4513_v38 = vpop.xlane.xlu1 %4512 }
 0xbb1   : > { %7019 = vrsqrt.f32 %v4547_v15  ;;  %v4548_v18 = vadd.f32 1e-05, %v4532_v42  ;;  %v4533_v34 = vmul.f32 0.0078125, %v4513_v38 }
 0xbb3   : > { %7021 = vrsqrt.f32 %v4548_v18  ;;  %v4549_v3 = vadd.f32 1e-05, %v4533_v34 }
 0xbb5   : > { %7023 = vrsqrt.f32 %v4549_v3 }
 0xbb9   : > { %v7018_v49 = vpop.eup %7017 }
 0xbba   : > { %v4578_v54 = vmul.f32 %v7018_v49, %v9185_v22 }
 0xbbb   : > { %v7020_v30 = vpop.eup %7019 }
 0xbbc   : > { %v4579_v27 = vmul.f32 %v7020_v30, %v9188_v5  ;;  %v4600_v40 = vmul.f32 %v9227_v51, %v4578_v54  ;;  %v6869_v5 = vld [vmem:[#allocation17 + $0x70] sm:$0xff]  }
 0xbbd   : > { %v7022_v0 = vpop.eup %7021  ;;  %6001 = vmatprep.subr.bf16.mxu0 %v6869_v5  ;;  %6395 = vmatprep.subr.bf16.mxu1 %v6869_v5 }
 0xbbe   : > { %v4601_v41 = vmul.f32 %v9227_v51, %v4579_v27  ;;  %v9291_v24 = vadd.f32 %v9235_v58, %v4600_v40  ;;  %v4580_v26 = vmul.f32 %v7022_v0, %v9193_v29  ;;  %6002 = vmatpush3.bf16.msra.mxu0 %v6870_v19  ;;  %6403 = vmatpush3.bf16.msra.mxu1 %v6870_v19  ;;  %v4654_v27 = vld [vmem:[%s9839_s10] sm:$0x3] }
 0xbbf   : > { %v7024_v62 = vpop.eup %7023  ;;  %6003 = vmatprep.subr.bf16.mxu0 %v6871_v52  ;;  %6396 = vmatprep.subr.bf16.mxu1 %v6871_v52 }
 0xbc0   : > { %v9294_v32 = vadd.f32 %v9235_v58, %v4601_v41  ;;  %v4581_v22 = vmul.f32 %v7024_v62, %v9198_v63  ;;  %v4602_v29 = vmul.f32 %v9227_v51, %v4580_v26 }
 0xbc1   : > { %v4515_v48 = vpop.xlane.xlu0 %4514 }
 0xbc2   : > { %v4534_v53 = vmul.f32 0.0078125, %v4515_v48  ;;  %v4634_v36 = vpack.c.bf16 %v9294_v32, %v9291_v24  ;;  %v4603_v16 = vmul.f32 %v9227_v51, %v4581_v22  ;;  %v9307_v59 = vadd.f32 %v9235_v58, %v4602_v29  ;;  %6004 = vmatpush3.bf16.msra.mxu0 %v6872_v20  ;;  %6404 = vmatpush3.bf16.msra.mxu1 %v6872_v20 }
 0xbc3   : > { %v4517_v46 = vpop.xlane.xlu1 %4516 }
 0xbc4   : > { %v4550_v33 = vadd.f32 1e-05, %v4534_v53  ;;  %v4535_v43 = vmul.f32 0.0078125, %v4517_v46  ;;  %4819 = vmatmul.mubr.bf16.gmra.mrb[16].mxu1 %v4634_v36  ;;  %v9304_v45 = vadd.f32 %v9235_v58, %v4603_v16 }
 0xbc5   : > { %v4519_v63 = vpop.xlane.xlu0 %4518  ;;  %4828 = vmatprep.mubr.bf16.mxu1 %v7480_v60 }
 0xbc6   : > { %7025 = vrsqrt.f32 %v4550_v33  ;;  %v4551_v21 = vadd.f32 1e-05, %v4535_v43  ;;  %v4536_v47 = vmul.f32 0.0078125, %v4519_v63  ;;  %v4635_v6 = vpack.c.bf16 %v9304_v45, %v9307_v59 }
 0xbc7   : > { %v4521_v55 = vpop.xlane.xlu1 %4520 }
 0xbc8   : > { %7027 = vrsqrt.f32 %v4551_v21  ;;  %v4552_v23 = vadd.f32 1e-05, %v4536_v47  ;;  %v4537_v7 = vmul.f32 0.0078125, %v4521_v55 }
 0xbca   : > { %7029 = vrsqrt.f32 %v4552_v23  ;;  %v4553_v50 = vadd.f32 1e-05, %v4537_v7 }
 0xbcc   : > { %7031 = vrsqrt.f32 %v4553_v50  ;;  %4829 = vmatmul.mubr.bf16.gmra.mrb[20].mxu1 %v4635_v6 }
 0xbcd   : > { %4838 = vmatprep.mubr.bf16.mxu1 %v7480_v60 }
 0xbd0   : > { %v7026_v25 = vpop.eup %7025 }
 0xbd1   : > { %v4582_v11 = vmul.f32 %v7026_v25, %v9205_v35 }
 0xbd2   : > { %v7028_v44 = vpop.eup %7027 }
 0xbd3   : > { %v4583_v13 = vmul.f32 %v7028_v44, %v9208_v31  ;;  %v4604_v14 = vmul.f32 %v9227_v51, %v4582_v11 }
 0xbd4   : > { %v7030_v28 = vpop.eup %7029 }
 0xbd5   : > { %v4605_v1 = vmul.f32 %v9227_v51, %v4583_v13  ;;  %v9317_v15 = vadd.f32 %v9235_v58, %v4604_v14  ;;  %v4584_v38 = vmul.f32 %v7030_v28, %v9213_v56 }
 0xbd6   : > { %v7032_v37 = vpop.eup %7031 }
 0xbd7   : > { %v9320_v42 = vadd.f32 %v9235_v58, %v4605_v1  ;;  %v4585_v18 = vmul.f32 %v7032_v37, %v9218_v17  ;;  %v4606_v34 = vmul.f32 %v9227_v51, %v4584_v38  ;;  %v4656_v17 = vlaneseq }
 0xbd9   : > { %v4636_v35 = vpack.c.bf16 %v9320_v42, %v9317_v15  ;;  %v4607_v31 = vmul.f32 %v9227_v51, %v4585_v18  ;;  %v9333_v49 = vadd.f32 %v9235_v58, %v4606_v34  ;;  %v4657_v54 = vshrl.u32 %v4656_v17, 7 }
 0xbdb   : > { %4839 = vmatmul.mubr.bf16.gmra.mrb[24].mxu1 %v4636_v35  ;;  %v9330_v3 = vadd.f32 %v9235_v58, %v4607_v31  ;;  %v4658_v30 = vsub.s32 0, %v4657_v54  ;;  %v4662_v51 = vsub.s32 1, %v4657_v54 }
 0xbdc   : > { %4848 = vmatprep.mubr.bf16.mxu1 %v7480_v60 }
 0xbdd   : > { %v4637_v56 = vpack.c.bf16 %v9330_v3, %v9333_v49  ;;  %v9340_v40 = vrot.slane %v4654_v27, %v4658_v30  ;;  %v9342_v60 = vrot.slane %v4654_v27, %v4662_v51 }
 0xbe3   : > { %4849 = vmatmul.mubr.bf16.gmra.mrb[28].mxu1 %v4637_v56 }
 0xc3f   : > { %v4780_v0 = vpop.f32.mrb[0].mxu1 }
 0xc40   : > { %v4781_v58 = vadd.f32 %v4780_v0, %v9340_v40  ;;  %v4782_v41 = vpop.f32.mrb[1].mxu1 }
 0xc41   : > { %v4783_v39 = vadd.f32 %v4782_v41, %v9342_v60  ;;  %v4784_v62 = vpop.f32.mrb[2].mxu1 }
 0xc42   : > { %v4785_v26 = vadd.f32 %v4784_v62, %v9340_v40  ;;  %v4786_v22 = vpop.f32.mrb[3].mxu1  ;;  %v4859_v5 = vmax.f32 %v4781_v58, 0.0 }
 0xc43   : > { %v4787_v48 = vadd.f32 %v4786_v22, %v9342_v60  ;;  %v4860_v36 = vmax.f32 %v4783_v39, 0.0 }
 0xc44   : > { %v4861_v53 = vmax.f32 %v4785_v26, 0.0 }
 0xc45   : > { %v4862_v16 = vmax.f32 %v4787_v48, 0.0 }
 0xc46   : > { %v4891_v19 = vpack.c.bf16 %v4861_v53, %v4859_v5 }
 0xc47   : > { %v4892_v46 = vpack.c.bf16 %v4862_v16, %v4860_v36  ;;  %v4790_v33 = vpop.f32.mrb[4].mxu1 }
 0xc48   : > { %v4791_v43 = vadd.f32 %v4790_v33, %v9340_v40  ;;  %v4792_v29 = vpop.f32.mrb[5].mxu1 }
 0xc49   : > { %v4793_v63 = vadd.f32 %v4792_v29, %v9342_v60  ;;  %v4794_v52 = vpop.f32.mrb[6].mxu1  ;;  %5074 = vmatprep.mubr.bf16.mxu0 %v4892_v46 }
 0xc4a   : > { %v4795_v21 = vadd.f32 %v4794_v52, %v9340_v40  ;;  %v4796_v47 = vpop.f32.mrb[7].mxu1  ;;  %5075 = vmatmul.mubr.bf16.vlgmr.msra.gmra.mrb[16].mxu0 %v4891_v19  ;;  %v4863_v55 = vmax.f32 %v4791_v43, 0.0 }
 0xc4b   : > { %v4797_v20 = vadd.f32 %v4796_v47, %v9342_v60  ;;  %v4864_v7 = vmax.f32 %v4793_v63, 0.0 }
 0xc4c   : > { %v4865_v23 = vmax.f32 %v4795_v21, 0.0 }
 0xc4d   : > { %v4866_v50 = vmax.f32 %v4797_v20, 0.0 }
 0xc4e   : > { %v4893_v6 = vpack.c.bf16 %v4865_v23, %v4863_v55 }
 0xc4f   : > { %v4894_v25 = vpack.c.bf16 %v4866_v50, %v4864_v7 }
 0xc51   : > { %5082 = vmatprep.mubr.bf16.mxu0 %v4894_v25 }
 0xc52   : > { %5083 = vmatmul.mubr.bf16.gmra.mrb[20].mxu0 %v4893_v6 }
 0xc6b   : > { %v4800_v11 = vpop.f32.mrb[8].mxu1 }
 0xc6c   : > { %v4801_v44 = vadd.f32 %v4800_v11, %v9340_v40  ;;  %v4802_v13 = vpop.f32.mrb[9].mxu1 }
 0xc6d   : > { %v4803_v14 = vadd.f32 %v4802_v13, %v9342_v60  ;;  %v4804_v28 = vpop.f32.mrb[10].mxu1 }
 0xc6e   : > { %v4805_v1 = vadd.f32 %v4804_v28, %v9340_v40  ;;  %v4806_v37 = vpop.f32.mrb[11].mxu1  ;;  %v4867_v18 = vmax.f32 %v4801_v44, 0.0 }
 0xc6f   : > { %v4807_v38 = vadd.f32 %v4806_v37, %v9342_v60  ;;  %v4868_v31 = vmax.f32 %v4803_v14, 0.0 }
 0xc70   : > { %v4869_v35 = vmax.f32 %v4805_v1, 0.0 }
 0xc71   : > { %v4870_v34 = vmax.f32 %v4807_v38, 0.0 }
 0xc72   : > { %v4895_v56 = vpack.c.bf16 %v4869_v35, %v4867_v18 }
 0xc73   : > { %v4896_v17 = vpack.c.bf16 %v4870_v34, %v4868_v31  ;;  %v4810_v54 = vpop.f32.mrb[12].mxu1 }
 0xc74   : > { %v4811_v30 = vadd.f32 %v4810_v54, %v9340_v40  ;;  %v4812_v27 = vpop.f32.mrb[13].mxu1 }
 0xc75   : > { %v4813_v51 = vadd.f32 %v4812_v27, %v9342_v60  ;;  %v4814_v0 = vpop.f32.mrb[14].mxu1  ;;  %5090 = vmatprep.mubr.bf16.mxu0 %v4896_v17 }
 0xc76   : > { %v4815_v58 = vadd.f32 %v4814_v0, %v9340_v40  ;;  %v4816_v41 = vpop.f32.mrb[15].mxu1  ;;  %5091 = vmatmul.mubr.bf16.gmra.mrb[24].mxu0 %v4895_v56  ;;  %v4871_v62 = vmax.f32 %v4811_v30, 0.0 }
 0xc77   : > { %v4817_v39 = vadd.f32 %v4816_v41, %v9342_v60  ;;  %v4872_v22 = vmax.f32 %v4813_v51, 0.0 }
 0xc78   : > { %v4873_v26 = vmax.f32 %v4815_v58, 0.0 }
 0xc79   : > { %v4874_v48 = vmax.f32 %v4817_v39, 0.0 }
 0xc7a   : > { %v4897_v5 = vpack.c.bf16 %v4873_v26, %v4871_v62 }
 0xc7b   : > { %v4898_v53 = vpack.c.bf16 %v4874_v48, %v4872_v22 }
 0xc7d   : > { %5098 = vmatprep.mubr.bf16.mxu0 %v4898_v53 }
 0xc7e   : > { %5099 = vmatmul.mubr.bf16.gmra.mrb[28].mxu0 %v4897_v5 }
 0xc97   : > { %v4820_v36 = vpop.f32.mrb[16].mxu1 }
 0xc98   : > { %v4821_v16 = vadd.f32 %v4820_v36, %v9340_v40  ;;  %v4822_v19 = vpop.f32.mrb[17].mxu1 }
 0xc99   : > { %v4823_v46 = vadd.f32 %v4822_v19, %v9342_v60  ;;  %v4824_v33 = vpop.f32.mrb[18].mxu1 }
 0xc9a   : > { %v4825_v43 = vadd.f32 %v4824_v33, %v9340_v40  ;;  %v4826_v29 = vpop.f32.mrb[19].mxu1  ;;  %v4875_v52 = vmax.f32 %v4821_v16, 0.0 }
 0xc9b   : > { %v4827_v63 = vadd.f32 %v4826_v29, %v9342_v60  ;;  %v4876_v47 = vmax.f32 %v4823_v46, 0.0 }
 0xc9c   : > { %v4877_v21 = vmax.f32 %v4825_v43, 0.0 }
 0xc9d   : > { %v4878_v20 = vmax.f32 %v4827_v63, 0.0 }
 0xc9e   : > { %v4899_v55 = vpack.c.bf16 %v4877_v21, %v4875_v52 }
 0xc9f   : > { %v4900_v23 = vpack.c.bf16 %v4878_v20, %v4876_v47  ;;  %v4830_v7 = vpop.f32.mrb[20].mxu1  ;;  %v9379_v20 = vld [vmem:[%s9840_s17] ss:$0 sm:$0xff] }
 0xca0   : > { %v4831_v50 = vadd.f32 %v4830_v7, %v9340_v40  ;;  %v4832_v6 = vpop.f32.mrb[21].mxu1 }
 0xca1   : > { %v4833_v25 = vadd.f32 %v4832_v6, %v9342_v60  ;;  %v4834_v11 = vpop.f32.mrb[22].mxu1  ;;  %5106 = vmatprep.mubr.bf16.mxu0 %v4900_v23 }
 0xca2   : > { %v4835_v44 = vadd.f32 %v4834_v11, %v9340_v40  ;;  %v4836_v13 = vpop.f32.mrb[23].mxu1  ;;  %5107 = vmatmul.mubr.bf16.gmra.mrb[32].mxu0 %v4899_v55  ;;  %v4879_v28 = vmax.f32 %v4831_v50, 0.0 }
 0xca3   : > { %v4837_v14 = vadd.f32 %v4836_v13, %v9342_v60  ;;  %v4880_v37 = vmax.f32 %v4833_v25, 0.0 }
 0xca4   : > { %v4881_v1 = vmax.f32 %v4835_v44, 0.0 }
 0xca5   : > { %v4882_v38 = vmax.f32 %v4837_v14, 0.0 }
 0xca6   : > { %v4901_v18 = vpack.c.bf16 %v4881_v1, %v4879_v28 }
 0xca7   : > { %v4902_v35 = vpack.c.bf16 %v4882_v38, %v4880_v37 }
 0xca9   : > { %5114 = vmatprep.mubr.bf16.mxu0 %v4902_v35 }
 0xcaa   : > { %5115 = vmatmul.mubr.bf16.gmra.mrb[36].mxu0 %v4901_v18 }
 0xcae   : > { %v4840_v31 = vpop.f32.mrb[24].mxu1 }
 0xcaf   : > { %v4841_v34 = vadd.f32 %v4840_v31, %v9340_v40  ;;  %v4842_v56 = vpop.f32.mrb[25].mxu1 }
 0xcb0   : > { %v4843_v17 = vadd.f32 %v4842_v56, %v9342_v60  ;;  %v4844_v54 = vpop.f32.mrb[26].mxu1 }
 0xcb1   : > { %v4845_v30 = vadd.f32 %v4844_v54, %v9340_v40  ;;  %v4846_v27 = vpop.f32.mrb[27].mxu1  ;;  %v4883_v0 = vmax.f32 %v4841_v34, 0.0 }
 0xcb2   : > { %v4847_v51 = vadd.f32 %v4846_v27, %v9342_v60  ;;  %v4884_v41 = vmax.f32 %v4843_v17, 0.0 }
 0xcb3   : > { %v4885_v58 = vmax.f32 %v4845_v30, 0.0 }
 0xcb4   : > { %v4886_v39 = vmax.f32 %v4847_v51, 0.0 }
 0xcb5   : > { %v4903_v62 = vpack.c.bf16 %v4885_v58, %v4883_v0 }
 0xcb6   : > { %v4904_v26 = vpack.c.bf16 %v4886_v39, %v4884_v41  ;;  %v4850_v22 = vpop.f32.mrb[28].mxu1 }
 0xcb7   : > { %v4851_v48 = vadd.f32 %v4850_v22, %v9340_v40  ;;  %v4852_v5 = vpop.f32.mrb[29].mxu1 }
 0xcb8   : > { %v4853_v53 = vadd.f32 %v4852_v5, %v9342_v60  ;;  %v4854_v36 = vpop.f32.mrb[30].mxu1  ;;  %5122 = vmatprep.mubr.bf16.mxu1 %v4904_v26 }
 0xcb9   : > { %v4855_v16 = vadd.f32 %v4854_v36, %v9340_v40  ;;  %v4856_v19 = vpop.f32.mrb[31].mxu1  ;;  %5123 = vmatmul.mubr.bf16.vlgmr.msra.gmra.mrb[32].mxu1 %v4903_v62  ;;  %v4887_v33 = vmax.f32 %v4851_v48, 0.0 }
 0xcba   : > { %v4857_v46 = vadd.f32 %v4856_v19, %v9342_v60  ;;  %v4888_v29 = vmax.f32 %v4853_v53, 0.0 }
 0xcbb   : > { %v4889_v43 = vmax.f32 %v4855_v16, 0.0 }
 0xcbc   : > { %v4890_v63 = vmax.f32 %v4857_v46, 0.0 }
 0xcbd   : > { %v4905_v52 = vpack.c.bf16 %v4889_v43, %v4887_v33 }
 0xcbe   : > { %v4906_v21 = vpack.c.bf16 %v4890_v63, %v4888_v29 }
 0xcc0   : > { %5130 = vmatprep.mubr.bf16.mxu1 %v4906_v21 }
 0xcc1   : > { %5131 = vmatmul.mubr.bf16.gmra.mrb[36].mxu1 %v4905_v52 }
 0xd1d   : > { %v6005_v47 = vpop.f32.mrb[16].mxu0 }
 0xd1e   : > { %v6006_v55 = vpop.f32.mrb[17].mxu0 }
 0xd1f   : > { %v6007_v40 = vadd.f32 %v6006_v55, %v6005_v47  ;;  %v6008_v23 = vpop.f32.mrb[18].mxu0 }
 0xd20   : > { %v6009_v7 = vpop.f32.mrb[19].mxu0 }
 0xd21   : > { %v5077_v60 = vadd.f32 %v6007_v40, %v9379_v20  ;;  %v6010_v50 = vadd.f32 %v6009_v7, %v6008_v23 }
 0xd23   : > { %v5080_v6 = vadd.f32 %v6010_v50, %v9379_v20  ;;  %v9384_v25 = vadd.f32 %v5077_v60, %v9239_v61 }
 0xd25   : > { %5157 = vadd.xlane.f32.xlu0 %v9384_v25  ;;  %v6011_v11 = vpop.f32.mrb[20].mxu0  ;;  %v9388_v44 = vadd.f32 %v5080_v6, %v9242_v8 }
 0xd26   : > { %v6012_v13 = vpop.f32.mrb[21].mxu0 }
 0xd27   : > { %v6013_v14 = vadd.f32 %v6012_v13, %v6011_v11  ;;  %5159 = vadd.xlane.f32.xlu1 %v9388_v44  ;;  %v6014_v28 = vpop.f32.mrb[22].mxu0 }
 0xd28   : > { %v6015_v1 = vpop.f32.mrb[23].mxu0 }
 0xd29   : > { %v5085_v37 = vadd.f32 %v6013_v14, %v9379_v20  ;;  %v6016_v38 = vadd.f32 %v6015_v1, %v6014_v28 }
 0xd2b   : > { %v5088_v18 = vadd.f32 %v6016_v38, %v9379_v20  ;;  %v9394_v61 = vadd.f32 %v5085_v37, %v9252_v2 }
 0xd2d   : > { %5161 = vadd.xlane.f32.xlu0 %v9394_v61  ;;  %v9398_v35 = vadd.f32 %v5088_v18, %v9255_v9 }
 0xd2f   : > { %5163 = vadd.xlane.f32.xlu1 %v9398_v35 }
 0xd49   : > { %v6017_v8 = vpop.f32.mrb[24].mxu0 }
 0xd4a   : > { %v6018_v31 = vpop.f32.mrb[25].mxu0 }
 0xd4b   : > { %v6019_v34 = vadd.f32 %v6018_v31, %v6017_v8  ;;  %v6020_v56 = vpop.f32.mrb[26].mxu0 }
 0xd4c   : > { %v6021_v17 = vpop.f32.mrb[27].mxu0 }
 0xd4d   : > { %v5093_v54 = vadd.f32 %v6019_v34, %v9379_v20  ;;  %v6022_v30 = vadd.f32 %v6021_v17, %v6020_v56 }
 0xd4f   : > { %v5096_v27 = vadd.f32 %v6022_v30, %v9379_v20  ;;  %v9404_v2 = vadd.f32 %v5093_v54, %v9265_v4 }
 0xd51   : > { %5165 = vadd.xlane.f32.xlu0 %v9404_v2  ;;  %v6023_v51 = vpop.f32.mrb[28].mxu0  ;;  %v9408_v9 = vadd.f32 %v5096_v27, %v9268_v57 }
 0xd52   : > { %v6024_v0 = vpop.f32.mrb[29].mxu0 }
 0xd53   : > { %v6025_v58 = vadd.f32 %v6024_v0, %v6023_v51  ;;  %5167 = vadd.xlane.f32.xlu1 %v9408_v9  ;;  %v6026_v41 = vpop.f32.mrb[30].mxu0 }
 0xd54   : > { %v6027_v39 = vpop.f32.mrb[31].mxu0 }
 0xd55   : > { %v5101_v62 = vadd.f32 %v6025_v58, %v9379_v20  ;;  %v6028_v26 = vadd.f32 %v6027_v39, %v6026_v41 }
 0xd57   : > { %v5104_v22 = vadd.f32 %v6028_v26, %v9379_v20  ;;  %v9414_v4 = vadd.f32 %v5101_v62, %v9281_v12 }
 0xd59   : > { %5169 = vadd.xlane.f32.xlu0 %v9414_v4  ;;  %v9418_v48 = vadd.f32 %v5104_v22, %v9278_v10 }
 0xd5b   : > { %5171 = vadd.xlane.f32.xlu1 %v9418_v48 }
 0xd75   : > { %v6029_v57 = vpop.f32.mrb[32].mxu0 }
 0xd76   : > { %v6030_v5 = vpop.f32.mrb[33].mxu0 }
 0xd77   : > { %v6031_v53 = vadd.f32 %v6030_v5, %v6029_v57  ;;  %v6032_v36 = vpop.f32.mrb[34].mxu0 }
 0xd78   : > { %v6033_v16 = vpop.f32.mrb[35].mxu0 }
 0xd79   : > { %v5109_v19 = vadd.f32 %v6031_v53, %v9379_v20  ;;  %v6034_v46 = vadd.f32 %v6033_v16, %v6032_v36 }
 0xd7b   : > { %v5112_v33 = vadd.f32 %v6034_v46, %v9379_v20  ;;  %v9424_v12 = vadd.f32 %v5109_v19, %v9291_v24 }
 0xd7d   : > { %5173 = vadd.xlane.f32.xlu0 %v9424_v12  ;;  %v6035_v43 = vpop.f32.mrb[36].mxu0  ;;  %v9428_v10 = vadd.f32 %v5112_v33, %v9294_v32 }
 0xd7e   : > { %v6036_v29 = vpop.f32.mrb[37].mxu0 }
 0xd7f   : > { %v6037_v63 = vadd.f32 %v6036_v29, %v6035_v43  ;;  %5175 = vadd.xlane.f32.xlu1 %v9428_v10  ;;  %v6038_v52 = vpop.f32.mrb[38].mxu0 }
 0xd80   : > { %v6039_v21 = vpop.f32.mrb[39].mxu0 }
 0xd81   : > { %v5117_v47 = vadd.f32 %v6037_v63, %v9379_v20  ;;  %v6040_v55 = vadd.f32 %v6039_v21, %v6038_v52 }
 0xd83   : > { %v5120_v40 = vadd.f32 %v6040_v55, %v9379_v20  ;;  %v9434_v24 = vadd.f32 %v5117_v47, %v9307_v59 }
 0xd85   : > { %5177 = vadd.xlane.f32.xlu0 %v9434_v24  ;;  %v9438_v23 = vadd.f32 %v5120_v40, %v9304_v45 }
 0xd87   : > { %5179 = vadd.xlane.f32.xlu1 %v9438_v23 }
 0xd8c   : > { %v6041_v32 = vpop.f32.mrb[32].mxu1 }
 0xd8d   : > { %v6042_v7 = vpop.f32.mrb[33].mxu1 }
 0xd8e   : > { %v6043_v60 = vadd.f32 %v6042_v7, %v6041_v32  ;;  %v6044_v50 = vpop.f32.mrb[34].mxu1 }
 0xd8f   : > { %v6045_v6 = vpop.f32.mrb[35].mxu1 }
 0xd90   : > { %v5125_v11 = vadd.f32 %v6043_v60, %v9379_v20  ;;  %v6046_v13 = vadd.f32 %v6045_v6, %v6044_v50 }
 0xd92   : > { %v5128_v14 = vadd.f32 %v6046_v13, %v9379_v20  ;;  %v9444_v59 = vadd.f32 %v5125_v11, %v9317_v15 }
 0xd94   : > { %5181 = vadd.xlane.f32.xlu0 %v9444_v59  ;;  %v6047_v28 = vpop.f32.mrb[36].mxu1  ;;  %v9448_v45 = vadd.f32 %v5128_v14, %v9320_v42 }
 0xd95   : > { %v6048_v1 = vpop.f32.mrb[37].mxu1 }
 0xd96   : > { %v6049_v37 = vadd.f32 %v6048_v1, %v6047_v28  ;;  %5183 = vadd.xlane.f32.xlu1 %v9448_v45  ;;  %v6050_v38 = vpop.f32.mrb[38].mxu1 }
 0xd97   : > { %v6051_v18 = vpop.f32.mrb[39].mxu1 }
 0xd98   : > { %v5133_v8 = vadd.f32 %v6049_v37, %v9379_v20  ;;  %v6052_v31 = vadd.f32 %v6051_v18, %v6050_v38 }
 0xd9a   : > { %v5136_v34 = vadd.f32 %v6052_v31, %v9379_v20  ;;  %v9454_v15 = vadd.f32 %v5133_v8, %v9333_v49 }
 0xd9c   : > { %5185 = vadd.xlane.f32.xlu0 %v9454_v15  ;;  %v9458_v56 = vadd.f32 %v5136_v34, %v9330_v3 }
 0xd9e   : > { %5187 = vadd.xlane.f32.xlu1 %v9458_v56 }
 0xdb2   : > { %v5158_v42 = vpop.xlane.xlu0 %5157 }
 0xdb3   : > { %v5189_v17 = vmul.f32 0.0078125, %v5158_v42 }
 0xdb4   : > { %v5160_v54 = vpop.xlane.xlu1 %5159 }
 0xdb5   : > { %v9462_v30 = vsub.f32 %v9384_v25, %v5189_v17  ;;  %v5190_v27 = vmul.f32 0.0078125, %v5160_v54 }
 0xdb7   : > { %v9465_v51 = vsub.f32 %v9388_v44, %v5190_v27  ;;  %v5221_v49 = vmul.f32 %v9462_v30, %v9462_v30 }
 0xdb9   : > { %5237 = vadd.xlane.f32.xlu0 %v5221_v49  ;;  %v5222_v3 = vmul.f32 %v9465_v51, %v9465_v51 }
 0xdba   : > { %v5162_v20 = vpop.xlane.xlu0 %5161 }
 0xdbb   : > { %v5191_v0 = vmul.f32 0.0078125, %v5162_v20  ;;  %5239 = vadd.xlane.f32.xlu1 %v5222_v3 }
 0xdbc   : > { %v5164_v58 = vpop.xlane.xlu1 %5163 }
 0xdbd   : > { %v9472_v41 = vsub.f32 %v9394_v61, %v5191_v0  ;;  %v5192_v25 = vmul.f32 0.0078125, %v5164_v58 }
 0xdbf   : > { %v9475_v39 = vsub.f32 %v9398_v35, %v5192_v25  ;;  %v5223_v44 = vmul.f32 %v9472_v41, %v9472_v41 }
 0xdc1   : > { %5241 = vadd.xlane.f32.xlu0 %v5223_v44  ;;  %v5224_v62 = vmul.f32 %v9475_v39, %v9475_v39 }
 0xdc3   : > { %5243 = vadd.xlane.f32.xlu1 %v5224_v62 }
 0xdde   : > { %v5166_v26 = vpop.xlane.xlu0 %5165 }
 0xddf   : > { %v5193_v22 = vmul.f32 0.0078125, %v5166_v26 }
 0xde0   : > { %v5168_v57 = vpop.xlane.xlu1 %5167 }
 0xde1   : > { %v9482_v5 = vsub.f32 %v9404_v2, %v5193_v22  ;;  %v5194_v61 = vmul.f32 0.0078125, %v5168_v57  ;;  %v9544_v22 = vld [vmem:[%s9841_s28] ss:$0 sm:$0xff] }
 0xde3   : > { %v9485_v53 = vsub.f32 %v9408_v9, %v5194_v61  ;;  %v5225_v35 = vmul.f32 %v9482_v5, %v9482_v5 }
 0xde5   : > { %5245 = vadd.xlane.f32.xlu0 %v5225_v35  ;;  %v5226_v36 = vmul.f32 %v9485_v53, %v9485_v53  ;;  %v9550_v35 = vld [vmem:[%s9842_s7] ss:$0 sm:$0xff] }
 0xde6   : > { %v5170_v16 = vpop.xlane.xlu0 %5169 }
 0xde7   : > { %v5195_v19 = vmul.f32 0.0078125, %v5170_v16  ;;  %5247 = vadd.xlane.f32.xlu1 %v5226_v36 }
 0xde8   : > { %v5172_v46 = vpop.xlane.xlu1 %5171 }
 0xde9   : > { %v9492_v33 = vsub.f32 %v9414_v4, %v5195_v19  ;;  %v5196_v2 = vmul.f32 0.0078125, %v5172_v46 }
 0xdeb   : > { %v9495_v43 = vsub.f32 %v9418_v48, %v5196_v2  ;;  %v5227_v9 = vmul.f32 %v9492_v33, %v9492_v33 }
 0xded   : > { %5249 = vadd.xlane.f32.xlu0 %v5227_v9  ;;  %v5228_v29 = vmul.f32 %v9495_v43, %v9495_v43 }
 0xdef   : > { %5251 = vadd.xlane.f32.xlu1 %v5228_v29 }
 0xe0a   : > { %v5174_v63 = vpop.xlane.xlu0 %5173 }
 0xe0b   : > { %v5197_v52 = vmul.f32 0.0078125, %v5174_v63 }
 0xe0c   : > { %v5176_v21 = vpop.xlane.xlu1 %5175 }
 0xe0d   : > { %v9502_v47 = vsub.f32 %v9424_v12, %v5197_v52  ;;  %v5198_v4 = vmul.f32 0.0078125, %v5176_v21 }
 0xe0f   : > { %v9505_v55 = vsub.f32 %v9428_v10, %v5198_v4  ;;  %v5229_v48 = vmul.f32 %v9502_v47, %v9502_v47 }
 0xe11   : > { %5253 = vadd.xlane.f32.xlu0 %v5229_v48  ;;  %v5230_v40 = vmul.f32 %v9505_v55, %v9505_v55 }
 0xe12   : > { %v5178_v32 = vpop.xlane.xlu0 %5177 }
 0xe13   : > { %v5199_v7 = vmul.f32 0.0078125, %v5178_v32  ;;  %5255 = vadd.xlane.f32.xlu1 %v5230_v40 }
 0xe14   : > { %v5180_v60 = vpop.xlane.xlu1 %5179 }
 0xe15   : > { %v9512_v50 = vsub.f32 %v9434_v24, %v5199_v7  ;;  %v5200_v12 = vmul.f32 0.0078125, %v5180_v60 }
 0xe17   : > { %v9515_v6 = vsub.f32 %v9438_v23, %v5200_v12  ;;  %v5231_v10 = vmul.f32 %v9512_v50, %v9512_v50 }
 0xe19   : > { %5257 = vadd.xlane.f32.xlu0 %v5231_v10  ;;  %v5232_v11 = vmul.f32 %v9515_v6, %v9515_v6 }
 0xe1b   : > { %5259 = vadd.xlane.f32.xlu1 %v5232_v11 }
 0xe21   : > { %v5182_v13 = vpop.xlane.xlu0 %5181 }
 0xe22   : > { %v5201_v14 = vmul.f32 0.0078125, %v5182_v13 }
 0xe23   : > { %v5184_v28 = vpop.xlane.xlu1 %5183 }
 0xe24   : > { %v9522_v1 = vsub.f32 %v9444_v59, %v5201_v14  ;;  %v5202_v24 = vmul.f32 0.0078125, %v5184_v28 }
 0xe26   : > { %v9525_v37 = vsub.f32 %v9448_v45, %v5202_v24  ;;  %v5233_v23 = vmul.f32 %v9522_v1, %v9522_v1 }
 0xe28   : > { %5261 = vadd.xlane.f32.xlu0 %v5233_v23  ;;  %v5234_v38 = vmul.f32 %v9525_v37, %v9525_v37 }
 0xe29   : > { %v5186_v18 = vpop.xlane.xlu0 %5185 }
 0xe2a   : > { %v5203_v8 = vmul.f32 0.0078125, %v5186_v18  ;;  %5263 = vadd.xlane.f32.xlu1 %v5234_v38 }
 0xe2b   : > { %v5188_v31 = vpop.xlane.xlu1 %5187 }
 0xe2c   : > { %v9532_v34 = vsub.f32 %v9454_v15, %v5203_v8  ;;  %v5204_v59 = vmul.f32 0.0078125, %v5188_v31 }
 0xe2e   : > { %v9535_v42 = vsub.f32 %v9458_v56, %v5204_v59  ;;  %v5235_v45 = vmul.f32 %v9532_v34, %v9532_v34 }
 0xe30   : > { %5265 = vadd.xlane.f32.xlu0 %v5235_v45  ;;  %v5236_v17 = vmul.f32 %v9535_v42, %v9535_v42 }
 0xe32   : > { %5267 = vadd.xlane.f32.xlu1 %v5236_v17 }
 0xe46   : > { %v5238_v54 = vpop.xlane.xlu0 %5237 }
 0xe47   : > { %v5269_v27 = vmul.f32 0.0078125, %v5238_v54 }
 0xe48   : > { %v5240_v49 = vpop.xlane.xlu1 %5239 }
 0xe49   : > { %v5285_v3 = vadd.f32 1e-05, %v5269_v27  ;;  %v5270_v20 = vmul.f32 0.0078125, %v5240_v49 }
 0xe4b   : > { %7033 = vrsqrt.f32 %v5285_v3  ;;  %v5286_v15 = vadd.f32 1e-05, %v5270_v20 }
 0xe4d   : > { %7035 = vrsqrt.f32 %v5286_v15 }
 0xe4e   : > { %v5242_v0 = vpop.xlane.xlu0 %5241 }
 0xe4f   : > { %v5271_v58 = vmul.f32 0.0078125, %v5242_v0 }
 0xe50   : > { %v5244_v56 = vpop.xlane.xlu1 %5243 }
 0xe51   : > { %v5287_v25 = vadd.f32 1e-05, %v5271_v58  ;;  %v5272_v44 = vmul.f32 0.0078125, %v5244_v56 }
 0xe53   : > { %7037 = vrsqrt.f32 %v5287_v25  ;;  %v5288_v62 = vadd.f32 1e-05, %v5272_v44 }
 0xe55   : > { %v7034_v26 = vpop.eup %7033  ;;  %7039 = vrsqrt.f32 %v5288_v62 }
 0xe56   : > { %v5317_v57 = vmul.f32 %v7034_v26, %v9462_v30 }
 0xe57   : > { %v7036_v61 = vpop.eup %7035 }
 0xe58   : > { %v5339_v36 = vmul.f32 %v9544_v22, %v5317_v57  ;;  %v5318_v16 = vmul.f32 %v7036_v61, %v9465_v51 }
 0xe5a   : > { %v5361_v19 = vadd.f32 %v9550_v35, %v5339_v36  ;;  %v5340_v46 = vmul.f32 %v9544_v22, %v5318_v16 }
 0xe5c   : > { %5377 = vst [vmem:[%s8061_s11] sm:$0xff] %v5361_v19  ;;  %v5362_v2 = vadd.f32 %v9550_v35, %v5340_v46 }
 0xe5d   : > { %v7038_v30 = vpop.eup %7037 }
 0xe5e   : > { %5378 = vst [vmem:[%s8061_s11 + $0x8] sm:$0xff] %v5362_v2  ;;  %v5319_v9 = vmul.f32 %v7038_v30, %v9472_v41 }
 0xe5f   : > { %v7040_v29 = vpop.eup %7039 }
 0xe60   : > { %v5341_v63 = vmul.f32 %v9544_v22, %v5319_v9  ;;  %v5320_v52 = vmul.f32 %v7040_v29, %v9475_v39 }
 0xe62   : > { %v5363_v21 = vadd.f32 %v9550_v35, %v5341_v63  ;;  %v5342_v51 = vmul.f32 %v9544_v22, %v5320_v52 }
 0xe64   : > { %5379 = vst [vmem:[%s8061_s11 + $0x10] sm:$0xff] %v5363_v21  ;;  %v5364_v4 = vadd.f32 %v9550_v35, %v5342_v51 }
 0xe66   : > { %5380 = vst [vmem:[%s8061_s11 + $0x18] sm:$0xff] %v5364_v4 }
 0xe72   : > { %v5246_v48 = vpop.xlane.xlu0 %5245 }
 0xe73   : > { %v5273_v40 = vmul.f32 0.0078125, %v5246_v48 }
 0xe74   : > { %v5248_v32 = vpop.xlane.xlu1 %5247 }
 0xe75   : > { %v5289_v7 = vadd.f32 1e-05, %v5273_v40  ;;  %v5274_v60 = vmul.f32 0.0078125, %v5248_v32 }
 0xe77   : > { %7041 = vrsqrt.f32 %v5289_v7  ;;  %v5290_v41 = vadd.f32 1e-05, %v5274_v60 }
 0xe79   : > { %7043 = vrsqrt.f32 %v5290_v41 }
 0xe7a   : > { %v5250_v12 = vpop.xlane.xlu0 %5249 }
 0xe7b   : > { %v5275_v10 = vmul.f32 0.0078125, %v5250_v12 }
 0xe7c   : > { %v5252_v39 = vpop.xlane.xlu1 %5251 }
 0xe7d   : > { %v5291_v11 = vadd.f32 1e-05, %v5275_v10  ;;  %v5276_v13 = vmul.f32 0.0078125, %v5252_v39 }
 0xe7f   : > { %7045 = vrsqrt.f32 %v5291_v11  ;;  %v5292_v14 = vadd.f32 1e-05, %v5276_v13 }
 0xe81   : > { %v7042_v28 = vpop.eup %7041  ;;  %7047 = vrsqrt.f32 %v5292_v14 }
 0xe82   : > { %v5321_v24 = vmul.f32 %v7042_v28, %v9482_v5 }
 0xe83   : > { %v7044_v23 = vpop.eup %7043 }
 0xe84   : > { %v5343_v38 = vmul.f32 %v9544_v22, %v5321_v24  ;;  %v5322_v18 = vmul.f32 %v7044_v23, %v9485_v53 }
 0xe86   : > { %v5365_v8 = vadd.f32 %v9550_v35, %v5343_v38  ;;  %v5344_v31 = vmul.f32 %v9544_v22, %v5322_v18 }
 0xe88   : > { %5381 = vst [vmem:[%s8061_s11 + $0x20] sm:$0xff] %v5365_v8  ;;  %v5366_v59 = vadd.f32 %v9550_v35, %v5344_v31 }
 0xe89   : > { %v7046_v45 = vpop.eup %7045 }
 0xe8a   : > { %5382 = vst [vmem:[%s8061_s11 + $0x28] sm:$0xff] %v5366_v59  ;;  %v5323_v17 = vmul.f32 %v7046_v45, %v9492_v33 }
 0xe8b   : > { %v7048_v54 = vpop.eup %7047 }
 0xe8c   : > { %v5345_v5 = vmul.f32 %v9544_v22, %v5323_v17  ;;  %v5324_v27 = vmul.f32 %v7048_v54, %v9495_v43 }
 0xe8e   : > { %v5367_v49 = vadd.f32 %v9550_v35, %v5345_v5  ;;  %v5346_v53 = vmul.f32 %v9544_v22, %v5324_v27 }
 0xe90   : > { %5383 = vst [vmem:[%s8061_s11 + $0x30] sm:$0xff] %v5367_v49  ;;  %v5368_v3 = vadd.f32 %v9550_v35, %v5346_v53 }
 0xe92   : > { %5384 = vst [vmem:[%s8061_s11 + $0x38] sm:$0xff] %v5368_v3 }
 0xe9e   : > { %v5254_v20 = vpop.xlane.xlu0 %5253 }
 0xe9f   : > { %v5277_v15 = vmul.f32 0.0078125, %v5254_v20 }
 0xea0   : > { %v5256_v0 = vpop.xlane.xlu1 %5255 }
 0xea1   : > { %v5293_v58 = vadd.f32 1e-05, %v5277_v15  ;;  %v5278_v56 = vmul.f32 0.0078125, %v5256_v0 }
 0xea3   : > { %7049 = vrsqrt.f32 %v5293_v58  ;;  %v5294_v33 = vadd.f32 1e-05, %v5278_v56 }
 0xea5   : > { %7051 = vrsqrt.f32 %v5294_v33 }
 0xea6   : > { %v5258_v25 = vpop.xlane.xlu0 %5257 }
 0xea7   : > { %v5279_v44 = vmul.f32 0.0078125, %v5258_v25 }
 0xea8   : > { %v5260_v43 = vpop.xlane.xlu1 %5259 }
 0xea9   : > { %v5295_v62 = vadd.f32 1e-05, %v5279_v44  ;;  %v5280_v26 = vmul.f32 0.0078125, %v5260_v43 }
 0xeab   : > { %7053 = vrsqrt.f32 %v5295_v62  ;;  %v5296_v57 = vadd.f32 1e-05, %v5280_v26 }
 0xead   : > { %v7050_v61 = vpop.eup %7049  ;;  %7055 = vrsqrt.f32 %v5296_v57 }
 0xeae   : > { %v5325_v36 = vmul.f32 %v7050_v61, %v9502_v47 }
 0xeaf   : > { %v7052_v16 = vpop.eup %7051 }
 0xeb0   : > { %v5347_v19 = vmul.f32 %v9544_v22, %v5325_v36  ;;  %v5326_v46 = vmul.f32 %v7052_v16, %v9505_v55 }
 0xeb2   : > { %v5369_v2 = vadd.f32 %v9550_v35, %v5347_v19  ;;  %v5348_v30 = vmul.f32 %v9544_v22, %v5326_v46 }
 0xeb4   : > { %5385 = vst [vmem:[%s8061_s11 + $0x40] sm:$0xff] %v5369_v2  ;;  %v5370_v9 = vadd.f32 %v9550_v35, %v5348_v30 }
 0xeb5   : > { %v7054_v29 = vpop.eup %7053  ;;  %v5262_v63 = vpop.xlane.xlu0 %5261 }
 0xeb6   : > { %5386 = vst [vmem:[%s8061_s11 + $0x48] sm:$0xff] %v5370_v9  ;;  %v5327_v52 = vmul.f32 %v7054_v29, %v9512_v50  ;;  %v5281_v47 = vmul.f32 0.0078125, %v5262_v63 }
 0xeb7   : > { %v7056_v21 = vpop.eup %7055  ;;  %v5264_v51 = vpop.xlane.xlu1 %5263 }
 0xeb8   : > { %v5349_v4 = vmul.f32 %v9544_v22, %v5327_v52  ;;  %v5328_v55 = vmul.f32 %v7056_v21, %v9515_v6  ;;  %v5297_v48 = vadd.f32 1e-05, %v5281_v47  ;;  %v5282_v40 = vmul.f32 0.0078125, %v5264_v51 }
 0xeba   : > { %v5371_v32 = vadd.f32 %v9550_v35, %v5349_v4  ;;  %v5350_v7 = vmul.f32 %v9544_v22, %v5328_v55  ;;  %7057 = vrsqrt.f32 %v5297_v48  ;;  %v5298_v60 = vadd.f32 1e-05, %v5282_v40 }
 0xebc   : > { %5387 = vst [vmem:[%s8061_s11 + $0x50] sm:$0xff] %v5371_v32  ;;  %v5372_v41 = vadd.f32 %v9550_v35, %v5350_v7  ;;  %7059 = vrsqrt.f32 %v5298_v60 }
 0xebd   : > { %v5266_v50 = vpop.xlane.xlu0 %5265 }
 0xebe   : > { %5388 = vst [vmem:[%s8061_s11 + $0x58] sm:$0xff] %v5372_v41  ;;  %v5283_v12 = vmul.f32 0.0078125, %v5266_v50 }
 0xebf   : > { %v5268_v10 = vpop.xlane.xlu1 %5267 }
 0xec0   : > { %v5299_v39 = vadd.f32 1e-05, %v5283_v12  ;;  %v5284_v6 = vmul.f32 0.0078125, %v5268_v10 }
 0xec2   : > { %7061 = vrsqrt.f32 %v5299_v39  ;;  %v5300_v11 = vadd.f32 1e-05, %v5284_v6 }
 0xec4   : > { %v7058_v13 = vpop.eup %7057  ;;  %7063 = vrsqrt.f32 %v5300_v11 }
 0xec5   : > { %v5329_v14 = vmul.f32 %v7058_v13, %v9522_v1 }
 0xec6   : > { %v7060_v28 = vpop.eup %7059 }
 0xec7   : > { %v5351_v24 = vmul.f32 %v9544_v22, %v5329_v14  ;;  %v5330_v23 = vmul.f32 %v7060_v28, %v9525_v37 }
 0xec9   : > { %v5373_v38 = vadd.f32 %v9550_v35, %v5351_v24  ;;  %v5352_v18 = vmul.f32 %v9544_v22, %v5330_v23 }
 0xecb   : > { %5389 = vst [vmem:[%s8061_s11 + $0x60] sm:$0xff] %v5373_v38  ;;  %v5374_v8 = vadd.f32 %v9550_v35, %v5352_v18 }
 0xecc   : > { %v7062_v31 = vpop.eup %7061 }
 0xecd   : > { %5390 = vst [vmem:[%s8061_s11 + $0x68] sm:$0xff] %v5374_v8  ;;  %v5331_v59 = vmul.f32 %v7062_v31, %v9532_v34 }
 0xece   : > { %v7064_v45 = vpop.eup %7063 }
 0xecf   : > { %v5353_v1 = vmul.f32 %v9544_v22, %v5331_v59  ;;  %v5332_v17 = vmul.f32 %v7064_v45, %v9535_v42 }
 0xed1   : > { %v5375_v54 = vadd.f32 %v9550_v35, %v5353_v1  ;;  %v5354_v37 = vmul.f32 %v9544_v22, %v5332_v17 }
 0xed3   : > { %5391 = vst [vmem:[%s8061_s11 + $0x70] sm:$0xff] %v5375_v54  ;;  %v5376_v5 = vadd.f32 %v9550_v35, %v5354_v37 }
 0xed5   : > { %5392 = vst [vmem:[%s8061_s11 + $0x78] sm:$0xff] %v5376_v5 }
 0xed6 PF: > { %s9843_s5 = sld [smem:[#allocation32_spill]]  ;;  %s9844_s12 = sld [smem:[#allocation59_spill]] }
 0xed7   : > { %s5407_s27 = sshll.u32 %s8061_s11, 4  ;;  %s5394_s23 = scalar_lea.sflag [#allocation7], %s8024_s1  ;;  %s9622_s27 = int_to_ptr.vmem [resolvable:$true] %s5407_s27 }
 0xed8   : > { %s7295_s10 = scalar_lea.vmem %s9622_s27, 2048  ;;  %p9845_p2 = scmp.ne.s32.totalorder %s9794_s20, 0 }
 0xed9   : > { %p7296_p13 = scmp.ne.s32.totalorder %s9622_s27, %s7295_s10  ;;  %s7484_s21 = smov [#allocation19]  }
 0xeda   : > { %s7299_s4 = sshll.u32 %s7484_s21, 4  ;;  %s7300_s4 = int_to_ptr.vmem [resolvable:$false] %s7299_s4 }
 0xedb   : > { %p7297_p8 = pnand %p7296_p13, %p9845_p2  ;;  %s7301_s17 = scalar_lea.vmem %s7300_s4, 4096 }
 0xedc   : > { %s5789_s14 = sshll.u32 %s9843_s5, 11  ;;  %p7302_p0 = scmp.lt.s32.totalorder %s9622_s27, %s7300_s4 }
 0xedd   : > { %s9619_s0 = scalar_lea.hbm %s9844_s12, %s5789_s14  ;;  %p7298_p1 = pneg %p7297_p8 }
 0xede   : > { %p7303_p5 = scmp.lt.s32.totalorder %s7301_s17, %s7295_s10 }
 0xee0   : > { %p7304_p12 = por %p7303_p5, %p7302_p0 }
 0xee2   : > { %p7305_p10 = pnand %p7304_p12, %p7298_p1 }
 0xee4   : > { %7308 = shalt.err (!%p7305_p10)
}
 0xee5   : > { %s7309_s11 = scalar_lea.hbm %s9619_s0, 2048  ;;  %s7313_s28 = scalar_lea.hbm %s9844_s12, 4096 }
 0xee6   : > { %p7310_p3 = scmp.ne.s32.totalorder %s9619_s0, %s7309_s11  ;;  %p7314_p7 = scmp.lt.u32.totalorder %s9619_s0, %s9844_s12 }
 0xee7   : > { %p7315_p6 = scmp.lt.u32.totalorder %s7313_s28, %s7309_s11  ;;  %p7317_p13 = scmp.lt.u32.totalorder %s7309_s11, %s9619_s0 }
 0xee8   : > { %p7311_p4 = pnand %p7310_p3, %p9845_p2 }
 0xee9   : > { %p7316_p11 = por %p7315_p6, %p7314_p7 }
 0xeea   : > { %p7312_p9 = pneg %p7311_p4 }
 0xeeb   : > { %p7318_p8 = por %p7317_p13, %p7316_p11 }
 0xeed   : > { %p7319_p1 = pnand %p7318_p8, %p7312_p9 }
 0xeef   : > { %7322 = shalt.err (!%p7319_p1)
}
 0xef0   : > { %s7485_s7 = smov 128   ;;  %s7486_s5 = smov 8  }
 0xef1   : > { %6463 = dma.vmem_to_hbm [thread:$0]  (%p9845_p2), %s9622_s27, 2048, %s9619_s0, %s5394_s23, %s7485_s7, %s7485_s7, %s7486_s5  }
 0xef2 PF: > { %p6506_p0 = scmp.ge.s32.totalorder %s7461_s16, 2  ;;  %s5422_s14 = sand.u32 1, %s7433_s24  }
 0xef3   : > { %p9846_p5 = scmp.ne.s32.totalorder %s9796_s19, 0  ;;  %s5423_s2 = scalar_lea.sflag [#allocation7], %s5422_s14 }
 0xef5   : > { %p6492_p12 = pnand %p6506_p0, %p9846_p5 }
 0xef7   : > { %7404 = dma.done.wait (!%p6492_p12), %s5423_s2, 2048  }
 0xef8   : > { %7406 = vsyncadd (!%p6492_p12), %s5423_s2, 4294965248  ;;  %s37_s16 = sadd.s32 1, %s7461_s16   ;;  %s9848_s18 = sld [smem:[#allocation28_spill]] }
 0xef9   : > { %p9653_p10 = scmp.ge.s32.totalorder %s37_s16, 6   ;;  %s9849_s19 = sld [smem:[#allocation29_spill]] }
 0xefa   : > { %s9850_s1 = sld [smem:[#allocation30_spill]]  ;;  %s9851_s23 = sld [smem:[#allocation36_spill]] }
 0xefb   : > { %s9852_s0 = sld [smem:[#allocation38_spill]]  ;;  %s9853_s10 = sld [smem:[#allocation34_spill]] }
 0xefc   : > { %s9854_s4 = sld [smem:[#allocation37_spill]]  ;;  %s9855_s20 = smov %s7962_s6 }
 0xefd   : > { %s9856_s21 = smov %s7425_s22  ;;  %s9858_s24 = smov %s7437_s25 }
 0xefe   : > { %s9859_s25 = smov %s7441_s26  ;;  %s9861_s27 = smov %s7453_s29 }
 0xeff   : > { %s9862_s28 = smov %s7457_s30  ;;  %36 = sbr.rel (!%p9653_p10) target bundleno = 32 (0x20), region = 177 }
 0xf00   : > { %s9857_s22 = smov %s9850_s1 }
 0xf01   : > { %s9860_s26 = smov %s9852_s0  ;;  %s9863_s29 = smov %s9853_s10 }
 0xf02   : > { %s9864_s30 = smov %s9854_s4 }
 0xf06   :  { %5428 = vsyncpa [#allocation6], 1 }
 0xf07   :  { %5430 = vsyncpa [#allocation6 + $0x1], 1 }
 0xf08   :  { %5431 = vsyncpa [#allocation9], 1 }
 0xf09   :  { %5433 = vsyncpa [#allocation9 + $0x1], 1 }
 0xf0a   :  { %5434 = vsyncpa [#allocation12], 1 }
 0xf0b   :  { %5435 = vsyncpa [#allocation15], 1 }
 0xf0c   :  { %5436 = vsyncpa [#allocation18], 1 }
 0xf0d   :  { %5437 = vsyncpa [#allocation7], 1 }
 0xf0e   :  { %5439 = vsyncpa [#allocation7 + $0x1], 1 }

</bundles_post_ra>
